<compile_context>
chip_gen: v7x
topology: tpu7x:2x2x1
jax: 0.10.0
libtpu: 0.0.40
codegen_flags: <defaults>
</compile_context>

<pallas_src>
import functools
import math

import jax
import jax.numpy as jnp
from jax.experimental import pallas as pl
from jax.experimental.pallas import tpu as pltpu

# ----------------------------- configuration -------------------------------
B          = 2          # batch
C_IN       = 4          # latent channels
H = W      = 16         # latent spatial
PATCH      = 2          # patch size  -> 8x8 = 64 tokens
TOKENS     = (H // PATCH) * (W // PATCH)
HIDDEN     = 32         # transformer width
HEADS      = 2
HEAD_DIM   = HIDDEN // HEADS
JOINT_DIM  = 48         # joint_attention_dim (adapter output / context_embedder input)
TEXT_DIM   = 24         # raw text_embeds feature dim (adapter input)
POOLED_DIM = 16         # pooled projections dim
SEQ        = 8          # text sequence length
FREQ_DIM   = 32         # sinusoidal timestep embedding width
N_LAYERS   = 2          # joint transformer blocks == controlnet blocks
FF_MULT    = 4
PATCH_FEAT = C_IN * PATCH * PATCH        # 16
TP_DIM     = FREQ_DIM + POOLED_DIM       # 48
MODS_PER_STREAM = 6 * HIDDEN             # 192
MODS_PER_LAYER  = 2 * MODS_PER_STREAM    # 384 (hidden stream then context stream)


# ----------------------------- weight packing ------------------------------

class _Packer:
    """Packs many small (rows, cols<=lanes) weights (+ optional bias row) into
    one lane-padded f32 slab; records static (row, rows, bias_row, cols)."""

    def __init__(self, lanes):
        self.lanes = lanes
        self.row = 0
        self.spec = {}
        self.chunks = []

    def _pad_lanes(self, a):
        a = jnp.asarray(a, jnp.float32)
        return jnp.pad(a, ((0, 0), (0, self.lanes - a.shape[1])))

    def add(self, name, w, b=None):
        rows, cols = w.shape
        assert cols <= self.lanes
        w_off = self.row
        self.chunks.append(self._pad_lanes(w))
        self.row += rows
        b_off = None
        if b is not None:
            b_off = self.row
            self.chunks.append(self._pad_lanes(jnp.reshape(b, (1, -1))))
            self.row += 1
        pad = (-self.row) % 8                       # keep every entry 8-aligned
        if pad:
            self.chunks.append(jnp.zeros((pad, self.lanes), jnp.float32))
            self.row += pad
        self.spec[name] = (w_off, rows, b_off, cols)

    def finalize(self):
        return jnp.concatenate(self.chunks, axis=0), dict(self.spec)


# ----------------------------- fused kernel --------------------------------

def build_kernel(bb, slab_spec, qkv_spec):
    """bb = batch elements processed per grid step (static)."""
    HTOK = bb * TOKENS
    CTOK = bb * SEQ

    def kernel(xc_ref, tp_ref, text_ref, slab_ref, qkv_ref, adw_ref, adb_ref, o_ref):
        f32 = jnp.float32
        gelu = functools.partial(jax.nn.gelu, approximate=True)
        silu = jax.nn.silu

        def get(spec, ref, name):
            w_off, r, b_off, c = spec[name]
            w = ref[w_off:w_off + r, 0:c]
            b = ref[b_off:b_off + 1, 0:c] if b_off is not None else None
            return w, b

        def sget(name):
            return get(slab_spec, slab_ref, name)

        def mm(x, w, b=None):
            y = jnp.dot(x, w, preferred_element_type=f32)
            return y if b is None else y + b

        def ln(x):
            mu = jnp.mean(x, axis=-1, keepdims=True)
            ex2 = jnp.mean(x * x, axis=-1, keepdims=True)     # independent reductions
            var = ex2 - mu * mu
            return (x - mu) * jax.lax.rsqrt(var + 1e-6)

        def rows(m, n):
            # (bb, C) per-batch row -> (bb*n, C): broadcast each batch row over its tokens
            c = m.shape[-1]
            return jnp.concatenate(
                [jnp.broadcast_to(m[i:i + 1, :], (n, c)) for i in range(bb)], axis=0)

        def batch_cat(ref):
            # (bb, r, c) block -> (bb*r, c) without reshapes
            return jnp.concatenate([ref[i] for i in range(bb)], axis=0)

        # ---------------- adapter -> context embedder (pre-composed) --------
        txt = batch_cat(text_ref)                                   # (CTOK, TEXT_DIM)
        w, b = sget("ad1")
        hmid = gelu(mm(txt, w, b))
        w, b = sget("adctx")                                        # adapter2 @ ctx_embed
        context = mm(hmid, w, b)                                    # (CTOK, HIDDEN)

        # ---------------- fused patch embed (x | cond) + pos ----------------
        xc = batch_cat(xc_ref)                                      # (HTOK, 2*PATCH_FEAT)
        w, b = sget("patch")
        pos, _ = sget("pos")
        hidden = mm(xc, w, b) + jnp.concatenate([pos] * bb, axis=0)  # (HTOK, HIDDEN)

        # ---------------- fused timestep/pooled conditioning ----------------
        tp = batch_cat(tp_ref)                                      # (bb, TP_DIM)
        w, b = sget("tp1")                                          # block-diagonal
        hcond = silu(mm(tp, w, b))
        w, b = sget("tp2")                                          # row-stacked (== t_emb + p_emb)
        emb = silu(mm(hcond, w, b))                                 # (bb, HIDDEN)

        # All AdaLN-Zero modulations (both layers, both streams) in one matmul.
        mods = mm(emb, adw_ref[...], adb_ref[...])                  # (bb, 768)

        scale = 1.0 / math.sqrt(HEAD_DIM)
        samples = []
        for l in range(N_LAYERS):                                   # static unroll (2)
            base = l * MODS_PER_LAYER
            mh = rows(mods[:, base:base + MODS_PER_STREAM], TOKENS)               # (HTOK,192)
            mc = rows(mods[:, base + MODS_PER_STREAM:base + MODS_PER_LAYER], SEQ)  # (CTOK,192)

            hn = ln(hidden)  * (1.0 + mh[:, 32:64]) + mh[:, 0:32]
            cn = ln(context) * (1.0 + mc[:, 32:64]) + mc[:, 0:32]

            # joint fused QKV: rows = [context ; hidden], lanes = [ctx q|k|v | hid q|k|v]
            qw, qb = get(qkv_spec, qkv_ref, f"qkv{l}")
            jqkv = mm(jnp.concatenate([cn, hn], axis=0), qw, qb)    # (CTOK+HTOK, 192)

            attn_c, attn_h = [], []
            for bi in range(bb):                                    # attention is per-batch
                cs = slice(bi * SEQ, (bi + 1) * SEQ)
                hs = slice(CTOK + bi * TOKENS, CTOK + (bi + 1) * TOKENS)
                q = jnp.concatenate([jqkv[cs, 0:32],  jqkv[hs, 96:128]],  axis=0)
                k = jnp.concatenate([jqkv[cs, 32:64], jqkv[hs, 128:160]], axis=0)
                v = jnp.concatenate([jqkv[cs, 64:96], jqkv[hs, 160:192]], axis=0)
                heads = []
                for hh in range(HEADS):                             # static unroll (2)
                    sl = slice(hh * HEAD_DIM, (hh + 1) * HEAD_DIM)
                    s = jax.lax.dot_general(q[:, sl], k[:, sl], (((1,), (1,)), ((), ())),
                                            preferred_element_type=f32) * scale
                    s = s - jnp.max(s, axis=-1, keepdims=True)
                    e = jnp.exp(s)
                    e = e * pl.reciprocal(jnp.sum(e, axis=-1, keepdims=True), approx=True)
                    heads.append(jnp.dot(e, v[:, sl], preferred_element_type=f32))
                a = jnp.concatenate(heads, axis=-1)                 # (SEQ+TOKENS, HIDDEN)
                attn_c.append(a[:SEQ])
                attn_h.append(a[SEQ:])

            # joint fused out-projection: lanes 0:32 ctx proj, 32:64 hidden proj
            attn_j = jnp.concatenate(attn_c + attn_h, axis=0)       # (CTOK+HTOK, 32)
            ow, ob = sget(f"outj{l}")
            outs = mm(attn_j, ow, ob)                               # (CTOK+HTOK, 64)
            context = context + mc[:, 64:96] * outs[0:CTOK, 0:32]
            hidden  = hidden  + mh[:, 64:96] * outs[CTOK:,   32:64]

            # feed-forward (hidden stream) — 128-wide intermediate stays in VMEM
            hn2 = ln(hidden) * (1.0 + mh[:, 128:160]) + mh[:, 96:128]
            w1, b1 = sget(f"ff1_{l}")
            w2, b2 = sget(f"ff2_{l}")
            hidden = hidden + mh[:, 160:192] * mm(gelu(mm(hn2, w1, b1)), w2, b2)

            # feed-forward (context stream)
            cn2 = ln(context) * (1.0 + mc[:, 128:160]) + mc[:, 96:128]
            w1, b1 = sget(f"fc1_{l}")
            w2, b2 = sget(f"fc2_{l}")
            context = context + mc[:, 160:192] * mm(gelu(mm(cn2, w1, b1)), w2, b2)

            cw, cb = sget(f"cno{l}")
            samples.append(mm(hidden, cw, cb))                      # (HTOK, HIDDEN)

        # lane-dense (TOKENS/2, 128) writeback per batch element:
        #   lanes = [s0 tok 0:32 | s1 tok 0:32 | s0 tok 32:64 | s1 tok 32:64]
        half = TOKENS // 2
        for bi in range(bb):
            r0 = bi * TOKENS
            pieces = []
            for part in range(2):
                start = r0 + part * half
                for l in range(N_LAYERS):
                    pieces.append(samples[l][start:start + half, :])
            o_ref[bi] = jnp.concatenate(pieces, axis=-1).astype(o_ref.dtype)

    return kernel


def _batch_block(batch):
    """How many batch elements each grid step handles.

    v7x has 2 TensorCores per chip -> keep grid=(B,) with 'parallel' so each
    core takes one batch element.  Single-TensorCore chips (v5e/v6e): merge
    the whole batch into one grid step (bigger M, no per-step grid overhead)."""
    kind = ""
    try:
        kind = jax.devices()[0].device_kind.lower()
    except Exception:
        pass
    if "v7" in kind and batch > 1:
        return 1
    return batch if batch <= 8 else 1


def controlnet_fused_call(xc, tp, text, weights, specs):
    batch = xc.shape[0]
    bb = _batch_block(batch)
    kernel = build_kernel(bb, specs["slab"], specs["qkv"])
    warrs = [weights["slab"], weights["qkv"], weights["adaln_w"], weights["adaln_b"]]

    def dspec(a):                                    # batch-blocked data input
        nd = a.ndim
        return pl.BlockSpec((bb,) + tuple(a.shape[1:]),
                            lambda i, _n=nd: (i,) + (0,) * (_n - 1))

    def cspec(a):                                    # VMEM-resident constant (weights)
        nd = a.ndim
        return pl.BlockSpec(tuple(a.shape), lambda i, _n=nd: (0,) * _n)

    out_w = 2 * N_LAYERS * HIDDEN                    # 128 lanes
    out_shape = jax.ShapeDtypeStruct((batch, TOKENS // 2, out_w), jnp.float32)
    out_spec = pl.BlockSpec((bb, TOKENS // 2, out_w), lambda i: (i, 0, 0))

    return pl.pallas_call(
        kernel,
        out_shape=out_shape,
        grid_spec=pltpu.PrefetchScalarGridSpec(
            num_scalar_prefetch=0,
            grid=(batch // bb,),
            in_specs=[dspec(xc), dspec(tp), dspec(text)] + [cspec(w) for w in warrs],
            out_specs=out_spec,
        ),
        compiler_params=pltpu.CompilerParams(
            dimension_semantics=("parallel",)),
    )(xc, tp, text, *warrs)


# ----------------------------- parameter init ------------------------------

def _lin_params(key, fan_in, fan_out, scale=0.02):
    kw, kb = jax.random.split(key)
    return {
        "w": jax.random.normal(kw, (fan_in, fan_out), jnp.float32) * scale,
        "b": jax.random.normal(kb, (fan_out,), jnp.float32) * scale,
    }


def init_params(key):
    keys = iter(jax.random.split(key, 128))
    p = {}
    p["adapter1"] = _lin_params(next(keys), TEXT_DIM, JOINT_DIM)
    p["adapter2"] = _lin_params(next(keys), JOINT_DIM, JOINT_DIM)
    p["patch_proj"] = _lin_params(next(keys), PATCH_FEAT, HIDDEN)
    p["pos_embed"] = jax.random.normal(next(keys), (1, TOKENS, HIDDEN), jnp.float32) * 0.02
    p["cond_proj"] = _lin_params(next(keys), PATCH_FEAT, HIDDEN)
    p["time1"] = _lin_params(next(keys), FREQ_DIM, HIDDEN)
    p["time2"] = _lin_params(next(keys), HIDDEN, HIDDEN)
    p["pool1"] = _lin_params(next(keys), POOLED_DIM, HIDDEN)
    p["pool2"] = _lin_params(next(keys), HIDDEN, HIDDEN)
    p["ctx_embed"] = _lin_params(next(keys), JOINT_DIM, HIDDEN)
    blocks = []
    for _ in range(N_LAYERS):
        blk = {
            "adaln_h": _lin_params(next(keys), HIDDEN, 6 * HIDDEN),
            "adaln_c": _lin_params(next(keys), HIDDEN, 6 * HIDDEN),
            "to_q": _lin_params(next(keys), HIDDEN, HIDDEN),
            "to_k": _lin_params(next(keys), HIDDEN, HIDDEN),
            "to_v": _lin_params(next(keys), HIDDEN, HIDDEN),
            "add_q": _lin_params(next(keys), HIDDEN, HIDDEN),
            "add_k": _lin_params(next(keys), HIDDEN, HIDDEN),
            "add_v": _lin_params(next(keys), HIDDEN, HIDDEN),
            "to_out": _lin_params(next(keys), HIDDEN, HIDDEN),
            "to_add_out": _lin_params(next(keys), HIDDEN, HIDDEN),
            "ff1": _lin_params(next(keys), HIDDEN, FF_MULT * HIDDEN),
            "ff2": _lin_params(next(keys), FF_MULT * HIDDEN, HIDDEN),
            "ff_c1": _lin_params(next(keys), HIDDEN, FF_MULT * HIDDEN),
            "ff_c2": _lin_params(next(keys), FF_MULT * HIDDEN, HIDDEN),
            "cnet_out": _lin_params(next(keys), HIDDEN, HIDDEN),
        }
        blocks.append(blk)
    p["blocks"] = blocks
    return p


def pack_params(p):
    """Offline exact fusions + packing into a few VMEM slabs.

    Returns (weights: dict of arrays, specs: dict of static offset tables)."""
    pk = _Packer(128)

    pk.add("ad1", p["adapter1"]["w"], p["adapter1"]["b"])
    # adapter2 composed with context_embedder (exact linear-linear fusion)
    adctx_w = p["adapter2"]["w"] @ p["ctx_embed"]["w"]
    adctx_b = p["adapter2"]["b"] @ p["ctx_embed"]["w"] + p["ctx_embed"]["b"]
    pk.add("adctx", adctx_w, adctx_b)
    # fused patch embed: input = [x_patches | cond_patches]
    patch_w = jnp.concatenate([p["patch_proj"]["w"], p["cond_proj"]["w"]], axis=0)
    patch_b = p["patch_proj"]["b"] + p["cond_proj"]["b"]
    pk.add("patch", patch_w, patch_b)
    pk.add("pos", jnp.reshape(p["pos_embed"], (TOKENS, HIDDEN)))
    # fused timestep/pooled MLP: block-diagonal layer 1, row-stacked layer 2
    tp1_w = jnp.concatenate([
        jnp.concatenate([p["time1"]["w"], jnp.zeros((FREQ_DIM, HIDDEN), jnp.float32)], axis=1),
        jnp.concatenate([jnp.zeros((POOLED_DIM, HIDDEN), jnp.float32), p["pool1"]["w"]], axis=1),
    ], axis=0)                                                       # (48, 64)
    tp1_b = jnp.concatenate([p["time1"]["b"], p["pool1"]["b"]])
    pk.add("tp1", tp1_w, tp1_b)
    tp2_w = jnp.concatenate([p["time2"]["w"], p["pool2"]["w"]], axis=0)  # (64, 32)
    tp2_b = p["time2"]["b"] + p["pool2"]["b"]
    pk.add("tp2", tp2_w, tp2_b)

    for l, blk in enumerate(p["blocks"]):
        outj_w = jnp.concatenate([blk["to_add_out"]["w"], blk["to_out"]["w"]], axis=1)  # (32,64)
        outj_b = jnp.concatenate([blk["to_add_out"]["b"], blk["to_out"]["b"]])
        pk.add(f"outj{l}", outj_w, outj_b)
        pk.add(f"ff1_{l}", blk["ff1"]["w"], blk["ff1"]["b"])
        pk.add(f"ff2_{l}", blk["ff2"]["w"], blk["ff2"]["b"])
        pk.add(f"fc1_{l}", blk["ff_c1"]["w"], blk["ff_c1"]["b"])
        pk.add(f"fc2_{l}", blk["ff_c2"]["w"], blk["ff_c2"]["b"])
        pk.add(f"cno{l}", blk["cnet_out"]["w"], blk["cnet_out"]["b"])
    slab, slab_spec = pk.finalize()

    # 192-lane slab: per-layer fused QKV = [ctx q|k|v | hid q|k|v]
    qk = _Packer(192)
    for l, blk in enumerate(p["blocks"]):
        qw = jnp.concatenate([blk["add_q"]["w"], blk["add_k"]["w"], blk["add_v"]["w"],
                              blk["to_q"]["w"], blk["to_k"]["w"], blk["to_v"]["w"]], axis=1)
        qb = jnp.concatenate([blk["add_q"]["b"], blk["add_k"]["b"], blk["add_v"]["b"],
                              blk["to_q"]["b"], blk["to_k"]["b"], blk["to_v"]["b"]])
        qk.add(f"qkv{l}", qw, qb)
    qkv_slab, qkv_spec = qk.finalize()

    # AdaLN-Zero, both layers stacked: lanes [l*384 : +192]=hidden, [+192:+384]=context
    adw = jnp.concatenate(
        [jnp.concatenate([blk["adaln_h"]["w"], blk["adaln_c"]["w"]], axis=1)
         for blk in p["blocks"]], axis=1)                            # (32, 768)
    adb = jnp.concatenate(
        [jnp.concatenate([blk["adaln_h"]["b"], blk["adaln_c"]["b"]])
         for blk in p["blocks"]]).reshape(1, -1)                     # (1, 768)

    weights = {"slab": slab, "qkv": qkv_slab, "adaln_w": adw, "adaln_b": adb}
    specs = {"slab": slab_spec, "qkv": qkv_spec}
    return weights, specs


# ----------------------------- wrapper (layout plumbing only) ---------------

def extract_patches(x):
    # NCHW -> (B, tokens, C*p*p): non-overlapping p x p patches (conv k=s=p).
    b, c, h, w = x.shape
    hp, wp = h // PATCH, w // PATCH
    x = x.reshape(b, c, hp, PATCH, wp, PATCH)
    return x.transpose(0, 2, 4, 1, 3, 5).reshape(b, hp * wp, c * PATCH * PATCH)


def timestep_embedding(t, dim):
    # TODO(synk): cos-then-sin, no freq shift; match Timesteps(flip_sin_to_cos,...) if parity
    # with a specific diffusers config is required.
    half = dim // 2
    freqs = jnp.exp(-math.log(10000.0) * jnp.arange(half, dtype=jnp.float32) / half)
    args = t.astype(jnp.float32)[:, None] * freqs[None, :]
    return jnp.concatenate([jnp.cos(args), jnp.sin(args)], axis=-1)  # (B, dim)


def wrapper_forward(specs, weights, noisy_model_input, timestep, prompt_embeds,
                    controlnet_pooled_projections, controlnet_cond, text_embeds):
    # prompt_embeds is accepted (like the PyTorch wrapper) but unused: the adapter
    # output replaces it as encoder_hidden_states.
    del prompt_embeds
    b = noisy_model_input.shape[0]
    xc = jnp.concatenate([extract_patches(noisy_model_input),
                          extract_patches(controlnet_cond)], axis=-1)       # (B, 64, 32)
    tp = jnp.concatenate([timestep_embedding(timestep, FREQ_DIM),
                          controlnet_pooled_projections], axis=-1)          # (B, 48)
    tp = tp.reshape(b, 1, TP_DIM)
    out = controlnet_fused_call(xc, tp, text_embeds, weights, specs)        # (B, 32, 128)
    base = N_LAYERS * HIDDEN                                                # 64
    samples = []
    for l in range(N_LAYERS):
        samples.append(jnp.concatenate(
            [out[:, :, l * HIDDEN:(l + 1) * HIDDEN],
             out[:, :, base + l * HIDDEN: base + (l + 1) * HIDDEN]], axis=1))  # (B, 64, 32)
    return tuple(samples)


# ----------------------------------- main -----------------------------------
if __name__ == "__main__":
    key = jax.random.PRNGKey(0)
    k_param, k_x, k_t, k_pe, k_pool, k_cond, k_txt = jax.random.split(key, 7)

    params = init_params(k_param)
    weights, specs = pack_params(params)   # offline fusion + slab packing (once)

    noisy_model_input = jax.random.normal(k_x, (B, C_IN, H, W), jnp.float32)
    timestep = jax.random.uniform(k_t, (B,), jnp.float32, 0.0, 1000.0)
    prompt_embeds = jax.random.normal(k_pe, (B, SEQ, JOINT_DIM), jnp.float32)  # unused, per wrapper
    controlnet_pooled_projections = jax.random.normal(k_pool, (B, POOLED_DIM), jnp.float32)
    controlnet_cond = jax.random.normal(k_cond, (B, C_IN, H, W), jnp.float32)
    text_embeds = jax.random.normal(k_txt, (B, SEQ, TEXT_DIM), jnp.float32)

    fwd = jax.jit(functools.partial(wrapper_forward, specs))   # specs stay static
    out = fwd(weights, noisy_model_input, timestep, prompt_embeds,
              controlnet_pooled_projections, controlnet_cond, text_embeds)
    for o in out:
        jax.block_until_ready(o)
        assert o.shape == (B, TOKENS, HIDDEN)
        assert bool(jnp.all(jnp.isfinite(o)))
    print("KERNEL_OK")
</pallas_src>

<mosaic_0001>
module attributes {stable_mosaic.version = 11 : i64} {
  func.func @kernel(%arg0: i32, %arg1: memref<2x64x32xf32, #tpu.memory_space<vmem>>, %arg2: memref<2x1x48xf32, #tpu.memory_space<vmem>>, %arg3: memref<2x8x24xf32, #tpu.memory_space<vmem>>, %arg4: memref<1184x128xf32, #tpu.memory_space<vmem>>, %arg5: memref<80x192xf32, #tpu.memory_space<vmem>>, %arg6: memref<32x768xf32, #tpu.memory_space<vmem>>, %arg7: memref<1x768xf32, #tpu.memory_space<vmem>>, %arg8: memref<2x32x128xf32, #tpu.memory_space<vmem>>) attributes {dimension_semantics = [#tpu.dimension_semantics<parallel>], iteration_bounds = array<i64: 1>, scalar_prefetch = 0 : i64, scratch_operands = 0 : i64, tpu.core_type = #tpu.core_type<tc>, window_params = [{transform_indices = @transform_0, window_bounds = array<i64: 2, 64, 32>}, {transform_indices = @transform_1, window_bounds = array<i64: 2, 1, 48>}, {transform_indices = @transform_2, window_bounds = array<i64: 2, 8, 24>}, {pipeline_mode = #tpu.pipeline_mode<synchronous>, transform_indices = @transform_3, window_bounds = array<i64: 1184, 128>}, {pipeline_mode = #tpu.pipeline_mode<synchronous>, transform_indices = @transform_4, window_bounds = array<i64: 80, 192>}, {pipeline_mode = #tpu.pipeline_mode<synchronous>, transform_indices = @transform_5, window_bounds = array<i64: 32, 768>}, {pipeline_mode = #tpu.pipeline_mode<synchronous>, transform_indices = @transform_6, window_bounds = array<i64: 1, 768>}, {transform_indices = @transform_7, window_bounds = array<i64: 2, 32, 128>}]} {
    %c0 = arith.constant 0 : index
    %c0_0 = arith.constant 0 : index
    %c0_1 = arith.constant 0 : index
    %0 = vector.load %arg3[%c0, %c0_0, %c0_1] : memref<2x8x24xf32, #tpu.memory_space<vmem>>, vector<1x8x24xf32>
    %1 = vector.shape_cast %0 : vector<1x8x24xf32> to vector<8x24xf32>
    %c1 = arith.constant 1 : index
    %c0_2 = arith.constant 0 : index
    %c0_3 = arith.constant 0 : index
    %2 = vector.load %arg3[%c1, %c0_2, %c0_3] : memref<2x8x24xf32, #tpu.memory_space<vmem>>, vector<1x8x24xf32>
    %3 = vector.shape_cast %2 : vector<1x8x24xf32> to vector<8x24xf32>
    %4 = tpu.concatenate %1, %3 in 0 : vector<8x24xf32>, vector<8x24xf32> -> vector<16x24xf32>
    %c0_4 = arith.constant 0 : index
    %c0_5 = arith.constant 0 : index
    %5 = vector.load %arg4[%c0_4, %c0_5] : memref<1184x128xf32, #tpu.memory_space<vmem>>, vector<24x48xf32>
    %c24 = arith.constant 24 : index
    %c0_6 = arith.constant 0 : index
    %6 = vector.load %arg4[%c24, %c0_6] : memref<1184x128xf32, #tpu.memory_space<vmem>>, vector<1x48xf32>
    %cst = arith.constant dense<0.000000e+00> : vector<16x48xf32>
    %7 = tpu.matmul %4, %5, %cst {dimension_numbers = #tpu.dot_dimension_numbers<[1], [0], [0], [1], [0, 0, 1, 1], [], []>} : vector<16x24xf32>, vector<24x48xf32>, vector<16x48xf32> -> vector<16x48xf32>
    %8 = vector.broadcast %6 : vector<1x48xf32> to vector<16x48xf32>
    %9 = arith.addf %7, %8 : vector<16x48xf32>
    %10 = arith.mulf %9, %9 : vector<16x48xf32>
    %11 = arith.mulf %9, %10 : vector<16x48xf32>
    %cst_7 = arith.constant 4.471500e-02 : f32
    %12 = vector.broadcast %cst_7 : f32 to vector<16x48xf32>
    %13 = arith.mulf %12, %11 : vector<16x48xf32>
    %14 = arith.addf %9, %13 : vector<16x48xf32>
    %cst_8 = arith.constant 0.797884583 : f32
    %15 = vector.broadcast %cst_8 : f32 to vector<16x48xf32>
    %16 = arith.mulf %15, %14 : vector<16x48xf32>
    %17 = math.tanh %16 : vector<16x48xf32>
    %cst_9 = arith.constant 1.000000e+00 : f32
    %18 = vector.broadcast %cst_9 : f32 to vector<16x48xf32>
    %19 = arith.addf %18, %17 : vector<16x48xf32>
    %cst_10 = arith.constant 5.000000e-01 : f32
    %20 = vector.broadcast %cst_10 : f32 to vector<16x48xf32>
    %21 = arith.mulf %20, %19 : vector<16x48xf32>
    %22 = arith.mulf %9, %21 : vector<16x48xf32>
    %c32 = arith.constant 32 : index
    %c0_11 = arith.constant 0 : index
    %23 = vector.load %arg4[%c32, %c0_11] : memref<1184x128xf32, #tpu.memory_space<vmem>>, vector<48x32xf32>
    %c80 = arith.constant 80 : index
    %c0_12 = arith.constant 0 : index
    %24 = vector.load %arg4[%c80, %c0_12] : memref<1184x128xf32, #tpu.memory_space<vmem>>, vector<1x32xf32>
    %cst_13 = arith.constant dense<0.000000e+00> : vector<16x32xf32>
    %25 = tpu.matmul %22, %23, %cst_13 {dimension_numbers = #tpu.dot_dimension_numbers<[1], [0], [0], [1], [0, 0, 1, 1], [], []>} : vector<16x48xf32>, vector<48x32xf32>, vector<16x32xf32> -> vector<16x32xf32>
    %26 = vector.broadcast %24 : vector<1x32xf32> to vector<16x32xf32>
    %27 = arith.addf %25, %26 : vector<16x32xf32>
    %c0_14 = arith.constant 0 : index
    %c0_15 = arith.constant 0 : index
    %c0_16 = arith.constant 0 : index
    %28 = vector.load %arg1[%c0_14, %c0_15, %c0_16] : memref<2x64x32xf32, #tpu.memory_space<vmem>>, vector<1x64x32xf32>
    %29 = vector.shape_cast %28 : vector<1x64x32xf32> to vector<64x32xf32>
    %c1_17 = arith.constant 1 : index
    %c0_18 = arith.constant 0 : index
    %c0_19 = arith.constant 0 : index
    %30 = vector.load %arg1[%c1_17, %c0_18, %c0_19] : memref<2x64x32xf32, #tpu.memory_space<vmem>>, vector<1x64x32xf32>
    %31 = vector.shape_cast %30 : vector<1x64x32xf32> to vector<64x32xf32>
    %32 = tpu.concatenate %29, %31 in 0 : vector<64x32xf32>, vector<64x32xf32> -> vector<128x32xf32>
    %c88 = arith.constant 88 : index
    %c0_20 = arith.constant 0 : index
    %33 = vector.load %arg4[%c88, %c0_20] : memref<1184x128xf32, #tpu.memory_space<vmem>>, vector<32x32xf32>
    %c120 = arith.constant 120 : index
    %c0_21 = arith.constant 0 : index
    %34 = vector.load %arg4[%c120, %c0_21] : memref<1184x128xf32, #tpu.memory_space<vmem>>, vector<1x32xf32>
    %c128 = arith.constant 128 : index
    %c0_22 = arith.constant 0 : index
    %35 = vector.load %arg4[%c128, %c0_22] : memref<1184x128xf32, #tpu.memory_space<vmem>>, vector<64x32xf32>
    %cst_23 = arith.constant dense<0.000000e+00> : vector<128x32xf32>
    %36 = tpu.matmul %32, %33, %cst_23 {dimension_numbers = #tpu.dot_dimension_numbers<[1], [0], [0], [1], [0, 0, 1, 1], [], []>} : vector<128x32xf32>, vector<32x32xf32>, vector<128x32xf32> -> vector<128x32xf32>
    %37 = vector.broadcast %34 : vector<1x32xf32> to vector<128x32xf32>
    %38 = arith.addf %36, %37 : vector<128x32xf32>
    %39 = tpu.concatenate %35, %35 in 0 : vector<64x32xf32>, vector<64x32xf32> -> vector<128x32xf32>
    %40 = arith.addf %38, %39 : vector<128x32xf32>
    %c0_24 = arith.constant 0 : index
    %c0_25 = arith.constant 0 : index
    %c0_26 = arith.constant 0 : index
    %41 = vector.load %arg2[%c0_24, %c0_25, %c0_26] : memref<2x1x48xf32, #tpu.memory_space<vmem>>, vector<1x1x48xf32>
    %42 = vector.shape_cast %41 : vector<1x1x48xf32> to vector<1x48xf32>
    %c1_27 = arith.constant 1 : index
    %c0_28 = arith.constant 0 : index
    %c0_29 = arith.constant 0 : index
    %43 = vector.load %arg2[%c1_27, %c0_28, %c0_29] : memref<2x1x48xf32, #tpu.memory_space<vmem>>, vector<1x1x48xf32>
    %44 = vector.shape_cast %43 : vector<1x1x48xf32> to vector<1x48xf32>
    %45 = tpu.concatenate %42, %44 in 0 : vector<1x48xf32>, vector<1x48xf32> -> vector<2x48xf32>
    %c192 = arith.constant 192 : index
    %c0_30 = arith.constant 0 : index
    %46 = vector.load %arg4[%c192, %c0_30] : memref<1184x128xf32, #tpu.memory_space<vmem>>, vector<48x64xf32>
    %c240 = arith.constant 240 : index
    %c0_31 = arith.constant 0 : index
    %47 = vector.load %arg4[%c240, %c0_31] : memref<1184x128xf32, #tpu.memory_space<vmem>>, vector<1x64xf32>
    %cst_32 = arith.constant dense<0.000000e+00> : vector<2x64xf32>
    %48 = tpu.matmul %45, %46, %cst_32 {dimension_numbers = #tpu.dot_dimension_numbers<[1], [0], [0], [1], [0, 0, 1, 1], [], []>} : vector<2x48xf32>, vector<48x64xf32>, vector<2x64xf32> -> vector<2x64xf32>
    %49 = vector.broadcast %47 : vector<1x64xf32> to vector<2x64xf32>
    %50 = arith.addf %48, %49 : vector<2x64xf32>
    %51 = arith.negf %50 : vector<2x64xf32>
    %52 = math.exp %51 : vector<2x64xf32>
    %cst_33 = arith.constant 1.000000e+00 : f32
    %53 = vector.broadcast %cst_33 : f32 to vector<2x64xf32>
    %54 = arith.addf %53, %52 : vector<2x64xf32>
    %55 = arith.divf %53, %54 : vector<2x64xf32>
    %56 = arith.mulf %50, %55 : vector<2x64xf32>
    %c248 = arith.constant 248 : index
    %c0_34 = arith.constant 0 : index
    %57 = vector.load %arg4[%c248, %c0_34] : memref<1184x128xf32, #tpu.memory_space<vmem>>, vector<64x32xf32>
    %c312 = arith.constant 312 : index
    %c0_35 = arith.constant 0 : index
    %58 = vector.load %arg4[%c312, %c0_35] : memref<1184x128xf32, #tpu.memory_space<vmem>>, vector<1x32xf32>
    %cst_36 = arith.constant dense<0.000000e+00> : vector<2x32xf32>
    %59 = tpu.matmul %56, %57, %cst_36 {dimension_numbers = #tpu.dot_dimension_numbers<[1], [0], [0], [1], [0, 0, 1, 1], [], []>} : vector<2x64xf32>, vector<64x32xf32>, vector<2x32xf32> -> vector<2x32xf32>
    %60 = vector.broadcast %58 : vector<1x32xf32> to vector<2x32xf32>
    %61 = arith.addf %59, %60 : vector<2x32xf32>
    %62 = arith.negf %61 : vector<2x32xf32>
    %63 = math.exp %62 : vector<2x32xf32>
    %cst_37 = arith.constant 1.000000e+00 : f32
    %64 = vector.broadcast %cst_37 : f32 to vector<2x32xf32>
    %65 = arith.addf %64, %63 : vector<2x32xf32>
    %66 = arith.divf %64, %65 : vector<2x32xf32>
    %67 = arith.mulf %61, %66 : vector<2x32xf32>
    %c0_38 = arith.constant 0 : index
    %c0_39 = arith.constant 0 : index
    %68 = vector.load %arg6[%c0_38, %c0_39] : memref<32x768xf32, #tpu.memory_space<vmem>>, vector<32x768xf32>
    %c0_40 = arith.constant 0 : index
    %c0_41 = arith.constant 0 : index
    %69 = vector.load %arg7[%c0_40, %c0_41] : memref<1x768xf32, #tpu.memory_space<vmem>>, vector<1x768xf32>
    %cst_42 = arith.constant dense<0.000000e+00> : vector<2x768xf32>
    %70 = tpu.matmul %67, %68, %cst_42 {dimension_numbers = #tpu.dot_dimension_numbers<[1], [0], [0], [1], [0, 0, 1, 1], [], []>} : vector<2x32xf32>, vector<32x768xf32>, vector<2x768xf32> -> vector<2x768xf32>
    %71 = vector.broadcast %69 : vector<1x768xf32> to vector<2x768xf32>
    %72 = arith.addf %70, %71 : vector<2x768xf32>
    %73 = vector.extract_strided_slice %72 {offsets = [0, 0], sizes = [2, 192], strides = [1, 1]} : vector<2x768xf32> to vector<2x192xf32>
    %74 = vector.extract_strided_slice %73 {offsets = [0, 0], sizes = [1, 192], strides = [1, 1]} : vector<2x192xf32> to vector<1x192xf32>
    %75 = vector.shape_cast %74 : vector<1x192xf32> to vector<1x192xf32>
    %76 = vector.broadcast %75 : vector<1x192xf32> to vector<64x192xf32>
    %77 = vector.extract_strided_slice %73 {offsets = [1, 0], sizes = [1, 192], strides = [1, 1]} : vector<2x192xf32> to vector<1x192xf32>
    %78 = vector.shape_cast %77 : vector<1x192xf32> to vector<1x192xf32>
    %79 = vector.broadcast %78 : vector<1x192xf32> to vector<64x192xf32>
    %80 = tpu.concatenate %76, %79 in 0 : vector<64x192xf32>, vector<64x192xf32> -> vector<128x192xf32>
    %81 = vector.extract_strided_slice %72 {offsets = [0, 192], sizes = [2, 192], strides = [1, 1]} : vector<2x768xf32> to vector<2x192xf32>
    %82 = vector.extract_strided_slice %81 {offsets = [0, 0], sizes = [1, 192], strides = [1, 1]} : vector<2x192xf32> to vector<1x192xf32>
    %83 = vector.shape_cast %82 : vector<1x192xf32> to vector<1x192xf32>
    %84 = vector.broadcast %83 : vector<1x192xf32> to vector<8x192xf32>
    %85 = vector.extract_strided_slice %81 {offsets = [1, 0], sizes = [1, 192], strides = [1, 1]} : vector<2x192xf32> to vector<1x192xf32>
    %86 = vector.shape_cast %85 : vector<1x192xf32> to vector<1x192xf32>
    %87 = vector.broadcast %86 : vector<1x192xf32> to vector<8x192xf32>
    %88 = tpu.concatenate %84, %87 in 0 : vector<8x192xf32>, vector<8x192xf32> -> vector<16x192xf32>
    %cst_43 = arith.constant dense<0.000000e+00> : vector<128xf32>
    %89 = vector.multi_reduction <add>, %40, %cst_43 [1] : vector<128x32xf32> to vector<128xf32>
    %90 = vector.shape_cast %89 : vector<128xf32> to vector<128x1xf32>
    %cst_44 = arith.constant 3.200000e+01 : f32
    %91 = vector.broadcast %cst_44 : f32 to vector<128x1xf32>
    %92 = arith.divf %90, %91 : vector<128x1xf32>
    %93 = arith.mulf %40, %40 : vector<128x32xf32>
    %cst_45 = arith.constant dense<0.000000e+00> : vector<128xf32>
    %94 = vector.multi_reduction <add>, %93, %cst_45 [1] : vector<128x32xf32> to vector<128xf32>
    %95 = vector.shape_cast %94 : vector<128xf32> to vector<128x1xf32>
    %cst_46 = arith.constant 3.200000e+01 : f32
    %96 = vector.broadcast %cst_46 : f32 to vector<128x1xf32>
    %97 = arith.divf %95, %96 : vector<128x1xf32>
    %98 = arith.mulf %92, %92 : vector<128x1xf32>
    %99 = arith.subf %97, %98 : vector<128x1xf32>
    %100 = vector.broadcast %92 : vector<128x1xf32> to vector<128x32xf32>
    %101 = arith.subf %40, %100 : vector<128x32xf32>
    %cst_47 = arith.constant 9.99999997E-7 : f32
    %102 = vector.broadcast %cst_47 : f32 to vector<128x1xf32>
    %103 = arith.addf %99, %102 : vector<128x1xf32>
    %104 = math.rsqrt %103 : vector<128x1xf32>
    %105 = vector.broadcast %104 : vector<128x1xf32> to vector<128x32xf32>
    %106 = arith.mulf %101, %105 : vector<128x32xf32>
    %107 = vector.extract_strided_slice %80 {offsets = [0, 32], sizes = [128, 32], strides = [1, 1]} : vector<128x192xf32> to vector<128x32xf32>
    %cst_48 = arith.constant 1.000000e+00 : f32
    %108 = vector.broadcast %cst_48 : f32 to vector<128x32xf32>
    %109 = arith.addf %108, %107 : vector<128x32xf32>
    %110 = arith.mulf %106, %109 : vector<128x32xf32>
    %111 = vector.extract_strided_slice %80 {offsets = [0, 0], sizes = [128, 32], strides = [1, 1]} : vector<128x192xf32> to vector<128x32xf32>
    %112 = arith.addf %110, %111 : vector<128x32xf32>
    %cst_49 = arith.constant dense<0.000000e+00> : vector<16xf32>
    %113 = vector.multi_reduction <add>, %27, %cst_49 [1] : vector<16x32xf32> to vector<16xf32>
    %114 = vector.shape_cast %113 : vector<16xf32> to vector<16x1xf32>
    %cst_50 = arith.constant 3.200000e+01 : f32
    %115 = vector.broadcast %cst_50 : f32 to vector<16x1xf32>
    %116 = arith.divf %114, %115 : vector<16x1xf32>
    %117 = arith.mulf %27, %27 : vector<16x32xf32>
    %cst_51 = arith.constant dense<0.000000e+00> : vector<16xf32>
    %118 = vector.multi_reduction <add>, %117, %cst_51 [1] : vector<16x32xf32> to vector<16xf32>
    %119 = vector.shape_cast %118 : vector<16xf32> to vector<16x1xf32>
    %cst_52 = arith.constant 3.200000e+01 : f32
    %120 = vector.broadcast %cst_52 : f32 to vector<16x1xf32>
    %121 = arith.divf %119, %120 : vector<16x1xf32>
    %122 = arith.mulf %116, %116 : vector<16x1xf32>
    %123 = arith.subf %121, %122 : vector<16x1xf32>
    %124 = vector.broadcast %116 : vector<16x1xf32> to vector<16x32xf32>
    %125 = arith.subf %27, %124 : vector<16x32xf32>
    %cst_53 = arith.constant 9.99999997E-7 : f32
    %126 = vector.broadcast %cst_53 : f32 to vector<16x1xf32>
    %127 = arith.addf %123, %126 : vector<16x1xf32>
    %128 = math.rsqrt %127 : vector<16x1xf32>
    %129 = vector.broadcast %128 : vector<16x1xf32> to vector<16x32xf32>
    %130 = arith.mulf %125, %129 : vector<16x32xf32>
    %131 = vector.extract_strided_slice %88 {offsets = [0, 32], sizes = [16, 32], strides = [1, 1]} : vector<16x192xf32> to vector<16x32xf32>
    %cst_54 = arith.constant 1.000000e+00 : f32
    %132 = vector.broadcast %cst_54 : f32 to vector<16x32xf32>
    %133 = arith.addf %132, %131 : vector<16x32xf32>
    %134 = arith.mulf %130, %133 : vector<16x32xf32>
    %135 = vector.extract_strided_slice %88 {offsets = [0, 0], sizes = [16, 32], strides = [1, 1]} : vector<16x192xf32> to vector<16x32xf32>
    %136 = arith.addf %134, %135 : vector<16x32xf32>
    %c0_55 = arith.constant 0 : index
    %c0_56 = arith.constant 0 : index
    %137 = vector.load %arg5[%c0_55, %c0_56] : memref<80x192xf32, #tpu.memory_space<vmem>>, vector<32x192xf32>
    %c32_57 = arith.constant 32 : index
    %c0_58 = arith.constant 0 : index
    %138 = vector.load %arg5[%c32_57, %c0_58] : memref<80x192xf32, #tpu.memory_space<vmem>>, vector<1x192xf32>
    %139 = tpu.concatenate %136, %112 in 0 : vector<16x32xf32>, vector<128x32xf32> -> vector<144x32xf32>
    %cst_59 = arith.constant dense<0.000000e+00> : vector<144x192xf32>
    %140 = tpu.matmul %139, %137, %cst_59 {dimension_numbers = #tpu.dot_dimension_numbers<[1], [0], [0], [1], [0, 0, 1, 1], [], []>} : vector<144x32xf32>, vector<32x192xf32>, vector<144x192xf32> -> vector<144x192xf32>
    %141 = vector.broadcast %138 : vector<1x192xf32> to vector<144x192xf32>
    %142 = arith.addf %140, %141 : vector<144x192xf32>
    %143 = vector.extract_strided_slice %142 {offsets = [0, 0], sizes = [8, 32], strides = [1, 1]} : vector<144x192xf32> to vector<8x32xf32>
    %144 = vector.extract_strided_slice %142 {offsets = [16, 96], sizes = [64, 32], strides = [1, 1]} : vector<144x192xf32> to vector<64x32xf32>
    %145 = tpu.concatenate %143, %144 in 0 : vector<8x32xf32>, vector<64x32xf32> -> vector<72x32xf32>
    %146 = vector.extract_strided_slice %142 {offsets = [0, 32], sizes = [8, 32], strides = [1, 1]} : vector<144x192xf32> to vector<8x32xf32>
    %147 = vector.extract_strided_slice %142 {offsets = [16, 128], sizes = [64, 32], strides = [1, 1]} : vector<144x192xf32> to vector<64x32xf32>
    %148 = tpu.concatenate %146, %147 in 0 : vector<8x32xf32>, vector<64x32xf32> -> vector<72x32xf32>
    %149 = vector.extract_strided_slice %142 {offsets = [0, 64], sizes = [8, 32], strides = [1, 1]} : vector<144x192xf32> to vector<8x32xf32>
    %150 = vector.extract_strided_slice %142 {offsets = [16, 160], sizes = [64, 32], strides = [1, 1]} : vector<144x192xf32> to vector<64x32xf32>
    %151 = tpu.concatenate %149, %150 in 0 : vector<8x32xf32>, vector<64x32xf32> -> vector<72x32xf32>
    %152 = vector.extract_strided_slice %145 {offsets = [0, 0], sizes = [72, 16], strides = [1, 1]} : vector<72x32xf32> to vector<72x16xf32>
    %153 = vector.extract_strided_slice %148 {offsets = [0, 0], sizes = [72, 16], strides = [1, 1]} : vector<72x32xf32> to vector<72x16xf32>
    %cst_60 = arith.constant dense<0.000000e+00> : vector<72x72xf32>
    %154 = tpu.matmul %152, %153, %cst_60 {dimension_numbers = #tpu.dot_dimension_numbers<[1], [1], [0], [0], [0, 0, 1, 0], [], []>} : vector<72x16xf32>, vector<72x16xf32>, vector<72x72xf32> -> vector<72x72xf32>
    %cst_61 = arith.constant 2.500000e-01 : f32
    %155 = vector.broadcast %cst_61 : f32 to vector<72x72xf32>
    %156 = arith.mulf %154, %155 : vector<72x72xf32>
    %cst_62 = arith.constant dense<0xFF800000> : vector<72xf32>
    %157 = vector.multi_reduction <maximumf>, %156, %cst_62 [1] : vector<72x72xf32> to vector<72xf32>
    %158 = vector.shape_cast %157 : vector<72xf32> to vector<72x1xf32>
    %159 = vector.broadcast %158 : vector<72x1xf32> to vector<72x72xf32>
    %160 = arith.subf %156, %159 : vector<72x72xf32>
    %161 = math.exp %160 : vector<72x72xf32>
    %cst_63 = arith.constant dense<0.000000e+00> : vector<72xf32>
    %162 = vector.multi_reduction <add>, %161, %cst_63 [1] : vector<72x72xf32> to vector<72xf32>
    %163 = vector.shape_cast %162 : vector<72xf32> to vector<72x1xf32>
    %164 = tpu.reciprocal %163 {approx = true} : vector<72x1xf32> -> vector<72x1xf32>
    %165 = vector.broadcast %164 : vector<72x1xf32> to vector<72x72xf32>
    %166 = arith.mulf %161, %165 : vector<72x72xf32>
    %167 = vector.extract_strided_slice %151 {offsets = [0, 0], sizes = [72, 16], strides = [1, 1]} : vector<72x32xf32> to vector<72x16xf32>
    %cst_64 = arith.constant dense<0.000000e+00> : vector<72x16xf32>
    %168 = tpu.matmul %166, %167, %cst_64 {dimension_numbers = #tpu.dot_dimension_numbers<[1], [0], [0], [1], [0, 0, 1, 1], [], []>} : vector<72x72xf32>, vector<72x16xf32>, vector<72x16xf32> -> vector<72x16xf32>
    %169 = vector.extract_strided_slice %145 {offsets = [0, 16], sizes = [72, 16], strides = [1, 1]} : vector<72x32xf32> to vector<72x16xf32>
    %170 = vector.extract_strided_slice %148 {offsets = [0, 16], sizes = [72, 16], strides = [1, 1]} : vector<72x32xf32> to vector<72x16xf32>
    %cst_65 = arith.constant dense<0.000000e+00> : vector<72x72xf32>
    %171 = tpu.matmul %169, %170, %cst_65 {dimension_numbers = #tpu.dot_dimension_numbers<[1], [1], [0], [0], [0, 0, 1, 0], [], []>} : vector<72x16xf32>, vector<72x16xf32>, vector<72x72xf32> -> vector<72x72xf32>
    %cst_66 = arith.constant 2.500000e-01 : f32
    %172 = vector.broadcast %cst_66 : f32 to vector<72x72xf32>
    %173 = arith.mulf %171, %172 : vector<72x72xf32>
    %cst_67 = arith.constant dense<0xFF800000> : vector<72xf32>
    %174 = vector.multi_reduction <maximumf>, %173, %cst_67 [1] : vector<72x72xf32> to vector<72xf32>
    %175 = vector.shape_cast %174 : vector<72xf32> to vector<72x1xf32>
    %176 = vector.broadcast %175 : vector<72x1xf32> to vector<72x72xf32>
    %177 = arith.subf %173, %176 : vector<72x72xf32>
    %178 = math.exp %177 : vector<72x72xf32>
    %cst_68 = arith.constant dense<0.000000e+00> : vector<72xf32>
    %179 = vector.multi_reduction <add>, %178, %cst_68 [1] : vector<72x72xf32> to vector<72xf32>
    %180 = vector.shape_cast %179 : vector<72xf32> to vector<72x1xf32>
    %181 = tpu.reciprocal %180 {approx = true} : vector<72x1xf32> -> vector<72x1xf32>
    %182 = vector.broadcast %181 : vector<72x1xf32> to vector<72x72xf32>
    %183 = arith.mulf %178, %182 : vector<72x72xf32>
    %184 = vector.extract_strided_slice %151 {offsets = [0, 16], sizes = [72, 16], strides = [1, 1]} : vector<72x32xf32> to vector<72x16xf32>
    %cst_69 = arith.constant dense<0.000000e+00> : vector<72x16xf32>
    %185 = tpu.matmul %183, %184, %cst_69 {dimension_numbers = #tpu.dot_dimension_numbers<[1], [0], [0], [1], [0, 0, 1, 1], [], []>} : vector<72x72xf32>, vector<72x16xf32>, vector<72x16xf32> -> vector<72x16xf32>
    %186 = tpu.concatenate %168, %185 in 1 : vector<72x16xf32>, vector<72x16xf32> -> vector<72x32xf32>
    %187 = vector.extract_strided_slice %186 {offsets = [0, 0], sizes = [8, 32], strides = [1, 1]} : vector<72x32xf32> to vector<8x32xf32>
    %188 = vector.extract_strided_slice %186 {offsets = [8, 0], sizes = [64, 32], strides = [1, 1]} : vector<72x32xf32> to vector<64x32xf32>
    %189 = vector.extract_strided_slice %142 {offsets = [8, 0], sizes = [8, 32], strides = [1, 1]} : vector<144x192xf32> to vector<8x32xf32>
    %190 = vector.extract_strided_slice %142 {offsets = [80, 96], sizes = [64, 32], strides = [1, 1]} : vector<144x192xf32> to vector<64x32xf32>
    %191 = tpu.concatenate %189, %190 in 0 : vector<8x32xf32>, vector<64x32xf32> -> vector<72x32xf32>
    %192 = vector.extract_strided_slice %142 {offsets = [8, 32], sizes = [8, 32], strides = [1, 1]} : vector<144x192xf32> to vector<8x32xf32>
    %193 = vector.extract_strided_slice %142 {offsets = [80, 128], sizes = [64, 32], strides = [1, 1]} : vector<144x192xf32> to vector<64x32xf32>
    %194 = tpu.concatenate %192, %193 in 0 : vector<8x32xf32>, vector<64x32xf32> -> vector<72x32xf32>
    %195 = vector.extract_strided_slice %142 {offsets = [8, 64], sizes = [8, 32], strides = [1, 1]} : vector<144x192xf32> to vector<8x32xf32>
    %196 = vector.extract_strided_slice %142 {offsets = [80, 160], sizes = [64, 32], strides = [1, 1]} : vector<144x192xf32> to vector<64x32xf32>
    %197 = tpu.concatenate %195, %196 in 0 : vector<8x32xf32>, vector<64x32xf32> -> vector<72x32xf32>
    %198 = vector.extract_strided_slice %191 {offsets = [0, 0], sizes = [72, 16], strides = [1, 1]} : vector<72x32xf32> to vector<72x16xf32>
    %199 = vector.extract_strided_slice %194 {offsets = [0, 0], sizes = [72, 16], strides = [1, 1]} : vector<72x32xf32> to vector<72x16xf32>
    %cst_70 = arith.constant dense<0.000000e+00> : vector<72x72xf32>
    %200 = tpu.matmul %198, %199, %cst_70 {dimension_numbers = #tpu.dot_dimension_numbers<[1], [1], [0], [0], [0, 0, 1, 0], [], []>} : vector<72x16xf32>, vector<72x16xf32>, vector<72x72xf32> -> vector<72x72xf32>
    %cst_71 = arith.constant 2.500000e-01 : f32
    %201 = vector.broadcast %cst_71 : f32 to vector<72x72xf32>
    %202 = arith.mulf %200, %201 : vector<72x72xf32>
    %cst_72 = arith.constant dense<0xFF800000> : vector<72xf32>
    %203 = vector.multi_reduction <maximumf>, %202, %cst_72 [1] : vector<72x72xf32> to vector<72xf32>
    %204 = vector.shape_cast %203 : vector<72xf32> to vector<72x1xf32>
    %205 = vector.broadcast %204 : vector<72x1xf32> to vector<72x72xf32>
    %206 = arith.subf %202, %205 : vector<72x72xf32>
    %207 = math.exp %206 : vector<72x72xf32>
    %cst_73 = arith.constant dense<0.000000e+00> : vector<72xf32>
    %208 = vector.multi_reduction <add>, %207, %cst_73 [1] : vector<72x72xf32> to vector<72xf32>
    %209 = vector.shape_cast %208 : vector<72xf32> to vector<72x1xf32>
    %210 = tpu.reciprocal %209 {approx = true} : vector<72x1xf32> -> vector<72x1xf32>
    %211 = vector.broadcast %210 : vector<72x1xf32> to vector<72x72xf32>
    %212 = arith.mulf %207, %211 : vector<72x72xf32>
    %213 = vector.extract_strided_slice %197 {offsets = [0, 0], sizes = [72, 16], strides = [1, 1]} : vector<72x32xf32> to vector<72x16xf32>
    %cst_74 = arith.constant dense<0.000000e+00> : vector<72x16xf32>
    %214 = tpu.matmul %212, %213, %cst_74 {dimension_numbers = #tpu.dot_dimension_numbers<[1], [0], [0], [1], [0, 0, 1, 1], [], []>} : vector<72x72xf32>, vector<72x16xf32>, vector<72x16xf32> -> vector<72x16xf32>
    %215 = vector.extract_strided_slice %191 {offsets = [0, 16], sizes = [72, 16], strides = [1, 1]} : vector<72x32xf32> to vector<72x16xf32>
    %216 = vector.extract_strided_slice %194 {offsets = [0, 16], sizes = [72, 16], strides = [1, 1]} : vector<72x32xf32> to vector<72x16xf32>
    %cst_75 = arith.constant dense<0.000000e+00> : vector<72x72xf32>
    %217 = tpu.matmul %215, %216, %cst_75 {dimension_numbers = #tpu.dot_dimension_numbers<[1], [1], [0], [0], [0, 0, 1, 0], [], []>} : vector<72x16xf32>, vector<72x16xf32>, vector<72x72xf32> -> vector<72x72xf32>
    %cst_76 = arith.constant 2.500000e-01 : f32
    %218 = vector.broadcast %cst_76 : f32 to vector<72x72xf32>
    %219 = arith.mulf %217, %218 : vector<72x72xf32>
    %cst_77 = arith.constant dense<0xFF800000> : vector<72xf32>
    %220 = vector.multi_reduction <maximumf>, %219, %cst_77 [1] : vector<72x72xf32> to vector<72xf32>
    %221 = vector.shape_cast %220 : vector<72xf32> to vector<72x1xf32>
    %222 = vector.broadcast %221 : vector<72x1xf32> to vector<72x72xf32>
    %223 = arith.subf %219, %222 : vector<72x72xf32>
    %224 = math.exp %223 : vector<72x72xf32>
    %cst_78 = arith.constant dense<0.000000e+00> : vector<72xf32>
    %225 = vector.multi_reduction <add>, %224, %cst_78 [1] : vector<72x72xf32> to vector<72xf32>
    %226 = vector.shape_cast %225 : vector<72xf32> to vector<72x1xf32>
    %227 = tpu.reciprocal %226 {approx = true} : vector<72x1xf32> -> vector<72x1xf32>
    %228 = vector.broadcast %227 : vector<72x1xf32> to vector<72x72xf32>
    %229 = arith.mulf %224, %228 : vector<72x72xf32>
    %230 = vector.extract_strided_slice %197 {offsets = [0, 16], sizes = [72, 16], strides = [1, 1]} : vector<72x32xf32> to vector<72x16xf32>
    %cst_79 = arith.constant dense<0.000000e+00> : vector<72x16xf32>
    %231 = tpu.matmul %229, %230, %cst_79 {dimension_numbers = #tpu.dot_dimension_numbers<[1], [0], [0], [1], [0, 0, 1, 1], [], []>} : vector<72x72xf32>, vector<72x16xf32>, vector<72x16xf32> -> vector<72x16xf32>
    %232 = tpu.concatenate %214, %231 in 1 : vector<72x16xf32>, vector<72x16xf32> -> vector<72x32xf32>
    %233 = vector.extract_strided_slice %232 {offsets = [0, 0], sizes = [8, 32], strides = [1, 1]} : vector<72x32xf32> to vector<8x32xf32>
    %234 = vector.extract_strided_slice %232 {offsets = [8, 0], sizes = [64, 32], strides = [1, 1]} : vector<72x32xf32> to vector<64x32xf32>
    %235 = tpu.concatenate %187, %233, %188, %234 in 0 : vector<8x32xf32>, vector<8x32xf32>, vector<64x32xf32>, vector<64x32xf32> -> vector<144x32xf32>
    %c320 = arith.constant 320 : index
    %c0_80 = arith.constant 0 : index
    %236 = vector.load %arg4[%c320, %c0_80] : memref<1184x128xf32, #tpu.memory_space<vmem>>, vector<32x64xf32>
    %c352 = arith.constant 352 : index
    %c0_81 = arith.constant 0 : index
    %237 = vector.load %arg4[%c352, %c0_81] : memref<1184x128xf32, #tpu.memory_space<vmem>>, vector<1x64xf32>
    %cst_82 = arith.constant dense<0.000000e+00> : vector<144x64xf32>
    %238 = tpu.matmul %235, %236, %cst_82 {dimension_numbers = #tpu.dot_dimension_numbers<[1], [0], [0], [1], [0, 0, 1, 1], [], []>} : vector<144x32xf32>, vector<32x64xf32>, vector<144x64xf32> -> vector<144x64xf32>
    %239 = vector.broadcast %237 : vector<1x64xf32> to vector<144x64xf32>
    %240 = arith.addf %238, %239 : vector<144x64xf32>
    %241 = vector.extract_strided_slice %88 {offsets = [0, 64], sizes = [16, 32], strides = [1, 1]} : vector<16x192xf32> to vector<16x32xf32>
    %242 = vector.extract_strided_slice %240 {offsets = [0, 0], sizes = [16, 32], strides = [1, 1]} : vector<144x64xf32> to vector<16x32xf32>
    %243 = arith.mulf %241, %242 : vector<16x32xf32>
    %244 = arith.addf %27, %243 : vector<16x32xf32>
    %245 = vector.extract_strided_slice %80 {offsets = [0, 64], sizes = [128, 32], strides = [1, 1]} : vector<128x192xf32> to vector<128x32xf32>
    %246 = vector.extract_strided_slice %240 {offsets = [16, 32], sizes = [128, 32], strides = [1, 1]} : vector<144x64xf32> to vector<128x32xf32>
    %247 = arith.mulf %245, %246 : vector<128x32xf32>
    %248 = arith.addf %40, %247 : vector<128x32xf32>
    %cst_83 = arith.constant dense<0.000000e+00> : vector<128xf32>
    %249 = vector.multi_reduction <add>, %248, %cst_83 [1] : vector<128x32xf32> to vector<128xf32>
    %250 = vector.shape_cast %249 : vector<128xf32> to vector<128x1xf32>
    %cst_84 = arith.constant 3.200000e+01 : f32
    %251 = vector.broadcast %cst_84 : f32 to vector<128x1xf32>
    %252 = arith.divf %250, %251 : vector<128x1xf32>
    %253 = arith.mulf %248, %248 : vector<128x32xf32>
    %cst_85 = arith.constant dense<0.000000e+00> : vector<128xf32>
    %254 = vector.multi_reduction <add>, %253, %cst_85 [1] : vector<128x32xf32> to vector<128xf32>
    %255 = vector.shape_cast %254 : vector<128xf32> to vector<128x1xf32>
    %cst_86 = arith.constant 3.200000e+01 : f32
    %256 = vector.broadcast %cst_86 : f32 to vector<128x1xf32>
    %257 = arith.divf %255, %256 : vector<128x1xf32>
    %258 = arith.mulf %252, %252 : vector<128x1xf32>
    %259 = arith.subf %257, %258 : vector<128x1xf32>
    %260 = vector.broadcast %252 : vector<128x1xf32> to vector<128x32xf32>
    %261 = arith.subf %248, %260 : vector<128x32xf32>
    %cst_87 = arith.constant 9.99999997E-7 : f32
    %262 = vector.broadcast %cst_87 : f32 to vector<128x1xf32>
    %263 = arith.addf %259, %262 : vector<128x1xf32>
    %264 = math.rsqrt %263 : vector<128x1xf32>
    %265 = vector.broadcast %264 : vector<128x1xf32> to vector<128x32xf32>
    %266 = arith.mulf %261, %265 : vector<128x32xf32>
    %267 = vector.extract_strided_slice %80 {offsets = [0, 128], sizes = [128, 32], strides = [1, 1]} : vector<128x192xf32> to vector<128x32xf32>
    %cst_88 = arith.constant 1.000000e+00 : f32
    %268 = vector.broadcast %cst_88 : f32 to vector<128x32xf32>
    %269 = arith.addf %268, %267 : vector<128x32xf32>
    %270 = arith.mulf %266, %269 : vector<128x32xf32>
    %271 = vector.extract_strided_slice %80 {offsets = [0, 96], sizes = [128, 32], strides = [1, 1]} : vector<128x192xf32> to vector<128x32xf32>
    %272 = arith.addf %270, %271 : vector<128x32xf32>
    %c360 = arith.constant 360 : index
    %c0_89 = arith.constant 0 : index
    %273 = vector.load %arg4[%c360, %c0_89] : memref<1184x128xf32, #tpu.memory_space<vmem>>, vector<32x128xf32>
    %c392 = arith.constant 392 : index
    %c0_90 = arith.constant 0 : index
    %274 = vector.load %arg4[%c392, %c0_90] : memref<1184x128xf32, #tpu.memory_space<vmem>>, vector<1x128xf32>
    %c400 = arith.constant 400 : index
    %c0_91 = arith.constant 0 : index
    %275 = vector.load %arg4[%c400, %c0_91] : memref<1184x128xf32, #tpu.memory_space<vmem>>, vector<128x32xf32>
    %c528 = arith.constant 528 : index
    %c0_92 = arith.constant 0 : index
    %276 = vector.load %arg4[%c528, %c0_92] : memref<1184x128xf32, #tpu.memory_space<vmem>>, vector<1x32xf32>
    %277 = vector.extract_strided_slice %80 {offsets = [0, 160], sizes = [128, 32], strides = [1, 1]} : vector<128x192xf32> to vector<128x32xf32>
    %cst_93 = arith.constant dense<0.000000e+00> : vector<128x128xf32>
    %278 = tpu.matmul %272, %273, %cst_93 {dimension_numbers = #tpu.dot_dimension_numbers<[1], [0], [0], [1], [0, 0, 1, 1], [], []>} : vector<128x32xf32>, vector<32x128xf32>, vector<128x128xf32> -> vector<128x128xf32>
    %279 = vector.broadcast %274 : vector<1x128xf32> to vector<128x128xf32>
    %280 = arith.addf %278, %279 : vector<128x128xf32>
    %281 = arith.mulf %280, %280 : vector<128x128xf32>
    %282 = arith.mulf %280, %281 : vector<128x128xf32>
    %cst_94 = arith.constant 4.471500e-02 : f32
    %283 = vector.broadcast %cst_94 : f32 to vector<128x128xf32>
    %284 = arith.mulf %283, %282 : vector<128x128xf32>
    %285 = arith.addf %280, %284 : vector<128x128xf32>
    %cst_95 = arith.constant 0.797884583 : f32
    %286 = vector.broadcast %cst_95 : f32 to vector<128x128xf32>
    %287 = arith.mulf %286, %285 : vector<128x128xf32>
    %288 = math.tanh %287 : vector<128x128xf32>
    %cst_96 = arith.constant 1.000000e+00 : f32
    %289 = vector.broadcast %cst_96 : f32 to vector<128x128xf32>
    %290 = arith.addf %289, %288 : vector<128x128xf32>
    %cst_97 = arith.constant 5.000000e-01 : f32
    %291 = vector.broadcast %cst_97 : f32 to vector<128x128xf32>
    %292 = arith.mulf %291, %290 : vector<128x128xf32>
    %293 = arith.mulf %280, %292 : vector<128x128xf32>
    %cst_98 = arith.constant dense<0.000000e+00> : vector<128x32xf32>
    %294 = tpu.matmul %293, %275, %cst_98 {dimension_numbers = #tpu.dot_dimension_numbers<[1], [0], [0], [1], [0, 0, 1, 1], [], []>} : vector<128x128xf32>, vector<128x32xf32>, vector<128x32xf32> -> vector<128x32xf32>
    %295 = vector.broadcast %276 : vector<1x32xf32> to vector<128x32xf32>
    %296 = arith.addf %294, %295 : vector<128x32xf32>
    %297 = arith.mulf %277, %296 : vector<128x32xf32>
    %298 = arith.addf %248, %297 : vector<128x32xf32>
    %cst_99 = arith.constant dense<0.000000e+00> : vector<16xf32>
    %299 = vector.multi_reduction <add>, %244, %cst_99 [1] : vector<16x32xf32> to vector<16xf32>
    %300 = vector.shape_cast %299 : vector<16xf32> to vector<16x1xf32>
    %cst_100 = arith.constant 3.200000e+01 : f32
    %301 = vector.broadcast %cst_100 : f32 to vector<16x1xf32>
    %302 = arith.divf %300, %301 : vector<16x1xf32>
    %303 = arith.mulf %244, %244 : vector<16x32xf32>
    %cst_101 = arith.constant dense<0.000000e+00> : vector<16xf32>
    %304 = vector.multi_reduction <add>, %303, %cst_101 [1] : vector<16x32xf32> to vector<16xf32>
    %305 = vector.shape_cast %304 : vector<16xf32> to vector<16x1xf32>
    %cst_102 = arith.constant 3.200000e+01 : f32
    %306 = vector.broadcast %cst_102 : f32 to vector<16x1xf32>
    %307 = arith.divf %305, %306 : vector<16x1xf32>
    %308 = arith.mulf %302, %302 : vector<16x1xf32>
    %309 = arith.subf %307, %308 : vector<16x1xf32>
    %310 = vector.broadcast %302 : vector<16x1xf32> to vector<16x32xf32>
    %311 = arith.subf %244, %310 : vector<16x32xf32>
    %cst_103 = arith.constant 9.99999997E-7 : f32
    %312 = vector.broadcast %cst_103 : f32 to vector<16x1xf32>
    %313 = arith.addf %309, %312 : vector<16x1xf32>
    %314 = math.rsqrt %313 : vector<16x1xf32>
    %315 = vector.broadcast %314 : vector<16x1xf32> to vector<16x32xf32>
    %316 = arith.mulf %311, %315 : vector<16x32xf32>
    %317 = vector.extract_strided_slice %88 {offsets = [0, 128], sizes = [16, 32], strides = [1, 1]} : vector<16x192xf32> to vector<16x32xf32>
    %cst_104 = arith.constant 1.000000e+00 : f32
    %318 = vector.broadcast %cst_104 : f32 to vector<16x32xf32>
    %319 = arith.addf %318, %317 : vector<16x32xf32>
    %320 = arith.mulf %316, %319 : vector<16x32xf32>
    %321 = vector.extract_strided_slice %88 {offsets = [0, 96], sizes = [16, 32], strides = [1, 1]} : vector<16x192xf32> to vector<16x32xf32>
    %322 = arith.addf %320, %321 : vector<16x32xf32>
    %c536 = arith.constant 536 : index
    %c0_105 = arith.constant 0 : index
    %323 = vector.load %arg4[%c536, %c0_105] : memref<1184x128xf32, #tpu.memory_space<vmem>>, vector<32x128xf32>
    %c568 = arith.constant 568 : index
    %c0_106 = arith.constant 0 : index
    %324 = vector.load %arg4[%c568, %c0_106] : memref<1184x128xf32, #tpu.memory_space<vmem>>, vector<1x128xf32>
    %c576 = arith.constant 576 : index
    %c0_107 = arith.constant 0 : index
    %325 = vector.load %arg4[%c576, %c0_107] : memref<1184x128xf32, #tpu.memory_space<vmem>>, vector<128x32xf32>
    %c704 = arith.constant 704 : index
    %c0_108 = arith.constant 0 : index
    %326 = vector.load %arg4[%c704, %c0_108] : memref<1184x128xf32, #tpu.memory_space<vmem>>, vector<1x32xf32>
    %327 = vector.extract_strided_slice %88 {offsets = [0, 160], sizes = [16, 32], strides = [1, 1]} : vector<16x192xf32> to vector<16x32xf32>
    %cst_109 = arith.constant dense<0.000000e+00> : vector<16x128xf32>
    %328 = tpu.matmul %322, %323, %cst_109 {dimension_numbers = #tpu.dot_dimension_numbers<[1], [0], [0], [1], [0, 0, 1, 1], [], []>} : vector<16x32xf32>, vector<32x128xf32>, vector<16x128xf32> -> vector<16x128xf32>
    %329 = vector.broadcast %324 : vector<1x128xf32> to vector<16x128xf32>
    %330 = arith.addf %328, %329 : vector<16x128xf32>
    %331 = arith.mulf %330, %330 : vector<16x128xf32>
    %332 = arith.mulf %330, %331 : vector<16x128xf32>
    %cst_110 = arith.constant 4.471500e-02 : f32
    %333 = vector.broadcast %cst_110 : f32 to vector<16x128xf32>
    %334 = arith.mulf %333, %332 : vector<16x128xf32>
    %335 = arith.addf %330, %334 : vector<16x128xf32>
    %cst_111 = arith.constant 0.797884583 : f32
    %336 = vector.broadcast %cst_111 : f32 to vector<16x128xf32>
    %337 = arith.mulf %336, %335 : vector<16x128xf32>
    %338 = math.tanh %337 : vector<16x128xf32>
    %cst_112 = arith.constant 1.000000e+00 : f32
    %339 = vector.broadcast %cst_112 : f32 to vector<16x128xf32>
    %340 = arith.addf %339, %338 : vector<16x128xf32>
    %cst_113 = arith.constant 5.000000e-01 : f32
    %341 = vector.broadcast %cst_113 : f32 to vector<16x128xf32>
    %342 = arith.mulf %341, %340 : vector<16x128xf32>
    %343 = arith.mulf %330, %342 : vector<16x128xf32>
    %cst_114 = arith.constant dense<0.000000e+00> : vector<16x32xf32>
    %344 = tpu.matmul %343, %325, %cst_114 {dimension_numbers = #tpu.dot_dimension_numbers<[1], [0], [0], [1], [0, 0, 1, 1], [], []>} : vector<16x128xf32>, vector<128x32xf32>, vector<16x32xf32> -> vector<16x32xf32>
    %345 = vector.broadcast %326 : vector<1x32xf32> to vector<16x32xf32>
    %346 = arith.addf %344, %345 : vector<16x32xf32>
    %347 = arith.mulf %327, %346 : vector<16x32xf32>
    %348 = arith.addf %244, %347 : vector<16x32xf32>
    %c712 = arith.constant 712 : index
    %c0_115 = arith.constant 0 : index
    %349 = vector.load %arg4[%c712, %c0_115] : memref<1184x128xf32, #tpu.memory_space<vmem>>, vector<32x32xf32>
    %c744 = arith.constant 744 : index
    %c0_116 = arith.constant 0 : index
    %350 = vector.load %arg4[%c744, %c0_116] : memref<1184x128xf32, #tpu.memory_space<vmem>>, vector<1x32xf32>
    %cst_117 = arith.constant dense<0.000000e+00> : vector<128x32xf32>
    %351 = tpu.matmul %298, %349, %cst_117 {dimension_numbers = #tpu.dot_dimension_numbers<[1], [0], [0], [1], [0, 0, 1, 1], [], []>} : vector<128x32xf32>, vector<32x32xf32>, vector<128x32xf32> -> vector<128x32xf32>
    %352 = vector.broadcast %350 : vector<1x32xf32> to vector<128x32xf32>
    %353 = arith.addf %351, %352 : vector<128x32xf32>
    %354 = vector.extract_strided_slice %72 {offsets = [0, 384], sizes = [2, 192], strides = [1, 1]} : vector<2x768xf32> to vector<2x192xf32>
    %355 = vector.extract_strided_slice %354 {offsets = [0, 0], sizes = [1, 192], strides = [1, 1]} : vector<2x192xf32> to vector<1x192xf32>
    %356 = vector.shape_cast %355 : vector<1x192xf32> to vector<1x192xf32>
    %357 = vector.broadcast %356 : vector<1x192xf32> to vector<64x192xf32>
    %358 = vector.extract_strided_slice %354 {offsets = [1, 0], sizes = [1, 192], strides = [1, 1]} : vector<2x192xf32> to vector<1x192xf32>
    %359 = vector.shape_cast %358 : vector<1x192xf32> to vector<1x192xf32>
    %360 = vector.broadcast %359 : vector<1x192xf32> to vector<64x192xf32>
    %361 = tpu.concatenate %357, %360 in 0 : vector<64x192xf32>, vector<64x192xf32> -> vector<128x192xf32>
    %362 = vector.extract_strided_slice %72 {offsets = [0, 576], sizes = [2, 192], strides = [1, 1]} : vector<2x768xf32> to vector<2x192xf32>
    %363 = vector.extract_strided_slice %362 {offsets = [0, 0], sizes = [1, 192], strides = [1, 1]} : vector<2x192xf32> to vector<1x192xf32>
    %364 = vector.shape_cast %363 : vector<1x192xf32> to vector<1x192xf32>
    %365 = vector.broadcast %364 : vector<1x192xf32> to vector<8x192xf32>
    %366 = vector.extract_strided_slice %362 {offsets = [1, 0], sizes = [1, 192], strides = [1, 1]} : vector<2x192xf32> to vector<1x192xf32>
    %367 = vector.shape_cast %366 : vector<1x192xf32> to vector<1x192xf32>
    %368 = vector.broadcast %367 : vector<1x192xf32> to vector<8x192xf32>
    %369 = tpu.concatenate %365, %368 in 0 : vector<8x192xf32>, vector<8x192xf32> -> vector<16x192xf32>
    %cst_118 = arith.constant dense<0.000000e+00> : vector<128xf32>
    %370 = vector.multi_reduction <add>, %298, %cst_118 [1] : vector<128x32xf32> to vector<128xf32>
    %371 = vector.shape_cast %370 : vector<128xf32> to vector<128x1xf32>
    %cst_119 = arith.constant 3.200000e+01 : f32
    %372 = vector.broadcast %cst_119 : f32 to vector<128x1xf32>
    %373 = arith.divf %371, %372 : vector<128x1xf32>
    %374 = arith.mulf %298, %298 : vector<128x32xf32>
    %cst_120 = arith.constant dense<0.000000e+00> : vector<128xf32>
    %375 = vector.multi_reduction <add>, %374, %cst_120 [1] : vector<128x32xf32> to vector<128xf32>
    %376 = vector.shape_cast %375 : vector<128xf32> to vector<128x1xf32>
    %cst_121 = arith.constant 3.200000e+01 : f32
    %377 = vector.broadcast %cst_121 : f32 to vector<128x1xf32>
    %378 = arith.divf %376, %377 : vector<128x1xf32>
    %379 = arith.mulf %373, %373 : vector<128x1xf32>
    %380 = arith.subf %378, %379 : vector<128x1xf32>
    %381 = vector.broadcast %373 : vector<128x1xf32> to vector<128x32xf32>
    %382 = arith.subf %298, %381 : vector<128x32xf32>
    %cst_122 = arith.constant 9.99999997E-7 : f32
    %383 = vector.broadcast %cst_122 : f32 to vector<128x1xf32>
    %384 = arith.addf %380, %383 : vector<128x1xf32>
    %385 = math.rsqrt %384 : vector<128x1xf32>
    %386 = vector.broadcast %385 : vector<128x1xf32> to vector<128x32xf32>
    %387 = arith.mulf %382, %386 : vector<128x32xf32>
    %388 = vector.extract_strided_slice %361 {offsets = [0, 32], sizes = [128, 32], strides = [1, 1]} : vector<128x192xf32> to vector<128x32xf32>
    %cst_123 = arith.constant 1.000000e+00 : f32
    %389 = vector.broadcast %cst_123 : f32 to vector<128x32xf32>
    %390 = arith.addf %389, %388 : vector<128x32xf32>
    %391 = arith.mulf %387, %390 : vector<128x32xf32>
    %392 = vector.extract_strided_slice %361 {offsets = [0, 0], sizes = [128, 32], strides = [1, 1]} : vector<128x192xf32> to vector<128x32xf32>
    %393 = arith.addf %391, %392 : vector<128x32xf32>
    %cst_124 = arith.constant dense<0.000000e+00> : vector<16xf32>
    %394 = vector.multi_reduction <add>, %348, %cst_124 [1] : vector<16x32xf32> to vector<16xf32>
    %395 = vector.shape_cast %394 : vector<16xf32> to vector<16x1xf32>
    %cst_125 = arith.constant 3.200000e+01 : f32
    %396 = vector.broadcast %cst_125 : f32 to vector<16x1xf32>
    %397 = arith.divf %395, %396 : vector<16x1xf32>
    %398 = arith.mulf %348, %348 : vector<16x32xf32>
    %cst_126 = arith.constant dense<0.000000e+00> : vector<16xf32>
    %399 = vector.multi_reduction <add>, %398, %cst_126 [1] : vector<16x32xf32> to vector<16xf32>
    %400 = vector.shape_cast %399 : vector<16xf32> to vector<16x1xf32>
    %cst_127 = arith.constant 3.200000e+01 : f32
    %401 = vector.broadcast %cst_127 : f32 to vector<16x1xf32>
    %402 = arith.divf %400, %401 : vector<16x1xf32>
    %403 = arith.mulf %397, %397 : vector<16x1xf32>
    %404 = arith.subf %402, %403 : vector<16x1xf32>
    %405 = vector.broadcast %397 : vector<16x1xf32> to vector<16x32xf32>
    %406 = arith.subf %348, %405 : vector<16x32xf32>
    %cst_128 = arith.constant 9.99999997E-7 : f32
    %407 = vector.broadcast %cst_128 : f32 to vector<16x1xf32>
    %408 = arith.addf %404, %407 : vector<16x1xf32>
    %409 = math.rsqrt %408 : vector<16x1xf32>
    %410 = vector.broadcast %409 : vector<16x1xf32> to vector<16x32xf32>
    %411 = arith.mulf %406, %410 : vector<16x32xf32>
    %412 = vector.extract_strided_slice %369 {offsets = [0, 32], sizes = [16, 32], strides = [1, 1]} : vector<16x192xf32> to vector<16x32xf32>
    %cst_129 = arith.constant 1.000000e+00 : f32
    %413 = vector.broadcast %cst_129 : f32 to vector<16x32xf32>
    %414 = arith.addf %413, %412 : vector<16x32xf32>
    %415 = arith.mulf %411, %414 : vector<16x32xf32>
    %416 = vector.extract_strided_slice %369 {offsets = [0, 0], sizes = [16, 32], strides = [1, 1]} : vector<16x192xf32> to vector<16x32xf32>
    %417 = arith.addf %415, %416 : vector<16x32xf32>
    %c40 = arith.constant 40 : index
    %c0_130 = arith.constant 0 : index
    %418 = vector.load %arg5[%c40, %c0_130] : memref<80x192xf32, #tpu.memory_space<vmem>>, vector<32x192xf32>
    %c72 = arith.constant 72 : index
    %c0_131 = arith.constant 0 : index
    %419 = vector.load %arg5[%c72, %c0_131] : memref<80x192xf32, #tpu.memory_space<vmem>>, vector<1x192xf32>
    %420 = tpu.concatenate %417, %393 in 0 : vector<16x32xf32>, vector<128x32xf32> -> vector<144x32xf32>
    %cst_132 = arith.constant dense<0.000000e+00> : vector<144x192xf32>
    %421 = tpu.matmul %420, %418, %cst_132 {dimension_numbers = #tpu.dot_dimension_numbers<[1], [0], [0], [1], [0, 0, 1, 1], [], []>} : vector<144x32xf32>, vector<32x192xf32>, vector<144x192xf32> -> vector<144x192xf32>
    %422 = vector.broadcast %419 : vector<1x192xf32> to vector<144x192xf32>
    %423 = arith.addf %421, %422 : vector<144x192xf32>
    %424 = vector.extract_strided_slice %423 {offsets = [0, 0], sizes = [8, 32], strides = [1, 1]} : vector<144x192xf32> to vector<8x32xf32>
    %425 = vector.extract_strided_slice %423 {offsets = [16, 96], sizes = [64, 32], strides = [1, 1]} : vector<144x192xf32> to vector<64x32xf32>
    %426 = tpu.concatenate %424, %425 in 0 : vector<8x32xf32>, vector<64x32xf32> -> vector<72x32xf32>
    %427 = vector.extract_strided_slice %423 {offsets = [0, 32], sizes = [8, 32], strides = [1, 1]} : vector<144x192xf32> to vector<8x32xf32>
    %428 = vector.extract_strided_slice %423 {offsets = [16, 128], sizes = [64, 32], strides = [1, 1]} : vector<144x192xf32> to vector<64x32xf32>
    %429 = tpu.concatenate %427, %428 in 0 : vector<8x32xf32>, vector<64x32xf32> -> vector<72x32xf32>
    %430 = vector.extract_strided_slice %423 {offsets = [0, 64], sizes = [8, 32], strides = [1, 1]} : vector<144x192xf32> to vector<8x32xf32>
    %431 = vector.extract_strided_slice %423 {offsets = [16, 160], sizes = [64, 32], strides = [1, 1]} : vector<144x192xf32> to vector<64x32xf32>
    %432 = tpu.concatenate %430, %431 in 0 : vector<8x32xf32>, vector<64x32xf32> -> vector<72x32xf32>
    %433 = vector.extract_strided_slice %426 {offsets = [0, 0], sizes = [72, 16], strides = [1, 1]} : vector<72x32xf32> to vector<72x16xf32>
    %434 = vector.extract_strided_slice %429 {offsets = [0, 0], sizes = [72, 16], strides = [1, 1]} : vector<72x32xf32> to vector<72x16xf32>
    %cst_133 = arith.constant dense<0.000000e+00> : vector<72x72xf32>
    %435 = tpu.matmul %433, %434, %cst_133 {dimension_numbers = #tpu.dot_dimension_numbers<[1], [1], [0], [0], [0, 0, 1, 0], [], []>} : vector<72x16xf32>, vector<72x16xf32>, vector<72x72xf32> -> vector<72x72xf32>
    %cst_134 = arith.constant 2.500000e-01 : f32
    %436 = vector.broadcast %cst_134 : f32 to vector<72x72xf32>
    %437 = arith.mulf %435, %436 : vector<72x72xf32>
    %cst_135 = arith.constant dense<0xFF800000> : vector<72xf32>
    %438 = vector.multi_reduction <maximumf>, %437, %cst_135 [1] : vector<72x72xf32> to vector<72xf32>
    %439 = vector.shape_cast %438 : vector<72xf32> to vector<72x1xf32>
    %440 = vector.broadcast %439 : vector<72x1xf32> to vector<72x72xf32>
    %441 = arith.subf %437, %440 : vector<72x72xf32>
    %442 = math.exp %441 : vector<72x72xf32>
    %cst_136 = arith.constant dense<0.000000e+00> : vector<72xf32>
    %443 = vector.multi_reduction <add>, %442, %cst_136 [1] : vector<72x72xf32> to vector<72xf32>
    %444 = vector.shape_cast %443 : vector<72xf32> to vector<72x1xf32>
    %445 = tpu.reciprocal %444 {approx = true} : vector<72x1xf32> -> vector<72x1xf32>
    %446 = vector.broadcast %445 : vector<72x1xf32> to vector<72x72xf32>
    %447 = arith.mulf %442, %446 : vector<72x72xf32>
    %448 = vector.extract_strided_slice %432 {offsets = [0, 0], sizes = [72, 16], strides = [1, 1]} : vector<72x32xf32> to vector<72x16xf32>
    %cst_137 = arith.constant dense<0.000000e+00> : vector<72x16xf32>
    %449 = tpu.matmul %447, %448, %cst_137 {dimension_numbers = #tpu.dot_dimension_numbers<[1], [0], [0], [1], [0, 0, 1, 1], [], []>} : vector<72x72xf32>, vector<72x16xf32>, vector<72x16xf32> -> vector<72x16xf32>
    %450 = vector.extract_strided_slice %426 {offsets = [0, 16], sizes = [72, 16], strides = [1, 1]} : vector<72x32xf32> to vector<72x16xf32>
    %451 = vector.extract_strided_slice %429 {offsets = [0, 16], sizes = [72, 16], strides = [1, 1]} : vector<72x32xf32> to vector<72x16xf32>
    %cst_138 = arith.constant dense<0.000000e+00> : vector<72x72xf32>
    %452 = tpu.matmul %450, %451, %cst_138 {dimension_numbers = #tpu.dot_dimension_numbers<[1], [1], [0], [0], [0, 0, 1, 0], [], []>} : vector<72x16xf32>, vector<72x16xf32>, vector<72x72xf32> -> vector<72x72xf32>
    %cst_139 = arith.constant 2.500000e-01 : f32
    %453 = vector.broadcast %cst_139 : f32 to vector<72x72xf32>
    %454 = arith.mulf %452, %453 : vector<72x72xf32>
    %cst_140 = arith.constant dense<0xFF800000> : vector<72xf32>
    %455 = vector.multi_reduction <maximumf>, %454, %cst_140 [1] : vector<72x72xf32> to vector<72xf32>
    %456 = vector.shape_cast %455 : vector<72xf32> to vector<72x1xf32>
    %457 = vector.broadcast %456 : vector<72x1xf32> to vector<72x72xf32>
    %458 = arith.subf %454, %457 : vector<72x72xf32>
    %459 = math.exp %458 : vector<72x72xf32>
    %cst_141 = arith.constant dense<0.000000e+00> : vector<72xf32>
    %460 = vector.multi_reduction <add>, %459, %cst_141 [1] : vector<72x72xf32> to vector<72xf32>
    %461 = vector.shape_cast %460 : vector<72xf32> to vector<72x1xf32>
    %462 = tpu.reciprocal %461 {approx = true} : vector<72x1xf32> -> vector<72x1xf32>
    %463 = vector.broadcast %462 : vector<72x1xf32> to vector<72x72xf32>
    %464 = arith.mulf %459, %463 : vector<72x72xf32>
    %465 = vector.extract_strided_slice %432 {offsets = [0, 16], sizes = [72, 16], strides = [1, 1]} : vector<72x32xf32> to vector<72x16xf32>
    %cst_142 = arith.constant dense<0.000000e+00> : vector<72x16xf32>
    %466 = tpu.matmul %464, %465, %cst_142 {dimension_numbers = #tpu.dot_dimension_numbers<[1], [0], [0], [1], [0, 0, 1, 1], [], []>} : vector<72x72xf32>, vector<72x16xf32>, vector<72x16xf32> -> vector<72x16xf32>
    %467 = tpu.concatenate %449, %466 in 1 : vector<72x16xf32>, vector<72x16xf32> -> vector<72x32xf32>
    %468 = vector.extract_strided_slice %467 {offsets = [0, 0], sizes = [8, 32], strides = [1, 1]} : vector<72x32xf32> to vector<8x32xf32>
    %469 = vector.extract_strided_slice %467 {offsets = [8, 0], sizes = [64, 32], strides = [1, 1]} : vector<72x32xf32> to vector<64x32xf32>
    %470 = vector.extract_strided_slice %423 {offsets = [8, 0], sizes = [8, 32], strides = [1, 1]} : vector<144x192xf32> to vector<8x32xf32>
    %471 = vector.extract_strided_slice %423 {offsets = [80, 96], sizes = [64, 32], strides = [1, 1]} : vector<144x192xf32> to vector<64x32xf32>
    %472 = tpu.concatenate %470, %471 in 0 : vector<8x32xf32>, vector<64x32xf32> -> vector<72x32xf32>
    %473 = vector.extract_strided_slice %423 {offsets = [8, 32], sizes = [8, 32], strides = [1, 1]} : vector<144x192xf32> to vector<8x32xf32>
    %474 = vector.extract_strided_slice %423 {offsets = [80, 128], sizes = [64, 32], strides = [1, 1]} : vector<144x192xf32> to vector<64x32xf32>
    %475 = tpu.concatenate %473, %474 in 0 : vector<8x32xf32>, vector<64x32xf32> -> vector<72x32xf32>
    %476 = vector.extract_strided_slice %423 {offsets = [8, 64], sizes = [8, 32], strides = [1, 1]} : vector<144x192xf32> to vector<8x32xf32>
    %477 = vector.extract_strided_slice %423 {offsets = [80, 160], sizes = [64, 32], strides = [1, 1]} : vector<144x192xf32> to vector<64x32xf32>
    %478 = tpu.concatenate %476, %477 in 0 : vector<8x32xf32>, vector<64x32xf32> -> vector<72x32xf32>
    %479 = vector.extract_strided_slice %472 {offsets = [0, 0], sizes = [72, 16], strides = [1, 1]} : vector<72x32xf32> to vector<72x16xf32>
    %480 = vector.extract_strided_slice %475 {offsets = [0, 0], sizes = [72, 16], strides = [1, 1]} : vector<72x32xf32> to vector<72x16xf32>
    %cst_143 = arith.constant dense<0.000000e+00> : vector<72x72xf32>
    %481 = tpu.matmul %479, %480, %cst_143 {dimension_numbers = #tpu.dot_dimension_numbers<[1], [1], [0], [0], [0, 0, 1, 0], [], []>} : vector<72x16xf32>, vector<72x16xf32>, vector<72x72xf32> -> vector<72x72xf32>
    %cst_144 = arith.constant 2.500000e-01 : f32
    %482 = vector.broadcast %cst_144 : f32 to vector<72x72xf32>
    %483 = arith.mulf %481, %482 : vector<72x72xf32>
    %cst_145 = arith.constant dense<0xFF800000> : vector<72xf32>
    %484 = vector.multi_reduction <maximumf>, %483, %cst_145 [1] : vector<72x72xf32> to vector<72xf32>
    %485 = vector.shape_cast %484 : vector<72xf32> to vector<72x1xf32>
    %486 = vector.broadcast %485 : vector<72x1xf32> to vector<72x72xf32>
    %487 = arith.subf %483, %486 : vector<72x72xf32>
    %488 = math.exp %487 : vector<72x72xf32>
    %cst_146 = arith.constant dense<0.000000e+00> : vector<72xf32>
    %489 = vector.multi_reduction <add>, %488, %cst_146 [1] : vector<72x72xf32> to vector<72xf32>
    %490 = vector.shape_cast %489 : vector<72xf32> to vector<72x1xf32>
    %491 = tpu.reciprocal %490 {approx = true} : vector<72x1xf32> -> vector<72x1xf32>
    %492 = vector.broadcast %491 : vector<72x1xf32> to vector<72x72xf32>
    %493 = arith.mulf %488, %492 : vector<72x72xf32>
    %494 = vector.extract_strided_slice %478 {offsets = [0, 0], sizes = [72, 16], strides = [1, 1]} : vector<72x32xf32> to vector<72x16xf32>
    %cst_147 = arith.constant dense<0.000000e+00> : vector<72x16xf32>
    %495 = tpu.matmul %493, %494, %cst_147 {dimension_numbers = #tpu.dot_dimension_numbers<[1], [0], [0], [1], [0, 0, 1, 1], [], []>} : vector<72x72xf32>, vector<72x16xf32>, vector<72x16xf32> -> vector<72x16xf32>
    %496 = vector.extract_strided_slice %472 {offsets = [0, 16], sizes = [72, 16], strides = [1, 1]} : vector<72x32xf32> to vector<72x16xf32>
    %497 = vector.extract_strided_slice %475 {offsets = [0, 16], sizes = [72, 16], strides = [1, 1]} : vector<72x32xf32> to vector<72x16xf32>
    %cst_148 = arith.constant dense<0.000000e+00> : vector<72x72xf32>
    %498 = tpu.matmul %496, %497, %cst_148 {dimension_numbers = #tpu.dot_dimension_numbers<[1], [1], [0], [0], [0, 0, 1, 0], [], []>} : vector<72x16xf32>, vector<72x16xf32>, vector<72x72xf32> -> vector<72x72xf32>
    %cst_149 = arith.constant 2.500000e-01 : f32
    %499 = vector.broadcast %cst_149 : f32 to vector<72x72xf32>
    %500 = arith.mulf %498, %499 : vector<72x72xf32>
    %cst_150 = arith.constant dense<0xFF800000> : vector<72xf32>
    %501 = vector.multi_reduction <maximumf>, %500, %cst_150 [1] : vector<72x72xf32> to vector<72xf32>
    %502 = vector.shape_cast %501 : vector<72xf32> to vector<72x1xf32>
    %503 = vector.broadcast %502 : vector<72x1xf32> to vector<72x72xf32>
    %504 = arith.subf %500, %503 : vector<72x72xf32>
    %505 = math.exp %504 : vector<72x72xf32>
    %cst_151 = arith.constant dense<0.000000e+00> : vector<72xf32>
    %506 = vector.multi_reduction <add>, %505, %cst_151 [1] : vector<72x72xf32> to vector<72xf32>
    %507 = vector.shape_cast %506 : vector<72xf32> to vector<72x1xf32>
    %508 = tpu.reciprocal %507 {approx = true} : vector<72x1xf32> -> vector<72x1xf32>
    %509 = vector.broadcast %508 : vector<72x1xf32> to vector<72x72xf32>
    %510 = arith.mulf %505, %509 : vector<72x72xf32>
    %511 = vector.extract_strided_slice %478 {offsets = [0, 16], sizes = [72, 16], strides = [1, 1]} : vector<72x32xf32> to vector<72x16xf32>
    %cst_152 = arith.constant dense<0.000000e+00> : vector<72x16xf32>
    %512 = tpu.matmul %510, %511, %cst_152 {dimension_numbers = #tpu.dot_dimension_numbers<[1], [0], [0], [1], [0, 0, 1, 1], [], []>} : vector<72x72xf32>, vector<72x16xf32>, vector<72x16xf32> -> vector<72x16xf32>
    %513 = tpu.concatenate %495, %512 in 1 : vector<72x16xf32>, vector<72x16xf32> -> vector<72x32xf32>
    %514 = vector.extract_strided_slice %513 {offsets = [0, 0], sizes = [8, 32], strides = [1, 1]} : vector<72x32xf32> to vector<8x32xf32>
    %515 = vector.extract_strided_slice %513 {offsets = [8, 0], sizes = [64, 32], strides = [1, 1]} : vector<72x32xf32> to vector<64x32xf32>
    %516 = tpu.concatenate %468, %514, %469, %515 in 0 : vector<8x32xf32>, vector<8x32xf32>, vector<64x32xf32>, vector<64x32xf32> -> vector<144x32xf32>
    %c752 = arith.constant 752 : index
    %c0_153 = arith.constant 0 : index
    %517 = vector.load %arg4[%c752, %c0_153] : memref<1184x128xf32, #tpu.memory_space<vmem>>, vector<32x64xf32>
    %c784 = arith.constant 784 : index
    %c0_154 = arith.constant 0 : index
    %518 = vector.load %arg4[%c784, %c0_154] : memref<1184x128xf32, #tpu.memory_space<vmem>>, vector<1x64xf32>
    %cst_155 = arith.constant dense<0.000000e+00> : vector<144x64xf32>
    %519 = tpu.matmul %516, %517, %cst_155 {dimension_numbers = #tpu.dot_dimension_numbers<[1], [0], [0], [1], [0, 0, 1, 1], [], []>} : vector<144x32xf32>, vector<32x64xf32>, vector<144x64xf32> -> vector<144x64xf32>
    %520 = vector.broadcast %518 : vector<1x64xf32> to vector<144x64xf32>
    %521 = arith.addf %519, %520 : vector<144x64xf32>
    %522 = vector.extract_strided_slice %361 {offsets = [0, 64], sizes = [128, 32], strides = [1, 1]} : vector<128x192xf32> to vector<128x32xf32>
    %523 = vector.extract_strided_slice %521 {offsets = [16, 32], sizes = [128, 32], strides = [1, 1]} : vector<144x64xf32> to vector<128x32xf32>
    %524 = arith.mulf %522, %523 : vector<128x32xf32>
    %525 = arith.addf %298, %524 : vector<128x32xf32>
    %cst_156 = arith.constant dense<0.000000e+00> : vector<128xf32>
    %526 = vector.multi_reduction <add>, %525, %cst_156 [1] : vector<128x32xf32> to vector<128xf32>
    %527 = vector.shape_cast %526 : vector<128xf32> to vector<128x1xf32>
    %cst_157 = arith.constant 3.200000e+01 : f32
    %528 = vector.broadcast %cst_157 : f32 to vector<128x1xf32>
    %529 = arith.divf %527, %528 : vector<128x1xf32>
    %530 = arith.mulf %525, %525 : vector<128x32xf32>
    %cst_158 = arith.constant dense<0.000000e+00> : vector<128xf32>
    %531 = vector.multi_reduction <add>, %530, %cst_158 [1] : vector<128x32xf32> to vector<128xf32>
    %532 = vector.shape_cast %531 : vector<128xf32> to vector<128x1xf32>
    %cst_159 = arith.constant 3.200000e+01 : f32
    %533 = vector.broadcast %cst_159 : f32 to vector<128x1xf32>
    %534 = arith.divf %532, %533 : vector<128x1xf32>
    %535 = arith.mulf %529, %529 : vector<128x1xf32>
    %536 = arith.subf %534, %535 : vector<128x1xf32>
    %537 = vector.broadcast %529 : vector<128x1xf32> to vector<128x32xf32>
    %538 = arith.subf %525, %537 : vector<128x32xf32>
    %cst_160 = arith.constant 9.99999997E-7 : f32
    %539 = vector.broadcast %cst_160 : f32 to vector<128x1xf32>
    %540 = arith.addf %536, %539 : vector<128x1xf32>
    %541 = math.rsqrt %540 : vector<128x1xf32>
    %542 = vector.broadcast %541 : vector<128x1xf32> to vector<128x32xf32>
    %543 = arith.mulf %538, %542 : vector<128x32xf32>
    %544 = vector.extract_strided_slice %361 {offsets = [0, 128], sizes = [128, 32], strides = [1, 1]} : vector<128x192xf32> to vector<128x32xf32>
    %cst_161 = arith.constant 1.000000e+00 : f32
    %545 = vector.broadcast %cst_161 : f32 to vector<128x32xf32>
    %546 = arith.addf %545, %544 : vector<128x32xf32>
    %547 = arith.mulf %543, %546 : vector<128x32xf32>
    %548 = vector.extract_strided_slice %361 {offsets = [0, 96], sizes = [128, 32], strides = [1, 1]} : vector<128x192xf32> to vector<128x32xf32>
    %549 = arith.addf %547, %548 : vector<128x32xf32>
    %c792 = arith.constant 792 : index
    %c0_162 = arith.constant 0 : index
    %550 = vector.load %arg4[%c792, %c0_162] : memref<1184x128xf32, #tpu.memory_space<vmem>>, vector<32x128xf32>
    %c824 = arith.constant 824 : index
    %c0_163 = arith.constant 0 : index
    %551 = vector.load %arg4[%c824, %c0_163] : memref<1184x128xf32, #tpu.memory_space<vmem>>, vector<1x128xf32>
    %c832 = arith.constant 832 : index
    %c0_164 = arith.constant 0 : index
    %552 = vector.load %arg4[%c832, %c0_164] : memref<1184x128xf32, #tpu.memory_space<vmem>>, vector<128x32xf32>
    %c960 = arith.constant 960 : index
    %c0_165 = arith.constant 0 : index
    %553 = vector.load %arg4[%c960, %c0_165] : memref<1184x128xf32, #tpu.memory_space<vmem>>, vector<1x32xf32>
    %554 = vector.extract_strided_slice %361 {offsets = [0, 160], sizes = [128, 32], strides = [1, 1]} : vector<128x192xf32> to vector<128x32xf32>
    %cst_166 = arith.constant dense<0.000000e+00> : vector<128x128xf32>
    %555 = tpu.matmul %549, %550, %cst_166 {dimension_numbers = #tpu.dot_dimension_numbers<[1], [0], [0], [1], [0, 0, 1, 1], [], []>} : vector<128x32xf32>, vector<32x128xf32>, vector<128x128xf32> -> vector<128x128xf32>
    %556 = vector.broadcast %551 : vector<1x128xf32> to vector<128x128xf32>
    %557 = arith.addf %555, %556 : vector<128x128xf32>
    %558 = arith.mulf %557, %557 : vector<128x128xf32>
    %559 = arith.mulf %557, %558 : vector<128x128xf32>
    %cst_167 = arith.constant 4.471500e-02 : f32
    %560 = vector.broadcast %cst_167 : f32 to vector<128x128xf32>
    %561 = arith.mulf %560, %559 : vector<128x128xf32>
    %562 = arith.addf %557, %561 : vector<128x128xf32>
    %cst_168 = arith.constant 0.797884583 : f32
    %563 = vector.broadcast %cst_168 : f32 to vector<128x128xf32>
    %564 = arith.mulf %563, %562 : vector<128x128xf32>
    %565 = math.tanh %564 : vector<128x128xf32>
    %cst_169 = arith.constant 1.000000e+00 : f32
    %566 = vector.broadcast %cst_169 : f32 to vector<128x128xf32>
    %567 = arith.addf %566, %565 : vector<128x128xf32>
    %cst_170 = arith.constant 5.000000e-01 : f32
    %568 = vector.broadcast %cst_170 : f32 to vector<128x128xf32>
    %569 = arith.mulf %568, %567 : vector<128x128xf32>
    %570 = arith.mulf %557, %569 : vector<128x128xf32>
    %cst_171 = arith.constant dense<0.000000e+00> : vector<128x32xf32>
    %571 = tpu.matmul %570, %552, %cst_171 {dimension_numbers = #tpu.dot_dimension_numbers<[1], [0], [0], [1], [0, 0, 1, 1], [], []>} : vector<128x128xf32>, vector<128x32xf32>, vector<128x32xf32> -> vector<128x32xf32>
    %572 = vector.broadcast %553 : vector<1x32xf32> to vector<128x32xf32>
    %573 = arith.addf %571, %572 : vector<128x32xf32>
    %574 = arith.mulf %554, %573 : vector<128x32xf32>
    %575 = arith.addf %525, %574 : vector<128x32xf32>
    %c1144 = arith.constant 1144 : index
    %c0_172 = arith.constant 0 : index
    %576 = vector.load %arg4[%c1144, %c0_172] : memref<1184x128xf32, #tpu.memory_space<vmem>>, vector<32x32xf32>
    %c1176 = arith.constant 1176 : index
    %c0_173 = arith.constant 0 : index
    %577 = vector.load %arg4[%c1176, %c0_173] : memref<1184x128xf32, #tpu.memory_space<vmem>>, vector<1x32xf32>
    %cst_174 = arith.constant dense<0.000000e+00> : vector<128x32xf32>
    %578 = tpu.matmul %575, %576, %cst_174 {dimension_numbers = #tpu.dot_dimension_numbers<[1], [0], [0], [1], [0, 0, 1, 1], [], []>} : vector<128x32xf32>, vector<32x32xf32>, vector<128x32xf32> -> vector<128x32xf32>
    %579 = vector.broadcast %577 : vector<1x32xf32> to vector<128x32xf32>
    %580 = arith.addf %578, %579 : vector<128x32xf32>
    %581 = vector.extract_strided_slice %353 {offsets = [0, 0], sizes = [32, 32], strides = [1, 1]} : vector<128x32xf32> to vector<32x32xf32>
    %582 = vector.extract_strided_slice %580 {offsets = [0, 0], sizes = [32, 32], strides = [1, 1]} : vector<128x32xf32> to vector<32x32xf32>
    %583 = vector.extract_strided_slice %353 {offsets = [32, 0], sizes = [32, 32], strides = [1, 1]} : vector<128x32xf32> to vector<32x32xf32>
    %584 = vector.extract_strided_slice %580 {offsets = [32, 0], sizes = [32, 32], strides = [1, 1]} : vector<128x32xf32> to vector<32x32xf32>
    %585 = tpu.concatenate %581, %582, %583, %584 in 1 : vector<32x32xf32>, vector<32x32xf32>, vector<32x32xf32>, vector<32x32xf32> -> vector<32x128xf32>
    %c0_175 = arith.constant 0 : index
    %c0_176 = arith.constant 0 : index
    %c0_177 = arith.constant 0 : index
    %586 = vector.load %arg8[%c0_175, %c0_176, %c0_177] : memref<2x32x128xf32, #tpu.memory_space<vmem>>, vector<1x32x128xf32>
    %587 = vector.shape_cast %586 : vector<1x32x128xf32> to vector<32x128xf32>
    %588 = vector.shape_cast %585 : vector<32x128xf32> to vector<1x32x128xf32>
    tpu.vector_store %arg8[%c0_175, %c0_176, %c0_177], %588 {strides = array<i32>} : memref<2x32x128xf32, #tpu.memory_space<vmem>>, vector<1x32x128xf32>,
    %589 = vector.extract_strided_slice %353 {offsets = [64, 0], sizes = [32, 32], strides = [1, 1]} : vector<128x32xf32> to vector<32x32xf32>
    %590 = vector.extract_strided_slice %580 {offsets = [64, 0], sizes = [32, 32], strides = [1, 1]} : vector<128x32xf32> to vector<32x32xf32>
    %591 = vector.extract_strided_slice %353 {offsets = [96, 0], sizes = [32, 32], strides = [1, 1]} : vector<128x32xf32> to vector<32x32xf32>
    %592 = vector.extract_strided_slice %580 {offsets = [96, 0], sizes = [32, 32], strides = [1, 1]} : vector<128x32xf32> to vector<32x32xf32>
    %593 = tpu.concatenate %589, %590, %591, %592 in 1 : vector<32x32xf32>, vector<32x32xf32>, vector<32x32xf32>, vector<32x32xf32> -> vector<32x128xf32>
    %c1_178 = arith.constant 1 : index
    %c0_179 = arith.constant 0 : index
    %c0_180 = arith.constant 0 : index
    %594 = vector.load %arg8[%c1_178, %c0_179, %c0_180] : memref<2x32x128xf32, #tpu.memory_space<vmem>>, vector<1x32x128xf32>
    %595 = vector.shape_cast %594 : vector<1x32x128xf32> to vector<32x128xf32>
    %596 = vector.shape_cast %593 : vector<32x128xf32> to vector<1x32x128xf32>
    tpu.vector_store %arg8[%c1_178, %c0_179, %c0_180], %596 {strides = array<i32>} : memref<2x32x128xf32, #tpu.memory_space<vmem>>, vector<1x32x128xf32>,
    return
  }
  func.func @transform_0(%arg0: i32) -> (i32, i32, i32) {
    %c0_i32 = arith.constant 0 : i32
    %c0_i32_0 = arith.constant 0 : i32
    %c0_i32_1 = arith.constant 0 : i32
    return %arg0, %c0_i32, %c0_i32_0 : i32, i32, i32
  }
  func.func @transform_1(%arg0: i32) -> (i32, i32, i32) {
    %c0_i32 = arith.constant 0 : i32
    %c0_i32_0 = arith.constant 0 : i32
    %c0_i32_1 = arith.constant 0 : i32
    return %arg0, %c0_i32, %c0_i32_0 : i32, i32, i32
  }
  func.func @transform_2(%arg0: i32) -> (i32, i32, i32) {
    %c0_i32 = arith.constant 0 : i32
    %c0_i32_0 = arith.constant 0 : i32
    %c0_i32_1 = arith.constant 0 : i32
    return %arg0, %c0_i32, %c0_i32_0 : i32, i32, i32
  }
  func.func @transform_3(%arg0: i32) -> (i32, i32) {
    %c0_i32 = arith.constant 0 : i32
    %c0_i32_0 = arith.constant 0 : i32
    %c0_i32_1 = arith.constant 0 : i32
    return %c0_i32, %c0_i32_0 : i32, i32
  }
  func.func @transform_4(%arg0: i32) -> (i32, i32) {
    %c0_i32 = arith.constant 0 : i32
    %c0_i32_0 = arith.constant 0 : i32
    %c0_i32_1 = arith.constant 0 : i32
    return %c0_i32, %c0_i32_0 : i32, i32
  }
  func.func @transform_5(%arg0: i32) -> (i32, i32) {
    %c0_i32 = arith.constant 0 : i32
    %c0_i32_0 = arith.constant 0 : i32
    %c0_i32_1 = arith.constant 0 : i32
    return %c0_i32, %c0_i32_0 : i32, i32
  }
  func.func @transform_6(%arg0: i32) -> (i32, i32) {
    %c0_i32 = arith.constant 0 : i32
    %c0_i32_0 = arith.constant 0 : i32
    %c0_i32_1 = arith.constant 0 : i32
    return %c0_i32, %c0_i32_0 : i32, i32
  }
  func.func @transform_7(%arg0: i32) -> (i32, i32, i32) {
    %c0_i32 = arith.constant 0 : i32
    %c0_i32_0 = arith.constant 0 : i32
    %c0_i32_1 = arith.constant 0 : i32
    return %arg0, %c0_i32, %c0_i32_0 : i32, i32, i32
  }
}

</mosaic_0001>

<bundles_post_ra>
// kernel: wrapper_forward.1
= control target key start
LH: loop header
LB: loop body
LE: loop exit
PB: predicated region body
PF: predicated region fallthrough
CT: control target
= control target key end

     0   :  { %vm37_vm0 = vcmask 195584   ;;  %vm264_vm1 = vcmask 261120   ;;  %v17880_v29 = vmov 0.0   ;;  %vm148_vm2 = vcmask 392192   ;;  %s13057_s10 = smov 64   ;;  %s13058_s11 = smov 32   ;;  %s17870_s3 = inlined_call_operand.vmem [shape: f32[1184,128], index: 3, kind: input, shape index: {}]   ;;  %s17871_s2 = inlined_call_operand.vmem [shape: f32[2,8,24], index: 2, kind: input, shape index: {}]   ;;  %s17872_s0 = inlined_call_operand.vmem [shape: f32[2,64,32], index: 0, kind: input, shape index: {}]   ;;  %s17873_s1 = inlined_call_operand.vmem [shape: f32[2,1,48], index: 1, kind: input, shape index: {}]   ;;  %s17874_s5 = inlined_call_operand.vmem [shape: f32[32,768], index: 5, kind: input, shape index: {}]   ;;  %s17875_s4 = inlined_call_operand.vmem [shape: f32[80,192], index: 4, kind: input, shape index: {}]   ;;  %s17876_s6 = inlined_call_operand.vmem [shape: f32[1,768], index: 6, kind: input, shape index: {}]   ;;  %s17877_s7 = inlined_call_operand.vmem [shape: f32[2,32,128], index: 7, kind: output, shape index: {}]  }
   0x1   :  { %v29_v0 = vld [vmem:[%s17870_s3] sm:$0xff]  ;;  %v30_v1 = vld [vmem:[%s17870_s3 + $0x8] sm:$0xff]  ;;  %v31_v4 = vld [vmem:[%s17870_s3 + $0x10] sm:$0xff]  ;;  %vm483_vm3 = vcmask 1040384   ;;  %vm13056_vm4 = vmmov 0   ;;  %vm589_vm5 = vcmask 523264  }
   0x2   :  { %v11679_v2 = vpack.c.bf16 %v30_v1, %v29_v0  ;;  %v26_v3 = vld [vmem:[%s17871_s2] sm:$0xff]  ;;  %v247_v5 = vld [vmem:[%s17870_s3 + $0x58] sm:$0xff]  ;;  %v249_v7 = vld [vmem:[%s17870_s3 + $0x68] sm:$0xff]  ;;  %s13059_s12 = smov 96   ;;  %s13061_s15 = smov 112   ;;  %vm1610_vm6 = vcmask 130048  }
   0x3   :  { %10519 = vmatprep.mubr.msk.f32.mxu0 %vm37_vm0, %v26_v3  ;;  %v248_v6 = vld [vmem:[%s17870_s3 + $0x60] sm:$0xff]  ;;  %v250_v8 = vld [vmem:[%s17870_s3 + $0x70] sm:$0xff]  ;;  %v9551_v10 = vld [vmem:[%s17871_s2 + $0x8] sm:$0xff]  ;;  %vm1766_vm8 = vcmask 588800   ;;  %s13063_s16 = smov 16   ;;  %vm9473_vm9 = vcmask 785408  }
   0x4   :  { %11680 = vmatprep.subr.bf16.mxu0 %v11679_v2  ;;  %v13129_v9 = vpack.c.bf16 %v248_v6, %v247_v5  ;;  %v13134_v11 = vpack.c.bf16 %v250_v8, %v249_v7  ;;  %v230_v12 = vld [vmem:[%s17872_s0] sm:$0xff]  ;;  %v231_v13 = vld [vmem:[%s17872_s0 + $0x8] sm:$0xff]  ;;  %v232_v14 = vld [vmem:[%s17872_s0 + $0x10] sm:$0xff] }
   0x5   :  { %11682 = vmatpush3.bf16.msra.mxu0 %v11679_v2  ;;  %v233_v15 = vld [vmem:[%s17872_s0 + $0x18] sm:$0xff]  ;;  %v234_v16 = vld [vmem:[%s17872_s0 + $0x20] sm:$0xff]  ;;  %v235_v17 = vld [vmem:[%s17872_s0 + $0x28] sm:$0xff] }
   0x6   :  { %10517 = vmatprep.subr.mxu0 %v31_v4  ;;  %v137_v18 = vld [vmem:[%s17870_s3 + $0x20] sm:$0xff]  ;;  %v138_v19 = vld [vmem:[%s17870_s3 + $0x28] sm:$0xff]  ;;  %v236_v20 = vld [vmem:[%s17872_s0 + $0x30] sm:$0xff] }
   0x7   :  { %v139_v21 = vld [vmem:[%s17870_s3 + $0x30] sm:$0xff]  ;;  %v11683_v22 = vpack.c.bf16 %v138_v19, %v137_v18  ;;  %v140_v23 = vld [vmem:[%s17870_s3 + $0x38] sm:$0xff]  ;;  %v141_v26 = vld [vmem:[%s17870_s3 + $0x40] sm:$0xff] }
   0x8   :  { %v11687_v24 = vpack.c.bf16 %v140_v23, %v139_v21  ;;  %v237_v25 = vld [vmem:[%s17872_s0 + $0x38] sm:$0xff]  ;;  %v142_v27 = vld [vmem:[%s17870_s3 + $0x48] sm:$0xff]  ;;  %v13210_v46 = vld [vmem:[%s17870_s3 + $0x80] sm:$0xff] }
   0x9   :  { %10518 = vmatpush3.msra.mxu0 %v31_v4  ;;  %11684 = vmatprep.subr.bf16.mxu1 %v11683_v22  ;;  %v11691_v28 = vpack.c.bf16 %v142_v27, %v141_v26  ;;  %v9552_v30 = vld [vmem:[%s17870_s3 + $0x18] ss:$0 sm:$0xff]  ;;  %v13204_v42 = vld [vmem:[%s17870_s3 + $0x88] sm:$0xff]  ;;  %v9558_v4 = vld [vmem:[%s17872_s0 + $0x40] sm:$0xff] }
   0xa   :  { %10520 = vmatmul.mubr.msk.f32.vlgmr.msra.gmra.mrb[0].mxu0 %vm37_vm0, %v9551_v10  ;;  %11696 = vmatprep.subr.bf16.mxu0 %v13129_v9  ;;  %v13199_v39 = vld [vmem:[%s17870_s3 + $0x78] ss:$0 sm:$0xff]  ;;  %v485_v5 = vld [vmem:[%s17870_s3 + $0xc0] sm:$0xff]  ;;  %v486_v6 = vld [vmem:[%s17870_s3 + $0xc8] sm:$0xff]  ;;  %v17878_v10 = vmov 0.0|0.0  }
   0xb   :  { %11698 = vmatpush3.bf16.msra.mxu0 %v13129_v9  ;;  %10545 = vmatprep.mubr.msk.f32.mxu0 %vm264_vm1, %v230_v12  ;;  %v9559_v7 = vld [vmem:[%s17872_s0 + $0x48] sm:$0xff]  ;;  %v11704_v8 = vpack.c.bf16 %v486_v6, %v485_v5  ;;  %v487_v12 = vld [vmem:[%s17870_s3 + $0xd0] sm:$0xff]  ;;  %v9565_v21 = vld [vmem:[%s17872_s0 + $0x78] sm:$0xff] }
   0xc   :  { %11700 = vmatprep.subr.bf16.mxu0 %v13134_v11  ;;  %11686 = vmatpush3.bf16.msra.mxu1 %v11683_v22  ;;  %v9563_v18 = vld [vmem:[%s17872_s0 + $0x68] sm:$0xff]  ;;  %v474_v22 = vld [vmem:[%s17873_s1] sm:$0x1]  ;;  %v9584_v23 = vld [vmem:[%s17873_s1 + $0x1] ss:$0 sm:$0xff]  ;;  %s13062_s1 = smov 48  }
   0xd   :  { %11688 = vmatprep.subr.bf16.mxu1 %v11687_v24  ;;  %vm13994_vm7 = vmpackc.low %vm1610_vm6, %vm1610_vm6 }
   0xf   :  { %11702 = vmatpush3.bf16.msra.mxu0 %v13134_v11 }
  0x10   :  { %11690 = vmatpush3.bf16.msra.mxu1 %v11687_v24  ;;  %v484_v24 = vsel %vm483_vm3, %v474_v22, %v9584_v23 }
  0x11   :  { %11692 = vmatprep.subr.bf16.mxu1 %v11691_v28 }
  0x12   :  { %10546 = vmatmul.mubr.msk.f32.vlgmr.msra.gmra.mrb[2].mxu0 %vm264_vm1, %v231_v13  ;;  %v9561_v13 = vld [vmem:[%s17872_s0 + $0x58] sm:$0xff] }
  0x13   :  { %10548 = vmatprep.mubr.msk.f32.mxu0 %vm264_vm1, %v232_v14 }
  0x14   :  { %11694 = vmatpush3.bf16.msra.mxu1 %v11691_v28  ;;  %v13308_v28 = vld [vmem:[%s17870_s3 + $0x90] sm:$0xff] }
  0x15   :  { %12140 = vmatprep.subr.bf16.mxu1 %v13129_v9 }
  0x16   :  { %10549 = vmatmul.mubr.msk.f32.gmra.mrb[4].mxu0 %vm264_vm1, %v233_v15  ;;  %v9562_v15 = vld [vmem:[%s17872_s0 + $0x60] sm:$0xff] }
  0x17   :  { %10551 = vmatprep.mubr.msk.f32.mxu0 %vm264_vm1, %v234_v16  ;;  %v489_v16 = vld [vmem:[%s17870_s3 + $0xe0] sm:$0xff] }
  0x1a   :  { %10552 = vmatmul.mubr.msk.f32.gmra.mrb[6].mxu0 %vm264_vm1, %v235_v17  ;;  %v490_v17 = vld [vmem:[%s17870_s3 + $0xe8] sm:$0xff] }
  0x1b   :  { %10554 = vmatprep.mubr.msk.f32.mxu0 %vm264_vm1, %v236_v20  ;;  %v11710_v19 = vpack.c.bf16 %v490_v17, %v489_v16  ;;  %v9564_v20 = vld [vmem:[%s17872_s0 + $0x70] sm:$0xff]  ;;  %v582_v17 = vld [vmem:[%s17870_s3 + $0x128] sm:$0xff] }
  0x1e   :  { %10555 = vmatmul.mubr.msk.f32.gmra.mrb[8].mxu0 %vm264_vm1, %v237_v25  ;;  %v13302_v25 = vld [vmem:[%s17870_s3 + $0x98] sm:$0xff] }
  0x1f   :  { %788 = vmatprep.mubr.f32.mxu0 %v17880_v29 }
  0xdd   :  { %v10521_v31 = vpop.f32.mrb[0].mxu0 }
  0xde   :  { %v116_v32 = vadd.f32 %v10521_v31, %v9552_v30  ;;  %v110_v33 = vpop.f32.mrb[1].mxu0 }
  0xdf   :  { %v111_v34 = vadd.f32 %v9552_v30, %v110_v33 }
  0xe0   :  { %v120_v35 = vmul.f32 %v116_v32, %v116_v32 }
  0xe1   :  { %v119_v36 = vmul.f32 %v111_v34, %v111_v34 }
  0xe2   :  { %v122_v37 = vmul.f32 %v120_v35, %v116_v32 }
  0xe3   :  { %v121_v38 = vmul.f32 %v119_v36, %v111_v34 }
  0xe4   :  { %v124_v40 = vmul.f32 0.044715, %v122_v37 }
  0xe5   :  { %v123_v41 = vmul.f32 0.044715, %v121_v38  ;;  %v10547_v43 = vpop.f32.mrb[2].mxu0 }
  0xe6   :  { %v126_v44 = vadd.f32 %v124_v40, %v116_v32  ;;  %v385_v45 = vadd.f32 %v10547_v43, %v13199_v39  ;;  %v379_v47 = vpop.f32.mrb[3].mxu0  ;;  %v13329_v40 = vld [vmem:[%s17870_s3 + $0xa8] sm:$0xff] }
  0xe7   :  { %v125_v48 = vadd.f32 %v123_v41, %v111_v34  ;;  %v380_v49 = vadd.f32 %v13199_v39, %v379_v47 }
  0xe8   :  { %v128_v50 = vmul.f32 0.7978846, %v126_v44  ;;  %v13214_v51 = vadd.f32 %v385_v45, %v13204_v42  ;;  %v13335_v44 = vld [vmem:[%s17870_s3 + $0xa0] sm:$0xff] }
  0xe9   :  { %v127_v52 = vmul.f32 0.7978846, %v125_v48  ;;  %v13217_v53 = vadd.f32 %v380_v49, %v13210_v46  ;;  %v10550_v26 = vpop.f32.mrb[4].mxu0 }
  0xea   :  { %17953 = vst [vmem:[#allocation2_spill] sm:$0xff] %v13214_v51  ;;  %12544 = vtanh.f32 %v128_v50  ;;  %v965_v54 = vsel %vm264_vm1, %v13214_v51, 0.0  ;;  %v1028_v55 = vmul.f32 %v13214_v51, %v13214_v51  ;;  %v395_v27 = vadd.f32 %v10550_v26, %v13199_v39  ;;  %v389_v30 = vpop.f32.mrb[5].mxu0 }
  0xeb   :  { %17954 = vst [vmem:[#allocation3_spill] sm:$0xff] %v13217_v53  ;;  %12546 = vtanh.f32 %v127_v52  ;;  %966 = vadd.xlane.f32.xlu0 %v965_v54  ;;  %v1027_v56 = vmul.f32 %v13217_v53, %v13217_v53  ;;  %v962_v58 = vsel %vm264_vm1, %v13217_v53, 0.0  ;;  %v390_v31 = vadd.f32 %v13199_v39, %v389_v30  ;;  %v13348_v52 = vld [vmem:[%s17870_s3 + $0xb8] sm:$0xff] }
  0xec   :  { %v1046_v57 = vsel %vm264_vm1, %v1028_v55, 0.0 }
  0xed   :  { %1047 = vadd.xlane.f32.xlu1 %v1046_v57  ;;  %v1043_v59 = vsel %vm264_vm1, %v1027_v56, 0.0  ;;  %v13315_v33 = vadd.f32 %v390_v31, %v13308_v28  ;;  %v10553_v41 = vpop.f32.mrb[6].mxu0 }
  0xee   :  { %v405_v43 = vadd.f32 %v10553_v41, %v13199_v39  ;;  %v399_v45 = vpop.f32.mrb[7].mxu0 }
  0xef   :  { %963 = vadd.xlane.f32.xlu0 %v962_v58  ;;  %17956 = vst [vmem:[#allocation5_spill] sm:$0xff] %v13315_v33  ;;  %v1029_v36 = vmul.f32 %v13315_v33, %v13315_v33  ;;  %v968_v38 = vsel %vm264_vm1, %v13315_v33, 0.0  ;;  %v400_v48 = vadd.f32 %v13199_v39, %v399_v45 }
  0xf0   :  { %v13340_v49 = vadd.f32 %v405_v43, %v13329_v40 }
  0xf1   :  { %1044 = vadd.xlane.f32.xlu1 %v1043_v59  ;;  %v1049_v47 = vsel %vm264_vm1, %v1029_v36, 0.0  ;;  %v13343_v50 = vadd.f32 %v400_v48, %v13335_v44  ;;  %v10556_v54 = vpop.f32.mrb[8].mxu0 }
  0xf2   :  { %17957 = vst [vmem:[#allocation6_spill] sm:$0xff] %v13340_v49  ;;  %v977_v55 = vsel %vm264_vm1, %v13340_v49, 0.0  ;;  %v415_v56 = vadd.f32 %v10556_v54, %v13199_v39  ;;  %v409_v57 = vpop.f32.mrb[9].mxu0  ;;  %v1032_v58 = vmul.f32 %v13340_v49, %v13340_v49  ;;  %v9585_v54 = vld [vmem:[%s17870_s3 + $0xf0] ss:$0 sm:$0xff] }
  0xf3   :  { %17958 = vst [vmem:[#allocation7_spill] sm:$0xff] %v13343_v50  ;;  %v1031_v59 = vmul.f32 %v13343_v50, %v13343_v50 }
  0xf4   :  { %v12545_v60 = vpop.eup %12544 }
  0xf5   :  { %v12547_v61 = vpop.eup %12546  ;;  %v132_v62 = vadd.f32 1.0, %v12545_v60  ;;  %v13358_v60 = vadd.f32 %v415_v56, %v13348_v52 }
  0xf6   :  { %v131_v63 = vadd.f32 1.0, %v12547_v61  ;;  %v410_v61 = vadd.f32 %v13199_v39, %v409_v57 }
  0xf7   :  { %v134_v0 = vmul.f32 0.5, %v132_v62  ;;  %17959 = vst [vmem:[#allocation8_spill] sm:$0xff] %v13358_v60  ;;  %v1058_v62 = vsel %vm264_vm1, %v1032_v58, 0.0 }
  0xf8   :  { %v133_v1 = vmul.f32 0.5, %v131_v63  ;;  %v974_v63 = vsel %vm264_vm1, %v13343_v50, 0.0 }
  0xf9   :  { %v136_v3 = vmul.f32 %v134_v0, %v116_v32  ;;  %v13312_v32 = vadd.f32 %v395_v27, %v13302_v25  ;;  %v13367_v0 = vld [vmem:[%s17870_s3 + $0xb0] sm:$0xff] }
  0xfa   :  { %v135_v2 = vmul.f32 %v133_v1, %v111_v34  ;;  %v1055_v1 = vsel %vm264_vm1, %v1031_v59, 0.0 }
  0xfb   :  { %17955 = vst [vmem:[#allocation4_spill] sm:$0xff] %v13312_v32  ;;  %v971_v34 = vsel %vm264_vm1, %v13312_v32, 0.0  ;;  %v1030_v35 = vmul.f32 %v13312_v32, %v13312_v32 }
  0xfc   :  { %10534 = vmatprep.mubr.msk.f32.mxu1 %vm148_vm2, %v135_v2  ;;  %972 = vadd.xlane.f32.xlu0 %v971_v34  ;;  %v13371_v2 = vadd.f32 %v410_v61, %v13367_v0 }
  0xfd   :  { %10535 = vmatmul.mubr.msk.f32.vlgmr.msra.gmra.mrb[0].mxu1 %vm148_vm2, %v136_v3  ;;  %v1052_v37 = vsel %vm264_vm1, %v1030_v35, 0.0  ;;  %v983_v3 = vsel %vm264_vm1, %v13358_v60, 0.0 }
  0xfe   :  { %12142 = vmatpush3.bf16.msra.mxu1 %v13129_v9  ;;  %10557 = vmatprep.mubr.msk.f32.mxu1 %vm264_vm1, %v9558_v4  ;;  %v9560_v9 = vld [vmem:[%s17872_s0 + $0x50] sm:$0xff]  ;;  %17960 = vst [vmem:[#allocation9_spill] sm:$0xff] %v13371_v2  ;;  %v1033_v4 = vmul.f32 %v13371_v2, %v13371_v2  ;;  %v980_v6 = vsel %vm264_vm1, %v13371_v2, 0.0  ;;  %s13060_s0 = smov 80  }
  0xff   :  { %12141 = vmatprep.subr.bf16.mxu1 %v13134_v11  ;;  %1053 = vadd.xlane.f32.xlu1 %v1052_v37 }
 0x100   :  { %969 = vadd.xlane.f32.xlu0 %v968_v38  ;;  %v1061_v5 = vsel %vm264_vm1, %v1033_v4, 0.0 }
 0x102   :  { %12143 = vmatpush3.bf16.msra.mxu1 %v13134_v11  ;;  %v488_v11 = vld [vmem:[%s17870_s3 + $0xd8] sm:$0xff] }
 0x103   :  { %11703 = vmatprep.subr.bf16.mxu1 %v17878_v10  ;;  %v11707_v14 = vpack.c.bf16 %v488_v11, %v487_v12  ;;  %1050 = vadd.xlane.f32.xlu1 %v1049_v47  ;;  %v578_v12 = vld [vmem:[%s17870_s3 + $0x108] sm:$0xff]  ;;  %v579_v11 = vld [vmem:[%s17870_s3 + $0x110] sm:$0xff] }
 0x104   :  { %978 = vadd.xlane.f32.xlu0 %v977_v55 }
 0x105   :  { %10558 = vmatmul.mubr.msk.f32.vlgmr.msra.gmra.mrb[2].mxu1 %vm264_vm1, %v9559_v7  ;;  %v576_v7 = vld [vmem:[%s17870_s3 + $0xf8] sm:$0xff] }
 0x106   :  { %10560 = vmatprep.mubr.msk.f32.mxu1 %vm264_vm1, %v9560_v9  ;;  %11705 = vmatpush3.bf16.msra.mxu1 %v11704_v8  ;;  %v577_v8 = vld [vmem:[%s17870_s3 + $0x100] sm:$0xff] }
 0x107   :  { %11706 = vmatprep.subr.bf16.mxu1 %v17878_v10  ;;  %1059 = vadd.xlane.f32.xlu1 %v1058_v62  ;;  %v11713_v9 = vpack.c.bf16 %v577_v8, %v576_v7  ;;  %v673_v7 = vld [vmem:[%s17874_s5 + $0x18] sm:$0xff] }
 0x108   :  { %975 = vadd.xlane.f32.xlu0 %v974_v63 }
 0x109   :  { %10561 = vmatmul.mubr.msk.f32.gmra.mrb[4].mxu1 %vm264_vm1, %v9561_v13  ;;  %v11716_v13 = vpack.c.bf16 %v579_v11, %v578_v12  ;;  %v672_v12 = vld [vmem:[%s17874_s5 + $0x10] sm:$0xff]  ;;  %v678_v11 = vld [vmem:[%s17874_s5 + $0x40] sm:$0xff] }
 0x10a   :  { %10563 = vmatprep.mubr.msk.f32.mxu1 %vm264_vm1, %v9562_v15  ;;  %11708 = vmatpush3.bf16.msra.mxu1 %v11707_v14  ;;  %v580_v14 = vld [vmem:[%s17870_s3 + $0x118] sm:$0xff]  ;;  %v581_v15 = vld [vmem:[%s17870_s3 + $0x120] sm:$0xff] }
 0x10b   :  { %11709 = vmatprep.subr.bf16.mxu1 %v17878_v10  ;;  %1056 = vadd.xlane.f32.xlu1 %v1055_v1  ;;  %v11719_v16 = vpack.c.bf16 %v581_v15, %v580_v14  ;;  %v671_v1 = vld [vmem:[%s17874_s5 + $0x8] sm:$0xff]  ;;  %v11734_v14 = vpack.c.bf16 %v678_v11, %v672_v12  ;;  %v692_v12 = vld [vmem:[%s17874_s5 + $0xb0] sm:$0xff] }
 0x10c   :  { %984 = vadd.xlane.f32.xlu0 %v983_v3  ;;  %v677_v3 = vld [vmem:[%s17874_s5 + $0x38] sm:$0xff]  ;;  %v683_v15 = vld [vmem:[%s17874_s5 + $0x68] sm:$0xff] }
 0x10d   :  { %10564 = vmatmul.mubr.msk.f32.gmra.mrb[6].mxu1 %vm264_vm1, %v9563_v18  ;;  %v583_v18 = vld [vmem:[%s17870_s3 + $0x130] sm:$0xff]  ;;  %v11724_v4 = vpack.c.bf16 %v677_v3, %v671_v1  ;;  %v687_v3 = vld [vmem:[%s17874_s5 + $0x88] sm:$0xff] }
 0x10e   :  { %10566 = vmatprep.mubr.msk.f32.mxu1 %vm264_vm1, %v9564_v20  ;;  %11711 = vmatpush3.bf16.msra.mxu1 %v11710_v19  ;;  %v11722_v19 = vpack.c.bf16 %v583_v18, %v582_v17  ;;  %v9555_v20 = vld [vmem:[%s17870_s3 + $0x50] ss:$0 sm:$0xff]  ;;  %v682_v18 = vld [vmem:[%s17874_s5 + $0x60] sm:$0xff] }
 0x10f   :  { %11712 = vmatprep.subr.bf16.mxu1 %v17878_v10  ;;  %1062 = vadd.xlane.f32.xlu1 %v1061_v5  ;;  %v670_v5 = vld [vmem:[%s17874_s5] sm:$0xff]  ;;  %v680_v1 = vld [vmem:[%s17874_s5 + $0x50] sm:$0xff] }
 0x110   :  { %981 = vadd.xlane.f32.xlu0 %v980_v6  ;;  %v676_v6 = vld [vmem:[%s17874_s5 + $0x30] sm:$0xff]  ;;  %11725 = vmatprep.subr.bf16.mxu0 %v11724_v4  ;;  %v693_v4 = vld [vmem:[%s17874_s5 + $0xb8] sm:$0xff] }
 0x111   :  { %10567 = vmatmul.mubr.msk.f32.gmra.mrb[8].mxu1 %vm264_vm1, %v9565_v21  ;;  %v11726_v8 = vpack.c.bf16 %v676_v6, %v670_v5 }
 0x112   :  { %10581 = vmatprep.mubr.msk.f32.mxu1 %vm13056_vm4, %v17880_v29 }
 0x113   :  { %11727 = vmatpush1.bf16.msra.mxu0 %v11726_v8  ;;  %v11744_v8 = vpack.c.bf16 %v693_v4, %v687_v3 }
 0x115   :  { %10582 = vmatmul.mubr.msk.f32.vlgmr.msra.gmra.mrb[10].mxu1 %vm148_vm2, %v484_v24 }
 0x116   :  { %10600 = vmatprep.mubr.msk.f32.mxu1 %vm13056_vm4, %v17880_v29  ;;  %11714 = vmatpush3.bf16.msra.mxu1 %v11713_v9  ;;  %v679_v9 = vld [vmem:[%s17874_s5 + $0x48] sm:$0xff] }
 0x117   :  { %11715 = vmatprep.subr.bf16.mxu1 %v17878_v10 }
 0x11a   :  { %11717 = vmatpush3.bf16.msra.mxu1 %v11716_v13  ;;  %v11732_v13 = vpack.c.bf16 %v679_v9, %v673_v7  ;;  %v686_v9 = vld [vmem:[%s17874_s5 + $0x80] sm:$0xff] }
 0x11b   :  { %11718 = vmatprep.subr.bf16.mxu1 %v17878_v10  ;;  %v11746_v11 = vpack.c.bf16 %v692_v12, %v686_v9 }
 0x11e   :  { %11720 = vmatpush3.bf16.msra.mxu1 %v11719_v16  ;;  %v689_v16 = vld [vmem:[%s17874_s5 + $0x98] sm:$0xff] }
 0x11f   :  { %11721 = vmatprep.subr.bf16.mxu1 %v17878_v10  ;;  %v11728_v17 = vpack.c.bf16 %v689_v16, %v683_v15  ;;  %v1297_v15 = vld [vmem:[%s17875_s4] sm:$0xff] }
 0x121   :  { %11729 = vmatprep.subr.bf16.mxu0 %v11728_v17  ;;  %v1299_v17 = vld [vmem:[%s17875_s4 + $0x10] sm:$0xff] }
 0x122   :  { %11723 = vmatpush3.bf16.msra.mxu1 %v11722_v19  ;;  %v688_v19 = vld [vmem:[%s17874_s5 + $0x90] sm:$0xff] }
 0x123   :  { %11733 = vmatprep.subr.bf16.mxu1 %v11732_v13  ;;  %v1298_v13 = vld [vmem:[%s17875_s4 + $0x8] sm:$0xff] }
 0x1d0   :  { %v10536_v21 = vpop.f32.mrb[0].mxu1 }
 0x1d1   :  { %v13410_v22 = vadd.f32 %v10536_v21, %v9555_v20  ;;  %v221_v23 = vpop.f32.mrb[1].mxu1  ;;  %v11730_v21 = vpack.c.bf16 %v688_v19, %v682_v18  ;;  %v11750_v18 = vpack.c.bf16 %v1299_v17, %v1297_v15  ;;  %v696_v19 = vlaneseq }
 0x1d2   :  { %v13412_v24 = vadd.f32 %v9555_v20, %v221_v23  ;;  %v685_v20 = vld [vmem:[%s17874_s5 + $0x78] sm:$0xff]  ;;  %v691_v23 = vld [vmem:[%s17874_s5 + $0xa8] sm:$0xff] }
 0x1d3   :  { %17961 = vst [vmem:[#allocation10_spill] sm:$0xff] %v13410_v22  ;;  %v1248_v26 = vsel %vm264_vm1, %v13410_v22, 0.0  ;;  %v1254_v27 = vmul.f32 %v13410_v22, %v13410_v22  ;;  %11731 = vmatpush1.bf16.msra.mxu0 %v11730_v21 }
 0x1d4   :  { %17962 = vst [vmem:[#allocation11_spill] sm:$0xff] %v13412_v24  ;;  %1249 = vadd.xlane.f32.xlu1 %v1248_v26  ;;  %v1245_v30 = vsel %vm264_vm1, %v13412_v24, 0.0  ;;  %v1253_v31 = vmul.f32 %v13412_v24, %v13412_v24  ;;  %v684_v26 = vld [vmem:[%s17874_s5 + $0x70] sm:$0xff] }
 0x1d5   :  { %1246 = vadd.xlane.f32.xlu0 %v1245_v30  ;;  %v1258_v34 = vsel %vm264_vm1, %v1254_v27, 0.0  ;;  %v690_v27 = vld [vmem:[%s17874_s5 + $0xa0] sm:$0xff]  ;;  %v11736_v30 = vpack.c.bf16 %v691_v23, %v685_v20  ;;  %v13540_v20 = vshrl.u32 %v696_v19, 7  ;;  %v1302_v23 = vld [vmem:[%s17875_s4 + $0x28] sm:$0xff] }
 0x1d6   :  { %v1255_v36 = vsel %vm264_vm1, %v1253_v31, 0.0  ;;  %v11738_v31 = vpack.c.bf16 %v690_v27, %v684_v26  ;;  %v1304_v26 = vld [vmem:[%s17875_s4 + $0x38] sm:$0xff]  ;;  %v694_v27 = vld [vmem:[%s17876_s6] sm:$0x3f] }
 0x1d7   :  { %17963 = vst [vmem:[#allocation12_spill] sm:$0xff] %v13540_v20  ;;  %v13543_v21 = vsub.s32 1, %v13540_v20 }
 0x1d8   :  { %v13423_v35 = vpop.f32.mrb[2].mxu1  ;;  %1259 = vadd.xlane.f32.xlu1 %v1258_v34  ;;  %v675_v34 = vld [vmem:[%s17874_s5 + $0x28] sm:$0xff] }
 0x1d9   :  { %v13426_v37 = vpop.f32.mrb[3].mxu1  ;;  %1256 = vadd.xlane.f32.xlu0 %v1255_v36  ;;  %v681_v36 = vld [vmem:[%s17874_s5 + $0x58] sm:$0xff]  ;;  %17964 = vst [vmem:[#allocation13_spill] sm:$0xff] %v13543_v21 }
 0x1da   :  { %v420_v12 = vadd.f32 %v13199_v39, %v13426_v37 }
 0x1dc   :  { %v13428_v38 = vpop.f32.mrb[4].mxu1 }
 0x1dd   :  { %v13430_v41 = vpop.f32.mrb[5].mxu1 }
 0x1de   :  { %v430_v37 = vadd.f32 %v13199_v39, %v13430_v41  ;;  %v1034_v41 = vmul.f32 %v13358_v60, %v13358_v60 }
 0x1e0   :  { %v13432_v43 = vpop.f32.mrb[6].mxu1  ;;  %v13624_v19 = vadd.f32 %v430_v37, %v13308_v28 }
 0x1e1   :  { %v13434_v45 = vpop.f32.mrb[7].mxu1 }
 0x1e2   :  { %17976 = vst [vmem:[#allocation25_spill] sm:$0xff] %v13624_v19  ;;  %v1037_v28 = vmul.f32 %v13624_v19, %v13624_v19 }
 0x1e4   :  { %v13436_v47 = vpop.f32.mrb[8].mxu1 }
 0x1e5   :  { %v13438_v48 = vpop.f32.mrb[9].mxu1 }
 0x1e8   :  { %v565_v55 = vpop.f32.mrb[10].mxu1 }
 0x1e9   :  { %v566_v56 = vadd.f32 %v9585_v54, %v565_v55  ;;  %v10583_v57 = vpop.f32.mrb[11].mxu1  ;;  %v11740_v54 = vpack.c.bf16 %v681_v36, %v675_v34  ;;  %v9588_v55 = vld [vmem:[%s17870_s3 + $0x138] ss:$0 sm:$0xff]  ;;  %v1303_v34 = vld [vmem:[%s17875_s4 + $0x30] sm:$0xff]  ;;  %v13561_v36 = vsub.s32 0, %v13540_v20 }
 0x1eb   :  { %v9587_v58 = vmul.f32 -1.442695, %v566_v56  ;;  %11741 = vmatprep.subr.bf16.mxu0 %v11740_v54  ;;  %17965 = vst [vmem:[#allocation14_spill] sm:$0xff] %v13561_v36 }
 0x1ed   :  { %12548 = vpow2.f32 %v9587_v58 }
 0x1f7   :  { %v12549_v59 = vpop.eup %12548 }
 0x1f8   :  { %v572_v61 = vadd.f32 1.0, %v12549_v59 }
 0x1fa   :  { %12550 = vrcp.f32 %v572_v61 }
 0x204   :  { %v12551_v62 = vpop.eup %12550 }
 0x205   :  { %v575_v63 = vmul.f32 %v12551_v62, %v566_v56 }
 0x207   :  { %10601 = vmatmul.mubr.msk.f32.vlgmr.msra.gmra.mrb[12].mxu1 %vm589_vm5, %v575_v63  ;;  %v674_v63 = vld [vmem:[%s17874_s5 + $0x20] sm:$0xff] }
 0x208   :  { %859 = vmatprep.mubr.f32.mxu1 %v17880_v29  ;;  %11735 = vmatpush1.bf16.msra.mxu1 %v11734_v14  ;;  %v11742_v6 = vpack.c.bf16 %v680_v1, %v674_v63  ;;  %v1300_v14 = vld [vmem:[%s17875_s4 + $0x18] sm:$0xff] }
 0x209   :  { %11737 = vmatprep.subr.bf16.mxu1 %v11736_v30  ;;  %v11748_v16 = vpack.c.bf16 %v1300_v14, %v1298_v13  ;;  %v11752_v30 = vpack.c.bf16 %v1304_v26, %v1302_v23  ;;  %v425_v13 = vadd.f32 %v13423_v35, %v13199_v39  ;;  %v435_v35 = vadd.f32 %v13428_v38, %v13199_v39 }
 0x20b   :  { %v13614_v17 = vadd.f32 %v425_v13, %v13204_v42  ;;  %v13633_v26 = vadd.f32 %v435_v35, %v13302_v25  ;;  %v1073_v25 = vsel %vm264_vm1, %v1037_v28, 0.0 }
 0x20c   :  { %11739 = vmatpush1.bf16.msra.mxu1 %v11738_v31  ;;  %v1301_v31 = vld [vmem:[%s17875_s4 + $0x20] sm:$0xff] }
 0x20d   :  { %11749 = vmatprep.subr.bf16.mxu1 %v11748_v16  ;;  %v11754_v54 = vpack.c.bf16 %v1303_v34, %v1301_v31  ;;  %v13611_v16 = vpop.xlane.xlu0 %966  ;;  %17975 = vst [vmem:[#allocation24_spill] sm:$0xff] %v13614_v17  ;;  %v989_v23 = vsel %vm264_vm1, %v13614_v17, 0.0  ;;  %v1036_v42 = vmul.f32 %v13614_v17, %v13614_v17  ;;  %17977 = vst [vmem:[#allocation26_spill] sm:$0xff] %v13633_v26  ;;  %v1064_v31 = vsel %vm264_vm1, %v1034_v41, 0.0 }
 0x20e   :  { %v445_v34 = vadd.f32 %v13432_v43, %v13199_v39 }
 0x20f   :  { %v1070_v38 = vsel %vm264_vm1, %v1036_v42, 0.0 }
 0x2da   :  { %v659_v56 = vpop.f32.mrb[12].mxu1 }
 0x2db   :  { %v660_v57 = vadd.f32 %v9588_v55, %v659_v56  ;;  %v10602_v58 = vpop.f32.mrb[13].mxu1  ;;  %v703_v55 = vrot.slane %v694_v27, %v13543_v21  ;;  %v699_v56 = vrot.slane %v694_v27, %v13561_v36  ;;  %v440_v27 = vadd.f32 %v13199_v39, %v13434_v45 }
 0x2dc   :  { %v1038_v45 = vmul.f32 %v13633_v26, %v13633_v26 }
 0x2dd   :  { %v9590_v59 = vmul.f32 -1.442695, %v660_v57 }
 0x2de   :  { %v1076_v43 = vsel %vm264_vm1, %v1038_v45, 0.0 }
 0x2df   :  { %12552 = vpow2.f32 %v9590_v59 }
 0x2e9   :  { %v12553_v61 = vpop.eup %12552 }
 0x2ea   :  { %v666_v62 = vadd.f32 1.0, %v12553_v61 }
 0x2ec   :  { %12554 = vrcp.f32 %v666_v62 }
 0x2f6   :  { %v12555_v5 = vpop.eup %12554 }
 0x2f7   :  { %v669_v7 = vmul.f32 %v12555_v5, %v660_v57 }
 0x2f9   :  { %9591 = vmatmul.mubr.msk.f32.vlgmr.msra.gmra.mrb[10].mxu0 %vm264_vm1, %v669_v7  ;;  %9592 = vmatmul.mubr.msk.f32.vlgmr.msra.gmra.mrb[14].mxu1 %vm264_vm1, %v669_v7 }
 0x2fa   :  { %11743 = vmatpush1.bf16.msra.mxu0 %v11742_v6  ;;  %930 = vmatprep.mubr.f32.mxu0 %v17880_v29 }
 0x2fb   :  { %11745 = vmatprep.subr.bf16.mxu0 %v11744_v8  ;;  %1436 = vmatprep.mubr.f32.mxu1 %v17880_v29 }
 0x2fc   :  { %11751 = vmatpush1.bf16.msra.mxu1 %v11750_v18  ;;  %v13619_v18 = vpop.xlane.xlu0 %963 }
 0x2fd   :  { %11753 = vmatprep.subr.bf16.mxu1 %v11752_v30 }
 0x2fe   :  { %11747 = vmatpush1.bf16.msra.mxu0 %v11746_v11  ;;  %v13603_v11 = vadd.f32 %v420_v12, %v13210_v46 }
 0x2ff   :  { %11756 = vmatprep.subr.bf16.mxu0 %v17878_v10 }
 0x300   :  { %11755 = vmatpush1.bf16.msra.mxu1 %v11754_v54  ;;  %17974 = vst [vmem:[#allocation23_spill] sm:$0xff] %v13603_v11  ;;  %v986_v14 = vsel %vm264_vm1, %v13603_v11, 0.0  ;;  %v1035_v15 = vmul.f32 %v13603_v11, %v13603_v11  ;;  %v13640_v30 = vpop.xlane.xlu0 %972  ;;  %v13646_v54 = vadd.f32 %v440_v27, %v13335_v44  ;;  %v450_v44 = vadd.f32 %v13199_v39, %v13438_v48 }
 0x301   :  { %9593 = vmatmul.mubr.msk.f32.vlgmr.msra.gmra.mrb[12].mxu0 %vm264_vm1, %v669_v7  ;;  %11784 = vmatprep.subr.bf16.mxu1 %v17878_v10 }
 0x302   :  { %10621 = vmatprep.mubr.msk.f32.mxu0 %vm13056_vm4, %v17880_v29  ;;  %v1067_v46 = vsel %vm264_vm1, %v1035_v15, 0.0  ;;  %17978 = vst [vmem:[#allocation27_spill] sm:$0xff] %v13646_v54  ;;  %v13668_v12 = vadd.f32 %v450_v44, %v13367_v0 }
 0x304   :  { %17980 = vst [vmem:[#allocation29_spill] sm:$0xff] %v13668_v12  ;;  %v1041_v37 = vmul.f32 %v13668_v12, %v13668_v12 }
 0x306   :  { %v1085_v42 = vsel %vm264_vm1, %v1041_v37, 0.0 }
 0x3cc   :  { %v790_v57 = vpop.f32.mrb[10].mxu0  ;;  %v13566_v58 = vpop.f32.mrb[14].mxu1 }
 0x3cd   :  { %17966 = vst [vmem:[#allocation15_spill] sm:$0xff] %v13566_v58  ;;  %v792_v59 = vpop.f32.mrb[11].mxu0  ;;  %v13568_v61 = vpop.f32.mrb[15].mxu1  ;;  %v13570_v63 = vadd.f32 %v790_v57, %v699_v56  ;;  %v992_v57 = vsel %vm264_vm1, %v13624_v19, 0.0 }
 0x3ce   :  { %17967 = vst [vmem:[#allocation16_spill] sm:$0xff] %v13568_v61  ;;  %v793_v62 = vadd.f32 %v792_v59, %v703_v55  ;;  %v13651_v55 = vpop.xlane.xlu1 %1047  ;;  %v13653_v56 = vpop.xlane.xlu0 %969  ;;  %v13658_v59 = vadd.f32 %v445_v34, %v13329_v40 }
 0x3cf   :  { %v13582_v4 = vrot.slane %v13570_v63, %v13561_v36 }
 0x3d0   :  { %v13573_v1 = vrot.slane %v793_v62, %v13561_v36  ;;  %v13585_v5 = vrot.slane %v793_v62, %v13543_v21  ;;  %17979 = vst [vmem:[#allocation28_spill] sm:$0xff] %v13658_v59  ;;  %v1039_v62 = vmul.f32 %v13646_v54, %v13646_v54  ;;  %v1040_v48 = vmul.f32 %v13658_v59, %v13658_v59 }
 0x3d1   :  { %17970 = vst [vmem:[#allocation19_spill] sm:$0xff] %v13582_v4  ;;  %v1203_v8 = vadd.f32 1.0, %v13582_v4 }
 0x3d2   :  { %17968 = vst [vmem:[#allocation17_spill] sm:$0xff] %v13573_v1  ;;  %1289 = vrot.lane.b32.xlu1 %v13573_v1, %s13057_s10  ;;  %v13578_v3 = vadd.f32 1.0, %v13573_v1  ;;  %17971 = vst [vmem:[#allocation20_spill] sm:$0xff] %v13585_v5  ;;  %v13596_v9 = vadd.f32 1.0, %v13585_v5  ;;  %v1079_v40 = vsel %vm264_vm1, %v1039_v62, 0.0  ;;  %v13673_v13 = vpop.xlane.xlu0 %978  ;;  %v1082_v15 = vsel %vm264_vm1, %v1040_v48, 0.0 }
 0x3d4   :  { %17969 = vst [vmem:[#allocation18_spill] sm:$0xff] %v13578_v3  ;;  %v13587_v6 = vpop.f32.mrb[12].mxu0  ;;  %1279 = vrot.lane.b32.xlu0 %v13578_v3, %s13058_s11  ;;  %17973 = vst [vmem:[#allocation22_spill] sm:$0xff] %v13596_v9 }
 0x3d5   :  { %17972 = vst [vmem:[#allocation21_spill] sm:$0xff] %v13587_v6  ;;  %v934_v7 = vpop.f32.mrb[13].mxu0 }
 0x3d6   :  { %1291 = vrot.lane.b32.xlu1 %v13585_v5, %s13057_s10  ;;  %v1045_v7 = vpop.xlane.xlu1 %1044  ;;  %v976_v35 = vpop.xlane.xlu0 %975 }
 0x3da   :  { %1207 = vrot.lane.b32.xlu1 %v1203_v8, %s13059_s12  ;;  %v995_v8 = vsel %vm264_vm1, %v13633_v26, 0.0  ;;  %v1054_v0 = vpop.xlane.xlu1 %1053  ;;  %v13690_v28 = vpop.xlane.xlu0 %984 }
 0x3de   :  { %1281 = vrot.lane.b32.xlu1 %v13596_v9, %s13058_s11  ;;  %v1051_v27 = vpop.xlane.xlu1 %1050  ;;  %v13696_v34 = vpop.xlane.xlu0 %981 }
 0x3e2   :  { %v1247_v45 = vpop.xlane.xlu0 %1246 }
 0x3e6   :  { %v1257_v62 = vpop.xlane.xlu0 %1256 }
 0x3f3   :  { %987 = vadd.xlane.f32.xlu0 %v986_v14  ;;  %v998_v14 = vsel %vm264_vm1, %v13646_v54, 0.0 }
 0x3f7   :  { %1068 = vadd.xlane.f32.xlu0 %v1067_v46  ;;  %v455_v46 = vadd.f32 %v13436_v47, %v13199_v39 }
 0x3f9   :  { %v13686_v41 = vadd.f32 %v455_v46, %v13348_v52  ;;  %v13708_v46 = vmul.f32 0.03125, %v13619_v18 }
 0x3fb   :  { %990 = vadd.xlane.f32.xlu0 %v989_v23  ;;  %v1001_v23 = vsel %vm264_vm1, %v13658_v59, 0.0  ;;  %17981 = vst [vmem:[#allocation30_spill] sm:$0xff] %v13686_v41  ;;  %v1007_v39 = vsel %vm264_vm1, %v13686_v41, 0.0  ;;  %v1042_v47 = vmul.f32 %v13686_v41, %v13686_v41 }
 0x3fd   :  { %v1088_v52 = vsel %vm264_vm1, %v1042_v47, 0.0  ;;  %v1091_v47 = vmul.f32 0.03125, %v1045_v7 }
 0x3ff   :  { %1071 = vadd.xlane.f32.xlu0 %v1070_v38  ;;  %v1004_v38 = vsel %vm264_vm1, %v13668_v12, 0.0 }
 0x402   :  { %1065 = vadd.xlane.f32.xlu1 %v1064_v31  ;;  %v1060_v31 = vpop.xlane.xlu1 %1059 }
 0x403   :  { %1074 = vadd.xlane.f32.xlu0 %v1073_v25 }
 0x406   :  { %993 = vadd.xlane.f32.xlu1 %v992_v57  ;;  %v1057_v25 = vpop.xlane.xlu1 %1056  ;;  %v13701_v57 = vrot.slane %v13570_v63, %v13543_v21 }
 0x407   :  { %1077 = vadd.xlane.f32.xlu0 %v1076_v43  ;;  %v1095_v10 = vmul.f32 0.03125, %v1057_v25  ;;  %v1139_v25 = vsub.f32 %v13217_v53, %v13708_v46 }
 0x408   :  { %17982 = vst [vmem:[#allocation31_spill] sm:$0xff] %v13701_v57  ;;  %v1204_v43 = vadd.f32 1.0, %v13701_v57 }
 0x40a   :  { %996 = vadd.xlane.f32.xlu1 %v995_v8  ;;  %v13703_v44 = vpop.xlane.xlu1 %1062  ;;  %v1251_v8 = vmul.f32 0.03125, %v1247_v45 }
 0x40b   :  { %1080 = vadd.xlane.f32.xlu0 %v1079_v40  ;;  %v1261_v40 = vmul.f32 0.03125, %v1257_v62  ;;  %v1092_v62 = vmul.f32 0.03125, %v13651_v55  ;;  %v1094_v55 = vmul.f32 0.03125, %v1054_v0 }
 0x40e   :  { %999 = vadd.xlane.f32.xlu1 %v998_v14  ;;  %v1250_v48 = vpop.xlane.xlu1 %1249  ;;  %v1263_v14 = vmul.f32 %v1251_v8, %v1251_v8 }
 0x40f   :  { %1083 = vadd.xlane.f32.xlu0 %v1082_v15 }
 0x410   :  { %v1265_v15 = vsub.f32 %v1261_v40, %v1263_v14  ;;  %v13719_v40 = vmul.f32 0.03125, %v13653_v56 }
 0x412   :  { %1002 = vadd.xlane.f32.xlu1 %v1001_v23  ;;  %v1260_v37 = vpop.xlane.xlu1 %1259  ;;  %v1252_v23 = vmul.f32 0.03125, %v1250_v48  ;;  %v1109_v7 = vmul.f32 %v13719_v40, %v13719_v40 }
 0x413   :  { %1086 = vadd.xlane.f32.xlu0 %v1085_v42  ;;  %v1269_v42 = vadd.f32 1e-06, %v1265_v15  ;;  %v1262_v63 = vmul.f32 0.03125, %v1260_v37  ;;  %v1093_v37 = vmul.f32 0.03125, %v1051_v27 }
 0x415   :  { %12556 = vrsqrt.f32 %v1269_v42 }
 0x416   :  { %1005 = vadd.xlane.f32.xlu1 %v1004_v38  ;;  %v13711_v38 = vmul.f32 0.03125, %v13611_v16  ;;  %v13722_v16 = vmul.f32 0.03125, %v13640_v30 }
 0x41a   :  { %1008 = vadd.xlane.f32.xlu1 %v1007_v39  ;;  %v1107_v39 = vmul.f32 %v13708_v46, %v13708_v46 }
 0x41c   :  { %v1123_v18 = vsub.f32 %v1091_v47, %v1107_v39  ;;  %v1267_v39 = vsub.f32 %v13412_v24, %v1251_v8  ;;  %v1125_v47 = vsub.f32 %v1093_v37, %v1109_v7  ;;  %v1096_v37 = vmul.f32 0.03125, %v1060_v31 }
 0x41e   :  { %1089 = vadd.xlane.f32.xlu1 %v1088_v52  ;;  %v1264_v52 = vmul.f32 %v1252_v23, %v1252_v23  ;;  %v1155_v15 = vadd.f32 1e-06, %v1123_v18  ;;  %v13732_v18 = vmul.f32 0.03125, %v13673_v13 }
 0x41f   :  { %v12557_v42 = vpop.eup %12556 }
 0x420   :  { %v1266_v45 = vsub.f32 %v1262_v63, %v1264_v52  ;;  %v1110_v63 = vmul.f32 %v13722_v16, %v13722_v16  ;;  %v13729_v52 = vmul.f32 0.03125, %v976_v35  ;;  %v1112_v35 = vmul.f32 %v13732_v18, %v13732_v18 }
 0x422   :  { %v1270_v48 = vadd.f32 1e-06, %v1266_v45  ;;  %v1273_v45 = vmul.f32 %v12557_v42, %v1267_v39  ;;  %v1111_v0 = vmul.f32 %v13729_v52, %v13729_v52  ;;  %v1017_v42 = vmul.f32 0.03125, %v13696_v34 }
 0x423   :  { %v1140_v34 = vsub.f32 %v13214_v51, %v13711_v38 }
 0x424   :  { %12558 = vrsqrt.f32 %v1270_v48  ;;  %v1157_v48 = vadd.f32 1e-06, %v1125_v47  ;;  %v1127_v13 = vsub.f32 %v1095_v10, %v1111_v0  ;;  %v1128_v47 = vsub.f32 %v1096_v37, %v1112_v35 }
 0x425   :  { %12560 = vrsqrt.f32 %v1155_v15  ;;  %v1113_v31 = vmul.f32 %v1017_v42, %v1017_v42  ;;  %v1142_v37 = vsub.f32 %v13312_v32, %v13722_v16 }
 0x426   :  { %v1160_v0 = vadd.f32 1e-06, %v1128_v47 }
 0x429   :  { %1209 = vrot.lane.b32.xlu0 %v1204_v43, %s13059_s12  ;;  %v1108_v43 = vmul.f32 %v13711_v38, %v13711_v38 }
 0x42b   :  { %v1124_v14 = vsub.f32 %v1092_v62, %v1108_v43  ;;  %v1126_v62 = vsub.f32 %v1094_v55, %v1110_v63  ;;  %v1268_v55 = vsub.f32 %v13410_v22, %v1252_v23 }
 0x42d   :  { %v1156_v56 = vadd.f32 1e-06, %v1124_v14  ;;  %v1158_v15 = vadd.f32 1e-06, %v1126_v62 }
 0x42e   :  { %v12559_v7 = vpop.eup %12558 }
 0x42f   :  { %12562 = vrsqrt.f32 %v1156_v56  ;;  %v12561_v39 = vpop.eup %12560  ;;  %v1274_v56 = vmul.f32 %v12559_v7, %v1268_v55  ;;  %v1143_v55 = vsub.f32 %v13343_v50, %v13729_v52 }
 0x430   :  { %12564 = vrsqrt.f32 %v1157_v48  ;;  %v1187_v62 = vmul.f32 %v12561_v39, %v1139_v25 }
 0x431   :  { %12566 = vrsqrt.f32 %v1158_v15 }
 0x444   :  { %v1290_v30 = vpop.permute.xlu1 %1289 }
 0x446   :  { %v1280_v43 = vpop.permute.xlu0 %1279 }
 0x447   :  { %v1285_v27 = vmul.f32 %v1280_v43, %v1273_v45  ;;  %v1097_v45 = vmul.f32 0.03125, %v13703_v44 }
 0x448   :  { %v1292_v8 = vpop.permute.xlu1 %1291 }
 0x449   :  { %v1295_v14 = vadd.f32 %v1290_v30, %v1285_v27  ;;  %v1159_v30 = vadd.f32 1e-06, %v1127_v13  ;;  %v12563_v27 = vpop.eup %12562  ;;  %v1129_v23 = vsub.f32 %v1097_v45, %v1113_v31 }
 0x44a   :  { %v1188_v44 = vmul.f32 %v12563_v27, %v1140_v34  ;;  %v12565_v15 = vpop.eup %12564  ;;  %v1145_v34 = vsub.f32 %v13371_v2, %v1017_v42 }
 0x44b   :  { %9595 = vmatmul.mubr.msk.f32.vlgmr.msra.gmra.mrb[16].mxu1 %vm264_vm1, %v1295_v14  ;;  %12568 = vrsqrt.f32 %v1159_v30  ;;  %v1141_v14 = vsub.f32 %v13315_v33, %v13719_v40  ;;  %v12567_v7 = vpop.eup %12566  ;;  %v1144_v30 = vsub.f32 %v13340_v49, %v13732_v18 }
 0x44c   :  { %v13740_v63 = vpop.permute.xlu1 %1207  ;;  %1441 = vmatprep.mubr.f32.mxu1 %v17880_v29  ;;  %12570 = vrsqrt.f32 %v1160_v0  ;;  %v1190_v39 = vmul.f32 %v12567_v7, %v1142_v37 }
 0x44d   :  { %v1213_v46 = vmul.f32 %v13740_v63, %v1187_v62  ;;  %v1214_v35 = vmul.f32 %v13740_v63, %v1188_v44  ;;  %v1189_v13 = vmul.f32 %v12565_v15, %v1141_v14 }
 0x44e   :  { %v1216_v47 = vmul.f32 %v13740_v63, %v1190_v39 }
 0x44f   :  { %v1229_v38 = vadd.f32 %v1213_v46, %v13582_v4  ;;  %v1230_v40 = vadd.f32 %v1214_v35, %v13582_v4  ;;  %v1215_v25 = vmul.f32 %v13740_v63, %v1189_v13  ;;  %v1018_v13 = vmul.f32 0.03125, %v13690_v28 }
 0x450   :  { %v1282_v10 = vpop.permute.xlu1 %1281  ;;  %v1232_v52 = vadd.f32 %v1216_v47, %v13582_v4 }
 0x451   :  { %v1286_v43 = vmul.f32 %v1282_v10, %v1274_v56  ;;  %v1231_v16 = vadd.f32 %v1215_v25, %v13582_v4 }
 0x453   :  { %v1296_v48 = vadd.f32 %v1292_v8, %v1286_v43  ;;  %v1161_v8 = vadd.f32 1e-06, %v1129_v23 }
 0x455   :  { %9596 = vmatmul.mubr.msk.f32.gmra.mrb[18].mxu1 %vm264_vm1, %v1296_v48  ;;  %12572 = vrsqrt.f32 %v1161_v8  ;;  %v12569_v56 = vpop.eup %12568 }
 0x456   :  { %1446 = vmatprep.mubr.f32.mxu1 %v17880_v29  ;;  %v1191_v45 = vmul.f32 %v12569_v56, %v1143_v55  ;;  %v12571_v31 = vpop.eup %12570  ;;  %v1114_v55 = vmul.f32 %v1018_v13, %v1018_v13 }
 0x457   :  { %v1192_v43 = vmul.f32 %v12571_v31, %v1144_v30 }
 0x458   :  { %v1217_v10 = vmul.f32 %v13740_v63, %v1191_v45 }
 0x459   :  { %9597 = vmatmul.mubr.msk.f32.gmra.mrb[20].mxu1 %vm264_vm1, %v1229_v38  ;;  %v1218_v27 = vmul.f32 %v13740_v63, %v1192_v43 }
 0x45a   :  { %1452 = vmatprep.mubr.f32.mxu1 %v17880_v29  ;;  %v1233_v18 = vadd.f32 %v1217_v10, %v13582_v4 }
 0x45b   :  { %v1234_v46 = vadd.f32 %v1218_v27, %v13582_v4 }
 0x45d   :  { %9598 = vmatmul.mubr.msk.f32.gmra.mrb[22].mxu1 %vm264_vm1, %v1230_v40 }
 0x45e   :  { %1458 = vmatprep.mubr.f32.mxu1 %v17880_v29 }
 0x45f   :  { %v12573_v62 = vpop.eup %12572 }
 0x460   :  { %v1193_v48 = vmul.f32 %v12573_v62, %v1145_v34 }
 0x461   :  { %9599 = vmatmul.mubr.msk.f32.gmra.mrb[24].mxu1 %vm264_vm1, %v1231_v16 }
 0x462   :  { %1464 = vmatprep.mubr.f32.mxu1 %v17880_v29  ;;  %v1219_v0 = vmul.f32 %v13740_v63, %v1193_v48 }
 0x464   :  { %v1235_v42 = vadd.f32 %v1219_v0, %v13582_v4 }
 0x465   :  { %9600 = vmatmul.mubr.msk.f32.gmra.mrb[26].mxu1 %vm264_vm1, %v1232_v52 }
 0x466   :  { %1470 = vmatprep.mubr.f32.mxu1 %v17880_v29 }
 0x469   :  { %9601 = vmatmul.mubr.msk.f32.gmra.mrb[28].mxu1 %vm264_vm1, %v1233_v18 }
 0x46a   :  { %1476 = vmatprep.mubr.f32.mxu1 %v17880_v29 }
 0x46d   :  { %9602 = vmatmul.mubr.msk.f32.gmra.mrb[30].mxu1 %vm264_vm1, %v1234_v46 }
 0x46e   :  { %1482 = vmatprep.mubr.f32.mxu1 %v17880_v29 }
 0x471   :  { %9603 = vmatmul.mubr.msk.f32.gmra.mrb[32].mxu1 %vm264_vm1, %v1235_v42 }
 0x472   :  { %1488 = vmatprep.mubr.f32.mxu1 %v17880_v29 }
 0x480   :  { %v988_v23 = vpop.xlane.xlu0 %987 }
 0x481   :  { %v1019_v44 = vmul.f32 0.03125, %v988_v23 }
 0x483   :  { %v1115_v35 = vmul.f32 %v1019_v44, %v1019_v44 }
 0x484   :  { %v1069_v14 = vpop.xlane.xlu0 %1068 }
 0x485   :  { %v1099_v38 = vmul.f32 0.03125, %v1069_v14 }
 0x487   :  { %v1131_v37 = vsub.f32 %v1099_v38, %v1115_v35 }
 0x488   :  { %v991_v15 = vpop.xlane.xlu0 %990 }
 0x489   :  { %v13788_v8 = vmul.f32 0.03125, %v991_v15  ;;  %v1163_v47 = vadd.f32 1e-06, %v1131_v37 }
 0x48b   :  { %v1116_v39 = vmul.f32 %v13788_v8, %v13788_v8  ;;  %12574 = vrsqrt.f32 %v1163_v47 }
 0x48c   :  { %v1072_v7 = vpop.xlane.xlu0 %1071 }
 0x48d   :  { %v1100_v40 = vmul.f32 0.03125, %v1072_v7 }
 0x48f   :  { %v1066_v25 = vpop.xlane.xlu1 %1065  ;;  %v1132_v30 = vsub.f32 %v1100_v40, %v1116_v39 }
 0x490   :  { %v1098_v56 = vmul.f32 0.03125, %v1066_v25  ;;  %v1075_v16 = vpop.xlane.xlu0 %1074 }
 0x491   :  { %v1164_v43 = vadd.f32 1e-06, %v1132_v30  ;;  %v1101_v62 = vmul.f32 0.03125, %v1075_v16 }
 0x492   :  { %v1130_v45 = vsub.f32 %v1098_v56, %v1114_v55  ;;  %v1146_v55 = vsub.f32 %v13358_v60, %v1018_v13 }
 0x493   :  { %v994_v31 = vpop.xlane.xlu1 %993 }
 0x494   :  { %v1162_v52 = vadd.f32 1e-06, %v1130_v45  ;;  %v1021_v10 = vmul.f32 0.03125, %v994_v31  ;;  %v1078_v34 = vpop.xlane.xlu0 %1077  ;;  %v1147_v45 = vsub.f32 %v13603_v11, %v1019_v44 }
 0x495   :  { %v1102_v42 = vmul.f32 0.03125, %v1078_v34  ;;  %v12575_v25 = vpop.eup %12574 }
 0x496   :  { %12576 = vrsqrt.f32 %v1162_v52  ;;  %v1117_v28 = vmul.f32 %v1021_v10, %v1021_v10 }
 0x497   :  { %v997_v18 = vpop.xlane.xlu1 %996  ;;  %12578 = vrsqrt.f32 %v1164_v43 }
 0x498   :  { %v1133_v27 = vsub.f32 %v1101_v62, %v1117_v28  ;;  %v13793_v48 = vmul.f32 0.03125, %v997_v18  ;;  %v1081_v46 = vpop.xlane.xlu0 %1080  ;;  %v1195_v18 = vmul.f32 %v12575_v25, %v1147_v45 }
 0x499   :  { %v1103_v37 = vmul.f32 0.03125, %v1081_v46 }
 0x49a   :  { %v1165_v0 = vadd.f32 1e-06, %v1133_v27  ;;  %v1118_v23 = vmul.f32 %v13793_v48, %v13793_v48 }
 0x49b   :  { %v1000_v14 = vpop.xlane.xlu1 %999 }
 0x49c   :  { %12580 = vrsqrt.f32 %v1165_v0  ;;  %v1134_v15 = vsub.f32 %v1102_v42, %v1118_v23  ;;  %v13797_v38 = vmul.f32 0.03125, %v1000_v14  ;;  %v1084_v35 = vpop.xlane.xlu0 %1083  ;;  %v1148_v42 = vsub.f32 %v13614_v17, %v13788_v8 }
 0x49d   :  { %v1104_v34 = vmul.f32 0.03125, %v1084_v35 }
 0x49e   :  { %v1166_v7 = vadd.f32 1e-06, %v1134_v15  ;;  %v1119_v40 = vmul.f32 %v13797_v38, %v13797_v38 }
 0x49f   :  { %v1003_v39 = vpop.xlane.xlu1 %1002 }
 0x4a0   :  { %v12577_v56 = vpop.eup %12576  ;;  %12582 = vrsqrt.f32 %v1166_v7  ;;  %v1135_v16 = vsub.f32 %v1103_v37, %v1119_v40  ;;  %v1024_v47 = vmul.f32 0.03125, %v1003_v39  ;;  %v1087_v30 = vpop.xlane.xlu0 %1086 }
 0x4a1   :  { %v1194_v31 = vmul.f32 %v12577_v56, %v1146_v55  ;;  %v12579_v27 = vpop.eup %12578  ;;  %v1105_v35 = vmul.f32 0.03125, %v1087_v30  ;;  %v1150_v30 = vsub.f32 %v13633_v26, %v13793_v48 }
 0x4a2   :  { %v1167_v52 = vadd.f32 1e-06, %v1135_v16  ;;  %v1120_v43 = vmul.f32 %v1024_v47, %v1024_v47  ;;  %v1196_v40 = vmul.f32 %v12579_v27, %v1148_v42  ;;  %v1151_v27 = vsub.f32 %v13646_v54, %v13797_v38 }
 0x4a3   :  { %v1006_v62 = vpop.xlane.xlu1 %1005  ;;  %v1220_v28 = vmul.f32 %v13740_v63, %v1194_v31  ;;  %v1149_v63 = vsub.f32 %v13624_v19, %v1021_v10 }
 0x4a4   :  { %12584 = vrsqrt.f32 %v1167_v52  ;;  %v1136_v46 = vsub.f32 %v1104_v34, %v1120_v43  ;;  %v1025_v13 = vmul.f32 0.03125, %v1006_v62  ;;  %v13804_v0 = vpop.permute.xlu0 %1209 }
 0x4a5   :  { %v1236_v23 = vadd.f32 %v1220_v28, %v13582_v4  ;;  %v1221_v44 = vmul.f32 %v13804_v0, %v1195_v18  ;;  %v1222_v56 = vmul.f32 %v13804_v0, %v1196_v40 }
 0x4a6   :  { %v12581_v14 = vpop.eup %12580  ;;  %v1168_v15 = vadd.f32 1e-06, %v1136_v46  ;;  %v1121_v7 = vmul.f32 %v1025_v13, %v1025_v13 }
 0x4a7   :  { %v1009_v37 = vpop.xlane.xlu1 %1008  ;;  %9604 = vmatmul.mubr.msk.f32.gmra.mrb[34].mxu1 %vm264_vm1, %v1236_v23  ;;  %v1197_v8 = vmul.f32 %v12581_v14, %v1149_v63  ;;  %v1237_v39 = vadd.f32 %v1221_v44, %v13701_v57  ;;  %v1238_v43 = vadd.f32 %v1222_v56, %v13701_v57  ;;  %v1152_v14 = vsub.f32 %v13658_v59, %v1024_v47 }
 0x4a8   :  { %12586 = vrsqrt.f32 %v1168_v15  ;;  %v1137_v25 = vsub.f32 %v1105_v35, %v1121_v7  ;;  %v1026_v55 = vmul.f32 0.03125, %v1009_v37  ;;  %1494 = vmatprep.mubr.f32.mxu1 %v17880_v29  ;;  %v1153_v63 = vsub.f32 %v13668_v12, %v1025_v13 }
 0x4a9   :  { %v1223_v62 = vmul.f32 %v13804_v0, %v1197_v8 }
 0x4aa   :  { %v12583_v16 = vpop.eup %12582  ;;  %v1169_v45 = vadd.f32 1e-06, %v1137_v25  ;;  %v1122_v31 = vmul.f32 %v1026_v55, %v1026_v55  ;;  %v1154_v25 = vsub.f32 %v13686_v41, %v1026_v55 }
 0x4ab   :  { %v1090_v10 = vpop.xlane.xlu1 %1089  ;;  %9605 = vmatmul.mubr.msk.f32.gmra.mrb[36].mxu1 %vm264_vm1, %v1237_v39  ;;  %v1198_v34 = vmul.f32 %v12583_v16, %v1150_v30  ;;  %v1239_v42 = vadd.f32 %v1223_v62, %v13701_v57 }
 0x4ac   :  { %12588 = vrsqrt.f32 %v1169_v45  ;;  %v1106_v52 = vmul.f32 0.03125, %v1090_v10  ;;  %1500 = vmatprep.mubr.f32.mxu1 %v17880_v29 }
 0x4ad   :  { %v1224_v23 = vmul.f32 %v13804_v0, %v1198_v34 }
 0x4ae   :  { %v12585_v28 = vpop.eup %12584  ;;  %v1138_v18 = vsub.f32 %v1106_v52, %v1122_v31 }
 0x4af   :  { %9606 = vmatmul.mubr.msk.f32.gmra.mrb[38].mxu1 %vm264_vm1, %v1238_v43  ;;  %v1199_v46 = vmul.f32 %v12585_v28, %v1151_v27  ;;  %v1240_v38 = vadd.f32 %v1224_v23, %v13701_v57 }
 0x4b0   :  { %v1170_v48 = vadd.f32 1e-06, %v1138_v18  ;;  %1506 = vmatprep.mubr.f32.mxu1 %v17880_v29 }
 0x4b1   :  { %v1225_v35 = vmul.f32 %v13804_v0, %v1199_v46 }
 0x4b2   :  { %v12587_v44 = vpop.eup %12586  ;;  %12590 = vrsqrt.f32 %v1170_v48 }
 0x4b3   :  { %9607 = vmatmul.mubr.msk.f32.gmra.mrb[40].mxu1 %vm264_vm1, %v1239_v42  ;;  %v1200_v15 = vmul.f32 %v12587_v44, %v1152_v14  ;;  %v1241_v40 = vadd.f32 %v1225_v35, %v13701_v57 }
 0x4b4   :  { %1512 = vmatprep.mubr.f32.mxu1 %v17880_v29 }
 0x4b5   :  { %v1226_v47 = vmul.f32 %v13804_v0, %v1200_v15 }
 0x4b6   :  { %v12589_v7 = vpop.eup %12588 }
 0x4b7   :  { %9608 = vmatmul.mubr.msk.f32.gmra.mrb[42].mxu1 %vm264_vm1, %v1240_v38  ;;  %v1201_v37 = vmul.f32 %v12589_v7, %v1153_v63  ;;  %v1242_v39 = vadd.f32 %v1226_v47, %v13701_v57 }
 0x4b8   :  { %1518 = vmatprep.mubr.f32.mxu1 %v17880_v29 }
 0x4b9   :  { %v1227_v13 = vmul.f32 %v13804_v0, %v1201_v37 }
 0x4bb   :  { %9609 = vmatmul.mubr.msk.f32.gmra.mrb[44].mxu1 %vm264_vm1, %v1241_v40  ;;  %v1243_v16 = vadd.f32 %v1227_v13, %v13701_v57 }
 0x4bc   :  { %v12591_v8 = vpop.eup %12590  ;;  %1524 = vmatprep.mubr.f32.mxu1 %v17880_v29 }
 0x4bd   :  { %v1202_v56 = vmul.f32 %v12591_v8, %v1154_v25 }
 0x4bf   :  { %9610 = vmatmul.mubr.msk.f32.gmra.mrb[46].mxu1 %vm264_vm1, %v1242_v39  ;;  %v1228_v45 = vmul.f32 %v13804_v0, %v1202_v56  ;;  %v9594_v0 = vld [vmem:[%s17875_s4 + $0x40] ss:$8 sm:$0x3] }
 0x4c0   :  { %1530 = vmatprep.mubr.f32.mxu1 %v17880_v29  ;;  %v13862_v62 = vrot.slane %v9594_v0, %v13543_v21 }
 0x4c1   :  { %v1244_v55 = vadd.f32 %v1228_v45, %v13701_v57 }
 0x4c3   :  { %9611 = vmatmul.mubr.msk.f32.gmra.mrb[48].mxu1 %vm264_vm1, %v1243_v16 }
 0x4c4   :  { %1536 = vmatprep.mubr.f32.mxu1 %v17880_v29 }
 0x4c7   :  { %9612 = vmatmul.mubr.msk.f32.gmra.mrb[50].mxu1 %vm264_vm1, %v1244_v55 }
 0x4c8   :  { %10711 = vmatprep.mubr.msk.f32.mxu1 %vm13056_vm4, %v17880_v29 }
 0x51e   :  { %v13852_v30 = vpop.f32.mrb[16].mxu1 }
 0x51f   :  { %v1440_v10 = vpop.f32.mrb[17].mxu1 }
 0x528   :  { %v13854_v31 = vpop.f32.mrb[18].mxu1 }
 0x529   :  { %v1445_v52 = vpop.f32.mrb[19].mxu1 }
 0x52c   :  { %v13856_v34 = vpop.f32.mrb[20].mxu1 }
 0x52d   :  { %v1450_v43 = vpop.f32.mrb[21].mxu1 }
 0x52e   :  { %v1451_v27 = vadd.f32 %v1450_v43, %v13862_v62 }
 0x530   :  { %v13864_v28 = vpop.f32.mrb[22].mxu1 }
 0x531   :  { %v1456_v18 = vpop.f32.mrb[23].mxu1 }
 0x532   :  { %v1457_v48 = vadd.f32 %v1456_v18, %v13862_v62 }
 0x534   :  { %v12154_v46 = vpack.i.bf16 %v1457_v48, %v1451_v27  ;;  %v13868_v42 = vpop.f32.mrb[24].mxu1 }
 0x535   :  { %v1462_v23 = vpop.f32.mrb[25].mxu1 }
 0x536   :  { %12155 = vrot.lane.b32.xlu1 %v12154_v46, %s13058_s11  ;;  %v1463_v15 = vadd.f32 %v1462_v23, %v13862_v62 }
 0x538   :  { %v13871_v44 = vpop.f32.mrb[26].mxu1 }
 0x539   :  { %v1468_v14 = vpop.f32.mrb[27].mxu1 }
 0x53a   :  { %v1469_v38 = vadd.f32 %v1468_v14, %v13862_v62 }
 0x53c   :  { %v12159_v35 = vpack.i.bf16 %v1469_v38, %v1463_v15  ;;  %v13875_v7 = vpop.f32.mrb[28].mxu1 }
 0x53d   :  { %v1474_v63 = vpop.f32.mrb[29].mxu1 }
 0x53e   :  { %12160 = vrot.lane.b32.xlu1 %v12159_v35, %s13058_s11  ;;  %v1475_v47 = vadd.f32 %v1474_v63, %v13862_v62 }
 0x540   :  { %v13878_v37 = vpop.f32.mrb[30].mxu1 }
 0x541   :  { %v1480_v40 = vpop.f32.mrb[31].mxu1 }
 0x542   :  { %v1481_v25 = vadd.f32 %v1480_v40, %v13862_v62 }
 0x544   :  { %v12164_v8 = vpack.i.bf16 %v1481_v25, %v1475_v47  ;;  %v13882_v39 = vpop.f32.mrb[32].mxu1 }
 0x545   :  { %v1486_v13 = vpop.f32.mrb[33].mxu1 }
 0x546   :  { %12165 = vrot.lane.b32.xlu0 %v12164_v8, %s13058_s11  ;;  %v1487_v52 = vadd.f32 %v1486_v13, %v13862_v62 }
 0x57a   :  { %v13885_v56 = vpop.f32.mrb[34].mxu1 }
 0x57b   :  { %v1492_v16 = vpop.f32.mrb[35].mxu1 }
 0x57c   :  { %v1493_v45 = vadd.f32 %v1492_v16, %v13862_v62 }
 0x57e   :  { %1589 = vrot.lane.b32.xlu0 %v1493_v45, %s13058_s11  ;;  %v13889_v55 = vpop.f32.mrb[36].mxu1 }
 0x57f   :  { %v1498_v10 = vpop.f32.mrb[37].mxu1 }
 0x580   :  { %v1499_v43 = vadd.f32 %v1498_v10, %v13862_v62 }
 0x582   :  { %v12169_v18 = vpack.i.bf16 %v1499_v43, %v1487_v52  ;;  %v13893_v27 = vpop.f32.mrb[38].mxu1 }
 0x583   :  { %v1504_v48 = vpop.f32.mrb[39].mxu1 }
 0x584   :  { %12170 = vrot.lane.b32.xlu1 %v12169_v18, %s13058_s11  ;;  %v1505_v14 = vadd.f32 %v1504_v48, %v13862_v62 }
 0x586   :  { %v13896_v46 = vpop.f32.mrb[40].mxu1 }
 0x587   :  { %v1510_v23 = vpop.f32.mrb[41].mxu1 }
 0x588   :  { %v1511_v15 = vadd.f32 %v1510_v23, %v13862_v62 }
 0x58a   :  { %v12189_v38 = vpack.i.bf16 %v1511_v15, %v1505_v14  ;;  %v13900_v35 = vpop.f32.mrb[42].mxu1  ;;  %v13915_v15 = vrot.slane %v9594_v0, %v13561_v36 }
 0x58b   :  { %v1516_v63 = vpop.f32.mrb[43].mxu1 }
 0x58c   :  { %v1517_v25 = vadd.f32 %v1516_v63, %v13862_v62  ;;  %v1449_v0 = vadd.f32 %v13856_v34, %v13915_v15  ;;  %v1467_v34 = vadd.f32 %v13871_v44, %v13915_v15 }
 0x58e   :  { %v13902_v40 = vpop.f32.mrb[44].mxu1 }
 0x58f   :  { %v1522_v47 = vpop.f32.mrb[45].mxu1 }
 0x590   :  { %v1523_v8 = vadd.f32 %v1522_v47, %v13862_v62  ;;  %v13919_v47 = vadd.f32 %v13852_v30, %v13915_v15 }
 0x592   :  { %v12199_v13 = vpack.i.bf16 %v1523_v8, %v1517_v25  ;;  %v13906_v16 = vpop.f32.mrb[46].mxu1 }
 0x593   :  { %v1528_v45 = vpop.f32.mrb[47].mxu1 }
 0x594   :  { %v1529_v43 = vadd.f32 %v1528_v45, %v13862_v62 }
 0x596   :  { %v13908_v10 = vpop.f32.mrb[48].mxu1 }
 0x597   :  { %v1534_v52 = vpop.f32.mrb[49].mxu1 }
 0x598   :  { %v1535_v18 = vadd.f32 %v1534_v52, %v13862_v62 }
 0x59a   :  { %v12209_v48 = vpack.i.bf16 %v1535_v18, %v1529_v43  ;;  %v13912_v23 = vpop.f32.mrb[50].mxu1 }
 0x59b   :  { %v1540_v14 = vpop.f32.mrb[51].mxu1 }
 0x5a8   :  { %v12156_v63 = vpop.permute.xlu1 %12155 }
 0x5a9   :  { %v12157_v25 = vunpack.i.l.bf16 %v12156_v63  ;;  %v12158_v52 = vunpack.i.h.bf16 %v12156_v63  ;;  %v1461_v63 = vadd.f32 %v13868_v42, %v13915_v15 }
 0x5ab   :  { %v13922_v8 = vpack.i.bf16 %v12157_v25, %v13919_v47  ;;  %v1455_v25 = vadd.f32 %v13864_v28, %v13915_v15  ;;  %v1491_v28 = vadd.f32 %v13885_v56, %v13915_v15  ;;  %v1479_v56 = vadd.f32 %v13878_v37, %v13915_v15 }
 0x5ad   :  { %12175 = vrot.lane.b32.xlu1 %v13922_v8, %s13059_s12 }
 0x5b0   :  { %v12161_v45 = vpop.permute.xlu1 %12160 }
 0x5b1   :  { %v12162_v43 = vunpack.i.l.bf16 %v12161_v45  ;;  %v12163_v29 = vunpack.i.h.bf16 %v12161_v45 }
 0x5b3   :  { %v13926_v18 = vpack.i.bf16 %v12162_v43, %v12158_v52 }
 0x5b5   :  { %12180 = vrot.lane.b32.xlu0 %v13926_v18, %s13059_s12 }
 0x5b8   :  { %v12166_v30 = vpop.permute.xlu0 %12165 }
 0x5b9   :  { %v12167_v61 = vunpack.i.l.bf16 %v12166_v30  ;;  %1551 = vrot.lane.b32.xlu0 %v1449_v0, %s13058_s11  ;;  %v17986_v0 = vmov 0.0|0.0  }
 0x5bb   :  { %v13935_v6 = vpack.i.bf16 %v12167_v61, %v12163_v29  ;;  %v1473_v29 = vadd.f32 %v13875_v7, %v13915_v15  ;;  %v1485_v61 = vadd.f32 %v13882_v39, %v13915_v15  ;;  %v12168_v7 = vunpack.i.h.bf16 %v12166_v30 }
 0x5bd   :  { %1553 = vrot.lane.b32.xlu0 %v1455_v25, %s13058_s11  ;;  %12185 = vrot.lane.b32.xlu1 %v13935_v6, %s13059_s12 }
 0x5c1   :  { %1555 = vrot.lane.b32.xlu0 %v1461_v63, %s13058_s11  ;;  %12190 = vrot.lane.b32.xlu1 %v12189_v38, %s13058_s11 }
 0x5c5   :  { %1557 = vrot.lane.b32.xlu0 %v1467_v34, %s13058_s11 }
 0x5c9   :  { %1559 = vrot.lane.b32.xlu0 %v1473_v29, %s13058_s11 }
 0x5cd   :  { %12210 = vrot.lane.b32.xlu0 %v12209_v48, %s13058_s11  ;;  %v1541_v48 = vadd.f32 %v1540_v14, %v13862_v62  ;;  %v17983_v14 = vmov 0 }
 0x5ce   :  { %v17984_v14 = vsel %vm13994_vm7, 4294967295, %v17983_v14 }
 0x5cf   :  { %17985 = vst [vmem:[#allocation32_spill] sm:$0xff] %v17984_v14 }
 0x5d1   :  { %1563 = vrot.lane.b32.xlu0 %v1485_v61, %s13058_s11 }
 0x5d5   :  { %1565 = vrot.lane.b32.xlu0 %v1491_v28, %s13058_s11 }
 0x5d9   :  { %12220 = vrot.lane.b32.xlu0 %v13935_v6, %s13060_s0 }
 0x5f0   :  { %v13959_v42 = vpop.permute.xlu0 %1589 }
 0x5f1   :  { %2064 = vrot.lane.b32.xlu0 %v13959_v42, %s13060_s0 }
 0x5f5   :  { %2030 = vrot.lane.b32.xlu0 %v13919_v47, %s13061_s15 }
 0x5f6   :  { %v12171_v44 = vpop.permute.xlu1 %12170 }
 0x5f7   :  { %v12172_v39 = vunpack.i.l.bf16 %v12171_v44  ;;  %v12173_v45 = vunpack.i.h.bf16 %v12171_v44 }
 0x5f9   :  { %v13965_v38 = vpack.i.bf16 %v12172_v39, %v12168_v7  ;;  %v1497_v39 = vadd.f32 %v13889_v55, %v13915_v15 }
 0x5fb   :  { %12195 = vrot.lane.b32.xlu1 %v13965_v38, %s13059_s12 }
 0x5ff   :  { %12200 = vrot.lane.b32.xlu1 %v12199_v13, %s13058_s11  ;;  %v13983_v13 = vadd.f32 %v13854_v31, %v13915_v15 }
 0x601   :  { %v13988_v52 = vpack.i.bf16 %v12173_v45, %v13983_v13 }
 0x603   :  { %1608 = vrot.lane.b32.xlu1 %v13959_v42, %s13059_s12 }
 0x607   :  { %12205 = vrot.lane.b32.xlu1 %v13922_v8, %s13060_s0 }
 0x60b   :  { %1561 = vrot.lane.b32.xlu1 %v1479_v56, %s13058_s11 }
 0x60f   :  { %12215 = vrot.lane.b32.xlu1 %v13926_v18, %s13060_s0 }
 0x613   :  { %2575 = vrot.lane.b32.xlu1 %v1541_v48, %s13058_s11 }
 0x617   :  { %12225 = vrot.lane.b32.xlu1 %v13965_v38, %s13060_s0 }
 0x61b   :  { %12230 = vrot.lane.b32.xlu1 %v13988_v52, %s13059_s12 }
 0x61f   :  { %v12176_v37 = vpop.permute.xlu1 %12175 }
 0x620   :  { %v12178_v43 = vunpack.i.h.bf16 %v12176_v37  ;;  %v12177_v62 = vunpack.i.l.bf16 %v12176_v37 }
 0x622   :  { %v11757_v31 = vpack.c.bf16 %v12178_v43, %v12177_v62  ;;  %v1509_v62 = vadd.f32 %v13896_v46, %v13915_v15  ;;  %v17987_v46 = vmov 0.0  }
 0x624   :  { %11759 = vmatpush3.bf16.xpose.msk.msra.mxu0 %vm13994_vm7, %v11757_v31  ;;  %v1515_v31 = vadd.f32 %v13900_v35, %v13915_v15  ;;  %v1503_v35 = vadd.f32 %v13893_v27, %v13915_v15 }
 0x625   :  { %11760 = vmatprep.subr.bf16.mxu0 %v17986_v0 }
 0x627   :  { %v12181_v30 = vpop.permute.xlu0 %12180 }
 0x628   :  { %v12183_v25 = vunpack.i.h.bf16 %v12181_v30  ;;  %v12182_v63 = vunpack.i.l.bf16 %v12181_v30 }
 0x62a   :  { %v11761_v34 = vpack.c.bf16 %v12183_v25, %v12182_v63 }
 0x62b   :  { %v1552_v29 = vpop.permute.xlu0 %1551 }
 0x62c   :  { %11763 = vmatpush3.bf16.xpose.msk.msra.mxu0 %vm13994_vm7, %v11761_v34  ;;  %2032 = vrot.lane.b32.xlu1 %v1552_v29, %s13061_s15 }
 0x62d   :  { %11764 = vmatprep.subr.bf16.mxu0 %v17986_v0 }
 0x62f   :  { %v1554_v61 = vpop.permute.xlu0 %1553  ;;  %v12186_v28 = vpop.permute.xlu1 %12185 }
 0x630   :  { %v12188_v44 = vunpack.i.h.bf16 %v12186_v28  ;;  %v12187_v7 = vunpack.i.l.bf16 %v12186_v28  ;;  %2034 = vrot.lane.b32.xlu1 %v1554_v61, %s13061_s15 }
 0x632   :  { %v11765_v56 = vpack.c.bf16 %v12188_v44, %v12187_v7 }
 0x633   :  { %v1556_v48 = vpop.permute.xlu0 %1555  ;;  %v14008_v45 = vpop.permute.xlu1 %12190 }
 0x634   :  { %2036 = vrot.lane.b32.xlu0 %v1556_v48, %s13061_s15  ;;  %2537 = vrot.lane.b32.xlu1 %v1497_v39, %s13058_s11 }
 0x635   :  { %11767 = vmatpush3.bf16.xpose.msk.msra.mxu0 %vm13994_vm7, %v11765_v56 }
 0x636   :  { %11768 = vmatprep.subr.bf16.mxu0 %v17986_v0 }
 0x637   :  { %v1558_v37 = vpop.permute.xlu0 %1557 }
 0x638   :  { %12235 = vrot.lane.b32.xlu0 %v14008_v45, %s13059_s12 }
 0x63b   :  { %v14017_v43 = vpop.permute.xlu0 %1559 }
 0x63c   :  { %2038 = vrot.lane.b32.xlu0 %v1558_v37, %s13061_s15 }
 0x63f   :  { %v14020_v55 = vpop.permute.xlu0 %12210 }
 0x640   :  { %2040 = vrot.lane.b32.xlu0 %v14017_v43, %s13061_s15 }
 0x643   :  { %v1564_v7 = vpop.permute.xlu0 %1563 }
 0x644   :  { %2541 = vrot.lane.b32.xlu0 %v1509_v62, %s13058_s11 }
 0x647   :  { %v1566_v27 = vpop.permute.xlu0 %1565 }
 0x648   :  { %12245 = vrot.lane.b32.xlu0 %v14020_v55, %s13059_s12 }
 0x64c   :  { %2543 = vrot.lane.b32.xlu0 %v1515_v31, %s13058_s11 }
 0x66d   :  { %v12196_v30 = vpop.permute.xlu1 %12195 }
 0x66e   :  { %v12198_v25 = vunpack.i.h.bf16 %v12196_v30  ;;  %v12197_v63 = vunpack.i.l.bf16 %v12196_v30 }
 0x670   :  { %v11769_v34 = vpack.c.bf16 %v12198_v25, %v12197_v63 }
 0x671   :  { %v14032_v28 = vpop.permute.xlu1 %12200 }
 0x672   :  { %11771 = vmatpush3.bf16.xpose.msk.msra.mxu0 %vm13994_vm7, %v11769_v34  ;;  %12240 = vrot.lane.b32.xlu1 %v14032_v28, %s13059_s12 }
 0x673   :  { %10619 = vmatprep.subr.mxu0 %v17987_v46 }
 0x675   :  { %v1609_v44 = vpop.permute.xlu1 %1608 }
 0x676   :  { %2539 = vrot.lane.b32.xlu1 %v1503_v35, %s13058_s11 }
 0x679   :  { %v12206_v39 = vpop.permute.xlu1 %12205 }
 0x67a   :  { %v12208_v56 = vunpack.i.h.bf16 %v12206_v39  ;;  %v12207_v62 = vunpack.i.l.bf16 %v12206_v39  ;;  %10620 = vmatpush3.xpose.msk.msra.mxu0 %vm1610_vm6, %v1609_v44  ;;  %v12221_v44 = vpop.permute.xlu0 %12220 }
 0x67b   :  { %11772 = vmatprep.subr.bf16.mxu0 %v17986_v0  ;;  %v12223_v39 = vunpack.i.h.bf16 %v12221_v44 }
 0x67c   :  { %v11785_v31 = vpack.c.bf16 %v12208_v56, %v12207_v62  ;;  %v12222_v56 = vunpack.i.l.bf16 %v12221_v44 }
 0x67d   :  { %v1562_v30 = vpop.permute.xlu1 %1561  ;;  %10622 = vmatmul.mubr.msk.f32.vlgmr.msra.gmra.mrb[14].mxu0 %vm1610_vm6, %v13919_v47 }
 0x67e   :  { %11787 = vmatpush3.bf16.xpose.msk.msra.mxu1 %vm13994_vm7, %v11785_v31  ;;  %2042 = vrot.lane.b32.xlu1 %v1562_v30, %s13061_s15  ;;  %v11793_v62 = vpack.c.bf16 %v12223_v39, %v12222_v56 }
 0x67f   :  { %10624 = vmatprep.mubr.msk.f32.mxu0 %vm13056_vm4, %v17987_v46  ;;  %11788 = vmatprep.subr.bf16.mxu1 %v17986_v0 }
 0x681   :  { %v12216_v25 = vpop.permute.xlu1 %12215  ;;  %10625 = vmatmul.mubr.msk.f32.gmra.mrb[16].mxu0 %vm1610_vm6, %v1552_v29  ;;  %v1521_v29 = vadd.f32 %v13902_v40, %v13915_v15  ;;  %v1533_v40 = vadd.f32 %v13908_v10, %v13915_v15 }
 0x682   :  { %v12218_v63 = vunpack.i.h.bf16 %v12216_v25  ;;  %v12217_v34 = vunpack.i.l.bf16 %v12216_v25  ;;  %2044 = vrot.lane.b32.xlu1 %v1564_v7, %s13061_s15  ;;  %10627 = vmatprep.mubr.msk.f32.mxu0 %vm13056_vm4, %v17987_v46 }
 0x684   :  { %v11789_v47 = vpack.c.bf16 %v12218_v63, %v12217_v34 }
 0x685   :  { %v14056_v35 = vpop.permute.xlu1 %2575  ;;  %10628 = vmatmul.mubr.msk.f32.gmra.mrb[18].mxu0 %vm1610_vm6, %v1554_v61  ;;  %v1527_v61 = vadd.f32 %v13906_v16, %v13915_v15  ;;  %v1539_v16 = vadd.f32 %v13912_v23, %v13915_v15  ;;  %v2065_v15 = vpop.permute.xlu0 %2064 }
 0x686   :  { %11791 = vmatpush3.bf16.xpose.msk.msra.mxu1 %vm13994_vm7, %v11789_v47  ;;  %2046 = vrot.lane.b32.xlu1 %v1566_v27, %s13061_s15 }
 0x687   :  { %2594 = vrot.lane.b32.xlu0 %v14056_v35, %s13059_s12  ;;  %10630 = vmatprep.mubr.msk.f32.mxu0 %vm13056_vm4, %v17987_v46 }
 0x688   :  { %11792 = vmatprep.subr.bf16.mxu1 %v17986_v0 }
 0x689   :  { %10631 = vmatmul.mubr.msk.f32.gmra.mrb[20].mxu0 %vm1610_vm6, %v1556_v48  ;;  %v12226_v31 = vpop.permute.xlu1 %12225 }
 0x68a   :  { %2545 = vrot.lane.b32.xlu1 %v1521_v29, %s13058_s11  ;;  %10633 = vmatprep.mubr.msk.f32.mxu0 %vm13056_vm4, %v17987_v46  ;;  %v12228_v48 = vunpack.i.h.bf16 %v12226_v31  ;;  %v12227_v25 = vunpack.i.l.bf16 %v12226_v31 }
 0x68b   :  { %12250 = vrot.lane.b32.xlu0 %v13988_v52, %s13060_s0 }
 0x68c   :  { %v11797_v10 = vpack.c.bf16 %v12228_v48, %v12227_v25 }
 0x68d   :  { %10634 = vmatmul.mubr.msk.f32.gmra.mrb[22].mxu0 %vm1610_vm6, %v1558_v37  ;;  %v12231_v23 = vpop.permute.xlu1 %12230 }
 0x68e   :  { %11795 = vmatpush3.bf16.xpose.msk.msra.mxu1 %vm13994_vm7, %v11793_v62  ;;  %2547 = vrot.lane.b32.xlu1 %v1527_v61, %s13058_s11  ;;  %v12233_v37 = vunpack.i.h.bf16 %v12231_v23 }
 0x68f   :  { %2549 = vrot.lane.b32.xlu0 %v1533_v40, %s13058_s11  ;;  %10636 = vmatprep.mubr.msk.f32.mxu0 %vm13056_vm4, %v17987_v46 }
 0x690   :  { %11796 = vmatprep.subr.bf16.mxu1 %v17986_v0 }
 0x691   :  { %10637 = vmatmul.mubr.msk.f32.gmra.mrb[24].mxu0 %vm1610_vm6, %v14017_v43  ;;  %v12232_v43 = vunpack.i.l.bf16 %v12231_v23 }
 0x692   :  { %12255 = vrot.lane.b32.xlu1 %v14008_v45, %s13060_s0  ;;  %10639 = vmatprep.mubr.msk.f32.mxu0 %vm13056_vm4, %v17987_v46 }
 0x693   :  { %2551 = vrot.lane.b32.xlu0 %v1539_v16, %s13058_s11  ;;  %v11813_v63 = vpack.c.bf16 %v12233_v37, %v12232_v43 }
 0x695   :  { %10640 = vmatmul.mubr.msk.f32.gmra.mrb[26].mxu0 %vm1610_vm6, %v1562_v30 }
 0x696   :  { %11799 = vmatpush3.bf16.xpose.msk.msra.mxu1 %vm13994_vm7, %v11797_v10  ;;  %12260 = vrot.lane.b32.xlu1 %v14032_v28, %s13060_s0 }
 0x697   :  { %12265 = vrot.lane.b32.xlu0 %v14020_v55, %s13060_s0  ;;  %10642 = vmatprep.mubr.msk.f32.mxu0 %vm13056_vm4, %v17987_v46 }
 0x698   :  { %10709 = vmatprep.subr.mxu1 %v17987_v46 }
 0x699   :  { %10643 = vmatmul.mubr.msk.f32.gmra.mrb[28].mxu0 %vm1610_vm6, %v1564_v7  ;;  %v2031_v7 = vpop.permute.xlu0 %2030 }
 0x69a   :  { %3048 = vrot.lane.b32.xlu1 %v14056_v35, %s13060_s0  ;;  %10645 = vmatprep.mubr.msk.f32.mxu0 %vm13056_vm4, %v17987_v46 }
 0x69b   :  { %3014 = vrot.lane.b32.xlu0 %v13983_v13, %s13061_s15 }
 0x69d   :  { %10646 = vmatmul.mubr.msk.f32.gmra.mrb[30].mxu0 %vm1610_vm6, %v1566_v27 }
 0x69e   :  { %v2033_v30 = vpop.permute.xlu1 %2032  ;;  %10710 = vmatpush3.xpose.msk.msra.mxu1 %vm1610_vm6, %v2065_v15  ;;  %10666 = vmatprep.mubr.msk.f32.mxu0 %vm13056_vm4, %v17987_v46 }
 0x69f   :  { %11812 = vmatprep.subr.bf16.mxu1 %v17986_v0 }
 0x6a1   :  { %10712 = vmatmul.mubr.msk.f32.vlgmr.msra.gmra.mrb[52].mxu1 %vm1610_vm6, %v2031_v7 }
 0x6a2   :  { %v2035_v34 = vpop.permute.xlu1 %2034  ;;  %11815 = vmatpush3.bf16.xpose.msk.msra.mxu1 %vm13994_vm7, %v11813_v63  ;;  %10714 = vmatprep.mubr.msk.f32.mxu1 %vm13056_vm4, %v17987_v46 }
 0x6a3   :  { %11816 = vmatprep.subr.bf16.mxu1 %v17986_v0 }
 0x6a5   :  { %10715 = vmatmul.mubr.msk.f32.gmra.mrb[54].mxu1 %vm1610_vm6, %v2033_v30 }
 0x6a6   :  { %v2037_v27 = vpop.permute.xlu0 %2036  ;;  %v14125_v47 = vpop.permute.xlu1 %2537  ;;  %10717 = vmatprep.mubr.msk.f32.mxu1 %vm13056_vm4, %v17987_v46 }
 0x6a7   :  { %3016 = vrot.lane.b32.xlu1 %v14125_v47, %s13061_s15 }
 0x6a9   :  { %10718 = vmatmul.mubr.msk.f32.gmra.mrb[56].mxu1 %vm1610_vm6, %v2035_v34 }
 0x6aa   :  { %v12236_v44 = vpop.permute.xlu0 %12235  ;;  %10720 = vmatprep.mubr.msk.f32.mxu1 %vm13056_vm4, %v17987_v46 }
 0x6ab   :  { %v12238_v29 = vunpack.i.h.bf16 %v12236_v44  ;;  %v12237_v39 = vunpack.i.l.bf16 %v12236_v44 }
 0x6ad   :  { %v11817_v56 = vpack.c.bf16 %v12238_v29, %v12237_v39  ;;  %10721 = vmatmul.mubr.msk.f32.gmra.mrb[58].mxu1 %vm1610_vm6, %v2037_v27 }
 0x6ae   :  { %v2039_v61 = vpop.permute.xlu0 %2038  ;;  %10723 = vmatprep.mubr.msk.f32.mxu1 %vm13056_vm4, %v17987_v46 }
 0x6af   :  { %11819 = vmatpush3.bf16.xpose.msk.msra.mxu1 %vm13994_vm7, %v11817_v56 }
 0x6b0   :  { %11820 = vmatprep.subr.bf16.mxu1 %v17986_v0 }
 0x6b1   :  { %10724 = vmatmul.mubr.msk.f32.gmra.mrb[60].mxu1 %vm1610_vm6, %v2039_v61 }
 0x6b2   :  { %v2041_v62 = vpop.permute.xlu0 %2040  ;;  %10726 = vmatprep.mubr.msk.f32.mxu1 %vm13056_vm4, %v17987_v46 }
 0x6b5   :  { %10727 = vmatmul.mubr.msk.f32.gmra.mrb[62].mxu1 %vm1610_vm6, %v2041_v62 }
 0x6b6   :  { %v14144_v40 = vpop.permute.xlu0 %2541  ;;  %10729 = vmatprep.mubr.msk.f32.mxu1 %vm13056_vm4, %v17987_v46 }
 0x6b7   :  { %3020 = vrot.lane.b32.xlu1 %v14144_v40, %s13061_s15 }
 0x6ba   :  { %v12246_v16 = vpop.permute.xlu0 %12245 }
 0x6bb   :  { %v12248_v15 = vunpack.i.h.bf16 %v12246_v16  ;;  %v12247_v37 = vunpack.i.l.bf16 %v12246_v16 }
 0x6bd   :  { %v11825_v7 = vpack.c.bf16 %v12248_v15, %v12247_v37 }
 0x6be   :  { %v2544_v43 = vpop.permute.xlu0 %2543 }
 0x6e4   :  { %v12241_v31 = vpop.permute.xlu1 %12240 }
 0x6e5   :  { %v12243_v48 = vunpack.i.h.bf16 %v12241_v31  ;;  %v12242_v25 = vunpack.i.l.bf16 %v12241_v31 }
 0x6e7   :  { %v11821_v10 = vpack.c.bf16 %v12243_v48, %v12242_v25 }
 0x6e8   :  { %v2540_v23 = vpop.permute.xlu1 %2539 }
 0x6e9   :  { %3018 = vrot.lane.b32.xlu0 %v2540_v23, %s13061_s15  ;;  %11823 = vmatpush3.bf16.xpose.msk.msra.mxu1 %vm13994_vm7, %v11821_v10 }
 0x6ea   :  { %11824 = vmatprep.subr.bf16.mxu1 %v17986_v0 }
 0x6ed   :  { %3022 = vrot.lane.b32.xlu0 %v2544_v43, %s13061_s15 }
 0x6f0   :  { %v2043_v30 = vpop.permute.xlu1 %2042 }
 0x6f1   :  { %10730 = vmatmul.mubr.msk.f32.gmra.mrb[64].mxu1 %vm1610_vm6, %v2043_v30 }
 0x6f2   :  { %10732 = vmatprep.mubr.msk.f32.mxu1 %vm13056_vm4, %v17987_v46  ;;  %11827 = vmatpush3.bf16.xpose.msk.msra.mxu1 %vm13994_vm7, %v11825_v7 }
 0x6f3   :  { %10799 = vmatprep.subr.mxu1 %v17987_v46 }
 0x6f4   :  { %v2045_v63 = vpop.permute.xlu1 %2044 }
 0x6f5   :  { %10733 = vmatmul.mubr.msk.f32.gmra.mrb[66].mxu1 %vm1610_vm6, %v2045_v63 }
 0x6f6   :  { %10735 = vmatprep.mubr.msk.f32.mxu1 %vm13056_vm4, %v17987_v46 }
 0x6f8   :  { %v2047_v34 = vpop.permute.xlu1 %2046 }
 0x6f9   :  { %v2595_v27 = vpop.permute.xlu0 %2594  ;;  %10736 = vmatmul.mubr.msk.f32.gmra.mrb[68].mxu1 %vm1610_vm6, %v2047_v34 }
 0x6fa   :  { %10801 = vmatprep.mubr.msk.f32.mxu1 %vm13056_vm4, %v17987_v46  ;;  %10800 = vmatpush3.xpose.msk.msra.mxu1 %vm1610_vm6, %v2595_v27 }
 0x6fb   :  { %11840 = vmatprep.subr.bf16.mxu1 %v17986_v0 }
 0x6fc   :  { %v2546_v44 = vpop.permute.xlu1 %2545 }
 0x6fd   :  { %v12251_v29 = vpop.permute.xlu0 %12250  ;;  %3024 = vrot.lane.b32.xlu1 %v2546_v44, %s13061_s15  ;;  %10802 = vmatmul.mubr.msk.f32.vlgmr.msra.gmra.mrb[70].mxu1 %vm1610_vm6, %v13983_v13 }
 0x6fe   :  { %v12253_v39 = vunpack.i.h.bf16 %v12251_v29  ;;  %v12252_v56 = vunpack.i.l.bf16 %v12251_v29  ;;  %10804 = vmatprep.mubr.msk.f32.mxu1 %vm13056_vm4, %v17987_v46 }
 0x700   :  { %v11841_v61 = vpack.c.bf16 %v12253_v39, %v12252_v56  ;;  %v2548_v62 = vpop.permute.xlu1 %2547 }
 0x701   :  { %v2550_v31 = vpop.permute.xlu0 %2549  ;;  %3026 = vrot.lane.b32.xlu0 %v2548_v62, %s13061_s15  ;;  %10805 = vmatmul.mubr.msk.f32.gmra.mrb[72].mxu1 %vm1610_vm6, %v14125_v47 }
 0x702   :  { %3028 = vrot.lane.b32.xlu1 %v2550_v31, %s13061_s15  ;;  %11843 = vmatpush3.bf16.xpose.msk.msra.mxu1 %vm13994_vm7, %v11841_v61 }
 0x703   :  { %11844 = vmatprep.subr.bf16.mxu1 %v17986_v0  ;;  %10807 = vmatprep.mubr.msk.f32.mxu1 %vm13056_vm4, %v17987_v46 }
 0x704   :  { %v12256_v48 = vpop.permute.xlu1 %12255 }
 0x705   :  { %v12258_v25 = vunpack.i.h.bf16 %v12256_v48  ;;  %v12257_v16 = vunpack.i.l.bf16 %v12256_v48  ;;  %v2552_v10 = vpop.permute.xlu0 %2551  ;;  %10808 = vmatmul.mubr.msk.f32.gmra.mrb[74].mxu1 %vm1610_vm6, %v2540_v23 }
 0x706   :  { %12275 = vrot.lane.b32.xlu1 %v13926_v18, %s13057_s10  ;;  %3030 = vrot.lane.b32.xlu0 %v2552_v10, %s13061_s15 }
 0x707   :  { %v11845_v13 = vpack.c.bf16 %v12258_v25, %v12257_v16  ;;  %10810 = vmatprep.mubr.msk.f32.mxu1 %vm13056_vm4, %v17987_v46 }
 0x708   :  { %v12261_v15 = vpop.permute.xlu1 %12260 }
 0x709   :  { %v12263_v47 = vunpack.i.h.bf16 %v12261_v15  ;;  %v12262_v37 = vunpack.i.l.bf16 %v12261_v15  ;;  %10811 = vmatmul.mubr.msk.f32.gmra.mrb[76].mxu1 %vm1610_vm6, %v14144_v40  ;;  %v12266_v30 = vpop.permute.xlu0 %12265 }
 0x70a   :  { %12285 = vrot.lane.b32.xlu1 %v13965_v38, %s13057_s10  ;;  %12270 = vrot.lane.b32.xlu0 %v13922_v8, %s13057_s10  ;;  %v12267_v40 = vunpack.i.l.bf16 %v12266_v30 }
 0x70b   :  { %11847 = vmatpush3.bf16.xpose.msk.msra.mxu1 %vm13994_vm7, %v11845_v13  ;;  %10813 = vmatprep.mubr.msk.f32.mxu1 %vm13056_vm4, %v17987_v46  ;;  %v11849_v23 = vpack.c.bf16 %v12263_v47, %v12262_v37 }
 0x70c   :  { %11848 = vmatprep.subr.bf16.mxu1 %v17986_v0 }
 0x70d   :  { %10814 = vmatmul.mubr.msk.f32.gmra.mrb[78].mxu1 %vm1610_vm6, %v2544_v43 }
 0x70e   :  { %12290 = vrot.lane.b32.xlu1 %v13922_v8, %s13062_s1  ;;  %12280 = vrot.lane.b32.xlu0 %v13935_v6, %s13057_s10  ;;  %v12268_v8 = vunpack.i.h.bf16 %v12266_v30 }
 0x70f   :  { %10816 = vmatprep.mubr.msk.f32.mxu1 %vm13056_vm4, %v17987_v46 }
 0x711   :  { %10817 = vmatmul.mubr.msk.f32.gmra.mrb[80].mxu1 %vm1610_vm6, %v2546_v44 }
 0x712   :  { %12300 = vrot.lane.b32.xlu1 %v13935_v6, %s13062_s1  ;;  %1882 = vrot.lane.b32.xlu0 %v13959_v42, %s13057_s10  ;;  %v11853_v6 = vpack.c.bf16 %v12268_v8, %v12267_v40 }
 0x713   :  { %11851 = vmatpush3.bf16.xpose.msk.msra.mxu1 %vm13994_vm7, %v11849_v23  ;;  %10819 = vmatprep.mubr.msk.f32.mxu1 %vm13056_vm4, %v17987_v46 }
 0x714   :  { %11852 = vmatprep.subr.bf16.mxu1 %v17986_v0 }
 0x715   :  { %10820 = vmatmul.mubr.msk.f32.gmra.mrb[82].mxu1 %vm1610_vm6, %v2548_v62 }
 0x716   :  { %2336 = vrot.lane.b32.xlu1 %v13959_v42, %s13062_s1  ;;  %12295 = vrot.lane.b32.xlu0 %v13926_v18, %s13062_s1  ;;  %v3049_v18 = vpop.permute.xlu1 %3048  ;;  %v3015_v42 = vpop.permute.xlu0 %3014 }
 0x717   :  { %10822 = vmatprep.mubr.msk.f32.mxu1 %vm13056_vm4, %v17987_v46 }
 0x719   :  { %10823 = vmatmul.mubr.msk.f32.gmra.mrb[84].mxu1 %vm1610_vm6, %v2550_v31 }
 0x71a   :  { %12315 = vrot.lane.b32.xlu1 %v14008_v45, %s13057_s10  ;;  %12305 = vrot.lane.b32.xlu0 %v13965_v38, %s13062_s1  ;;  %v3017_v38 = vpop.permute.xlu1 %3016 }
 0x71b   :  { %11855 = vmatpush3.bf16.xpose.msk.msra.mxu1 %vm13994_vm7, %v11853_v6  ;;  %10825 = vmatprep.mubr.msk.f32.mxu1 %vm13056_vm4, %v17987_v46 }
 0x71c   :  { %10889 = vmatprep.subr.mxu1 %v17987_v46 }
 0x71d   :  { %10826 = vmatmul.mubr.msk.f32.gmra.mrb[86].mxu1 %vm1610_vm6, %v2552_v10 }
 0x71e   :  { %12320 = vrot.lane.b32.xlu1 %v14032_v28, %s13057_s10  ;;  %12310 = vrot.lane.b32.xlu0 %v13988_v52, %s13057_s10 }
 0x71f   :  { %10891 = vmatprep.mubr.msk.f32.mxu1 %vm13056_vm4, %v17987_v46 }
 0x722   :  { %2866 = vrot.lane.b32.xlu1 %v14056_v35, %s13057_s10  ;;  %12325 = vrot.lane.b32.xlu0 %v14020_v55, %s13057_s10 }
 0x723   :  { %10890 = vmatpush3.xpose.msk.msra.mxu1 %vm1610_vm6, %v3049_v18 }
 0x726   :  { %10892 = vmatmul.mubr.msk.f32.vlgmr.msra.gmra.mrb[88].mxu1 %vm1610_vm6, %v3015_v42 }
 0x727   :  { %10894 = vmatprep.mubr.msk.f32.mxu1 %vm13056_vm4, %v17987_v46 }
 0x729   :  { %v3021_v25 = vpop.permute.xlu1 %3020 }
 0x72a   :  { %10895 = vmatmul.mubr.msk.f32.gmra.mrb[90].mxu1 %vm1610_vm6, %v3017_v38 }
 0x72b   :  { %10897 = vmatprep.mubr.msk.f32.mxu1 %vm13056_vm4, %v17987_v46 }
 0x750   :  { %v1713_v43 = vpop.f32.mrb[14].mxu0 }
 0x751   :  { %v14252_v7 = vmul.f32 0.25, %v1713_v43  ;;  %v10623_v63 = vpop.f32.mrb[15].mxu0 }
 0x753   :  { %v1767_v34 = vsel %vm1766_vm8, %v14252_v7, -inf }
 0x754   :  { %1768 = vmax.xlane.f32.xlu1 %v1767_v34  ;;  %v1718_v27 = vpop.f32.mrb[16].mxu0 }
 0x755   :  { %v10626_v44 = vpop.f32.mrb[17].mxu0  ;;  %v14283_v63 = vmul.f32 0.25, %v1718_v27 }
 0x757   :  { %v1770_v27 = vsel %vm1766_vm8, %v14283_v63, -inf }
 0x758   :  { %v1723_v29 = vpop.f32.mrb[18].mxu0 }
 0x759   :  { %v10629_v39 = vpop.f32.mrb[19].mxu0 }
 0x75b   :  { %v3019_v62 = vpop.permute.xlu0 %3018 }
 0x75c   :  { %v1728_v56 = vpop.f32.mrb[20].mxu0  ;;  %10898 = vmatmul.mubr.msk.f32.gmra.mrb[92].mxu1 %vm1610_vm6, %v3019_v62 }
 0x75d   :  { %v10632_v61 = vpop.f32.mrb[21].mxu0  ;;  %10900 = vmatprep.mubr.msk.f32.mxu1 %vm13056_vm4, %v17987_v46 }
 0x75e   :  { %v14290_v61 = vmul.f32 0.25, %v1723_v29 }
 0x75f   :  { %v3023_v13 = vpop.permute.xlu0 %3022 }
 0x760   :  { %v14256_v31 = vpop.f32.mrb[22].mxu0  ;;  %10901 = vmatmul.mubr.msk.f32.gmra.mrb[94].mxu1 %vm1610_vm6, %v3021_v25 }
 0x761   :  { %v10635_v48 = vpop.f32.mrb[23].mxu0  ;;  %10903 = vmatprep.mubr.msk.f32.mxu1 %vm13056_vm4, %v17987_v46 }
 0x764   :  { %v14261_v16 = vpop.f32.mrb[24].mxu0  ;;  %10904 = vmatmul.mubr.msk.f32.gmra.mrb[96].mxu1 %vm1610_vm6, %v3023_v13 }
 0x765   :  { %v10638_v10 = vpop.f32.mrb[25].mxu0  ;;  %10906 = vmatprep.mubr.msk.f32.mxu1 %vm13056_vm4, %v17987_v46 }
 0x768   :  { %v14266_v15 = vpop.f32.mrb[26].mxu0 }
 0x769   :  { %v10641_v47 = vpop.f32.mrb[27].mxu0 }
 0x76c   :  { %v14271_v37 = vpop.f32.mrb[28].mxu0 }
 0x76d   :  { %v10644_v23 = vpop.f32.mrb[29].mxu0 }
 0x76f   :  { %v3025_v30 = vpop.permute.xlu1 %3024 }
 0x770   :  { %v14273_v8 = vpop.f32.mrb[30].mxu0  ;;  %10907 = vmatmul.mubr.msk.f32.gmra.mrb[98].mxu1 %vm1610_vm6, %v3025_v30 }
 0x771   :  { %v10647_v40 = vpop.f32.mrb[31].mxu0  ;;  %10909 = vmatprep.mubr.msk.f32.mxu1 %vm13056_vm4, %v17987_v46 }
 0x772   :  { %v1773_v40 = vsel %vm1766_vm8, %v14290_v61, -inf }
 0x773   :  { %v3027_v6 = vpop.permute.xlu0 %3026 }
 0x774   :  { %v2168_v18 = vpop.f32.mrb[52].mxu1  ;;  %10910 = vmatmul.mubr.msk.f32.gmra.mrb[100].mxu1 %vm1610_vm6, %v3027_v6  ;;  %v3029_v43 = vpop.permute.xlu1 %3028 }
 0x775   :  { %v14279_v42 = vmul.f32 0.25, %v2168_v18  ;;  %v10713_v38 = vpop.f32.mrb[53].mxu1  ;;  %10912 = vmatprep.mubr.msk.f32.mxu1 %vm13056_vm4, %v17987_v46 }
 0x777   :  { %v2221_v34 = vsel %vm1766_vm8, %v14279_v42, -inf }
 0x778   :  { %v3031_v44 = vpop.permute.xlu0 %3030  ;;  %2222 = vmax.xlane.f32.xlu0 %v2221_v34  ;;  %10913 = vmatmul.mubr.msk.f32.gmra.mrb[102].mxu1 %vm1610_vm6, %v3029_v43  ;;  %v2173_v39 = vpop.f32.mrb[54].mxu1 }
 0x779   :  { %10915 = vmatprep.mubr.msk.f32.mxu1 %vm13056_vm4, %v17987_v46  ;;  %v14292_v62 = vmul.f32 0.25, %v2173_v39  ;;  %v10716_v48 = vpop.f32.mrb[55].mxu1  ;;  %v12276_v25 = vpop.permute.xlu1 %12275  ;;  %v14303_v39 = vmul.f32 0.25, %v1728_v56 }
 0x77a   :  { %v12278_v6 = vunpack.i.h.bf16 %v12276_v25  ;;  %v12277_v18 = vunpack.i.l.bf16 %v12276_v25 }
 0x77b   :  { %v2224_v13 = vsel %vm1766_vm8, %v14292_v62, -inf }
 0x77c   :  { %v12271_v10 = vpop.permute.xlu0 %12270  ;;  %10916 = vmatmul.mubr.msk.f32.gmra.mrb[104].mxu1 %vm1610_vm6, %v3031_v44  ;;  %1771 = vmax.xlane.f32.xlu0 %v1770_v27  ;;  %v2178_v30 = vpop.f32.mrb[56].mxu1 }
 0x77d   :  { %v12273_v47 = vunpack.i.h.bf16 %v12271_v10  ;;  %v12272_v23 = vunpack.i.l.bf16 %v12271_v10  ;;  %2225 = vmax.xlane.f32.xlu1 %v2224_v13  ;;  %v10719_v29 = vpop.f32.mrb[57].mxu1  ;;  %v14301_v43 = vmul.f32 0.25, %v2178_v30  ;;  %v11776_v10 = vpack.c.bf16 %v12278_v6, %v12277_v18 }
 0x77e   :  { %v1776_v6 = vsel %vm1766_vm8, %v14303_v39, -inf }
 0x77f   :  { %v11773_v38 = vpack.c.bf16 %v12273_v47, %v12272_v23  ;;  %v2227_v25 = vsel %vm1766_vm8, %v14301_v43, -inf  ;;  %v14311_v47 = vmul.f32 0.25, %v14256_v31  ;;  %v12286_v23 = vpop.permute.xlu1 %12285 }
 0x780   :  { %v12281_v34 = vpop.permute.xlu0 %12280  ;;  %1774 = vmax.xlane.f32.xlu0 %v1773_v40  ;;  %v2183_v44 = vpop.f32.mrb[58].mxu1  ;;  %v12288_v18 = vunpack.i.h.bf16 %v12286_v23 }
 0x781   :  { %11774 = vmatpush3.bf16.msra.mxu0 %v11773_v38  ;;  %v14305_v48 = vmul.f32 0.25, %v2183_v44  ;;  %v10722_v27 = vpop.f32.mrb[59].mxu1  ;;  %v12283_v13 = vunpack.i.h.bf16 %v12281_v34  ;;  %v12282_v29 = vunpack.i.l.bf16 %v12281_v34  ;;  %v12287_v38 = vunpack.i.l.bf16 %v12286_v23 }
 0x782   :  { %11775 = vmatprep.subr.bf16.mxu0 %v17986_v0  ;;  %v1779_v31 = vsel %vm1766_vm8, %v14311_v47, -inf }
 0x783   :  { %v2230_v30 = vsel %vm1766_vm8, %v14305_v48, -inf  ;;  %v11779_v34 = vpack.c.bf16 %v12283_v13, %v12282_v29  ;;  %v14331_v29 = vmul.f32 0.25, %v14266_v15 }
 0x784   :  { %2228 = vmax.xlane.f32.xlu0 %v2227_v25  ;;  %v2188_v56 = vpop.f32.mrb[60].mxu1  ;;  %2231 = vmax.xlane.f32.xlu1 %v2230_v30  ;;  %v14326_v30 = vmul.f32 0.25, %v14261_v16  ;;  %v1883_v16 = vpop.permute.xlu0 %1882 }
 0x785   :  { %11777 = vmatpush3.bf16.msra.mxu0 %v11776_v10  ;;  %v10725_v40 = vpop.f32.mrb[61].mxu1  ;;  %v14318_v44 = vmul.f32 0.25, %v2188_v56 }
 0x786   :  { %11778 = vmatprep.subr.bf16.mxu0 %v17986_v0  ;;  %v11782_v40 = vpack.c.bf16 %v12288_v18, %v12287_v38  ;;  %v1782_v56 = vsel %vm1766_vm8, %v14326_v30, -inf }
 0x787   :  { %v2233_v13 = vsel %vm1766_vm8, %v14318_v44, -inf }
 0x788   :  { %1777 = vmax.xlane.f32.xlu0 %v1776_v6  ;;  %v2193_v27 = vpop.f32.mrb[62].mxu1  ;;  %1780 = vmax.xlane.f32.xlu1 %v1779_v31  ;;  %v1785_v6 = vsel %vm1766_vm8, %v14331_v29, -inf }
 0x789   :  { %11780 = vmatpush3.bf16.msra.mxu0 %v11779_v34  ;;  %v14322_v10 = vmul.f32 0.25, %v2193_v27  ;;  %v10728_v25 = vpop.f32.mrb[63].mxu1  ;;  %v14344_v34 = vmul.f32 0.25, %v14271_v37 }
 0x78a   :  { %11781 = vmatprep.subr.bf16.mxu0 %v17986_v0 }
 0x78b   :  { %v2236_v23 = vsel %vm1766_vm8, %v14322_v10, -inf }
 0x78c   :  { %2234 = vmax.xlane.f32.xlu0 %v2233_v13  ;;  %2237 = vmax.xlane.f32.xlu1 %v2236_v23  ;;  %v14351_v13 = vmul.f32 0.25, %v14273_v8 }
 0x78d   :  { %11783 = vmatpush3.bf16.msra.mxu0 %v11782_v40 }
 0x78e   :  { %10664 = vmatprep.subr.mxu0 %v17987_v46 }
 0x790   :  { %1783 = vmax.xlane.f32.xlu0 %v1782_v56  ;;  %1786 = vmax.xlane.f32.xlu1 %v1785_v6  ;;  %v1788_v56 = vsel %vm1766_vm8, %v14344_v34, -inf }
 0x791   :  { %10665 = vmatpush3.msra.mxu0 %v1883_v16 }
 0x792   :  { %11800 = vmatprep.subr.bf16.mxu0 %v17986_v0 }
 0x7c4   :  { %v2198_v15 = vpop.f32.mrb[64].mxu1 }
 0x7c5   :  { %v14341_v18 = vmul.f32 0.25, %v2198_v15  ;;  %v10731_v38 = vpop.f32.mrb[65].mxu1 }
 0x7c6   :  { %v1791_v38 = vsel %vm1766_vm8, %v14351_v13, -inf }
 0x7c7   :  { %v2239_v31 = vsel %vm1766_vm8, %v14341_v18, -inf }
 0x7c8   :  { %v2203_v27 = vpop.f32.mrb[66].mxu1  ;;  %2240 = vmax.xlane.f32.xlu0 %v2239_v31 }
 0x7c9   :  { %v14348_v25 = vmul.f32 0.25, %v2203_v27  ;;  %v10734_v40 = vpop.f32.mrb[67].mxu1 }
 0x7cb   :  { %v2242_v23 = vsel %vm1766_vm8, %v14348_v25, -inf }
 0x7cc   :  { %v2208_v16 = vpop.f32.mrb[68].mxu1  ;;  %2243 = vmax.xlane.f32.xlu1 %v2242_v23  ;;  %1789 = vmax.xlane.f32.xlu0 %v1788_v56 }
 0x7cd   :  { %v14357_v37 = vmul.f32 0.25, %v2208_v16  ;;  %v10737_v6 = vpop.f32.mrb[69].mxu1 }
 0x7cf   :  { %v2245_v15 = vsel %vm1766_vm8, %v14357_v37, -inf }
 0x7d0   :  { %2246 = vmax.xlane.f32.xlu0 %v2245_v15  ;;  %1792 = vmax.xlane.f32.xlu1 %v1791_v38  ;;  %v2698_v8 = vpop.f32.mrb[70].mxu1 }
 0x7d1   :  { %v14363_v31 = vmul.f32 0.25, %v2698_v8  ;;  %v10803_v27 = vpop.f32.mrb[71].mxu1 }
 0x7d3   :  { %v2751_v40 = vsel %vm1766_vm8, %v14363_v31, -inf }
 0x7d4   :  { %v2703_v23 = vpop.f32.mrb[72].mxu1  ;;  %2752 = vmax.xlane.f32.xlu1 %v2751_v40 }
 0x7d5   :  { %v14367_v56 = vmul.f32 0.25, %v2703_v23  ;;  %v10806_v16 = vpop.f32.mrb[73].mxu1 }
 0x7d7   :  { %v2754_v6 = vsel %vm1766_vm8, %v14367_v56, -inf }
 0x7d8   :  { %v2708_v14 = vpop.f32.mrb[74].mxu1  ;;  %2755 = vmax.xlane.f32.xlu0 %v2754_v6 }
 0x7d9   :  { %v10809_v5 = vpop.f32.mrb[75].mxu1  ;;  %v14375_v59 = vmul.f32 0.25, %v2708_v14 }
 0x7dc   :  { %v2713_v15 = vpop.f32.mrb[76].mxu1 }
 0x7dd   :  { %v10812_v38 = vpop.f32.mrb[77].mxu1 }
 0x7e0   :  { %v2718_v1 = vpop.f32.mrb[78].mxu1 }
 0x7e1   :  { %v10815_v8 = vpop.f32.mrb[79].mxu1 }
 0x7e2   :  { %v14377_v8 = vmul.f32 0.25, %v2713_v15 }
 0x7e4   :  { %v2723_v9 = vpop.f32.mrb[80].mxu1 }
 0x7e5   :  { %v10818_v27 = vpop.f32.mrb[81].mxu1  ;;  %12335 = vrot.lane.b32.xlu1 %v14008_v45, %s13062_s1  ;;  %v2757_v45 = vsel %vm1766_vm8, %v14375_v59, -inf }
 0x7e8   :  { %v2728_v3 = vpop.f32.mrb[82].mxu1 }
 0x7e9   :  { %v10821_v40 = vpop.f32.mrb[83].mxu1  ;;  %v14379_v27 = vmul.f32 0.25, %v2728_v3  ;;  %v14393_v3 = vpop.permute.xlu1 %12290 }
 0x7ea   :  { %v14385_v40 = vmul.f32 0.25, %v2718_v1 }
 0x7eb   :  { %v2769_v14 = vsel %vm1766_vm8, %v14379_v27, -inf }
 0x7ec   :  { %v2733_v23 = vpop.f32.mrb[84].mxu1  ;;  %v2763_v1 = vsel %vm1766_vm8, %v14385_v40, -inf }
 0x7ed   :  { %v10824_v12 = vpop.f32.mrb[85].mxu1 }
 0x7ee   :  { %12330 = vrot.lane.b32.xlu0 %v13988_v52, %s13062_s1  ;;  %v14383_v12 = vpop.permute.xlu0 %12295 }
 0x7f0   :  { %v2738_v16 = vpop.f32.mrb[86].mxu1 }
 0x7f1   :  { %v10827_v41 = vpop.f32.mrb[87].mxu1  ;;  %v14387_v52 = vmul.f32 0.25, %v2738_v16 }
 0x7f2   :  { %v2760_v41 = vsel %vm1766_vm8, %v14377_v8, -inf  ;;  %v14395_v15 = vpop.permute.xlu0 %12305 }
 0x7f3   :  { %v2775_v16 = vsel %vm1766_vm8, %v14387_v52, -inf }
 0x7f9   :  { %v3152_v6 = vpop.f32.mrb[88].mxu1 }
 0x7fa   :  { %v10893_v5 = vpop.f32.mrb[89].mxu1 }
 0x7fb   :  { %v14397_v5 = vmul.f32 0.25, %v2723_v9  ;;  %v14411_v9 = vmul.f32 0.25, %v3152_v6 }
 0x7fd   :  { %v3157_v54 = vpop.f32.mrb[90].mxu1 }
 0x7fe   :  { %v10896_v38 = vpop.f32.mrb[91].mxu1 }
 0x7ff   :  { %v14403_v38 = vmul.f32 0.25, %v2733_v23  ;;  %v14419_v23 = vmul.f32 0.25, %v3157_v54 }
 0x801   :  { %v2772_v19 = vsel %vm1766_vm8, %v14403_v38, -inf  ;;  %v3208_v11 = vsel %vm1766_vm8, %v14419_v23, -inf }
 0x809   :  { %2758 = vmax.xlane.f32.xlu1 %v2757_v45  ;;  %v2766_v45 = vsel %vm1766_vm8, %v14397_v5, -inf }
 0x80d   :  { %2761 = vmax.xlane.f32.xlu0 %v2760_v41  ;;  %2770 = vmax.xlane.f32.xlu1 %v2769_v14  ;;  %v14407_v41 = vpop.permute.xlu1 %12300  ;;  %v14409_v14 = vpop.permute.xlu0 %12310 }
 0x811   :  { %2764 = vmax.xlane.f32.xlu0 %v2763_v1  ;;  %2776 = vmax.xlane.f32.xlu1 %v2775_v16  ;;  %v14415_v26 = vpop.permute.xlu1 %2336  ;;  %v14417_v1 = vpop.permute.xlu0 %12325  ;;  %v3205_v16 = vsel %vm1766_vm8, %v14411_v9, -inf }
 0x812   :  { %17988 = vst [vmem:[#allocation33_spill] sm:$0xff] %v14417_v1 }
 0x815   :  { %2767 = vmax.xlane.f32.xlu0 %v2766_v45  ;;  %v2223_v45 = vpop.xlane.xlu0 %2222  ;;  %v14425_v6 = vpop.permute.xlu1 %12315 }
 0x819   :  { %2773 = vmax.xlane.f32.xlu0 %v2772_v19  ;;  %v1772_v17 = vpop.xlane.xlu0 %1771  ;;  %v14427_v2 = vpop.permute.xlu1 %12320 }
 0x81a   :  { %17989 = vst [vmem:[#allocation34_spill] sm:$0xff] %v14427_v2  ;;  %v1795_v1 = vsub.f32 %v14283_v63, %v1772_v17 }
 0x81d   :  { %3206 = vmax.xlane.f32.xlu0 %v3205_v16  ;;  %v1775_v19 = vpop.xlane.xlu0 %1774  ;;  %v14429_v60 = vpop.permute.xlu1 %2866 }
 0x81e   :  { %17990 = vst [vmem:[#allocation35_spill] sm:$0xff] %v14429_v60 }
 0x821   :  { %3209 = vmax.xlane.f32.xlu0 %v3208_v11  ;;  %v1769_v49 = vpop.xlane.xlu1 %1768  ;;  %v14433_v32 = vpop.xlane.xlu0 %2228 }
 0x822   :  { %v1794_v21 = vsub.f32 %v14252_v7, %v1769_v49 }
 0x825   :  { %v2226_v57 = vpop.xlane.xlu1 %2225 }
 0x829   :  { %v2232_v58 = vpop.xlane.xlu1 %2231 }
 0x82a   :  { %v2251_v20 = vsub.f32 %v14305_v48, %v2232_v58  ;;  %v2249_v48 = vsub.f32 %v14292_v62, %v2226_v57 }
 0x82c   :  { %v2263_v49 = vmul.f32 1.442695, %v2251_v20 }
 0x82d   :  { %v1781_v20 = vpop.xlane.xlu1 %1780 }
 0x82f   :  { %v3162_v50 = vpop.f32.mrb[92].mxu1 }
 0x830   :  { %v14431_v54 = vmul.f32 0.25, %v3162_v50  ;;  %v10899_v33 = vpop.f32.mrb[93].mxu1  ;;  %v14441_v50 = vpop.xlane.xlu0 %1777 }
 0x832   :  { %v3211_v16 = vsel %vm1766_vm8, %v14431_v54, -inf }
 0x833   :  { %v3167_v53 = vpop.f32.mrb[94].mxu1  ;;  %3212 = vmax.xlane.f32.xlu1 %v3211_v16 }
 0x834   :  { %v14437_v11 = vmul.f32 0.25, %v3167_v53  ;;  %v10902_v51 = vpop.f32.mrb[95].mxu1  ;;  %v1803_v53 = vmul.f32 1.442695, %v1794_v21  ;;  %v2235_v4 = vpop.xlane.xlu0 %2234  ;;  %v1805_v21 = vmul.f32 1.442695, %v1795_v1  ;;  %v1796_v1 = vsub.f32 %v14290_v61, %v1775_v19 }
 0x835   :  { %v2248_v51 = vsub.f32 %v14279_v42, %v2223_v45  ;;  %v2252_v7 = vsub.f32 %v14318_v44, %v2235_v4  ;;  %v2259_v45 = vmul.f32 1.442695, %v2249_v48  ;;  %v1797_v48 = vsub.f32 %v14303_v39, %v14441_v50 }
 0x836   :  { %v3214_v24 = vsel %vm1766_vm8, %v14437_v11, -inf  ;;  %12592 = vpow2.f32 %v1803_v53  ;;  %v1798_v39 = vsub.f32 %v14311_v47, %v1781_v20 }
 0x837   :  { %v3172_v22 = vpop.f32.mrb[96].mxu1  ;;  %3215 = vmax.xlane.f32.xlu0 %v3214_v24  ;;  %v2257_v24 = vmul.f32 1.442695, %v2248_v51 }
 0x838   :  { %v14443_v33 = vmul.f32 0.25, %v3172_v22  ;;  %v10905_v36 = vpop.f32.mrb[97].mxu1 }
 0x839   :  { %12594 = vpow2.f32 %v2257_v24  ;;  %v1807_v24 = vmul.f32 1.442695, %v1796_v1 }
 0x83a   :  { %v3217_v16 = vsel %vm1766_vm8, %v14443_v33, -inf  ;;  %12596 = vpow2.f32 %v2263_v49  ;;  %v2238_v49 = vpop.xlane.xlu1 %2237 }
 0x83b   :  { %3218 = vmax.xlane.f32.xlu1 %v3217_v16  ;;  %12598 = vpow2.f32 %v1805_v21 }
 0x840   :  { %v14466_v57 = vpop.eup %12592 }
 0x841   :  { %v1821_v19 = vsel %vm1766_vm8, %v14466_v57, 0.0 }
 0x843   :  { %v3177_v60 = vpop.f32.mrb[98].mxu1 }
 0x844   :  { %v14451_v22 = vmul.f32 0.25, %v3177_v60  ;;  %v10908_v36 = vpop.f32.mrb[99].mxu1  ;;  %v2265_v60 = vmul.f32 1.442695, %v2252_v7  ;;  %v1784_v7 = vpop.xlane.xlu0 %1783 }
 0x845   :  { %v2250_v36 = vsub.f32 %v14301_v43, %v14433_v32 }
 0x846   :  { %v3220_v16 = vsel %vm1766_vm8, %v14451_v22, -inf  ;;  %12600 = vpow2.f32 %v2265_v60 }
 0x847   :  { %v3182_v2 = vpop.f32.mrb[100].mxu1  ;;  %3221 = vmax.xlane.f32.xlu1 %v3220_v16  ;;  %12602 = vpow2.f32 %v2259_v45  ;;  %v14472_v16 = vpop.eup %12594 }
 0x848   :  { %v14456_v58 = vmul.f32 0.25, %v3182_v2  ;;  %v10911_v42 = vpop.f32.mrb[101].mxu1  ;;  %v14478_v21 = vpop.eup %12596  ;;  %12604 = vpow2.f32 %v1807_v24 }
 0x849   :  { %v2261_v42 = vmul.f32 1.442695, %v2250_v36  ;;  %v14482_v43 = vpop.eup %12598  ;;  %v1787_v45 = vpop.xlane.xlu1 %1786  ;;  %v1811_v36 = vmul.f32 1.442695, %v1798_v39 }
 0x84a   :  { %v3223_v17 = vsel %vm1766_vm8, %v14456_v58, -inf }
 0x84b   :  { %v3187_v63 = vpop.f32.mrb[102].mxu1  ;;  %3224 = vmax.xlane.f32.xlu0 %v3223_v17  ;;  %v2284_v17 = vsel %vm1766_vm8, %v14478_v21, 0.0  ;;  %12606 = vpow2.f32 %v2261_v42 }
 0x84c   :  { %v14461_v4 = vmul.f32 0.25, %v3187_v63  ;;  %v10914_v44 = vpop.f32.mrb[103].mxu1  ;;  %v2275_v63 = vsel %vm1766_vm8, %v14472_v16, 0.0 }
 0x84e   :  { %v3226_v2 = vsel %vm1766_vm8, %v14461_v4, -inf }
 0x84f   :  { %v3192_v62 = vpop.f32.mrb[104].mxu1  ;;  %3227 = vmax.xlane.f32.xlu1 %v3226_v2  ;;  %v1809_v2 = vmul.f32 1.442695, %v1797_v48 }
 0x850   :  { %v14468_v51 = vmul.f32 0.25, %v3192_v62  ;;  %v10917_v53 = vpop.f32.mrb[105].mxu1  ;;  %v14489_v44 = vpop.eup %12600  ;;  %v1824_v62 = vsel %vm1766_vm8, %v14482_v43, 0.0 }
 0x851   :  { %v14496_v53 = vpop.eup %12602 }
 0x852   :  { %v3229_v61 = vsel %vm1766_vm8, %v14468_v51, -inf  ;;  %v2278_v20 = vsel %vm1766_vm8, %v14496_v53, 0.0  ;;  %v14502_v42 = vpop.eup %12604 }
 0x853   :  { %3230 = vmax.xlane.f32.xlu0 %v3229_v61  ;;  %1822 = vadd.xlane.f32.xlu1 %v1821_v19  ;;  %v1799_v61 = vsub.f32 %v14326_v30, %v1784_v7 }
 0x855   :  { %v2241_v32 = vpop.xlane.xlu0 %2240  ;;  %v14507_v30 = vpop.eup %12606 }
 0x856   :  { %v2254_v60 = vsub.f32 %v14341_v18, %v2241_v32  ;;  %v2287_v18 = vsel %vm1766_vm8, %v14489_v44, 0.0  ;;  %v2253_v32 = vsub.f32 %v14322_v10, %v2238_v49  ;;  %v2281_v49 = vsel %vm1766_vm8, %v14507_v30, 0.0 }
 0x857   :  { %2285 = vadd.xlane.f32.xlu0 %v2284_v17  ;;  %2276 = vadd.xlane.f32.xlu1 %v2275_v63  ;;  %v1827_v63 = vsel %vm1766_vm8, %v14502_v42, 0.0 }
 0x858   :  { %v2269_v1 = vmul.f32 1.442695, %v2254_v60  ;;  %v1813_v60 = vmul.f32 1.442695, %v1799_v61  ;;  %v2267_v7 = vmul.f32 1.442695, %v2253_v32 }
 0x859   :  { %v1790_v50 = vpop.xlane.xlu0 %1789  ;;  %v2244_v24 = vpop.xlane.xlu1 %2243 }
 0x85a   :  { %12608 = vpow2.f32 %v2269_v1  ;;  %v1800_v1 = vsub.f32 %v14331_v29, %v1787_v45  ;;  %v1801_v61 = vsub.f32 %v14344_v34, %v1790_v50 }
 0x85b   :  { %2288 = vadd.xlane.f32.xlu0 %v2287_v18  ;;  %1825 = vadd.xlane.f32.xlu1 %v1824_v62  ;;  %12610 = vpow2.f32 %v1809_v2 }
 0x85c   :  { %12612 = vpow2.f32 %v1811_v36  ;;  %v1815_v36 = vmul.f32 1.442695, %v1800_v1  ;;  %v1817_v32 = vmul.f32 1.442695, %v1801_v61 }
 0x85d   :  { %v2247_v19 = vpop.xlane.xlu0 %2246  ;;  %v1793_v17 = vpop.xlane.xlu1 %1792 }
 0x85e   :  { %v2256_v47 = vsub.f32 %v14357_v37, %v2247_v19 }
 0x85f   :  { %2279 = vadd.xlane.f32.xlu1 %v2278_v20 }
 0x860   :  { %v2273_v48 = vmul.f32 1.442695, %v2256_v47 }
 0x861   :  { %v2753_v2 = vpop.xlane.xlu1 %2752 }
 0x862   :  { %12614 = vpow2.f32 %v2273_v48  ;;  %v2778_v10 = vsub.f32 %v14363_v31, %v2753_v2  ;;  %v2255_v48 = vsub.f32 %v14348_v25, %v2244_v24 }
 0x863   :  { %1828 = vadd.xlane.f32.xlu1 %v1827_v63  ;;  %12616 = vpow2.f32 %v1813_v60  ;;  %v1802_v63 = vsub.f32 %v14351_v13, %v1793_v17 }
 0x864   :  { %v14509_v37 = vpop.eup %12608  ;;  %v2787_v62 = vmul.f32 1.442695, %v2778_v10  ;;  %12618 = vpow2.f32 %v2267_v7  ;;  %v2271_v60 = vmul.f32 1.442695, %v2255_v48 }
 0x865   :  { %v2293_v39 = vsel %vm1766_vm8, %v14509_v37, 0.0  ;;  %v14517_v18 = vpop.eup %12610  ;;  %v2756_v19 = vpop.xlane.xlu0 %2755  ;;  %v1819_v1 = vmul.f32 1.442695, %v1802_v63 }
 0x866   :  { %2294 = vadd.xlane.f32.xlu0 %v2293_v39  ;;  %12620 = vpow2.f32 %v2787_v62  ;;  %v2779_v29 = vsub.f32 %v14367_v56, %v2756_v19  ;;  %v1830_v45 = vsel %vm1766_vm8, %v14517_v18, 0.0  ;;  %v14523_v31 = vpop.eup %12612 }
 0x867   :  { %2282 = vadd.xlane.f32.xlu1 %v2281_v49  ;;  %12622 = vpow2.f32 %v1815_v36  ;;  %v1833_v56 = vsel %vm1766_vm8, %v14523_v31, 0.0 }
 0x868   :  { %v2789_v20 = vmul.f32 1.442695, %v2779_v29 }
 0x869   :  { %v14569_v48 = vpop.permute.xlu0 %12330 }
 0x86a   :  { %12624 = vpow2.f32 %v2789_v20  ;;  %v14565_v20 = vpop.permute.xlu1 %12335 }
 0x86b   :  { %1831 = vadd.xlane.f32.xlu1 %v1830_v45  ;;  %12626 = vpow2.f32 %v1817_v32 }
 0x86c   :  { %v14525_v47 = vpop.eup %12614  ;;  %12628 = vpow2.f32 %v2271_v60 }
 0x86d   :  { %v2299_v34 = vsel %vm1766_vm8, %v14525_v47, 0.0  ;;  %v14532_v50 = vpop.eup %12616  ;;  %12630 = vpow2.f32 %v1819_v1 }
 0x86e   :  { %2300 = vadd.xlane.f32.xlu0 %v2299_v34  ;;  %v1836_v7 = vsel %vm1766_vm8, %v14532_v50, 0.0  ;;  %v14537_v25 = vpop.eup %12618 }
 0x86f   :  { %1834 = vadd.xlane.f32.xlu1 %v1833_v56  ;;  %v2290_v39 = vsel %vm1766_vm8, %v14537_v25, 0.0 }
 0x870   :  { %v14539_v24 = vpop.eup %12620 }
 0x871   :  { %v2805_v2 = vsel %vm1766_vm8, %v14539_v24, 0.0  ;;  %v14545_v10 = vpop.eup %12622 }
 0x872   :  { %2806 = vadd.xlane.f32.xlu0 %v2805_v2  ;;  %v1839_v49 = vsel %vm1766_vm8, %v14545_v10, 0.0 }
 0x873   :  { %1837 = vadd.xlane.f32.xlu1 %v1836_v7 }
 0x874   :  { %v14547_v13 = vpop.eup %12624 }
 0x875   :  { %v2808_v17 = vsel %vm1766_vm8, %v14547_v13, 0.0  ;;  %v14553_v62 = vpop.eup %12626 }
 0x876   :  { %2809 = vadd.xlane.f32.xlu0 %v2808_v17  ;;  %v1842_v36 = vsel %vm1766_vm8, %v14553_v62, 0.0  ;;  %v14557_v61 = vpop.eup %12628 }
 0x877   :  { %2291 = vadd.xlane.f32.xlu1 %v2290_v39  ;;  %v2296_v19 = vsel %vm1766_vm8, %v14557_v61, 0.0  ;;  %v14561_v29 = vpop.eup %12630 }
 0x878   :  { %v1845_v45 = vsel %vm1766_vm8, %v14561_v29, 0.0 }
 0x87b   :  { %1840 = vadd.xlane.f32.xlu1 %v1839_v49 }
 0x87f   :  { %1843 = vadd.xlane.f32.xlu1 %v1842_v36 }
 0x883   :  { %2297 = vadd.xlane.f32.xlu1 %v2296_v19 }
 0x887   :  { %1846 = vadd.xlane.f32.xlu1 %v1845_v45 }
 0x896   :  { %v2759_v32 = vpop.xlane.xlu1 %2758 }
 0x897   :  { %v2780_v34 = vsub.f32 %v14375_v59, %v2759_v32 }
 0x898   :  { %12340 = vrot.lane.b32.xlu1 %v14032_v28, %s13062_s1 }
 0x899   :  { %v2791_v56 = vmul.f32 1.442695, %v2780_v34 }
 0x89a   :  { %v2762_v60 = vpop.xlane.xlu0 %2761  ;;  %v2771_v63 = vpop.xlane.xlu1 %2770 }
 0x89b   :  { %12632 = vpow2.f32 %v2791_v56  ;;  %v2784_v7 = vsub.f32 %v14379_v27, %v2771_v63  ;;  %v2781_v28 = vsub.f32 %v14377_v8, %v2762_v60 }
 0x89d   :  { %v2799_v17 = vmul.f32 1.442695, %v2784_v7  ;;  %v2793_v32 = vmul.f32 1.442695, %v2781_v28 }
 0x89e   :  { %v2765_v1 = vpop.xlane.xlu0 %2764  ;;  %v2777_v2 = vpop.xlane.xlu1 %2776 }
 0x89f   :  { %v2782_v39 = vsub.f32 %v14385_v40, %v2765_v1  ;;  %v2786_v36 = vsub.f32 %v14387_v52, %v2777_v2 }
 0x8a1   :  { %v2795_v49 = vmul.f32 1.442695, %v2782_v39  ;;  %v2803_v59 = vmul.f32 1.442695, %v2786_v36 }
 0x8a2   :  { %v2768_v19 = vpop.xlane.xlu0 %2767 }
 0x8a3   :  { %12634 = vpow2.f32 %v2795_v49  ;;  %v2783_v34 = vsub.f32 %v14397_v5, %v2768_v19 }
 0x8a4   :  { %12636 = vpow2.f32 %v2799_v17 }
 0x8a5   :  { %v14576_v45 = vpop.eup %12632  ;;  %12638 = vpow2.f32 %v2803_v59  ;;  %v2797_v40 = vmul.f32 1.442695, %v2783_v34 }
 0x8a6   :  { %v2774_v27 = vpop.xlane.xlu0 %2773  ;;  %v2811_v56 = vsel %vm1766_vm8, %v14576_v45, 0.0  ;;  %12640 = vpow2.f32 %v2793_v32 }
 0x8a7   :  { %2812 = vadd.xlane.f32.xlu0 %v2811_v56  ;;  %v2785_v52 = vsub.f32 %v14403_v38, %v2774_v27  ;;  %12642 = vpow2.f32 %v2797_v40 }
 0x8a9   :  { %v2801_v1 = vmul.f32 1.442695, %v2785_v52 }
 0x8aa   :  { %v3207_v8 = vpop.xlane.xlu0 %3206 }
 0x8ab   :  { %v3232_v60 = vsub.f32 %v14411_v9, %v3207_v8 }
 0x8ad   :  { %v14583_v63 = vpop.eup %12634  ;;  %v3241_v7 = vmul.f32 1.442695, %v3232_v60 }
 0x8ae   :  { %v3210_v2 = vpop.xlane.xlu0 %3209  ;;  %v2817_v5 = vsel %vm1766_vm8, %v14583_v63, 0.0  ;;  %v14587_v39 = vpop.eup %12636 }
 0x8af   :  { %12644 = vpow2.f32 %v3241_v7  ;;  %v3233_v17 = vsub.f32 %v14419_v23, %v3210_v2  ;;  %2818 = vadd.xlane.f32.xlu0 %v2817_v5  ;;  %v2823_v38 = vsel %vm1766_vm8, %v14587_v39, 0.0  ;;  %v14592_v9 = vpop.eup %12638 }
 0x8b0   :  { %12646 = vpow2.f32 %v2801_v1  ;;  %v14594_v36 = vpop.eup %12640  ;;  %v2829_v28 = vsel %vm1766_vm8, %v14592_v9, 0.0 }
 0x8b1   :  { %v3243_v49 = vmul.f32 1.442695, %v3233_v17  ;;  %v2814_v19 = vsel %vm1766_vm8, %v14594_v36, 0.0  ;;  %v14600_v23 = vpop.eup %12642 }
 0x8b2   :  { %v2820_v34 = vsel %vm1766_vm8, %v14600_v23, 0.0 }
 0x8b3   :  { %12648 = vpow2.f32 %v3243_v49  ;;  %2824 = vadd.xlane.f32.xlu0 %v2823_v38 }
 0x8b7   :  { %2830 = vadd.xlane.f32.xlu0 %v2829_v28 }
 0x8b9   :  { %v14602_v59 = vpop.eup %12644 }
 0x8ba   :  { %v3259_v32 = vsel %vm1766_vm8, %v14602_v59, 0.0  ;;  %v14608_v27 = vpop.eup %12646 }
 0x8bb   :  { %3260 = vadd.xlane.f32.xlu0 %v3259_v32  ;;  %v2826_v52 = vsel %vm1766_vm8, %v14608_v27, 0.0 }
 0x8bc   :  { %2815 = vadd.xlane.f32.xlu1 %v2814_v19 }
 0x8bd   :  { %v14610_v56 = vpop.eup %12648 }
 0x8be   :  { %v3262_v40 = vsel %vm1766_vm8, %v14610_v56, 0.0 }
 0x8bf   :  { %3263 = vadd.xlane.f32.xlu0 %v3262_v40 }
 0x8c0   :  { %2821 = vadd.xlane.f32.xlu1 %v2820_v34  ;;  %v3213_v8 = vpop.xlane.xlu1 %3212 }
 0x8c1   :  { %v3234_v60 = vsub.f32 %v14431_v54, %v3213_v8 }
 0x8c3   :  { %v3245_v7 = vmul.f32 1.442695, %v3234_v60 }
 0x8c4   :  { %2827 = vadd.xlane.f32.xlu1 %v2826_v52  ;;  %v3216_v1 = vpop.xlane.xlu0 %3215 }
 0x8c5   :  { %12650 = vpow2.f32 %v3245_v7  ;;  %v3235_v2 = vsub.f32 %v14437_v11, %v3216_v1 }
 0x8c7   :  { %v3247_v5 = vmul.f32 1.442695, %v3235_v2 }
 0x8c8   :  { %v3219_v17 = vpop.xlane.xlu1 %3218 }
 0x8c9   :  { %12652 = vpow2.f32 %v3247_v5  ;;  %v3236_v49 = vsub.f32 %v14443_v33, %v3219_v17 }
 0x8cb   :  { %v3249_v38 = vmul.f32 1.442695, %v3236_v49 }
 0x8cd   :  { %12654 = vpow2.f32 %v3249_v38 }
 0x8cf   :  { %v14619_v28 = vpop.eup %12650 }
 0x8d0   :  { %v3265_v32 = vsel %vm1766_vm8, %v14619_v28, 0.0 }
 0x8d1   :  { %3266 = vadd.xlane.f32.xlu0 %v3265_v32  ;;  %v12292_v32 = vunpack.i.l.bf16 %v14393_v3 }
 0x8d3   :  { %v14624_v34 = vpop.eup %12652 }
 0x8d4   :  { %v3222_v19 = vpop.xlane.xlu1 %3221  ;;  %v3268_v52 = vsel %vm1766_vm8, %v14624_v34, 0.0 }
 0x8d5   :  { %v3237_v54 = vsub.f32 %v14451_v22, %v3222_v19  ;;  %3269 = vadd.xlane.f32.xlu1 %v3268_v52  ;;  %v12293_v19 = vunpack.i.h.bf16 %v14393_v3  ;;  %v12303_v3 = vunpack.i.h.bf16 %v14407_v41 }
 0x8d7   :  { %v3251_v40 = vmul.f32 1.442695, %v3237_v54  ;;  %v14629_v8 = vpop.eup %12654  ;;  %v11801_v52 = vpack.c.bf16 %v12293_v19, %v12292_v32  ;;  %v12308_v19 = vunpack.i.h.bf16 %v14395_v15  ;;  %v12307_v32 = vunpack.i.l.bf16 %v14395_v15 }
 0x8d8   :  { %v3225_v11 = vpop.xlane.xlu0 %3224  ;;  %v3271_v1 = vsel %vm1766_vm8, %v14629_v8, 0.0 }
 0x8d9   :  { %12656 = vpow2.f32 %v3251_v40  ;;  %v3238_v33 = vsub.f32 %v14456_v58, %v3225_v11  ;;  %3272 = vadd.xlane.f32.xlu0 %v3271_v1 }
 0x8db   :  { %v3253_v60 = vmul.f32 1.442695, %v3238_v33  ;;  %v12298_v33 = vunpack.i.h.bf16 %v14383_v12 }
 0x8dc   :  { %v3228_v7 = vpop.xlane.xlu1 %3227 }
 0x8dd   :  { %12658 = vpow2.f32 %v3253_v60  ;;  %v12297_v60 = vunpack.i.l.bf16 %v14383_v12 }
 0x8e0   :  { %v1823_v22 = vpop.xlane.xlu1 %1822 }
 0x8e1   :  { %12660 = vrcp.f32 %v1823_v22  ;;  %v12302_v22 = vunpack.i.l.bf16 %v14407_v41 }
 0x8e3   :  { %v14633_v2 = vpop.eup %12656 }
 0x8e4   :  { %v14635_v5 = vpop.xlane.xlu1 %2276  ;;  %v3274_v17 = vsel %vm1766_vm8, %v14633_v2, 0.0 }
 0x8e5   :  { %3275 = vadd.xlane.f32.xlu1 %v3274_v17 }
 0x8e7   :  { %v14639_v58 = vpop.eup %12658 }
 0x8e8   :  { %v1826_v49 = vpop.xlane.xlu1 %1825  ;;  %v3277_v38 = vsel %vm1766_vm8, %v14639_v58, 0.0 }
 0x8e9   :  { %3278 = vadd.xlane.f32.xlu1 %v3277_v38  ;;  %12662 = vrcp.f32 %v1826_v49  ;;  %v11807_v38 = vpack.c.bf16 %v12303_v3, %v12302_v22 }
 0x8eb   :  { %v12661_v54 = vpop.eup %12660 }
 0x8ec   :  { %v14645_v40 = vpop.xlane.xlu1 %2279  ;;  %v1857_v11 = vmul.f32 %v12661_v54, %v14466_v57  ;;  %v11804_v57 = vpack.c.bf16 %v12298_v33, %v12297_v60  ;;  %v3239_v54 = vsub.f32 %v14461_v4, %v3228_v7  ;;  %v3231_v7 = vpop.xlane.xlu0 %3230 }
 0x8ee   :  { %10667 = vmatmul.mubr.msk.f32.vlgmr.msra.gmra.mrb[32].mxu0 %vm1766_vm8, %v1857_v11 }
 0x8ef   :  { %11802 = vmatpush3.bf16.msra.mxu0 %v11801_v52  ;;  %10669 = vmatprep.mubr.msk.f32.mxu0 %vm13056_vm4, %v17987_v46  ;;  %v3255_v52 = vmul.f32 1.442695, %v3239_v54 }
 0x8f0   :  { %v1829_v1 = vpop.xlane.xlu1 %1828  ;;  %11803 = vmatprep.subr.bf16.mxu0 %v17986_v0  ;;  %12345 = vrot.lane.b32.xlu0 %v14020_v55, %s13062_s1  ;;  %v11810_v55 = vpack.c.bf16 %v12308_v19, %v12307_v32 }
 0x8f1   :  { %12664 = vrcp.f32 %v1829_v1  ;;  %v3240_v1 = vsub.f32 %v14468_v51, %v3231_v7  ;;  %v17991_v7 = vld [vmem:[#allocation34_spill] sm:$0xff] }
 0x8f3   :  { %v12663_v17 = vpop.eup %12662  ;;  %11805 = vmatpush3.bf16.msra.mxu0 %v11804_v57 }
 0x8f4   :  { %v14658_v12 = vpop.xlane.xlu1 %2282  ;;  %11806 = vmatprep.subr.bf16.mxu0 %v17986_v0  ;;  %v1858_v49 = vmul.f32 %v12663_v17, %v14482_v43 }
 0x8f6   :  { %10670 = vmatmul.mubr.msk.f32.gmra.mrb[34].mxu0 %vm1766_vm8, %v1858_v49 }
 0x8f7   :  { %11808 = vmatpush3.bf16.msra.mxu0 %v11807_v38  ;;  %10672 = vmatprep.mubr.msk.f32.mxu0 %vm13056_vm4, %v17987_v46 }
 0x8f8   :  { %v1832_v41 = vpop.xlane.xlu1 %1831  ;;  %11809 = vmatprep.subr.bf16.mxu0 %v17986_v0 }
 0x8f9   :  { %12666 = vrcp.f32 %v1832_v41 }
 0x8fa   :  { %3320 = vrot.lane.b32.xlu1 %v14056_v35, %s13062_s1 }
 0x8fb   :  { %v12665_v43 = vpop.eup %12664  ;;  %11811 = vmatpush3.bf16.msra.mxu0 %v11810_v55 }
 0x8fc   :  { %v1835_v11 = vpop.xlane.xlu1 %1834  ;;  %v1859_v15 = vmul.f32 %v12665_v43, %v14502_v42  ;;  %10754 = vmatprep.subr.mxu0 %v17987_v46  ;;  %v2286_v43 = vpop.xlane.xlu0 %2285 }
 0x8fd   :  { %12668 = vrcp.f32 %v1835_v11  ;;  %v12313_v11 = vunpack.i.h.bf16 %v14409_v14 }
 0x8fe   :  { %10673 = vmatmul.mubr.msk.f32.gmra.mrb[36].mxu0 %vm1766_vm8, %v1859_v15  ;;  %v12312_v15 = vunpack.i.l.bf16 %v14409_v14 }
 0x8ff   :  { %10675 = vmatprep.mubr.msk.f32.mxu0 %vm13056_vm4, %v17987_v46  ;;  %10755 = vmatpush3.msra.mxu0 %v14415_v26 }
 0x900   :  { %v1838_v33 = vpop.xlane.xlu1 %1837  ;;  %11828 = vmatprep.subr.bf16.mxu0 %v17986_v0 }
 0x901   :  { %12670 = vrcp.f32 %v1838_v33 }
 0x902   :  { %12672 = vpow2.f32 %v3255_v52  ;;  %v2289_v52 = vpop.xlane.xlu0 %2288 }
 0x903   :  { %v12667_v35 = vpop.eup %12666 }
 0x904   :  { %v14678_v4 = vpop.xlane.xlu1 %2291  ;;  %v1860_v42 = vmul.f32 %v12667_v35, %v14517_v18  ;;  %v3257_v18 = vmul.f32 1.442695, %v3240_v1  ;;  %v12318_v35 = vunpack.i.h.bf16 %v14425_v6  ;;  %v12322_v1 = vunpack.i.l.bf16 %v17991_v7 }
 0x906   :  { %10676 = vmatmul.mubr.msk.f32.gmra.mrb[38].mxu0 %vm1766_vm8, %v1860_v42 }
 0x907   :  { %v12669_v60 = vpop.eup %12668  ;;  %10678 = vmatprep.mubr.msk.f32.mxu0 %vm13056_vm4, %v17987_v46 }
 0x908   :  { %v1841_v26 = vpop.xlane.xlu1 %1840  ;;  %v1861_v3 = vmul.f32 %v12669_v60, %v14523_v31  ;;  %v12323_v60 = vunpack.i.h.bf16 %v17991_v7 }
 0x909   :  { %12674 = vrcp.f32 %v1841_v26 }
 0x90a   :  { %10679 = vmatmul.mubr.msk.f32.gmra.mrb[40].mxu0 %vm1766_vm8, %v1861_v3  ;;  %v11835_v3 = vpack.c.bf16 %v12323_v60, %v12322_v1 }
 0x90b   :  { %v12671_v22 = vpop.eup %12670  ;;  %10681 = vmatprep.mubr.msk.f32.mxu0 %vm13056_vm4, %v17987_v46 }
 0x90c   :  { %v1844_v57 = vpop.xlane.xlu1 %1843  ;;  %v1862_v17 = vmul.f32 %v12671_v22, %v14532_v50  ;;  %v14690_v49 = vpop.eup %12672  ;;  %v17992_v22 = vld [vmem:[#allocation33_spill] sm:$0xff] }
 0x90d   :  { %12676 = vrcp.f32 %v1844_v57  ;;  %v3280_v31 = vsel %vm1766_vm8, %v14690_v49, 0.0  ;;  %v12327_v57 = vunpack.i.l.bf16 %v17992_v22 }
 0x90e   :  { %10682 = vmatmul.mubr.msk.f32.gmra.mrb[42].mxu0 %vm1766_vm8, %v1862_v17  ;;  %12678 = vpow2.f32 %v3257_v18  ;;  %v12328_v18 = vunpack.i.h.bf16 %v17992_v22 }
 0x90f   :  { %10684 = vmatprep.mubr.msk.f32.mxu0 %vm13056_vm4, %v17987_v46  ;;  %3281 = vadd.xlane.f32.xlu0 %v3280_v31 }
 0x910   :  { %v14695_v51 = vpop.xlane.xlu1 %2297  ;;  %v11838_v31 = vpack.c.bf16 %v12328_v18, %v12327_v57 }
 0x913   :  { %v12675_v38 = vpop.eup %12674 }
 0x914   :  { %v1847_v19 = vpop.xlane.xlu1 %1846  ;;  %v1863_v32 = vmul.f32 %v12675_v38, %v14545_v10 }
 0x915   :  { %12680 = vrcp.f32 %v1847_v19 }
 0x916   :  { %10685 = vmatmul.mubr.msk.f32.gmra.mrb[44].mxu0 %vm1766_vm8, %v1863_v32  ;;  %12682 = vrcp.f32 %v14635_v5 }
 0x917   :  { %v12677_v50 = vpop.eup %12676  ;;  %10687 = vmatprep.mubr.msk.f32.mxu0 %vm13056_vm4, %v17987_v46  ;;  %12684 = vrcp.f32 %v14645_v40 }
 0x918   :  { %v1864_v41 = vmul.f32 %v12677_v50, %v14553_v62  ;;  %v14705_v55 = vpop.eup %12678  ;;  %12686 = vrcp.f32 %v14658_v12  ;;  %v12317_v12 = vunpack.i.l.bf16 %v14425_v6  ;;  %v2295_v6 = vpop.xlane.xlu0 %2294 }
 0x919   :  { %v3283_v10 = vsel %vm1766_vm8, %v14705_v55, 0.0  ;;  %12688 = vrcp.f32 %v2286_v43 }
 0x91a   :  { %10688 = vmatmul.mubr.msk.f32.gmra.mrb[46].mxu0 %vm1766_vm8, %v1864_v41  ;;  %12690 = vrcp.f32 %v2289_v52  ;;  %v12338_v52 = vunpack.i.h.bf16 %v14565_v20 }
 0x91b   :  { %10690 = vmatprep.mubr.msk.f32.mxu0 %vm13056_vm4, %v17987_v46  ;;  %12692 = vrcp.f32 %v14678_v4 }
 0x91c   :  { %12694 = vrcp.f32 %v2295_v6 }
 0x91d   :  { %12696 = vrcp.f32 %v14695_v51 }
 0x91e   :  { %3284 = vadd.xlane.f32.xlu1 %v3283_v10 }
 0x91f   :  { %v12681_v5 = vpop.eup %12680 }
 0x920   :  { %v1865_v54 = vmul.f32 %v12681_v5, %v14561_v29  ;;  %v12683_v62 = vpop.eup %12682  ;;  %v11829_v29 = vpack.c.bf16 %v12313_v11, %v12312_v15  ;;  %v12332_v11 = vunpack.i.l.bf16 %v14569_v48  ;;  %v12341_v15 = vpop.permute.xlu1 %12340 }
 0x921   :  { %v2311_v40 = vmul.f32 %v12683_v62, %v14472_v16  ;;  %v12685_v33 = vpop.eup %12684  ;;  %v11832_v16 = vpack.c.bf16 %v12318_v35, %v12317_v12  ;;  %v12333_v62 = vunpack.i.h.bf16 %v14569_v48 }
 0x922   :  { %10691 = vmatmul.mubr.msk.f32.gmra.mrb[48].mxu0 %vm1766_vm8, %v1865_v54  ;;  %v2312_v14 = vmul.f32 %v12685_v33, %v14496_v53  ;;  %v12687_v42 = vpop.eup %12686  ;;  %v12337_v33 = vunpack.i.l.bf16 %v14565_v20 }
 0x923   :  { %10756 = vmatprep.mubr.msk.f32.mxu0 %vm13056_vm4, %v17987_v46  ;;  %v2313_v26 = vmul.f32 %v12687_v42, %v14507_v30  ;;  %v12689_v53 = vpop.eup %12688  ;;  %v2301_v30 = vpop.xlane.xlu0 %2300  ;;  %v11857_v35 = vpack.c.bf16 %v12333_v62, %v12332_v11  ;;  %v12342_v42 = vunpack.i.l.bf16 %v12341_v15 }
 0x924   :  { %v2314_v4 = vmul.f32 %v12689_v53, %v14478_v21  ;;  %v12691_v17 = vpop.eup %12690  ;;  %12698 = vrcp.f32 %v2301_v30  ;;  %v17993_v21 = vld [vmem:[#allocation35_spill] sm:$0xff] }
 0x925   :  { %v2315_v38 = vmul.f32 %v12691_v17, %v14489_v44  ;;  %v12693_v19 = vpop.eup %12692 }
 0x926   :  { %10757 = vmatmul.mubr.msk.f32.vlgmr.msra.gmra.mrb[50].mxu0 %vm1766_vm8, %v2311_v40  ;;  %v2316_v51 = vmul.f32 %v12693_v19, %v14537_v25  ;;  %v12695_v50 = vpop.eup %12694 }
 0x927   :  { %11830 = vmatpush3.bf16.msra.mxu0 %v11829_v29  ;;  %10759 = vmatprep.mubr.msk.f32.mxu0 %vm13056_vm4, %v17987_v46  ;;  %v2807_v32 = vpop.xlane.xlu0 %2806  ;;  %v2317_v41 = vmul.f32 %v12695_v50, %v14509_v37  ;;  %v12697_v10 = vpop.eup %12696  ;;  %v11860_v29 = vpack.c.bf16 %v12338_v52, %v12337_v33 }
 0x928   :  { %11831 = vmatprep.subr.bf16.mxu0 %v17986_v0  ;;  %12700 = vrcp.f32 %v2807_v32  ;;  %v2318_v43 = vmul.f32 %v12697_v10, %v14557_v61 }
 0x92a   :  { %10760 = vmatmul.mubr.msk.f32.gmra.mrb[52].mxu0 %vm1766_vm8, %v2312_v14  ;;  %v12343_v14 = vunpack.i.h.bf16 %v12341_v15 }
 0x92b   :  { %11833 = vmatpush3.bf16.msra.mxu0 %v11832_v16  ;;  %10762 = vmatprep.mubr.msk.f32.mxu0 %vm13056_vm4, %v17987_v46  ;;  %v2810_v44 = vpop.xlane.xlu0 %2809 }
 0x92c   :  { %11834 = vmatprep.subr.bf16.mxu0 %v17986_v0  ;;  %12702 = vrcp.f32 %v2810_v44  ;;  %v11863_v60 = vpack.c.bf16 %v12343_v14, %v12342_v42 }
 0x92e   :  { %10763 = vmatmul.mubr.msk.f32.gmra.mrb[54].mxu0 %vm1766_vm8, %v2313_v26  ;;  %v12699_v5 = vpop.eup %12698 }
 0x92f   :  { %11836 = vmatpush3.bf16.msra.mxu0 %v11835_v3  ;;  %10765 = vmatprep.mubr.msk.f32.mxu0 %vm13056_vm4, %v17987_v46  ;;  %v2319_v54 = vmul.f32 %v12699_v5, %v14525_v47 }
 0x930   :  { %11837 = vmatprep.subr.bf16.mxu0 %v17986_v0 }
 0x932   :  { %10766 = vmatmul.mubr.msk.f32.gmra.mrb[56].mxu0 %vm1766_vm8, %v2314_v4  ;;  %v12701_v37 = vpop.eup %12700 }
 0x933   :  { %11839 = vmatpush3.bf16.msra.mxu0 %v11838_v31  ;;  %10768 = vmatprep.mubr.msk.f32.mxu0 %vm13056_vm4, %v17987_v46  ;;  %v2841_v61 = vmul.f32 %v12701_v37, %v14539_v24 }
 0x934   :  { %10844 = vmatprep.subr.mxu0 %v17987_v46  ;;  %v2813_v25 = vpop.xlane.xlu0 %2812 }
 0x935   :  { %12704 = vrcp.f32 %v2813_v25 }
 0x936   :  { %10769 = vmatmul.mubr.msk.f32.gmra.mrb[58].mxu0 %vm1766_vm8, %v2315_v38  ;;  %v12703_v40 = vpop.eup %12702 }
 0x937   :  { %10845 = vmatpush3.msra.mxu0 %v17993_v21  ;;  %10771 = vmatprep.mubr.msk.f32.mxu0 %vm13056_vm4, %v17987_v46  ;;  %v2842_v24 = vmul.f32 %v12703_v40, %v14547_v13 }
 0x938   :  { %11856 = vmatprep.subr.bf16.mxu0 %v17986_v0 }
 0x93a   :  { %10772 = vmatmul.mubr.msk.f32.gmra.mrb[60].mxu0 %vm1766_vm8, %v2316_v51 }
 0x93b   :  { %10774 = vmatprep.mubr.msk.f32.mxu0 %vm13056_vm4, %v17987_v46 }
 0x93c   :  { %v2819_v47 = vpop.xlane.xlu0 %2818 }
 0x93e   :  { %10775 = vmatmul.mubr.msk.f32.gmra.mrb[62].mxu0 %vm1766_vm8, %v2317_v41 }
 0x93f   :  { %10777 = vmatprep.mubr.msk.f32.mxu0 %vm13056_vm4, %v17987_v46  ;;  %v12705_v48 = vpop.eup %12704 }
 0x940   :  { %v2825_v16 = vpop.xlane.xlu0 %2824  ;;  %v2843_v7 = vmul.f32 %v12705_v48, %v14576_v45 }
 0x942   :  { %10778 = vmatmul.mubr.msk.f32.gmra.mrb[64].mxu0 %vm1766_vm8, %v2318_v43 }
 0x943   :  { %10780 = vmatprep.mubr.msk.f32.mxu0 %vm13056_vm4, %v17987_v46 }
 0x944   :  { %v2831_v53 = vpop.xlane.xlu0 %2830 }
 0x946   :  { %10781 = vmatmul.mubr.msk.f32.gmra.mrb[66].mxu0 %vm1766_vm8, %v2319_v54 }
 0x947   :  { %10846 = vmatprep.mubr.msk.f32.mxu0 %vm13056_vm4, %v17987_v46 }
 0x948   :  { %v3261_v22 = vpop.xlane.xlu0 %3260 }
 0x949   :  { %v2816_v12 = vpop.xlane.xlu1 %2815 }
 0x94a   :  { %12706 = vrcp.f32 %v2816_v12  ;;  %10847 = vmatmul.mubr.msk.f32.vlgmr.msra.gmra.mrb[68].mxu0 %vm1766_vm8, %v2841_v61 }
 0x94b   :  { %11858 = vmatpush3.bf16.msra.mxu0 %v11857_v35  ;;  %10849 = vmatprep.mubr.msk.f32.mxu0 %vm13056_vm4, %v17987_v46  ;;  %12708 = vrcp.f32 %v2819_v47 }
 0x94c   :  { %11859 = vmatprep.subr.bf16.mxu0 %v17986_v0 }
 0x94d   :  { %v2822_v20 = vpop.xlane.xlu1 %2821 }
 0x94e   :  { %10850 = vmatmul.mubr.msk.f32.gmra.mrb[70].mxu0 %vm1766_vm8, %v2842_v24  ;;  %12710 = vrcp.f32 %v2822_v20 }
 0x94f   :  { %11861 = vmatpush3.bf16.msra.mxu0 %v11860_v29  ;;  %10852 = vmatprep.mubr.msk.f32.mxu0 %vm13056_vm4, %v17987_v46  ;;  %12712 = vrcp.f32 %v2825_v16 }
 0x950   :  { %11862 = vmatprep.subr.bf16.mxu0 %v17986_v0 }
 0x951   :  { %v2828_v1 = vpop.xlane.xlu1 %2827 }
 0x952   :  { %10853 = vmatmul.mubr.msk.f32.gmra.mrb[72].mxu0 %vm1766_vm8, %v2843_v7  ;;  %12714 = vrcp.f32 %v2828_v1 }
 0x953   :  { %11864 = vmatpush3.bf16.msra.mxu0 %v11863_v60  ;;  %10855 = vmatprep.mubr.msk.f32.mxu0 %vm13056_vm4, %v17987_v46  ;;  %12716 = vrcp.f32 %v2831_v53 }
 0x954   :  { %v12707_v13 = vpop.eup %12706  ;;  %11865 = vmatprep.subr.bf16.mxu0 %v17986_v0  ;;  %12718 = vrcp.f32 %v3261_v22 }
 0x955   :  { %v2844_v6 = vmul.f32 %v12707_v13, %v14594_v36  ;;  %v12709_v26 = vpop.eup %12708 }
 0x956   :  { %v2845_v45 = vmul.f32 %v12709_v26, %v14583_v63  ;;  %v3264_v63 = vpop.xlane.xlu0 %3263 }
 0x957   :  { %10856 = vmatmul.mubr.msk.f32.gmra.mrb[74].mxu0 %vm1766_vm8, %v2844_v6  ;;  %12720 = vrcp.f32 %v3264_v63 }
 0x958   :  { %10858 = vmatprep.mubr.msk.f32.mxu0 %vm13056_vm4, %v17987_v46  ;;  %v12711_v3 = vpop.eup %12710 }
 0x959   :  { %v2846_v36 = vmul.f32 %v12711_v3, %v14600_v23  ;;  %v12713_v18 = vpop.eup %12712 }
 0x95a   :  { %v2847_v57 = vmul.f32 %v12713_v18, %v14587_v39 }
 0x95b   :  { %10859 = vmatmul.mubr.msk.f32.gmra.mrb[76].mxu0 %vm1766_vm8, %v2845_v45 }
 0x95c   :  { %10861 = vmatprep.mubr.msk.f32.mxu0 %vm13056_vm4, %v17987_v46  ;;  %v12715_v4 = vpop.eup %12714 }
 0x95d   :  { %v2848_v17 = vmul.f32 %v12715_v4, %v14608_v27  ;;  %v12717_v31 = vpop.eup %12716 }
 0x95e   :  { %v3267_v30 = vpop.xlane.xlu0 %3266  ;;  %v2849_v23 = vmul.f32 %v12717_v31, %v14592_v9  ;;  %v12719_v9 = vpop.eup %12718  ;;  %v3514_v31 = vld [vmem:[%s17870_s3 + $0x148] sm:$0xff] }
 0x95f   :  { %10862 = vmatmul.mubr.msk.f32.gmra.mrb[78].mxu0 %vm1766_vm8, %v2846_v36  ;;  %12722 = vrcp.f32 %v3267_v30  ;;  %v3295_v44 = vmul.f32 %v12719_v9, %v14602_v59  ;;  %v3515_v30 = vld [vmem:[%s17870_s3 + $0x150] sm:$0xff] }
 0x960   :  { %10864 = vmatprep.mubr.msk.f32.mxu0 %vm13056_vm4, %v17987_v46 }
 0x961   :  { %v12721_v10 = vpop.eup %12720 }
 0x962   :  { %v3270_v39 = vpop.xlane.xlu1 %3269  ;;  %v3296_v25 = vmul.f32 %v12721_v10, %v14610_v56 }
 0x963   :  { %10865 = vmatmul.mubr.msk.f32.gmra.mrb[80].mxu0 %vm1766_vm8, %v2847_v57  ;;  %12724 = vrcp.f32 %v3270_v39  ;;  %v3516_v39 = vld [vmem:[%s17870_s3 + $0x158] sm:$0xff] }
 0x964   :  { %10867 = vmatprep.mubr.msk.f32.mxu0 %vm13056_vm4, %v17987_v46 }
 0x966   :  { %v3273_v38 = vpop.xlane.xlu0 %3272 }
 0x967   :  { %10868 = vmatmul.mubr.msk.f32.gmra.mrb[82].mxu0 %vm1766_vm8, %v2848_v17  ;;  %12726 = vrcp.f32 %v3273_v38  ;;  %v3513_v17 = vld [vmem:[%s17870_s3 + $0x140] sm:$0xff] }
 0x968   :  { %10870 = vmatprep.mubr.msk.f32.mxu0 %vm13056_vm4, %v17987_v46  ;;  %v11868_v38 = vpack.c.bf16 %v3514_v31, %v3513_v17 }
 0x969   :  { %v12723_v43 = vpop.eup %12722 }
 0x96a   :  { %v12346_v19 = vpop.permute.xlu0 %12345  ;;  %v3297_v59 = vmul.f32 %v12723_v43, %v14619_v28  ;;  %11869 = vmatprep.subr.bf16.mxu1 %v11868_v38 }
 0x96b   :  { %10871 = vmatmul.mubr.msk.f32.gmra.mrb[84].mxu0 %vm1766_vm8, %v2849_v23  ;;  %v12348_v32 = vunpack.i.h.bf16 %v12346_v19  ;;  %v12347_v27 = vunpack.i.l.bf16 %v12346_v19  ;;  %v11872_v19 = vpack.c.bf16 %v3516_v39, %v3515_v30  ;;  %11871 = vmatpush3.bf16.msra.mxu1 %v11868_v38 }
 0x96c   :  { %10936 = vmatprep.mubr.msk.f32.mxu0 %vm13056_vm4, %v17987_v46 }
 0x96d   :  { %v11866_v21 = vpack.c.bf16 %v12348_v32, %v12347_v27  ;;  %v12725_v5 = vpop.eup %12724  ;;  %11873 = vmatprep.subr.bf16.mxu1 %v11872_v19 }
 0x96e   :  { %v3298_v54 = vmul.f32 %v12725_v5, %v14624_v34 }
 0x96f   :  { %11867 = vmatpush3.bf16.msra.mxu0 %v11866_v21  ;;  %11875 = vmatpush3.bf16.msra.mxu1 %v11872_v19 }
 0x970   :  { %10934 = vmatprep.subr.mxu0 %v17987_v46 }
 0x971   :  { %v12727_v37 = vpop.eup %12726 }
 0x972   :  { %v3276_v51 = vpop.xlane.xlu1 %3275  ;;  %v3299_v56 = vmul.f32 %v12727_v37, %v14629_v8 }
 0x973   :  { %12728 = vrcp.f32 %v3276_v51 }
 0x976   :  { %v3279_v50 = vpop.xlane.xlu1 %3278 }
 0x977   :  { %12730 = vrcp.f32 %v3279_v50 }
 0x97a   :  { %v3321_v41 = vpop.permute.xlu1 %3320 }
 0x97b   :  { %10935 = vmatpush3.msra.mxu0 %v3321_v41 }
 0x97c   :  { %10937 = vmatmul.mubr.msk.f32.vlgmr.msra.gmra.mrb[86].mxu0 %vm1766_vm8, %v3295_v44 }
 0x97d   :  { %10939 = vmatprep.mubr.msk.f32.mxu0 %vm13056_vm4, %v17987_v46  ;;  %v12729_v62 = vpop.eup %12728 }
 0x97e   :  { %v3300_v28 = vmul.f32 %v12729_v62, %v14633_v2 }
 0x980   :  { %10940 = vmatmul.mubr.msk.f32.gmra.mrb[88].mxu0 %vm1766_vm8, %v3296_v25 }
 0x981   :  { %10942 = vmatprep.mubr.msk.f32.mxu0 %vm13056_vm4, %v17987_v46  ;;  %v12731_v11 = vpop.eup %12730 }
 0x982   :  { %v3301_v34 = vmul.f32 %v12731_v11, %v14639_v58 }
 0x984   :  { %10943 = vmatmul.mubr.msk.f32.gmra.mrb[90].mxu0 %vm1766_vm8, %v3297_v59 }
 0x985   :  { %10945 = vmatprep.mubr.msk.f32.mxu0 %vm13056_vm4, %v17987_v46 }
 0x988   :  { %10946 = vmatmul.mubr.msk.f32.gmra.mrb[92].mxu0 %vm1766_vm8, %v3298_v54 }
 0x989   :  { %10948 = vmatprep.mubr.msk.f32.mxu0 %vm13056_vm4, %v17987_v46 }
 0x98c   :  { %10949 = vmatmul.mubr.msk.f32.gmra.mrb[94].mxu0 %vm1766_vm8, %v3299_v56 }
 0x98d   :  { %10951 = vmatprep.mubr.msk.f32.mxu0 %vm13056_vm4, %v17987_v46 }
 0x990   :  { %10952 = vmatmul.mubr.msk.f32.gmra.mrb[96].mxu0 %vm1766_vm8, %v3300_v28 }
 0x991   :  { %10954 = vmatprep.mubr.msk.f32.mxu0 %vm13056_vm4, %v17987_v46 }
 0x994   :  { %10955 = vmatmul.mubr.msk.f32.gmra.mrb[98].mxu0 %vm1766_vm8, %v3301_v34 }
 0x995   :  { %10957 = vmatprep.mubr.msk.f32.mxu0 %vm13056_vm4, %v17987_v46 }
 0x99c   :  { %v3282_v8 = vpop.xlane.xlu0 %3281 }
 0x99d   :  { %12732 = vrcp.f32 %v3282_v8 }
 0x9a7   :  { %v12733_v15 = vpop.eup %12732 }
 0x9a8   :  { %v3302_v40 = vmul.f32 %v12733_v15, %v14690_v49 }
 0x9aa   :  { %10958 = vmatmul.mubr.msk.f32.gmra.mrb[100].mxu0 %vm1766_vm8, %v3302_v40 }
 0x9ab   :  { %v3285_v61 = vpop.xlane.xlu1 %3284  ;;  %10960 = vmatprep.mubr.msk.f32.mxu0 %vm13056_vm4, %v17987_v46 }
 0x9ac   :  { %12734 = vrcp.f32 %v3285_v61 }
 0x9b6   :  { %v12735_v2 = vpop.eup %12734 }
 0x9b7   :  { %v3303_v58 = vmul.f32 %v12735_v2, %v14705_v55 }
 0x9b9   :  { %10961 = vmatmul.mubr.msk.f32.gmra.mrb[102].mxu0 %vm1766_vm8, %v3303_v58 }
 0x9c1   :  { %v14848_v52 = vpop.f32.mrb[32].mxu0 }
 0x9c2   :  { %v10668_v33 = vpop.f32.mrb[33].mxu0 }
 0x9c9   :  { %v14850_v35 = vpop.f32.mrb[34].mxu0 }
 0x9ca   :  { %v10671_v47 = vpop.f32.mrb[35].mxu0 }
 0x9d1   :  { %v14852_v12 = vpop.f32.mrb[36].mxu0 }
 0x9d2   :  { %v10674_v49 = vpop.f32.mrb[37].mxu0 }
 0x9d9   :  { %v14854_v24 = vpop.f32.mrb[38].mxu0 }
 0x9da   :  { %v10677_v48 = vpop.f32.mrb[39].mxu0 }
 0x9dd   :  { %v14856_v29 = vpop.f32.mrb[40].mxu0 }
 0x9de   :  { %v10680_v14 = vpop.f32.mrb[41].mxu0 }
 0x9e1   :  { %v14858_v42 = vpop.f32.mrb[42].mxu0 }
 0x9e2   :  { %v10683_v55 = vpop.f32.mrb[43].mxu0 }
 0x9e9   :  { %v14860_v20 = vpop.f32.mrb[44].mxu0 }
 0x9ea   :  { %v10686_v16 = vpop.f32.mrb[45].mxu0 }
 0x9ed   :  { %v14862_v7 = vpop.f32.mrb[46].mxu0 }
 0x9ee   :  { %v10689_v60 = vpop.f32.mrb[47].mxu0 }
 0x9f5   :  { %v14864_v13 = vpop.f32.mrb[48].mxu0 }
 0x9f6   :  { %v10692_v1 = vpop.f32.mrb[49].mxu0 }
 0x9f9   :  { %v2440_v6 = vpop.f32.mrb[50].mxu0 }
 0x9fa   :  { %2493 = vrot.lane.b32.xlu0 %v2440_v6, %s13063_s16  ;;  %v10758_v26 = vpop.f32.mrb[51].mxu0 }
 0x9fd   :  { %v2445_v53 = vpop.f32.mrb[52].mxu0 }
 0x9fe   :  { %2495 = vrot.lane.b32.xlu0 %v2445_v53, %s13063_s16  ;;  %v10761_v45 = vpop.f32.mrb[53].mxu0 }
 0xa01   :  { %v2450_v3 = vpop.f32.mrb[54].mxu0 }
 0xa02   :  { %2497 = vrot.lane.b32.xlu0 %v2450_v3, %s13063_s16  ;;  %v10764_v22 = vpop.f32.mrb[55].mxu0 }
 0xa05   :  { %v2455_v36 = vpop.f32.mrb[56].mxu0 }
 0xa06   :  { %2499 = vrot.lane.b32.xlu0 %v2455_v36, %s13063_s16  ;;  %v10767_v18 = vpop.f32.mrb[57].mxu0 }
 0xa07   :  { %v17994_v18 = vld [vmem:[#allocation19_spill] sm:$0xff] }
 0xa09   :  { %v2460_v57 = vpop.f32.mrb[58].mxu0 }
 0xa0a   :  { %2501 = vrot.lane.b32.xlu0 %v2460_v57, %s13063_s16  ;;  %v10770_v4 = vpop.f32.mrb[59].mxu0 }
 0xa0d   :  { %v2465_v63 = vpop.f32.mrb[60].mxu0 }
 0xa0e   :  { %v10773_v23 = vpop.f32.mrb[61].mxu0 }
 0xa11   :  { %v2470_v32 = vpop.f32.mrb[62].mxu0 }
 0xa12   :  { %2505 = vrot.lane.b32.xlu0 %v2470_v32, %s13063_s16  ;;  %v10776_v27 = vpop.f32.mrb[63].mxu0 }
 0xa15   :  { %v2475_v21 = vpop.f32.mrb[64].mxu0 }
 0xa16   :  { %v10779_v51 = vpop.f32.mrb[65].mxu0 }
 0xa19   :  { %v2480_v50 = vpop.f32.mrb[66].mxu0 }
 0xa1a   :  { %2509 = vrot.lane.b32.xlu0 %v2480_v50, %s13063_s16  ;;  %v10782_v9 = vpop.f32.mrb[67].mxu0 }
 0xa1d   :  { %v2970_v44 = vpop.f32.mrb[68].mxu0 }
 0xa1e   :  { %v10848_v41 = vpop.f32.mrb[69].mxu0 }
 0xa21   :  { %v14885_v10 = vpop.f32.mrb[70].mxu0 }
 0xa22   :  { %v10851_v25 = vpop.f32.mrb[71].mxu0 }
 0xa25   :  { %v14887_v43 = vpop.f32.mrb[72].mxu0 }
 0xa26   :  { %v10854_v59 = vpop.f32.mrb[73].mxu0 }
 0xa2a   :  { %v14889_v5 = vpop.f32.mrb[74].mxu0 }
 0xa2b   :  { %v10857_v54 = vpop.f32.mrb[75].mxu0 }
 0xa2e   :  { %v14891_v37 = vpop.f32.mrb[76].mxu0 }
 0xa2f   :  { %v10860_v56 = vpop.f32.mrb[77].mxu0 }
 0xa32   :  { %v14893_v62 = vpop.f32.mrb[78].mxu0 }
 0xa33   :  { %v10863_v28 = vpop.f32.mrb[79].mxu0 }
 0xa36   :  { %v14895_v11 = vpop.f32.mrb[80].mxu0 }
 0xa37   :  { %v10866_v34 = vpop.f32.mrb[81].mxu0 }
 0xa3a   :  { %v14897_v8 = vpop.f32.mrb[82].mxu0 }
 0xa3b   :  { %v10869_v15 = vpop.f32.mrb[83].mxu0 }
 0xa3e   :  { %v14899_v61 = vpop.f32.mrb[84].mxu0 }
 0xa3f   :  { %v10872_v40 = vpop.f32.mrb[85].mxu0 }
 0xa4f   :  { %v3424_v2 = vpop.f32.mrb[86].mxu0 }
 0xa50   :  { %3477 = vrot.lane.b32.xlu1 %v3424_v2, %s13063_s16  ;;  %v10938_v58 = vpop.f32.mrb[87].mxu0 }
 0xa53   :  { %v3429_v33 = vpop.f32.mrb[88].mxu0 }
 0xa54   :  { %2503 = vrot.lane.b32.xlu1 %v2465_v63, %s13063_s16  ;;  %v10941_v47 = vpop.f32.mrb[89].mxu0 }
 0xa57   :  { %v3434_v49 = vpop.f32.mrb[90].mxu0 }
 0xa58   :  { %2507 = vrot.lane.b32.xlu1 %v2475_v21, %s13063_s16  ;;  %3481 = vrot.lane.b32.xlu0 %v3434_v49, %s13063_s16  ;;  %v10944_v48 = vpop.f32.mrb[91].mxu0  ;;  %v17995_v49 = vld [vmem:[#allocation12_spill] sm:$0xff] }
 0xa59   :  { %v706_v48 = vsub.s32 2, %v17995_v49 }
 0xa5b   :  { %v3439_v14 = vpop.f32.mrb[92].mxu0 }
 0xa5c   :  { %3479 = vrot.lane.b32.xlu1 %v3429_v33, %s13063_s16  ;;  %v10947_v55 = vpop.f32.mrb[93].mxu0 }
 0xa5f   :  { %v3444_v16 = vpop.f32.mrb[94].mxu0 }
 0xa60   :  { %3483 = vrot.lane.b32.xlu1 %v3439_v14, %s13063_s16  ;;  %3485 = vrot.lane.b32.xlu0 %v3444_v16, %s13063_s16  ;;  %v10950_v60 = vpop.f32.mrb[95].mxu0 }
 0xa63   :  { %v3449_v1 = vpop.f32.mrb[96].mxu0 }
 0xa64   :  { %3487 = vrot.lane.b32.xlu1 %v3449_v1, %s13063_s16  ;;  %v10953_v6 = vpop.f32.mrb[97].mxu0  ;;  %v13052_v1 = vld [vmem:[%s17876_s6] sm:$0x3f] }
 0xa65   :  { %v707_v6 = vrot.slane %v13052_v1, %v706_v48 }
 0xa67   :  { %v3454_v26 = vpop.f32.mrb[98].mxu0 }
 0xa68   :  { %3489 = vrot.lane.b32.xlu0 %v3454_v26, %s13063_s16  ;;  %v10956_v53 = vpop.f32.mrb[99].mxu0 }
 0xa6c   :  { %v2494_v45 = vpop.permute.xlu0 %2493 }
 0xa6d   :  { %v2520_v3 = vsel %vm1610_vm6, %v14848_v52, %v2494_v45 }
 0xa6e   :  { %10971 = vmatprep.mubr.msk.f32.mxu1 %vm264_vm1, %v2520_v3 }
 0xa70   :  { %v2496_v63 = vpop.permute.xlu0 %2495 }
 0xa71   :  { %v2521_v52 = vsel %vm1610_vm6, %v14850_v35, %v2496_v63 }
 0xa74   :  { %v2498_v17 = vpop.permute.xlu0 %2497 }
 0xa75   :  { %v2522_v39 = vsel %vm1610_vm6, %v14852_v12, %v2498_v17 }
 0xa78   :  { %v2500_v31 = vpop.permute.xlu0 %2499 }
 0xa79   :  { %v2523_v19 = vsel %vm1610_vm6, %v14854_v24, %v2500_v31 }
 0xa7c   :  { %v2502_v32 = vpop.permute.xlu0 %2501 }
 0xa7d   :  { %v3459_v22 = vpop.f32.mrb[100].mxu0  ;;  %v2524_v35 = vsel %vm1610_vm6, %v14856_v29, %v2502_v32 }
 0xa7e   :  { %3491 = vrot.lane.b32.xlu1 %v3459_v22, %s13063_s16  ;;  %v10959_v36 = vpop.f32.mrb[101].mxu0  ;;  %v17996_v22 = vld [vmem:[#allocation15_spill] sm:$0xff] }
 0xa7f   :  { %v862_v36 = vadd.f32 %v17996_v22, %v707_v6 }
 0xa82   :  { %4151 = vrot.lane.b32.xlu1 %v17994_v18, %s13058_s11 }
 0xa84   :  { %v2506_v21 = vpop.permute.xlu0 %2505 }
 0xa85   :  { %v2526_v24 = vsel %vm1610_vm6, %v14860_v20, %v2506_v21 }
 0xa8c   :  { %v3464_v57 = vpop.f32.mrb[102].mxu0  ;;  %v2510_v50 = vpop.permute.xlu0 %2509 }
 0xa8d   :  { %3493 = vrot.lane.b32.xlu0 %v3464_v57, %s13063_s16  ;;  %v10962_v4 = vpop.f32.mrb[103].mxu0  ;;  %v2528_v29 = vsel %vm1610_vm6, %v14864_v13, %v2510_v50 }
 0xac2   :  { %v3478_v30 = vpop.permute.xlu1 %3477 }
 0xac3   :  { %v3504_v23 = vsel %vm1610_vm6, %v2970_v44, %v3478_v30  ;;  %v17997_v30 = vld [vmem:[#allocation13_spill] sm:$0xff] }
 0xac4   :  { %10972 = vmatmul.mubr.msk.f32.vlgmr.msra.gmra.mrb[106].mxu1 %vm264_vm1, %v3504_v23  ;;  %v14978_v23 = vrot.slane %v862_v36, %v17997_v30 }
 0xac5   :  { %10974 = vmatprep.mubr.msk.f32.mxu1 %vm264_vm1, %v2521_v52 }
 0xac6   :  { %v2504_v38 = vpop.permute.xlu1 %2503 }
 0xac7   :  { %v2525_v51 = vsel %vm1610_vm6, %v14858_v42, %v2504_v38 }
 0xac8   :  { %10975 = vmatmul.mubr.msk.f32.gmra.mrb[108].mxu1 %vm264_vm1, %v2522_v39 }
 0xac9   :  { %10977 = vmatprep.mubr.msk.f32.mxu1 %vm264_vm1, %v2523_v19 }
 0xaca   :  { %v2508_v27 = vpop.permute.xlu1 %2507  ;;  %v3482_v44 = vpop.permute.xlu0 %3481 }
 0xacb   :  { %v2527_v9 = vsel %vm1610_vm6, %v14862_v7, %v2508_v27  ;;  %v3506_v20 = vsel %vm1610_vm6, %v14887_v43, %v3482_v44 }
 0xacc   :  { %10978 = vmatmul.mubr.msk.f32.gmra.mrb[110].mxu1 %vm264_vm1, %v2524_v35  ;;  %v17998_v35 = vld [vmem:[#allocation14_spill] sm:$0xff] }
 0xacd   :  { %10980 = vmatprep.mubr.msk.f32.mxu1 %vm264_vm1, %v2525_v51  ;;  %v14982_v21 = vrot.slane %v862_v36, %v17998_v35  ;;  %v17999_v51 = vld [vmem:[#allocation10_spill] sm:$0xff] }
 0xace   :  { %v3480_v12 = vpop.permute.xlu1 %3479 }
 0xacf   :  { %v3505_v41 = vsel %vm1610_vm6, %v14885_v10, %v3480_v12 }
 0xad0   :  { %10981 = vmatmul.mubr.msk.f32.gmra.mrb[112].mxu1 %vm264_vm1, %v2526_v24 }
 0xad1   :  { %10983 = vmatprep.mubr.msk.f32.mxu1 %vm264_vm1, %v2527_v9 }
 0xad2   :  { %v3484_v42 = vpop.permute.xlu1 %3483  ;;  %v3486_v25 = vpop.permute.xlu0 %3485 }
 0xad3   :  { %v3507_v7 = vsel %vm1610_vm6, %v14889_v5, %v3484_v42  ;;  %v3508_v13 = vsel %vm1610_vm6, %v14891_v37, %v3486_v25 }
 0xad4   :  { %10984 = vmatmul.mubr.msk.f32.gmra.mrb[114].mxu1 %vm264_vm1, %v2528_v29  ;;  %v18000_v29 = vld [vmem:[#allocation11_spill] sm:$0xff] }
 0xad5   :  { %10986 = vmatprep.mubr.msk.f32.mxu1 %vm264_vm1, %v3505_v41 }
 0xad6   :  { %v3488_v59 = vpop.permute.xlu1 %3487 }
 0xad7   :  { %v3509_v10 = vsel %vm1610_vm6, %v14893_v62, %v3488_v59 }
 0xad8   :  { %10987 = vmatmul.mubr.msk.f32.gmra.mrb[116].mxu1 %vm264_vm1, %v3506_v20 }
 0xad9   :  { %10989 = vmatprep.mubr.msk.f32.mxu1 %vm264_vm1, %v3507_v7 }
 0xada   :  { %v3490_v54 = vpop.permute.xlu0 %3489 }
 0xadb   :  { %v3510_v43 = vsel %vm1610_vm6, %v14895_v11, %v3490_v54  ;;  %v9721_v11 = vld [vmem:[%s17870_s3 + $0x160] ss:$0 sm:$0xff] }
 0xadc   :  { %10990 = vmatmul.mubr.msk.f32.gmra.mrb[118].mxu1 %vm264_vm1, %v3508_v13 }
 0xadd   :  { %10992 = vmatprep.mubr.msk.f32.mxu1 %vm264_vm1, %v3509_v10 }
 0xae0   :  { %10993 = vmatmul.mubr.msk.f32.gmra.mrb[120].mxu1 %vm264_vm1, %v3510_v43 }
 0xaf0   :  { %v3492_v5 = vpop.permute.xlu1 %3491 }
 0xaf1   :  { %v3511_v56 = vsel %vm1610_vm6, %v14897_v8, %v3492_v5 }
 0xaf2   :  { %10995 = vmatprep.mubr.msk.f32.mxu1 %vm264_vm1, %v3511_v56 }
 0xaff   :  { %v3494_v37 = vpop.permute.xlu0 %3493 }
 0xb00   :  { %v3512_v62 = vsel %vm1610_vm6, %v14899_v61, %v3494_v37  ;;  %v15015_v37 = vpop.permute.xlu1 %4151 }
 0xb01   :  { %10996 = vmatmul.mubr.msk.f32.gmra.mrb[122].mxu1 %vm264_vm1, %v3512_v62 }
 0xb97   :  { %v10973_v28 = vpop.f32.mrb[106].mxu1 }
 0xb98   :  { %v3642_v34 = vpop.f32.mrb[107].mxu1  ;;  %v3648_v4 = vadd.f32 %v10973_v28, %v9721_v11 }
 0xb99   :  { %v3643_v27 = vadd.f32 %v9721_v11, %v3642_v34 }
 0xb9a   :  { %v3732_v38 = vmul.f32 %v3648_v4, %v14978_v23 }
 0xb9b   :  { %v10976_v15 = vpop.f32.mrb[108].mxu1  ;;  %v3731_v24 = vmul.f32 %v3643_v27, %v14982_v21 }
 0xb9c   :  { %v3658_v40 = vadd.f32 %v10976_v15, %v9721_v11  ;;  %v3652_v2 = vpop.f32.mrb[109].mxu1  ;;  %v14985_v12 = vadd.f32 %v3732_v38, %v17999_v51 }
 0xb9d   :  { %v3653_v58 = vadd.f32 %v9721_v11, %v3652_v2  ;;  %v14993_v42 = vadd.f32 %v3731_v24, %v18000_v29  ;;  %v18002_v24 = vld [vmem:[#allocation2_spill] sm:$0xff]  ;;  %v18003_v29 = vld [vmem:[#allocation3_spill] sm:$0xff] }
 0xb9e   :  { %3753 = vrot.lane.b32.xlu0 %v3658_v40, %s13058_s11  ;;  %v4848_v50 = vsel %vm264_vm1, %v14985_v12, 0.0  ;;  %v4854_v9 = vmul.f32 %v14985_v12, %v14985_v12 }
 0xb9f   :  { %v10979_v8 = vpop.f32.mrb[110].mxu1  ;;  %3751 = vrot.lane.b32.xlu1 %v3653_v58, %s13058_s11  ;;  %v4845_v41 = vsel %vm264_vm1, %v14993_v42, 0.0  ;;  %v4853_v20 = vmul.f32 %v14993_v42, %v14993_v42 }
 0xba0   :  { %v3662_v33 = vpop.f32.mrb[111].mxu1  ;;  %v4858_v44 = vsel %vm264_vm1, %v4854_v9, 0.0  ;;  %v3668_v59 = vadd.f32 %v10979_v8, %v9721_v11 }
 0xba1   :  { %v4855_v7 = vsel %vm264_vm1, %v4853_v20, 0.0  ;;  %v3663_v54 = vadd.f32 %v9721_v11, %v3662_v33 }
 0xba3   :  { %v10982_v47 = vpop.f32.mrb[112].mxu1 }
 0xba4   :  { %v3672_v61 = vpop.f32.mrb[113].mxu1  ;;  %v3678_v5 = vadd.f32 %v10982_v47, %v9721_v11 }
 0xba5   :  { %v3673_v56 = vadd.f32 %v9721_v11, %v3672_v61 }
 0xba7   :  { %v10985_v14 = vpop.f32.mrb[114].mxu1 }
 0xba8   :  { %v3688_v55 = vadd.f32 %v10985_v14, %v9721_v11  ;;  %v3682_v16 = vpop.f32.mrb[115].mxu1 }
 0xba9   :  { %v3683_v60 = vadd.f32 %v9721_v11, %v3682_v16 }
 0xbab   :  { %v10988_v26 = vpop.f32.mrb[116].mxu1 }
 0xbac   :  { %v3698_v53 = vadd.f32 %v10988_v26, %v9721_v11  ;;  %v3692_v45 = vpop.f32.mrb[117].mxu1  ;;  %v18001_v26 = vld [vmem:[#allocation31_spill] sm:$0xff] }
 0xbad   :  { %v3693_v3 = vadd.f32 %v9721_v11, %v3692_v45 }
 0xbaf   :  { %v10991_v57 = vpop.f32.mrb[118].mxu1 }
 0xbb0   :  { %v3708_v63 = vadd.f32 %v10991_v57, %v9721_v11  ;;  %v3702_v17 = vpop.f32.mrb[119].mxu1 }
 0xbb1   :  { %v3703_v31 = vadd.f32 %v9721_v11, %v3702_v17 }
 0xbb3   :  { %v10994_v52 = vpop.f32.mrb[120].mxu1 }
 0xbb4   :  { %v3718_v39 = vadd.f32 %v10994_v52, %v9721_v11  ;;  %v3712_v19 = vpop.f32.mrb[121].mxu1 }
 0xbb5   :  { %v3713_v32 = vadd.f32 %v9721_v11, %v3712_v19 }
 0xbbd   :  { %4849 = vadd.xlane.f32.xlu0 %v4848_v50 }
 0xbc1   :  { %4859 = vadd.xlane.f32.xlu0 %v4858_v44 }
 0xbc3   :  { %4846 = vadd.xlane.f32.xlu1 %v4845_v41 }
 0xbc7   :  { %4856 = vadd.xlane.f32.xlu1 %v4855_v7 }
 0xbd4   :  { %v10997_v25 = vpop.f32.mrb[122].mxu1 }
 0xbd5   :  { %v3728_v13 = vadd.f32 %v10997_v25, %v9721_v11  ;;  %v3722_v10 = vpop.f32.mrb[123].mxu1 }
 0xbd6   :  { %v3723_v43 = vadd.f32 %v9721_v11, %v3722_v10  ;;  %v4173_v10 = vld [vmem:[%s17870_s3 + $0x168] sm:$0xff] }
 0xbd7   :  { %3757 = vrot.lane.b32.xlu0 %v3668_v59, %s13058_s11 }
 0xbd8   :  { %3755 = vrot.lane.b32.xlu1 %v3663_v54, %s13058_s11  ;;  %v4174_v54 = vld [vmem:[%s17870_s3 + $0x170] sm:$0xff] }
 0xbdb   :  { %3761 = vrot.lane.b32.xlu0 %v3678_v5, %s13058_s11  ;;  %v4175_v5 = vld [vmem:[%s17870_s3 + $0x178] sm:$0xff] }
 0xbdc   :  { %3759 = vrot.lane.b32.xlu1 %v3673_v56, %s13058_s11  ;;  %v4176_v56 = vld [vmem:[%s17870_s3 + $0x180] sm:$0xff] }
 0xbdf   :  { %3765 = vrot.lane.b32.xlu0 %v3688_v55, %s13058_s11 }
 0xbe0   :  { %3763 = vrot.lane.b32.xlu1 %v3683_v60, %s13058_s11 }
 0xbe3   :  { %3769 = vrot.lane.b32.xlu0 %v3698_v53, %s13058_s11 }
 0xbe4   :  { %3767 = vrot.lane.b32.xlu1 %v3693_v3, %s13058_s11 }
 0xbe7   :  { %3773 = vrot.lane.b32.xlu0 %v3708_v63, %s13058_s11 }
 0xbe8   :  { %3771 = vrot.lane.b32.xlu1 %v3703_v31, %s13058_s11 }
 0xbeb   :  { %3777 = vrot.lane.b32.xlu0 %v3718_v39, %s13058_s11 }
 0xbec   :  { %3775 = vrot.lane.b32.xlu1 %v3713_v32, %s13058_s11 }
 0xbef   :  { %3781 = vrot.lane.b32.xlu0 %v3728_v13, %s13058_s11 }
 0xbf0   :  { %3779 = vrot.lane.b32.xlu1 %v3723_v43, %s13058_s11  ;;  %v11876_v43 = vpack.c.bf16 %v4174_v54, %v4173_v10  ;;  %v18011_v54 = vld [vmem:[#allocation23_spill] sm:$0xff] }
 0xbf2   :  { %11877 = vmatprep.subr.bf16.mxu0 %v11876_v43 }
 0xbf3   :  { %11879 = vmatpush3.bf16.msra.mxu0 %v11876_v43 }
 0xc10   :  { %v3754_v62 = vpop.permute.xlu0 %3753 }
 0xc11   :  { %v3800_v28 = vmul.f32 %v3754_v62, %v17994_v18  ;;  %v3752_v34 = vpop.permute.xlu1 %3751  ;;  %v11880_v62 = vpack.c.bf16 %v4176_v56, %v4175_v5  ;;  %v18012_v56 = vld [vmem:[#allocation26_spill] sm:$0xff] }
 0xc12   :  { %v3799_v11 = vmul.f32 %v3752_v34, %v17994_v18  ;;  %v18004_v34 = vld [vmem:[#allocation4_spill] sm:$0xff] }
 0xc13   :  { %3833 = vrot.lane.b32.xlu0 %v3800_v28, %s13057_s10  ;;  %11881 = vmatprep.subr.bf16.mxu0 %v11880_v62 }
 0xc14   :  { %3831 = vrot.lane.b32.xlu1 %v3799_v11, %s13057_s10  ;;  %11883 = vmatpush3.bf16.msra.mxu0 %v11880_v62 }
 0xc4a   :  { %v15021_v15 = vpop.xlane.xlu0 %4849 }
 0xc4e   :  { %v15023_v40 = vpop.xlane.xlu0 %4859 }
 0xc50   :  { %v15025_v2 = vpop.xlane.xlu1 %4846 }
 0xc52   :  { %v3758_v58 = vpop.permute.xlu0 %3757 }
 0xc53   :  { %v3802_v8 = vmul.f32 %v3758_v58, %v17994_v18 }
 0xc54   :  { %v15028_v33 = vpop.xlane.xlu1 %4856 }
 0xc55   :  { %3837 = vrot.lane.b32.xlu0 %v3802_v8, %s13057_s10 }
 0xc56   :  { %v3762_v47 = vpop.permute.xlu0 %3761 }
 0xc57   :  { %v3804_v61 = vmul.f32 %v3762_v47, %v17994_v18 }
 0xc58   :  { %v3756_v48 = vpop.permute.xlu1 %3755 }
 0xc59   :  { %v3801_v14 = vmul.f32 %v3756_v48, %v17994_v18  ;;  %3841 = vrot.lane.b32.xlu0 %v3804_v61, %s13057_s10  ;;  %v18005_v48 = vld [vmem:[#allocation6_spill] sm:$0xff] }
 0xc5a   :  { %v3766_v55 = vpop.permute.xlu0 %3765 }
 0xc5b   :  { %v3806_v16 = vmul.f32 %v3766_v55, %v17994_v18  ;;  %3835 = vrot.lane.b32.xlu1 %v3801_v14, %s13057_s10  ;;  %v18006_v55 = vld [vmem:[#allocation5_spill] sm:$0xff] }
 0xc5c   :  { %v3760_v60 = vpop.permute.xlu1 %3759 }
 0xc5d   :  { %v3803_v1 = vmul.f32 %v3760_v60, %v17994_v18  ;;  %3845 = vrot.lane.b32.xlu0 %v3806_v16, %s13057_s10 }
 0xc5e   :  { %v3770_v6 = vpop.permute.xlu0 %3769 }
 0xc5f   :  { %v3808_v53 = vmul.f32 %v3770_v6, %v18001_v26  ;;  %3839 = vrot.lane.b32.xlu1 %v3803_v1, %s13057_s10 }
 0xc60   :  { %v3764_v45 = vpop.permute.xlu1 %3763 }
 0xc61   :  { %v3805_v3 = vmul.f32 %v3764_v45, %v17994_v18  ;;  %3849 = vrot.lane.b32.xlu0 %v3808_v53, %s13057_s10 }
 0xc62   :  { %v3774_v22 = vpop.permute.xlu0 %3773 }
 0xc63   :  { %v3810_v36 = vmul.f32 %v3774_v22, %v18001_v26  ;;  %3843 = vrot.lane.b32.xlu1 %v3805_v3, %s13057_s10 }
 0xc64   :  { %v3768_v57 = vpop.permute.xlu1 %3767 }
 0xc65   :  { %v3807_v4 = vmul.f32 %v3768_v57, %v18001_v26  ;;  %3853 = vrot.lane.b32.xlu0 %v3810_v36, %s13057_s10  ;;  %v18007_v36 = vld [vmem:[#allocation7_spill] sm:$0xff] }
 0xc66   :  { %v3778_v63 = vpop.permute.xlu0 %3777 }
 0xc67   :  { %v3812_v17 = vmul.f32 %v3778_v63, %v18001_v26  ;;  %3847 = vrot.lane.b32.xlu1 %v3807_v4, %s13057_s10  ;;  %v18008_v63 = vld [vmem:[#allocation8_spill] sm:$0xff] }
 0xc68   :  { %v3772_v31 = vpop.permute.xlu1 %3771 }
 0xc69   :  { %v3809_v18 = vmul.f32 %v3772_v31, %v18001_v26  ;;  %3857 = vrot.lane.b32.xlu0 %v3812_v17, %s13057_s10 }
 0xc6a   :  { %v3782_v52 = vpop.permute.xlu0 %3781 }
 0xc6b   :  { %v3814_v38 = vmul.f32 %v3782_v52, %v18001_v26  ;;  %3851 = vrot.lane.b32.xlu1 %v3809_v18, %s13057_s10 }
 0xc6c   :  { %v3776_v39 = vpop.permute.xlu1 %3775 }
 0xc6d   :  { %v3811_v19 = vmul.f32 %v3776_v39, %v18001_v26  ;;  %3861 = vrot.lane.b32.xlu0 %v3814_v38, %s13057_s10 }
 0xc6f   :  { %3855 = vrot.lane.b32.xlu1 %v3811_v19, %s13057_s10 }
 0xc70   :  { %v3780_v32 = vpop.permute.xlu1 %3779 }
 0xc71   :  { %v3813_v27 = vmul.f32 %v3780_v32, %v18001_v26 }
 0xc73   :  { %3859 = vrot.lane.b32.xlu1 %v3813_v27, %s13057_s10  ;;  %v18009_v27 = vld [vmem:[#allocation9_spill] sm:$0xff] }
 0xc85   :  { %v3834_v51 = vpop.permute.xlu0 %3833 }
 0xc86   :  { %v15058_v50 = vadd.f32 %v3834_v51, %v18002_v24  ;;  %v3832_v9 = vpop.permute.xlu1 %3831 }
 0xc87   :  { %v15061_v44 = vadd.f32 %v3832_v9, %v18003_v29  ;;  %v18010_v9 = vld [vmem:[#allocation24_spill] sm:$0xff] }
 0xc88   :  { %v3898_v41 = vsel %vm264_vm1, %v15058_v50, 0.0  ;;  %v3960_v20 = vmul.f32 %v15058_v50, %v15058_v50 }
 0xc89   :  { %v3959_v25 = vmul.f32 %v15061_v44, %v15061_v44  ;;  %v3895_v13 = vsel %vm264_vm1, %v15061_v44, 0.0 }
 0xc8a   :  { %v3978_v7 = vsel %vm264_vm1, %v3960_v20, 0.0 }
 0xc8b   :  { %v3975_v59 = vsel %vm264_vm1, %v3959_v25, 0.0 }
 0xc8c   :  { %3899 = vadd.xlane.f32.xlu0 %v3898_v41 }
 0xc90   :  { %3979 = vadd.xlane.f32.xlu0 %v3978_v7 }
 0xc94   :  { %3976 = vadd.xlane.f32.xlu0 %v3975_v59 }
 0xc97   :  { %3896 = vadd.xlane.f32.xlu1 %v3895_v13 }
 0xcc7   :  { %v3838_v28 = vpop.permute.xlu0 %3837 }
 0xcc8   :  { %v15086_v11 = vadd.f32 %v3838_v28, %v18004_v34 }
 0xcca   :  { %v3904_v58 = vsel %vm264_vm1, %v15086_v11, 0.0  ;;  %v3962_v8 = vmul.f32 %v15086_v11, %v15086_v11 }
 0xccb   :  { %3905 = vadd.xlane.f32.xlu0 %v3904_v58  ;;  %v3842_v47 = vpop.permute.xlu0 %3841 }
 0xccc   :  { %v15093_v14 = vadd.f32 %v3842_v47, %v18005_v48  ;;  %v3984_v60 = vsel %vm264_vm1, %v3962_v8, 0.0 }
 0xccd   :  { %v3836_v61 = vpop.permute.xlu1 %3835 }
 0xcce   :  { %v15096_v16 = vadd.f32 %v3836_v61, %v18006_v55  ;;  %v3910_v45 = vsel %vm264_vm1, %v15093_v14, 0.0  ;;  %v3964_v3 = vmul.f32 %v15093_v14, %v15093_v14  ;;  %v18013_v55 = vld [vmem:[#allocation25_spill] sm:$0xff] }
 0xccf   :  { %3985 = vadd.xlane.f32.xlu0 %v3984_v60  ;;  %v3846_v22 = vpop.permute.xlu0 %3845 }
 0xcd0   :  { %v3901_v1 = vsel %vm264_vm1, %v15096_v16, 0.0  ;;  %v3961_v6 = vmul.f32 %v15096_v16, %v15096_v16  ;;  %v15112_v17 = vadd.f32 %v3846_v22, %v18008_v63  ;;  %v3990_v31 = vsel %vm264_vm1, %v3964_v3, 0.0 }
 0xcd1   :  { %3902 = vadd.xlane.f32.xlu1 %v3901_v1  ;;  %v3840_v53 = vpop.permute.xlu1 %3839 }
 0xcd2   :  { %v15108_v57 = vadd.f32 %v3840_v53, %v18007_v36  ;;  %v3981_v4 = vsel %vm264_vm1, %v3961_v6, 0.0  ;;  %v3916_v39 = vsel %vm264_vm1, %v15112_v17, 0.0  ;;  %v3966_v19 = vmul.f32 %v15112_v17, %v15112_v17  ;;  %v18014_v6 = vld [vmem:[#allocation28_spill] sm:$0xff] }
 0xcd3   :  { %3911 = vadd.xlane.f32.xlu0 %v3910_v45  ;;  %v3850_v32 = vpop.permute.xlu0 %3849 }
 0xcd4   :  { %v3907_v18 = vsel %vm264_vm1, %v15108_v57, 0.0  ;;  %v3963_v52 = vmul.f32 %v15108_v57, %v15108_v57  ;;  %v15128_v29 = vadd.f32 %v3850_v32, %v18010_v9  ;;  %v3996_v41 = vsel %vm264_vm1, %v3966_v19, 0.0 }
 0xcd5   :  { %3982 = vadd.xlane.f32.xlu1 %v3981_v4  ;;  %v3844_v38 = vpop.permute.xlu1 %3843 }
 0xcd6   :  { %v15124_v51 = vadd.f32 %v3844_v38, %v18009_v27  ;;  %v3987_v24 = vsel %vm264_vm1, %v3963_v52, 0.0  ;;  %v3922_v59 = vsel %vm264_vm1, %v15128_v29, 0.0  ;;  %v3968_v13 = vmul.f32 %v15128_v29, %v15128_v29 }
 0xcd7   :  { %3991 = vadd.xlane.f32.xlu0 %v3990_v31  ;;  %v3854_v10 = vpop.permute.xlu0 %3853 }
 0xcd8   :  { %v3913_v20 = vsel %vm264_vm1, %v15124_v51, 0.0  ;;  %v3965_v7 = vmul.f32 %v15124_v51, %v15124_v51  ;;  %v15144_v62 = vadd.f32 %v3854_v10, %v18012_v56  ;;  %v4002_v28 = vsel %vm264_vm1, %v3968_v13, 0.0 }
 0xcd9   :  { %3908 = vadd.xlane.f32.xlu1 %v3907_v18  ;;  %v3848_v25 = vpop.permute.xlu1 %3847  ;;  %v18015_v18 = vld [vmem:[#allocation27_spill] sm:$0xff] }
 0xcda   :  { %v15140_v43 = vadd.f32 %v3848_v25, %v18011_v54  ;;  %v3993_v5 = vsel %vm264_vm1, %v3965_v7, 0.0  ;;  %v3928_v47 = vsel %vm264_vm1, %v15144_v62, 0.0  ;;  %v3970_v61 = vmul.f32 %v15144_v62, %v15144_v62  ;;  %v18017_v7 = vld [vmem:[#allocation29_spill] sm:$0xff] }
 0xcdb   :  { %3917 = vadd.xlane.f32.xlu0 %v3916_v39  ;;  %v3858_v48 = vpop.permute.xlu0 %3857  ;;  %v18016_v39 = vld [vmem:[#allocation30_spill] sm:$0xff]  ;;  %v4875_v54 = vadd.f32 1.0, %v14982_v21 }
 0xcdc   :  { %v3919_v34 = vsel %vm264_vm1, %v15140_v43, 0.0  ;;  %v3967_v58 = vmul.f32 %v15140_v43, %v15140_v43  ;;  %v15160_v53 = vadd.f32 %v3858_v48, %v18014_v6  ;;  %v4008_v45 = vsel %vm264_vm1, %v3970_v61, 0.0 }
 0xcdd   :  { %3988 = vadd.xlane.f32.xlu1 %v3987_v24  ;;  %v3852_v8 = vpop.permute.xlu1 %3851 }
 0xcde   :  { %v15156_v60 = vadd.f32 %v3852_v8, %v18013_v55  ;;  %v3999_v1 = vsel %vm264_vm1, %v3967_v58, 0.0  ;;  %v3934_v4 = vsel %vm264_vm1, %v15160_v53, 0.0  ;;  %v3972_v63 = vmul.f32 %v15160_v53, %v15160_v53 }
 0xcdf   :  { %3997 = vadd.xlane.f32.xlu0 %v3996_v41  ;;  %v3862_v31 = vpop.permute.xlu0 %3861 }
 0xce0   :  { %v3925_v3 = vsel %vm264_vm1, %v15156_v60, 0.0  ;;  %v3969_v22 = vmul.f32 %v15156_v60, %v15156_v60  ;;  %v15176_v19 = vadd.f32 %v3862_v31, %v18016_v39  ;;  %v4014_v32 = vsel %vm264_vm1, %v3972_v63, 0.0  ;;  %v18018_v39 = vld [vmem:[#allocation18_spill] sm:$0xff] }
 0xce1   :  { %3914 = vadd.xlane.f32.xlu1 %v3913_v20  ;;  %v3856_v36 = vpop.permute.xlu1 %3855 }
 0xce2   :  { %v15172_v52 = vadd.f32 %v3856_v36, %v18015_v18  ;;  %v4005_v38 = vsel %vm264_vm1, %v3969_v22, 0.0  ;;  %v3940_v41 = vsel %vm264_vm1, %v15176_v19, 0.0  ;;  %v3974_v20 = vmul.f32 %v15176_v19, %v15176_v19 }
 0xce3   :  { %3923 = vadd.xlane.f32.xlu0 %v3922_v59 }
 0xce4   :  { %v3931_v27 = vsel %vm264_vm1, %v15172_v52, 0.0  ;;  %v3971_v24 = vmul.f32 %v15172_v52, %v15172_v52  ;;  %v4020_v13 = vsel %vm264_vm1, %v3974_v20, 0.0  ;;  %v4897_v20 = vld [vmem:[%s17870_s3 + $0x218] sm:$0xff] }
 0xce5   :  { %3994 = vadd.xlane.f32.xlu1 %v3993_v5  ;;  %v3860_v9 = vpop.permute.xlu1 %3859 }
 0xce6   :  { %v15188_v25 = vadd.f32 %v3860_v9, %v18017_v7  ;;  %v4011_v59 = vsel %vm264_vm1, %v3971_v24, 0.0  ;;  %v4898_v7 = vld [vmem:[%s17870_s3 + $0x220] sm:$0xff] }
 0xce7   :  { %4003 = vadd.xlane.f32.xlu0 %v4002_v28 }
 0xce8   :  { %v3937_v10 = vsel %vm264_vm1, %v15188_v25, 0.0 }
 0xce9   :  { %3920 = vadd.xlane.f32.xlu1 %v3919_v34 }
 0xceb   :  { %3929 = vadd.xlane.f32.xlu0 %v3928_v47 }
 0xced   :  { %4000 = vadd.xlane.f32.xlu1 %v3999_v1 }
 0xcef   :  { %4009 = vadd.xlane.f32.xlu0 %v4008_v45 }
 0xcf1   :  { %3926 = vadd.xlane.f32.xlu1 %v3925_v3 }
 0xcf3   :  { %3935 = vadd.xlane.f32.xlu0 %v3934_v4 }
 0xcf5   :  { %4006 = vadd.xlane.f32.xlu1 %v4005_v38 }
 0xcf7   :  { %4015 = vadd.xlane.f32.xlu0 %v4014_v32 }
 0xcf9   :  { %3932 = vadd.xlane.f32.xlu1 %v3931_v27 }
 0xcfb   :  { %3941 = vadd.xlane.f32.xlu0 %v3940_v41  ;;  %v4876_v41 = vadd.f32 1.0, %v14978_v23 }
 0xcfd   :  { %4012 = vadd.xlane.f32.xlu1 %v4011_v59  ;;  %v11916_v59 = vpack.c.bf16 %v4898_v7, %v4897_v20 }
 0xcff   :  { %4021 = vadd.xlane.f32.xlu0 %v4020_v13  ;;  %v4899_v13 = vld [vmem:[%s17870_s3 + $0x228] sm:$0xff]  ;;  %11917 = vmatprep.subr.bf16.mxu0 %v11916_v59 }
 0xd01   :  { %3938 = vadd.xlane.f32.xlu1 %v3937_v10  ;;  %v4900_v10 = vld [vmem:[%s17870_s3 + $0x230] sm:$0xff] }
 0xd12   :  { %4879 = vrot.lane.b32.xlu1 %v4875_v54, %s13057_s10  ;;  %v11920_v54 = vpack.c.bf16 %v4900_v10, %v4899_v13 }
 0xd15   :  { %4153 = vrot.lane.b32.xlu0 %v18001_v26, %s13058_s11  ;;  %v3973_v26 = vmul.f32 %v15188_v25, %v15188_v25 }
 0xd17   :  { %v4017_v63 = vsel %vm264_vm1, %v3973_v26, 0.0 }
 0xd19   :  { %4891 = vrot.lane.b32.xlu0 %v14978_v23, %s13059_s12  ;;  %v3900_v5 = vpop.xlane.xlu0 %3899 }
 0xd1a   :  { %v3944_v56 = vmul.f32 0.03125, %v3900_v5 }
 0xd1c   :  { %v4040_v34 = vmul.f32 %v3944_v56, %v3944_v56  ;;  %v4072_v36 = vsub.f32 %v15058_v50, %v3944_v56 }
 0xd1d   :  { %v3980_v28 = vpop.xlane.xlu0 %3979 }
 0xd1e   :  { %v4024_v58 = vmul.f32 0.03125, %v3980_v28 }
 0xd20   :  { %v4056_v8 = vsub.f32 %v4024_v58, %v4040_v34 }
 0xd21   :  { %v3977_v61 = vpop.xlane.xlu0 %3976 }
 0xd22   :  { %v4088_v47 = vadd.f32 1e-06, %v4056_v8  ;;  %v4023_v1 = vmul.f32 0.03125, %v3977_v61 }
 0xd24   :  { %v3897_v48 = vpop.xlane.xlu1 %3896  ;;  %12736 = vrsqrt.f32 %v4088_v47 }
 0xd25   :  { %v3943_v55 = vmul.f32 0.03125, %v3897_v48 }
 0xd27   :  { %v4039_v6 = vmul.f32 %v3943_v55, %v3943_v55  ;;  %v4071_v31 = vsub.f32 %v15061_v44, %v3943_v55 }
 0xd29   :  { %v4055_v45 = vsub.f32 %v4023_v1, %v4039_v6 }
 0xd2b   :  { %v4087_v3 = vadd.f32 1e-06, %v4055_v45 }
 0xd2d   :  { %12738 = vrsqrt.f32 %v4087_v3 }
 0xd2e   :  { %v12737_v22 = vpop.eup %12736 }
 0xd2f   :  { %v4120_v4 = vmul.f32 %v12737_v22, %v4072_v36 }
 0xd31   :  { %v4136_v32 = vmul.f32 %v4120_v4, %v18018_v39 }
 0xd33   :  { %v4158_v9 = vadd.f32 %v15015_v37, %v4136_v32 }
 0xd36   :  { %4018 = vadd.xlane.f32.xlu1 %v4017_v63 }
 0xd37   :  { %v12739_v18 = vpop.eup %12738 }
 0xd38   :  { %v4119_v38 = vmul.f32 %v12739_v18, %v4071_v31 }
 0xd3a   :  { %v4135_v27 = vmul.f32 %v4119_v38, %v18018_v39 }
 0xd3c   :  { %v4157_v24 = vadd.f32 %v15015_v37, %v4135_v27 }
 0xd3e   :  { %11006 = vmatprep.mubr.msk.f32.mxu0 %vm264_vm1, %v4157_v24 }
 0xd3f   :  { %11007 = vmatmul.mubr.msk.f32.vlgmr.msra.gmra.mrb[104].mxu0 %vm264_vm1, %v4158_v9 }
 0xd40   :  { %11919 = vmatpush3.bf16.msra.mxu0 %v11916_v59 }
 0xd41   :  { %11921 = vmatprep.subr.bf16.mxu0 %v11920_v54 }
 0xd44   :  { %11923 = vmatpush3.bf16.msra.mxu0 %v11920_v54 }
 0xd47   :  { %4881 = vrot.lane.b32.xlu1 %v4876_v41, %s13057_s10 }
 0xd4b   :  { %4889 = vrot.lane.b32.xlu1 %v14982_v21, %s13059_s12 }
 0xd58   :  { %v3906_v5 = vpop.xlane.xlu0 %3905 }
 0xd59   :  { %v3946_v56 = vmul.f32 0.03125, %v3906_v5 }
 0xd5b   :  { %v4042_v34 = vmul.f32 %v3946_v56, %v3946_v56 }
 0xd5c   :  { %v3986_v28 = vpop.xlane.xlu0 %3985 }
 0xd5d   :  { %v4026_v58 = vmul.f32 0.03125, %v3986_v28  ;;  %v4074_v28 = vsub.f32 %v15086_v11, %v3946_v56 }
 0xd5e   :  { %v3903_v8 = vpop.xlane.xlu1 %3902 }
 0xd5f   :  { %v4058_v47 = vsub.f32 %v4026_v58, %v4042_v34  ;;  %v3945_v61 = vmul.f32 0.03125, %v3903_v8 }
 0xd60   :  { %v3912_v48 = vpop.xlane.xlu0 %3911 }
 0xd61   :  { %v4090_v55 = vadd.f32 1e-06, %v4058_v47  ;;  %v3948_v1 = vmul.f32 0.03125, %v3912_v48  ;;  %v4041_v45 = vmul.f32 %v3945_v61, %v3945_v61 }
 0xd62   :  { %v3983_v6 = vpop.xlane.xlu1 %3982 }
 0xd63   :  { %v4025_v3 = vmul.f32 0.03125, %v3983_v6  ;;  %12740 = vrsqrt.f32 %v4090_v55  ;;  %v4044_v22 = vmul.f32 %v3948_v1, %v3948_v1  ;;  %v4073_v6 = vsub.f32 %v15096_v16, %v3945_v61 }
 0xd64   :  { %v3992_v26 = vpop.xlane.xlu0 %3991 }
 0xd65   :  { %v4057_v36 = vsub.f32 %v4025_v3, %v4041_v45  ;;  %v4028_v4 = vmul.f32 0.03125, %v3992_v26 }
 0xd66   :  { %v3909_v63 = vpop.xlane.xlu1 %3908 }
 0xd67   :  { %v4089_v31 = vadd.f32 1e-06, %v4057_v36  ;;  %v4060_v18 = vsub.f32 %v4028_v4, %v4044_v22  ;;  %v3947_v38 = vmul.f32 0.03125, %v3909_v63 }
 0xd68   :  { %v3918_v32 = vpop.xlane.xlu0 %3917 }
 0xd69   :  { %12742 = vrsqrt.f32 %v4089_v31  ;;  %v4092_v27 = vadd.f32 1e-06, %v4060_v18  ;;  %v15227_v24 = vmul.f32 0.03125, %v3918_v32  ;;  %v4043_v41 = vmul.f32 %v3947_v38, %v3947_v38 }
 0xd6a   :  { %v3989_v9 = vpop.xlane.xlu1 %3988 }
 0xd6b   :  { %v4027_v20 = vmul.f32 0.03125, %v3989_v9  ;;  %12744 = vrsqrt.f32 %v4092_v27  ;;  %v4046_v59 = vmul.f32 %v15227_v24, %v15227_v24 }
 0xd6c   :  { %v3998_v7 = vpop.xlane.xlu0 %3997 }
 0xd6d   :  { %v4059_v13 = vsub.f32 %v4027_v20, %v4043_v41  ;;  %v4030_v10 = vmul.f32 0.03125, %v3998_v7  ;;  %v12741_v54 = vpop.eup %12740  ;;  %v4076_v41 = vsub.f32 %v15093_v14, %v3948_v1 }
 0xd6e   :  { %v3915_v5 = vpop.xlane.xlu1 %3914  ;;  %v4122_v55 = vmul.f32 %v12741_v54, %v4074_v28  ;;  %v4075_v28 = vsub.f32 %v15108_v57, %v3947_v38 }
 0xd6f   :  { %v4091_v34 = vadd.f32 1e-06, %v4059_v13  ;;  %v4062_v58 = vsub.f32 %v4030_v10, %v4046_v59  ;;  %v15232_v8 = vmul.f32 0.03125, %v3915_v5 }
 0xd70   :  { %v3924_v47 = vpop.xlane.xlu0 %3923  ;;  %v4138_v32 = vmul.f32 %v4122_v55, %v18018_v39 }
 0xd71   :  { %12746 = vrsqrt.f32 %v4091_v34  ;;  %v4094_v48 = vadd.f32 1e-06, %v4062_v58  ;;  %v15235_v45 = vmul.f32 0.03125, %v3924_v47  ;;  %v4045_v22 = vmul.f32 %v15232_v8, %v15232_v8 }
 0xd72   :  { %v3995_v3 = vpop.xlane.xlu1 %3994  ;;  %v4160_v54 = vadd.f32 %v15015_v37, %v4138_v32 }
 0xd73   :  { %v12743_v26 = vpop.eup %12742  ;;  %v4029_v36 = vmul.f32 0.03125, %v3995_v3  ;;  %12748 = vrsqrt.f32 %v4094_v48  ;;  %v4048_v63 = vmul.f32 %v15235_v45, %v15235_v45 }
 0xd74   :  { %v4004_v56 = vpop.xlane.xlu0 %4003  ;;  %v4121_v4 = vmul.f32 %v12743_v26, %v4073_v6 }
 0xd75   :  { %v4061_v31 = vsub.f32 %v4029_v36, %v4045_v22  ;;  %v4032_v18 = vmul.f32 0.03125, %v4004_v56  ;;  %v12745_v27 = vpop.eup %12744 }
 0xd76   :  { %v3921_v61 = vpop.xlane.xlu1 %3920  ;;  %v4137_v9 = vmul.f32 %v4121_v4, %v18018_v39  ;;  %v4124_v5 = vmul.f32 %v12745_v27, %v4076_v41  ;;  %v4078_v4 = vsub.f32 %v15112_v17, %v15227_v24 }
 0xd77   :  { %v4093_v20 = vadd.f32 1e-06, %v4061_v31  ;;  %v4064_v7 = vsub.f32 %v4032_v18, %v4048_v63  ;;  %v15244_v59 = vmul.f32 0.03125, %v3921_v61 }
 0xd78   :  { %v3930_v13 = vpop.xlane.xlu0 %3929  ;;  %v4159_v10 = vadd.f32 %v15015_v37, %v4137_v9  ;;  %v4140_v36 = vmul.f32 %v4124_v5, %v18018_v39 }
 0xd79   :  { %12750 = vrsqrt.f32 %v4093_v20  ;;  %v15249_v34 = vmul.f32 0.03125, %v3930_v13  ;;  %v4096_v1 = vadd.f32 1e-06, %v4064_v7  ;;  %v4047_v48 = vmul.f32 %v15244_v59, %v15244_v59 }
 0xd7a   :  { %v4001_v58 = vpop.xlane.xlu1 %4000  ;;  %11009 = vmatprep.mubr.msk.f32.mxu0 %vm264_vm1, %v4159_v10  ;;  %v4162_v20 = vadd.f32 %v15015_v37, %v4140_v36  ;;  %v4077_v13 = vsub.f32 %v15124_v51, %v15232_v8 }
 0xd7b   :  { %v12747_v47 = vpop.eup %12746  ;;  %v4031_v55 = vmul.f32 0.03125, %v4001_v58  ;;  %11010 = vmatmul.mubr.msk.f32.gmra.mrb[106].mxu0 %vm264_vm1, %v4160_v54  ;;  %v4050_v26 = vmul.f32 %v15249_v34, %v15249_v34  ;;  %12752 = vrsqrt.f32 %v4096_v1 }
 0xd7c   :  { %v4010_v6 = vpop.xlane.xlu0 %4009  ;;  %v4123_v3 = vmul.f32 %v12747_v47, %v4075_v28 }
 0xd7d   :  { %v4063_v22 = vsub.f32 %v4031_v55, %v4047_v48  ;;  %v4034_v38 = vmul.f32 0.03125, %v4010_v6  ;;  %v12749_v56 = vpop.eup %12748 }
 0xd7e   :  { %v3927_v63 = vpop.xlane.xlu1 %3926  ;;  %v4139_v31 = vmul.f32 %v4123_v3, %v18018_v39  ;;  %v4126_v7 = vmul.f32 %v12749_v56, %v4078_v4 }
 0xd7f   :  { %v4095_v18 = vadd.f32 1e-06, %v4063_v22  ;;  %v4066_v32 = vsub.f32 %v4034_v38, %v4050_v26  ;;  %v15261_v27 = vmul.f32 0.03125, %v3927_v63 }
 0xd80   :  { %v3936_v61 = vpop.xlane.xlu0 %3935  ;;  %v4161_v9 = vadd.f32 %v15015_v37, %v4139_v31  ;;  %v4142_v55 = vmul.f32 %v4126_v7, %v18018_v39 }
 0xd81   :  { %12754 = vrsqrt.f32 %v4095_v18  ;;  %v4098_v41 = vadd.f32 1e-06, %v4066_v32  ;;  %v15267_v24 = vmul.f32 0.03125, %v3936_v61  ;;  %v4049_v5 = vmul.f32 %v15261_v27, %v15261_v27 }
 0xd82   :  { %v4007_v10 = vpop.xlane.xlu1 %4006  ;;  %11012 = vmatprep.mubr.msk.f32.mxu0 %vm264_vm1, %v4161_v9  ;;  %v4164_v31 = vadd.f32 %v15015_v37, %v4142_v55  ;;  %v4080_v18 = vsub.f32 %v15128_v29, %v15235_v45  ;;  %v4079_v32 = vsub.f32 %v15140_v43, %v15244_v59  ;;  %v4082_v59 = vsub.f32 %v15144_v62, %v15249_v34 }
 0xd83   :  { %v12751_v54 = vpop.eup %12750  ;;  %v4033_v28 = vmul.f32 0.03125, %v4007_v10  ;;  %11013 = vmatmul.mubr.msk.f32.gmra.mrb[108].mxu0 %vm264_vm1, %v4162_v20  ;;  %12756 = vrsqrt.f32 %v4098_v41  ;;  %v4052_v1 = vmul.f32 %v15267_v24, %v15267_v24 }
 0xd84   :  { %v4016_v58 = vpop.xlane.xlu0 %4015  ;;  %v4125_v47 = vmul.f32 %v12751_v54, %v4077_v13  ;;  %v18019_v54 = vld [vmem:[#allocation22_spill] sm:$0xff] }
 0xd85   :  { %v4065_v48 = vsub.f32 %v4033_v28, %v4049_v5  ;;  %v4036_v8 = vmul.f32 0.03125, %v4016_v58  ;;  %v12753_v4 = vpop.eup %12752 }
 0xd86   :  { %v3933_v6 = vpop.xlane.xlu1 %3932  ;;  %v4141_v3 = vmul.f32 %v4125_v47, %v18018_v39  ;;  %v4128_v13 = vmul.f32 %v12753_v4, %v4080_v18  ;;  %v4084_v18 = vsub.f32 %v15160_v53, %v15267_v24 }
 0xd87   :  { %v4097_v26 = vadd.f32 1e-06, %v4065_v48  ;;  %v4068_v22 = vsub.f32 %v4036_v8, %v4052_v1  ;;  %v3955_v38 = vmul.f32 0.03125, %v3933_v6  ;;  %v4178_v1 = vld [vmem:[%s17870_s3 + $0x190] sm:$0xff]  ;;  %v4179_v48 = vld [vmem:[%s17870_s3 + $0x198] sm:$0xff]  ;;  %v4081_v8 = vsub.f32 %v15156_v60, %v15261_v27  ;;  %v4181_v27 = vld [vmem:[%s17870_s3 + $0x1a8] sm:$0xff] }
 0xd88   :  { %v15277_v36 = vpop.xlane.xlu0 %3941  ;;  %v4163_v56 = vadd.f32 %v15015_v37, %v4141_v3  ;;  %v4144_v58 = vmul.f32 %v4128_v13, %v18019_v54  ;;  %v11884_v6 = vpack.c.bf16 %v4179_v48, %v4178_v1  ;;  %v4186_v1 = vld [vmem:[%s17870_s3 + $0x1d0] sm:$0xff]  ;;  %v4187_v48 = vld [vmem:[%s17870_s3 + $0x1d8] sm:$0xff] }
 0xd89   :  { %12758 = vrsqrt.f32 %v4097_v26  ;;  %v4100_v63 = vadd.f32 1e-06, %v4068_v22  ;;  %v4051_v9 = vmul.f32 %v3955_v38, %v3955_v38 }
 0xd8a   :  { %v4013_v61 = vpop.xlane.xlu1 %4012  ;;  %11015 = vmatprep.mubr.msk.f32.mxu0 %vm264_vm1, %v4163_v56  ;;  %11885 = vmatprep.subr.bf16.mxu1 %v11884_v6  ;;  %v4180_v56 = vld [vmem:[%s17870_s3 + $0x1a0] sm:$0xff] }
 0xd8b   :  { %v12755_v39 = vpop.eup %12754  ;;  %v4035_v41 = vmul.f32 0.03125, %v4013_v61  ;;  %11016 = vmatmul.mubr.msk.f32.gmra.mrb[110].mxu0 %vm264_vm1, %v4164_v31  ;;  %12760 = vrsqrt.f32 %v4100_v63  ;;  %11887 = vmatpush3.bf16.msra.mxu1 %v11884_v6  ;;  %v11888_v31 = vpack.c.bf16 %v4181_v27, %v4180_v56  ;;  %v4192_v56 = vld [vmem:[%s17870_s3 + $0x200] sm:$0xff]  ;;  %v4193_v27 = vld [vmem:[%s17870_s3 + $0x208] sm:$0xff] }
 0xd8c   :  { %v15287_v20 = vpop.xlane.xlu0 %4021  ;;  %v4127_v7 = vmul.f32 %v12755_v39, %v4079_v32 }
 0xd8d   :  { %v4067_v37 = vsub.f32 %v4035_v41, %v4051_v9  ;;  %v12757_v10 = vpop.eup %12756  ;;  %11889 = vmatprep.subr.bf16.mxu1 %v11888_v31  ;;  %v4182_v9 = vld [vmem:[%s17870_s3 + $0x1b0] sm:$0xff]  ;;  %v4183_v41 = vld [vmem:[%s17870_s3 + $0x1b8] sm:$0xff] }
 0xd8e   :  { %v4143_v45 = vmul.f32 %v4127_v7, %v18019_v54  ;;  %v4130_v47 = vmul.f32 %v12757_v10, %v4082_v59  ;;  %v4083_v7 = vsub.f32 %v15172_v52, %v3955_v38  ;;  %v11892_v24 = vpack.c.bf16 %v4183_v41, %v4182_v9  ;;  %v4185_v59 = vld [vmem:[%s17870_s3 + $0x1c8] sm:$0xff] }
 0xd8f   :  { %v4099_v5 = vadd.f32 1e-06, %v4067_v37  ;;  %11891 = vmatpush3.bf16.msra.mxu1 %v11888_v31  ;;  %v4038_v31 = vmul.f32 0.03125, %v15287_v20  ;;  %v4861_v9 = vmul.f32 0.03125, %v15028_v33 }
 0xd90   :  { %v15292_v28 = vpop.permute.xlu0 %4153  ;;  %v4146_v22 = vmul.f32 %v4130_v47, %v18019_v54  ;;  %11893 = vmatprep.subr.bf16.mxu1 %v11892_v24 }
 0xd91   :  { %12762 = vrsqrt.f32 %v4099_v5  ;;  %v4165_v34 = vadd.f32 %v15292_v28, %v4143_v45  ;;  %v4166_v55 = vadd.f32 %v15292_v28, %v4144_v58  ;;  %v4184_v45 = vld [vmem:[%s17870_s3 + $0x1c0] sm:$0xff] }
 0xd92   :  { %v4168_v61 = vadd.f32 %v15292_v28, %v4146_v22  ;;  %v11896_v5 = vpack.c.bf16 %v4185_v59, %v4184_v45 }
 0xd93   :  { %v12759_v3 = vpop.eup %12758  ;;  %11018 = vmatprep.mubr.msk.f32.mxu0 %vm264_vm1, %v4165_v34  ;;  %11895 = vmatpush3.bf16.msra.mxu1 %v11892_v24  ;;  %v4188_v34 = vld [vmem:[%s17870_s3 + $0x1e0] sm:$0xff] }
 0xd94   :  { %v4129_v26 = vmul.f32 %v12759_v3, %v4081_v8  ;;  %11019 = vmatmul.mubr.msk.f32.gmra.mrb[112].mxu0 %vm264_vm1, %v4166_v55  ;;  %11897 = vmatprep.subr.bf16.mxu1 %v11896_v5  ;;  %v11900_v8 = vpack.c.bf16 %v4187_v48, %v4186_v1  ;;  %v4189_v55 = vld [vmem:[%s17870_s3 + $0x1e8] sm:$0xff]  ;;  %v4190_v3 = vld [vmem:[%s17870_s3 + $0x1f0] sm:$0xff] }
 0xd95   :  { %v12761_v4 = vpop.eup %12760  ;;  %v11904_v6 = vpack.c.bf16 %v4189_v55, %v4188_v34 }
 0xd96   :  { %v4145_v63 = vmul.f32 %v4129_v26, %v18019_v54  ;;  %v4132_v39 = vmul.f32 %v12761_v4, %v4084_v18  ;;  %v4191_v26 = vld [vmem:[%s17870_s3 + $0x1f8] sm:$0xff]  ;;  %v11912_v4 = vpack.c.bf16 %v4193_v27, %v4192_v56  ;;  %v3939_v18 = vpop.xlane.xlu1 %3938 }
 0xd97   :  { %11899 = vmatpush3.bf16.msra.mxu1 %v11896_v5  ;;  %v11908_v22 = vpack.c.bf16 %v4191_v26, %v4190_v3 }
 0xd98   :  { %v4167_v32 = vadd.f32 %v15292_v28, %v4145_v63  ;;  %v4148_v10 = vmul.f32 %v4132_v39, %v18019_v54  ;;  %11901 = vmatprep.subr.bf16.mxu1 %v11900_v8  ;;  %v3958_v63 = vmul.f32 0.03125, %v15277_v36  ;;  %v4852_v39 = vmul.f32 0.03125, %v15021_v15 }
 0xd9a   :  { %11021 = vmatprep.mubr.msk.f32.mxu0 %vm264_vm1, %v4167_v32  ;;  %v4170_v47 = vadd.f32 %v15292_v28, %v4148_v10  ;;  %v4851_v32 = vmul.f32 0.03125, %v15025_v2  ;;  %v4864_v10 = vmul.f32 %v4852_v39, %v4852_v39 }
 0xd9b   :  { %v12763_v13 = vpop.eup %12762  ;;  %11022 = vmatmul.mubr.msk.f32.gmra.mrb[114].mxu0 %vm264_vm1, %v4168_v61  ;;  %11903 = vmatpush3.bf16.msra.mxu1 %v11900_v8  ;;  %v4054_v61 = vmul.f32 %v3958_v63, %v3958_v63 }
 0xd9c   :  { %v4131_v37 = vmul.f32 %v12763_v13, %v4083_v7  ;;  %11905 = vmatprep.subr.bf16.mxu1 %v11904_v6  ;;  %v4862_v7 = vmul.f32 0.03125, %v15023_v40  ;;  %v4863_v24 = vmul.f32 %v4851_v32, %v4851_v32  ;;  %v4880_v13 = vpop.permute.xlu1 %4879  ;;  %v4086_v40 = vsub.f32 %v15176_v19, %v3958_v63 }
 0xd9d   :  { %v4070_v41 = vsub.f32 %v4038_v31, %v4054_v61  ;;  %v4867_v3 = vsub.f32 %v14993_v42, %v4851_v32  ;;  %v4892_v32 = vpop.permute.xlu0 %4891 }
 0xd9e   :  { %v4147_v38 = vmul.f32 %v4131_v37, %v18019_v54  ;;  %v3957_v37 = vmul.f32 0.03125, %v3939_v18  ;;  %v4865_v45 = vsub.f32 %v4861_v9, %v4863_v24  ;;  %v4866_v36 = vsub.f32 %v4862_v7, %v4864_v10 }
 0xd9f   :  { %11907 = vmatpush3.bf16.msra.mxu1 %v11904_v6  ;;  %v4102_v59 = vadd.f32 1e-06, %v4070_v41 }
 0xda0   :  { %v4169_v58 = vadd.f32 %v15292_v28, %v4147_v38  ;;  %11909 = vmatprep.subr.bf16.mxu1 %v11908_v22  ;;  %v4053_v20 = vmul.f32 %v3957_v37, %v3957_v37  ;;  %v4085_v34 = vsub.f32 %v15188_v25, %v3957_v37 }
 0xda1   :  { %12764 = vrsqrt.f32 %v4102_v59 }
 0xda2   :  { %11024 = vmatprep.mubr.msk.f32.mxu0 %vm264_vm1, %v4169_v58  ;;  %v4869_v58 = vadd.f32 1e-06, %v4865_v45 }
 0xda3   :  { %11025 = vmatmul.mubr.msk.f32.gmra.mrb[116].mxu0 %vm264_vm1, %v4170_v47  ;;  %11911 = vmatpush3.bf16.msra.mxu1 %v11908_v22  ;;  %v4870_v47 = vadd.f32 1e-06, %v4866_v36  ;;  %v4868_v22 = vsub.f32 %v14985_v12, %v4852_v39 }
 0xda4   :  { %11913 = vmatprep.subr.bf16.mxu1 %v11912_v4  ;;  %12766 = vrsqrt.f32 %v4869_v58 }
 0xda7   :  { %11915 = vmatpush3.bf16.msra.mxu1 %v11912_v4 }
 0xdab   :  { %v12765_v33 = vpop.eup %12764 }
 0xdac   :  { %v4134_v48 = vmul.f32 %v12765_v33, %v4086_v40 }
 0xdae   :  { %v12767_v8 = vpop.eup %12766  ;;  %v4150_v56 = vmul.f32 %v4134_v48, %v18019_v54 }
 0xdaf   :  { %v4873_v27 = vmul.f32 %v12767_v8, %v4867_v3  ;;  %v4903_v3 = vld [vmem:[%s17870_s3 + $0x248] sm:$0xff] }
 0xdb0   :  { %v4172_v41 = vadd.f32 %v15292_v28, %v4150_v56  ;;  %v4905_v56 = vld [vmem:[%s17870_s3 + $0x258] sm:$0xff] }
 0xdb1   :  { %v4885_v63 = vmul.f32 %v4880_v13, %v4873_v27 }
 0xdc3   :  { %v4019_v38 = vpop.xlane.xlu1 %4018 }
 0xdc4   :  { %v4037_v5 = vmul.f32 0.03125, %v4019_v38 }
 0xdc6   :  { %v4069_v2 = vsub.f32 %v4037_v5, %v4053_v20 }
 0xdc7   :  { %v4882_v1 = vpop.permute.xlu1 %4881 }
 0xdc8   :  { %v4101_v15 = vadd.f32 1e-06, %v4069_v2 }
 0xdca   :  { %12768 = vrsqrt.f32 %v4101_v15 }
 0xdcb   :  { %12770 = vrsqrt.f32 %v4870_v47  ;;  %v4890_v18 = vpop.permute.xlu1 %4889 }
 0xdcc   :  { %v4895_v7 = vadd.f32 %v4890_v18, %v4885_v63  ;;  %v4908_v63 = vld [vmem:[%s17870_s3 + $0x270] sm:$0xff] }
 0xdd4   :  { %v12769_v55 = vpop.eup %12768 }
 0xdd5   :  { %v12771_v6 = vpop.eup %12770  ;;  %v4133_v26 = vmul.f32 %v12769_v55, %v4085_v34 }
 0xdd6   :  { %v4874_v31 = vmul.f32 %v12771_v6, %v4868_v22  ;;  %v4902_v6 = vld [vmem:[%s17870_s3 + $0x240] sm:$0xff]  ;;  %v4904_v22 = vld [vmem:[%s17870_s3 + $0x250] sm:$0xff] }
 0xdd7   :  { %v4149_v4 = vmul.f32 %v4133_v26, %v18019_v54  ;;  %v15385_v54 = vld [vmem:[%s17870_s3 + $0x188] ss:$0 sm:$0xff]  ;;  %v11924_v26 = vpack.c.bf16 %v4903_v3, %v4902_v6  ;;  %v11928_v27 = vpack.c.bf16 %v4905_v56, %v4904_v22 }
 0xdd8   :  { %v4886_v9 = vmul.f32 %v4882_v1, %v4874_v31  ;;  %v4907_v31 = vld [vmem:[%s17870_s3 + $0x268] sm:$0xff] }
 0xdd9   :  { %v4171_v61 = vadd.f32 %v15292_v28, %v4149_v4  ;;  %11925 = vmatprep.subr.bf16.mxu1 %v11924_v26  ;;  %v4906_v4 = vld [vmem:[%s17870_s3 + $0x260] sm:$0xff] }
 0xdda   :  { %v4896_v39 = vadd.f32 %v4892_v32, %v4886_v9  ;;  %v11932_v18 = vpack.c.bf16 %v4907_v31, %v4906_v4 }
 0xddb   :  { %11027 = vmatprep.mubr.msk.f32.mxu0 %vm264_vm1, %v4171_v61  ;;  %v4909_v61 = vld [vmem:[%s17870_s3 + $0x278] sm:$0xff] }
 0xddc   :  { %11028 = vmatmul.mubr.msk.f32.gmra.mrb[118].mxu0 %vm264_vm1, %v4172_v41  ;;  %v11936_v9 = vpack.c.bf16 %v4909_v61, %v4908_v63  ;;  %v4910_v41 = vld [vmem:[%s17870_s3 + $0x280] sm:$0xff] }
 0xddd   :  { %11094 = vmatprep.mubr.msk.f32.mxu0 %vm264_vm1, %v4895_v7  ;;  %v4911_v7 = vld [vmem:[%s17870_s3 + $0x288] sm:$0xff] }
 0xdde   :  { %v11940_v32 = vpack.c.bf16 %v4911_v7, %v4910_v41 }
 0xde0   :  { %11095 = vmatmul.mubr.msk.f32.vlgmr.msra.gmra.mrb[120].mxu0 %vm264_vm1, %v4896_v39  ;;  %v4912_v39 = vld [vmem:[%s17870_s3 + $0x290] sm:$0xff] }
 0xe12   :  { %v11008_v24 = vpop.f32.mrb[104].mxu0 }
 0xe13   :  { %v4319_v13 = vadd.f32 %v11008_v24, %v15385_v54  ;;  %v4313_v28 = vpop.f32.mrb[105].mxu0  ;;  %v4913_v24 = vld [vmem:[%s17870_s3 + $0x298] sm:$0xff] }
 0xe14   :  { %v4314_v37 = vadd.f32 %v15385_v54, %v4313_v28  ;;  %v4914_v28 = vld [vmem:[%s17870_s3 + $0x2a0] sm:$0xff] }
 0xe15   :  { %v4393_v10 = vmul.f32 %v4319_v13, %v4319_v13 }
 0xe16   :  { %v4392_v45 = vmul.f32 %v4314_v37, %v4314_v37 }
 0xe17   :  { %v4409_v59 = vmul.f32 %v4393_v10, %v4319_v13 }
 0xe18   :  { %v4408_v36 = vmul.f32 %v4392_v45, %v4314_v37 }
 0xe19   :  { %v4425_v38 = vmul.f32 0.044715, %v4409_v59  ;;  %v4916_v59 = vld [vmem:[%s17870_s3 + $0x2b0] sm:$0xff] }
 0xe1a   :  { %v4424_v20 = vmul.f32 0.044715, %v4408_v36  ;;  %v4917_v36 = vld [vmem:[%s17870_s3 + $0x2b8] sm:$0xff] }
 0xe1b   :  { %v4441_v5 = vadd.f32 %v4425_v38, %v4319_v13 }
 0xe1c   :  { %v4440_v58 = vadd.f32 %v4424_v20, %v4314_v37 }
 0xe1d   :  { %v4457_v2 = vmul.f32 0.7978846, %v4441_v5  ;;  %v11952_v5 = vpack.c.bf16 %v4917_v36, %v4916_v59 }
 0xe1e   :  { %v4456_v47 = vmul.f32 0.7978846, %v4440_v58 }
 0xe1f   :  { %12772 = vtanh.f32 %v4457_v2 }
 0xe20   :  { %12774 = vtanh.f32 %v4456_v47 }
 0xe29   :  { %v12773_v15 = vpop.eup %12772 }
 0xe2a   :  { %v12775_v33 = vpop.eup %12774  ;;  %v4489_v40 = vadd.f32 1.0, %v12773_v15 }
 0xe2b   :  { %v4488_v1 = vadd.f32 1.0, %v12775_v33 }
 0xe2c   :  { %v4505_v48 = vmul.f32 0.5, %v4489_v40 }
 0xe2d   :  { %v4504_v8 = vmul.f32 0.5, %v4488_v1 }
 0xe2e   :  { %v4521_v55 = vmul.f32 %v4505_v48, %v4319_v13  ;;  %v11944_v13 = vpack.c.bf16 %v4913_v24, %v4912_v39 }
 0xe2f   :  { %v4520_v34 = vmul.f32 %v4504_v8, %v4314_v37  ;;  %v4915_v37 = vld [vmem:[%s17870_s3 + $0x2a8] sm:$0xff] }
 0xe30   :  { %v11948_v10 = vpack.c.bf16 %v4915_v37, %v4914_v28 }
 0xe31   :  { %11062 = vmatprep.mubr.f32.mxu1 %v4520_v34 }
 0xe32   :  { %11063 = vmatmul.mubr.f32.vlgmr.msra.gmra.mrb[124].mxu1 %v4521_v55 }
 0xe33   :  { %11927 = vmatpush3.bf16.msra.mxu1 %v11924_v26 }
 0xe34   :  { %11929 = vmatprep.subr.bf16.mxu1 %v11928_v27 }
 0xe37   :  { %11931 = vmatpush3.bf16.msra.mxu1 %v11928_v27 }
 0xe38   :  { %11933 = vmatprep.subr.bf16.mxu1 %v11932_v18 }
 0xe3b   :  { %11935 = vmatpush3.bf16.msra.mxu1 %v11932_v18 }
 0xe3c   :  { %11937 = vmatprep.subr.bf16.mxu1 %v11936_v9 }
 0xe3f   :  { %11939 = vmatpush3.bf16.msra.mxu1 %v11936_v9 }
 0xe40   :  { %11941 = vmatprep.subr.bf16.mxu1 %v11940_v32 }
 0xe43   :  { %11943 = vmatpush3.bf16.msra.mxu1 %v11940_v32 }
 0xe44   :  { %11945 = vmatprep.subr.bf16.mxu1 %v11944_v13 }
 0xe47   :  { %11947 = vmatpush3.bf16.msra.mxu1 %v11944_v13 }
 0xe48   :  { %11949 = vmatprep.subr.bf16.mxu1 %v11948_v10 }
 0xe4b   :  { %11951 = vmatpush3.bf16.msra.mxu1 %v11948_v10 }
 0xe4c   :  { %11953 = vmatprep.subr.bf16.mxu1 %v11952_v5 }
 0xe4e   :  { %v11011_v45 = vpop.f32.mrb[106].mxu0 }
 0xe4f   :  { %v4329_v38 = vadd.f32 %v11011_v45, %v15385_v54  ;;  %v4323_v20 = vpop.f32.mrb[107].mxu0  ;;  %11955 = vmatpush3.bf16.msra.mxu1 %v11952_v5 }
 0xe50   :  { %v4324_v58 = vadd.f32 %v15385_v54, %v4323_v20 }
 0xe51   :  { %v4395_v2 = vmul.f32 %v4329_v38, %v4329_v38 }
 0xe52   :  { %v4394_v47 = vmul.f32 %v4324_v58, %v4324_v58 }
 0xe53   :  { %v4411_v15 = vmul.f32 %v4395_v2, %v4329_v38 }
 0xe54   :  { %v4410_v33 = vmul.f32 %v4394_v47, %v4324_v58 }
 0xe55   :  { %v4427_v40 = vmul.f32 0.044715, %v4411_v15 }
 0xe56   :  { %v4426_v1 = vmul.f32 0.044715, %v4410_v33  ;;  %v11014_v48 = vpop.f32.mrb[108].mxu0 }
 0xe57   :  { %v4443_v8 = vadd.f32 %v4427_v40, %v4329_v38  ;;  %v15440_v34 = vadd.f32 %v11014_v48, %v15385_v54  ;;  %v4333_v55 = vpop.f32.mrb[109].mxu0 }
 0xe58   :  { %v4442_v6 = vadd.f32 %v4426_v1, %v4324_v58  ;;  %v15443_v3 = vadd.f32 %v15385_v54, %v4333_v55 }
 0xe59   :  { %v4459_v26 = vmul.f32 0.7978846, %v4443_v8  ;;  %v4397_v22 = vmul.f32 %v15440_v34, %v15440_v34 }
 0xe5a   :  { %v4458_v56 = vmul.f32 0.7978846, %v4442_v6  ;;  %v4396_v27 = vmul.f32 %v15443_v3, %v15443_v3 }
 0xe5b   :  { %v4413_v4 = vmul.f32 %v4397_v22, %v15440_v34  ;;  %12776 = vtanh.f32 %v4459_v26 }
 0xe5c   :  { %v4412_v31 = vmul.f32 %v4396_v27, %v15443_v3  ;;  %12778 = vtanh.f32 %v4458_v56 }
 0xe5d   :  { %v4429_v18 = vmul.f32 0.044715, %v4413_v4 }
 0xe5e   :  { %v4428_v63 = vmul.f32 0.044715, %v4412_v31  ;;  %v11017_v61 = vpop.f32.mrb[110].mxu0 }
 0xe5f   :  { %v4445_v9 = vadd.f32 %v4429_v18, %v15440_v34  ;;  %v15453_v41 = vadd.f32 %v11017_v61, %v15385_v54  ;;  %v4343_v7 = vpop.f32.mrb[111].mxu0 }
 0xe60   :  { %v4444_v32 = vadd.f32 %v4428_v63, %v15443_v3  ;;  %v15457_v39 = vadd.f32 %v15385_v54, %v4343_v7 }
 0xe61   :  { %v4461_v24 = vmul.f32 0.7978846, %v4445_v9  ;;  %v4399_v13 = vmul.f32 %v15453_v41, %v15453_v41 }
 0xe62   :  { %v4460_v28 = vmul.f32 0.7978846, %v4444_v32  ;;  %v4398_v37 = vmul.f32 %v15457_v39, %v15457_v39 }
 0xe63   :  { %v4415_v10 = vmul.f32 %v4399_v13, %v15453_v41  ;;  %12780 = vtanh.f32 %v4461_v24 }
 0xe64   :  { %v4414_v45 = vmul.f32 %v4398_v37, %v15457_v39  ;;  %12782 = vtanh.f32 %v4460_v28 }
 0xe65   :  { %v12777_v59 = vpop.eup %12776  ;;  %v4431_v36 = vmul.f32 0.044715, %v4415_v10 }
 0xe66   :  { %v12779_v20 = vpop.eup %12778  ;;  %v4430_v5 = vmul.f32 0.044715, %v4414_v45  ;;  %v4491_v2 = vadd.f32 1.0, %v12777_v59 }
 0xe67   :  { %v4447_v47 = vadd.f32 %v4431_v36, %v15453_v41  ;;  %v4490_v15 = vadd.f32 1.0, %v12779_v20  ;;  %v11020_v40 = vpop.f32.mrb[112].mxu0 }
 0xe68   :  { %v4446_v33 = vadd.f32 %v4430_v5, %v15457_v39  ;;  %v4507_v1 = vmul.f32 0.5, %v4491_v2  ;;  %v15468_v8 = vadd.f32 %v11020_v40, %v15385_v54  ;;  %v4353_v55 = vpop.f32.mrb[113].mxu0 }
 0xe69   :  { %v4463_v48 = vmul.f32 0.7978846, %v4447_v47  ;;  %v4506_v6 = vmul.f32 0.5, %v4490_v15  ;;  %v15471_v22 = vadd.f32 %v15385_v54, %v4353_v55 }
 0xe6a   :  { %v4462_v26 = vmul.f32 0.7978846, %v4446_v33  ;;  %v4401_v56 = vmul.f32 %v15468_v8, %v15468_v8  ;;  %v4523_v31 = vmul.f32 %v4507_v1, %v4329_v38 }
 0xe6b   :  { %v4522_v27 = vmul.f32 %v4506_v6, %v4324_v58  ;;  %12784 = vtanh.f32 %v4463_v48  ;;  %v4400_v4 = vmul.f32 %v15471_v22, %v15471_v22 }
 0xe6c   :  { %12786 = vtanh.f32 %v4462_v26  ;;  %v4417_v63 = vmul.f32 %v4401_v56, %v15468_v8 }
 0xe6d   :  { %v12781_v18 = vpop.eup %12780  ;;  %11065 = vmatprep.mubr.f32.mxu1 %v4522_v27  ;;  %v4416_v9 = vmul.f32 %v4400_v4, %v15471_v22 }
 0xe6e   :  { %v12783_v61 = vpop.eup %12782  ;;  %v11023_v7 = vpop.f32.mrb[114].mxu0  ;;  %11066 = vmatmul.mubr.f32.gmra.mrb[126].mxu1 %v4523_v31  ;;  %v4493_v32 = vadd.f32 1.0, %v12781_v18  ;;  %v4433_v24 = vmul.f32 0.044715, %v4417_v63 }
 0xe6f   :  { %v15480_v13 = vadd.f32 %v11023_v7, %v15385_v54  ;;  %v4363_v58 = vpop.f32.mrb[115].mxu0  ;;  %v4492_v28 = vadd.f32 1.0, %v12783_v61  ;;  %v4432_v37 = vmul.f32 0.044715, %v4416_v9 }
 0xe70   :  { %v15483_v38 = vadd.f32 %v15385_v54, %v4363_v58  ;;  %v4509_v10 = vmul.f32 0.5, %v4493_v32  ;;  %v4449_v45 = vadd.f32 %v4433_v24, %v15468_v8 }
 0xe71   :  { %v4403_v59 = vmul.f32 %v15480_v13, %v15480_v13  ;;  %v4508_v36 = vmul.f32 0.5, %v4492_v28  ;;  %v4448_v20 = vadd.f32 %v4432_v37, %v15471_v22 }
 0xe72   :  { %v4402_v5 = vmul.f32 %v15483_v38, %v15483_v38  ;;  %v4465_v2 = vmul.f32 0.7978846, %v4449_v45  ;;  %v4525_v1 = vmul.f32 %v4509_v10, %v15440_v34 }
 0xe73   :  { %v4419_v47 = vmul.f32 %v4403_v59, %v15480_v13  ;;  %v4524_v15 = vmul.f32 %v4508_v36, %v15443_v3  ;;  %v4464_v33 = vmul.f32 0.7978846, %v4448_v20 }
 0xe74   :  { %v4418_v40 = vmul.f32 %v4402_v5, %v15483_v38  ;;  %12788 = vtanh.f32 %v4465_v2 }
 0xe75   :  { %v12785_v48 = vpop.eup %12784  ;;  %v4435_v55 = vmul.f32 0.044715, %v4419_v47  ;;  %11068 = vmatprep.mubr.f32.mxu1 %v4524_v15  ;;  %12790 = vtanh.f32 %v4464_v33 }
 0xe76   :  { %v12787_v6 = vpop.eup %12786  ;;  %v4434_v26 = vmul.f32 0.044715, %v4418_v40  ;;  %v11026_v56 = vpop.f32.mrb[116].mxu0  ;;  %11069 = vmatmul.mubr.f32.gmra.mrb[128].mxu1 %v4525_v1  ;;  %v4495_v27 = vadd.f32 1.0, %v12785_v48 }
 0xe77   :  { %v4451_v4 = vadd.f32 %v4435_v55, %v15480_v13  ;;  %v4379_v31 = vadd.f32 %v11026_v56, %v15385_v54  ;;  %v4373_v3 = vpop.f32.mrb[117].mxu0  ;;  %v4494_v18 = vadd.f32 1.0, %v12787_v6 }
 0xe78   :  { %v4450_v63 = vadd.f32 %v4434_v26, %v15483_v38  ;;  %v4374_v34 = vadd.f32 %v15385_v54, %v4373_v3  ;;  %v4511_v61 = vmul.f32 0.5, %v4495_v27 }
 0xe79   :  { %v4467_v9 = vmul.f32 0.7978846, %v4451_v4  ;;  %v4405_v7 = vmul.f32 %v4379_v31, %v4379_v31  ;;  %v4510_v32 = vmul.f32 0.5, %v4494_v18 }
 0xe7a   :  { %v4466_v24 = vmul.f32 0.7978846, %v4450_v63  ;;  %v4404_v58 = vmul.f32 %v4374_v34, %v4374_v34  ;;  %v4527_v45 = vmul.f32 %v4511_v61, %v15453_v41 }
 0xe7b   :  { %v4421_v28 = vmul.f32 %v4405_v7, %v4379_v31  ;;  %v4526_v37 = vmul.f32 %v4510_v32, %v15457_v39  ;;  %12792 = vtanh.f32 %v4467_v9 }
 0xe7c   :  { %v4420_v10 = vmul.f32 %v4404_v58, %v4374_v34  ;;  %12794 = vtanh.f32 %v4466_v24 }
 0xe7d   :  { %v4437_v59 = vmul.f32 0.044715, %v4421_v28  ;;  %11071 = vmatprep.mubr.f32.mxu1 %v4526_v37 }
 0xe7e   :  { %v4436_v36 = vmul.f32 0.044715, %v4420_v10  ;;  %11072 = vmatmul.mubr.f32.gmra.mrb[130].mxu1 %v4527_v45  ;;  %v12789_v20 = vpop.eup %12788 }
 0xe7f   :  { %v4453_v5 = vadd.f32 %v4437_v59, %v4379_v31  ;;  %v12791_v2 = vpop.eup %12790  ;;  %v4497_v15 = vadd.f32 1.0, %v12789_v20 }
 0xe80   :  { %v4452_v47 = vadd.f32 %v4436_v36, %v4374_v34  ;;  %v4496_v40 = vadd.f32 1.0, %v12791_v2 }
 0xe81   :  { %v4469_v33 = vmul.f32 0.7978846, %v4453_v5  ;;  %v4513_v48 = vmul.f32 0.5, %v4497_v15 }
 0xe82   :  { %v4468_v1 = vmul.f32 0.7978846, %v4452_v47  ;;  %v4512_v55 = vmul.f32 0.5, %v4496_v40 }
 0xe83   :  { %12796 = vtanh.f32 %v4469_v33  ;;  %v4529_v26 = vmul.f32 %v4513_v48, %v15468_v8 }
 0xe84   :  { %12798 = vtanh.f32 %v4468_v1  ;;  %v4528_v41 = vmul.f32 %v4512_v55, %v15471_v22 }
 0xe85   :  { %v12793_v39 = vpop.eup %12792 }
 0xe86   :  { %v12795_v6 = vpop.eup %12794  ;;  %v4499_v56 = vadd.f32 1.0, %v12793_v39  ;;  %11074 = vmatprep.mubr.f32.mxu1 %v4528_v41 }
 0xe87   :  { %v4498_v27 = vadd.f32 1.0, %v12795_v6  ;;  %11075 = vmatmul.mubr.f32.gmra.mrb[132].mxu1 %v4529_v26 }
 0xe88   :  { %v4515_v4 = vmul.f32 0.5, %v4499_v56 }
 0xe89   :  { %v4514_v3 = vmul.f32 0.5, %v4498_v27 }
 0xe8a   :  { %v4531_v63 = vmul.f32 %v4515_v4, %v15480_v13  ;;  %v9758_v13 = vld [vmem:[%s17870_s3 + $0x238] ss:$0 sm:$0xff] }
 0xe8b   :  { %v4530_v18 = vmul.f32 %v4514_v3, %v15483_v38 }
 0xe8d   :  { %v12797_v61 = vpop.eup %12796  ;;  %11077 = vmatprep.mubr.f32.mxu1 %v4530_v18 }
 0xe8e   :  { %v12799_v9 = vpop.eup %12798  ;;  %11078 = vmatmul.mubr.f32.gmra.mrb[134].mxu1 %v4531_v63  ;;  %v4501_v7 = vadd.f32 1.0, %v12797_v61 }
 0xe8f   :  { %v4500_v32 = vadd.f32 1.0, %v12799_v9 }
 0xe90   :  { %v4517_v22 = vmul.f32 0.5, %v4501_v7 }
 0xe91   :  { %v4516_v24 = vmul.f32 0.5, %v4500_v32 }
 0xe92   :  { %v4533_v8 = vmul.f32 %v4517_v22, %v4379_v31 }
 0xe93   :  { %v4532_v58 = vmul.f32 %v4516_v24, %v4374_v34 }
 0xe95   :  { %11080 = vmatprep.mubr.f32.mxu1 %v4532_v58 }
 0xe96   :  { %11081 = vmatmul.mubr.f32.gmra.mrb[136].mxu1 %v4533_v8 }
 0xeaf   :  { %v11029_v28 = vpop.f32.mrb[118].mxu0 }
 0xeb0   :  { %v4389_v37 = vadd.f32 %v11029_v28, %v15385_v54  ;;  %v4383_v10 = vpop.f32.mrb[119].mxu0 }
 0xeb1   :  { %v4384_v38 = vadd.f32 %v15385_v54, %v4383_v10 }
 0xeb2   :  { %v4407_v45 = vmul.f32 %v4389_v37, %v4389_v37 }
 0xeb3   :  { %v4406_v59 = vmul.f32 %v4384_v38, %v4384_v38  ;;  %v11096_v36 = vpop.f32.mrb[120].mxu0 }
 0xeb4   :  { %v4423_v20 = vmul.f32 %v4407_v45, %v4389_v37  ;;  %v5001_v5 = vadd.f32 %v11096_v36, %v9758_v13  ;;  %v4995_v2 = vpop.f32.mrb[121].mxu0 }
 0xeb5   :  { %v4422_v34 = vmul.f32 %v4406_v59, %v4384_v38  ;;  %v4996_v31 = vadd.f32 %v9758_v13, %v4995_v2 }
 0xeb6   :  { %v4439_v47 = vmul.f32 0.044715, %v4423_v20  ;;  %v5005_v15 = vmul.f32 %v5001_v5, %v5001_v5 }
 0xeb7   :  { %v4438_v33 = vmul.f32 0.044715, %v4422_v34  ;;  %v5004_v40 = vmul.f32 %v4996_v31, %v4996_v31 }
 0xeb8   :  { %v4455_v1 = vadd.f32 %v4439_v47, %v4389_v37  ;;  %v5007_v48 = vmul.f32 %v5005_v15, %v5001_v5 }
 0xeb9   :  { %v4454_v55 = vadd.f32 %v4438_v33, %v4384_v38  ;;  %v5006_v54 = vmul.f32 %v5004_v40, %v4996_v31 }
 0xeba   :  { %v4471_v39 = vmul.f32 0.7978846, %v4455_v1  ;;  %v5009_v41 = vmul.f32 0.044715, %v5007_v48 }
 0xebb   :  { %v4470_v6 = vmul.f32 0.7978846, %v4454_v55  ;;  %v5008_v26 = vmul.f32 0.044715, %v5006_v54 }
 0xebc   :  { %v5011_v56 = vadd.f32 %v5009_v41, %v5001_v5  ;;  %12800 = vtanh.f32 %v4471_v39  ;;  %v9761_v41 = vld [vmem:[%s17870_s3 + $0x2c0] ss:$0 sm:$0xff] }
 0xebd   :  { %v5010_v27 = vadd.f32 %v5008_v26, %v4996_v31  ;;  %12802 = vtanh.f32 %v4470_v6 }
 0xebe   :  { %v5013_v4 = vmul.f32 0.7978846, %v5011_v56 }
 0xebf   :  { %v5012_v3 = vmul.f32 0.7978846, %v5010_v27  ;;  %v9757_v27 = vld [vmem:[%s17870_s3 + $0x210] ss:$0 sm:$0xff] }
 0xec0   :  { %12804 = vtanh.f32 %v5013_v4 }
 0xec1   :  { %12806 = vtanh.f32 %v5012_v3 }
 0xec6   :  { %v12801_v18 = vpop.eup %12800 }
 0xec7   :  { %v12803_v63 = vpop.eup %12802  ;;  %v4503_v61 = vadd.f32 1.0, %v12801_v18 }
 0xec8   :  { %v4502_v9 = vadd.f32 1.0, %v12803_v63 }
 0xec9   :  { %v4519_v7 = vmul.f32 0.5, %v4503_v61 }
 0xeca   :  { %v12805_v32 = vpop.eup %12804  ;;  %v4518_v22 = vmul.f32 0.5, %v4502_v9 }
 0xecb   :  { %v12807_v24 = vpop.eup %12806  ;;  %v5017_v58 = vadd.f32 1.0, %v12805_v32  ;;  %v4535_v13 = vmul.f32 %v4519_v7, %v4389_v37 }
 0xecc   :  { %v4534_v8 = vmul.f32 %v4518_v22, %v4384_v38  ;;  %v5016_v28 = vadd.f32 1.0, %v12807_v24 }
 0xecd   :  { %v5019_v10 = vmul.f32 0.5, %v5017_v58 }
 0xece   :  { %11083 = vmatprep.mubr.f32.mxu1 %v4534_v8  ;;  %v5018_v45 = vmul.f32 0.5, %v5016_v28 }
 0xecf   :  { %11084 = vmatmul.mubr.f32.gmra.mrb[138].mxu1 %v4535_v13  ;;  %v5021_v36 = vmul.f32 %v5019_v10, %v5001_v5 }
 0xed0   :  { %v5020_v59 = vmul.f32 %v5018_v45, %v4996_v31 }
 0xed2   :  { %11129 = vmatprep.mubr.f32.mxu1 %v5020_v59  ;;  %v5121_v59 = vld [vmem:[%s17870_s3 + $0x2c8] sm:$0xff] }
 0xed3   :  { %11130 = vmatmul.mubr.f32.vlgmr.msra.gmra.mrb[140].mxu1 %v5021_v36  ;;  %v5122_v36 = vld [vmem:[%s17870_s3 + $0x2d0] sm:$0xff] }
 0xed4   :  { %5814 = vmatprep.mubr.f32.mxu1 %v17987_v46 }
 0xf05   :  { %v11064_v20 = vpop.f32.mrb[124].mxu1 }
 0xf06   :  { %v4606_v2 = vpop.f32.mrb[125].mxu1  ;;  %v4612_v3 = vadd.f32 %v11064_v20, %v9757_v27 }
 0xf07   :  { %v4607_v18 = vadd.f32 %v9757_v27, %v4606_v2  ;;  %v11956_v2 = vpack.c.bf16 %v5122_v36, %v5121_v59 }
 0xf09   :  { %11957 = vmatprep.subr.bf16.mxu0 %v11956_v2 }
 0xf0a   :  { %11959 = vmatpush3.bf16.msra.mxu0 %v11956_v2 }
 0xf41   :  { %v11067_v34 = vpop.f32.mrb[126].mxu1 }
 0xf42   :  { %v4616_v47 = vpop.f32.mrb[127].mxu1  ;;  %v4622_v63 = vadd.f32 %v11067_v34, %v9757_v27  ;;  %v5123_v34 = vld [vmem:[%s17870_s3 + $0x2d8] sm:$0xff] }
 0xf43   :  { %v4617_v61 = vadd.f32 %v9757_v27, %v4616_v47  ;;  %v5124_v47 = vld [vmem:[%s17870_s3 + $0x2e0] sm:$0xff] }
 0xf49   :  { %v11070_v15 = vpop.f32.mrb[128].mxu1 }
 0xf4a   :  { %v4626_v33 = vpop.f32.mrb[129].mxu1  ;;  %v4632_v9 = vadd.f32 %v11070_v15, %v9757_v27  ;;  %v11960_v15 = vpack.c.bf16 %v5124_v47, %v5123_v34 }
 0xf4b   :  { %v4627_v7 = vadd.f32 %v9757_v27, %v4626_v33 }
 0xf4c   :  { %11961 = vmatprep.subr.bf16.mxu0 %v11960_v15 }
 0xf4d   :  { %11963 = vmatpush3.bf16.msra.mxu0 %v11960_v15 }
 0xf4e   :  { %11972 = vmatprep.subr.bf16.mxu0 %v17986_v0 }
 0xf51   :  { %v11073_v40 = vpop.f32.mrb[130].mxu1 }
 0xf52   :  { %v4636_v38 = vpop.f32.mrb[131].mxu1  ;;  %v4642_v32 = vadd.f32 %v11073_v40, %v9757_v27 }
 0xf53   :  { %v4637_v22 = vadd.f32 %v9757_v27, %v4636_v38 }
 0xf5a   :  { %v11076_v1 = vpop.f32.mrb[132].mxu1 }
 0xf5b   :  { %v4646_v48 = vpop.f32.mrb[133].mxu1  ;;  %v4652_v8 = vadd.f32 %v11076_v1, %v9757_v27  ;;  %v18020_v1 = vld [vmem:[#allocation17_spill] sm:$0xff] }
 0xf5c   :  { %v4647_v24 = vadd.f32 %v9757_v27, %v4646_v48 }
 0xf61   :  { %v11079_v37 = vpop.f32.mrb[134].mxu1 }
 0xf62   :  { %v4656_v55 = vpop.f32.mrb[135].mxu1  ;;  %v4662_v13 = vadd.f32 %v11079_v37, %v9757_v27 }
 0xf63   :  { %v4657_v10 = vadd.f32 %v9757_v27, %v4656_v55 }
 0xf69   :  { %v11082_v54 = vpop.f32.mrb[136].mxu1 }
 0xf6a   :  { %v4666_v39 = vpop.f32.mrb[137].mxu1  ;;  %v4672_v58 = vadd.f32 %v11082_v54, %v9757_v27 }
 0xf6b   :  { %v4667_v45 = vadd.f32 %v9757_v27, %v4666_v39 }
 0xfa2   :  { %v11085_v31 = vpop.f32.mrb[138].mxu1 }
 0xfa3   :  { %v4676_v5 = vpop.f32.mrb[139].mxu1  ;;  %v4682_v20 = vadd.f32 %v11085_v31, %v9757_v27 }
 0xfa4   :  { %v4677_v28 = vadd.f32 %v9757_v27, %v4676_v5 }
 0xfa6   :  { %v11131_v6 = vpop.f32.mrb[140].mxu1 }
 0xfa7   :  { %v5098_v26 = vadd.f32 %v11131_v6, %v9761_v41  ;;  %v5092_v56 = vpop.f32.mrb[141].mxu1 }
 0xfa8   :  { %v5093_v4 = vadd.f32 %v9761_v41, %v5092_v56 }
 0xfa9   :  { %5105 = vrot.lane.b32.xlu0 %v5098_v26, %s13059_s12 }
 0xfaa   :  { %5103 = vrot.lane.b32.xlu1 %v5093_v4, %s13059_s12 }
 0xfad   :  { %4703 = vrot.lane.b32.xlu0 %v4612_v3, %s13058_s11 }
 0xfae   :  { %4701 = vrot.lane.b32.xlu1 %v4607_v18, %s13058_s11 }
 0xfb1   :  { %4707 = vrot.lane.b32.xlu0 %v4622_v63, %s13058_s11 }
 0xfb2   :  { %4705 = vrot.lane.b32.xlu1 %v4617_v61, %s13058_s11  ;;  %v714_v61 = vsub.s32 4, %v17995_v49 }
 0xfb5   :  { %4711 = vrot.lane.b32.xlu0 %v4632_v9, %s13058_s11  ;;  %v18021_v9 = vld [vmem:[#allocation20_spill] sm:$0xff] }
 0xfb6   :  { %4709 = vrot.lane.b32.xlu1 %v4627_v7, %s13058_s11 }
 0xfb9   :  { %4715 = vrot.lane.b32.xlu0 %v4642_v32, %s13058_s11 }
 0xfba   :  { %4713 = vrot.lane.b32.xlu1 %v4637_v22, %s13058_s11 }
 0xfbd   :  { %4717 = vrot.lane.b32.xlu0 %v4647_v24, %s13058_s11  ;;  %v15570_v24 = vld [vmem:[%s17876_s6] sm:$0x3f] }
 0xfbe   :  { %4727 = vrot.lane.b32.xlu1 %v4672_v58, %s13058_s11  ;;  %v715_v58 = vrot.slane %v15570_v24, %v714_v61 }
 0xfc1   :  { %4719 = vrot.lane.b32.xlu0 %v4652_v8, %s13058_s11 }
 0xfc2   :  { %4729 = vrot.lane.b32.xlu1 %v4677_v28, %s13058_s11 }
 0xfc5   :  { %4721 = vrot.lane.b32.xlu0 %v4657_v10, %s13058_s11 }
 0xfc9   :  { %4723 = vrot.lane.b32.xlu0 %v4662_v13, %s13058_s11  ;;  %v18022_v13 = vld [vmem:[#allocation21_spill] sm:$0xff] }
 0xfcd   :  { %4725 = vrot.lane.b32.xlu0 %v4667_v45, %s13058_s11  ;;  %v933_v45 = vadd.f32 %v18022_v13, %v715_v58 }
 0xfcf   :  { %v15591_v47 = vrot.slane %v933_v45, %v17997_v30 }
 0xfd1   :  { %4731 = vrot.lane.b32.xlu0 %v4682_v20, %s13058_s11  ;;  %v15581_v20 = vrot.slane %v933_v45, %v17998_v35  ;;  %18025 = vst [vmem:[#allocation35_spill] sm:$0xff] %v15591_v47 }
 0xfd3   :  { %18023 = vst [vmem:[#allocation34_spill] sm:$0xff] %v15581_v20  ;;  %v15588_v34 = vadd.f32 1.0, %v15581_v20 }
 0xfd5   :  { %18024 = vst [vmem:[#allocation33_spill] sm:$0xff] %v15588_v34 }
0x101b   :  { %v5106_v33 = vpop.permute.xlu0 %5105 }
0x101c   :  { %v5104_v40 = vpop.permute.xlu1 %5103  ;;  %v5110_v8 = vmul.f32 %v5106_v33, %v14978_v23 }
0x101d   :  { %v5109_v23 = vmul.f32 %v5104_v40, %v14982_v21  ;;  %v15598_v21 = vadd.f32 1.0, %v15591_v47 }
0x101f   :  { %v4704_v38 = vpop.permute.xlu0 %4703  ;;  %18026 = vst [vmem:[#allocation19_spill] sm:$0xff] %v15598_v21 }
0x1020   :  { %v4750_v48 = vmul.f32 %v4704_v38, %v18020_v1  ;;  %v4702_v37 = vpop.permute.xlu1 %4701 }
0x1021   :  { %v4749_v55 = vmul.f32 %v4702_v37, %v18020_v1 }
0x1022   :  { %4783 = vrot.lane.b32.xlu0 %v4750_v48, %s13059_s12 }
0x1023   :  { %v4708_v54 = vpop.permute.xlu0 %4707  ;;  %4781 = vrot.lane.b32.xlu1 %v4749_v55, %s13059_s12 }
0x1024   :  { %v4752_v39 = vmul.f32 %v4708_v54, %v18020_v1  ;;  %v4706_v31 = vpop.permute.xlu1 %4705 }
0x1025   :  { %v4751_v41 = vmul.f32 %v4706_v31, %v18020_v1 }
0x1027   :  { %v4712_v5 = vpop.permute.xlu0 %4711  ;;  %4787 = vrot.lane.b32.xlu1 %v4752_v39, %s13059_s12 }
0x1028   :  { %v4710_v26 = vpop.permute.xlu1 %4709  ;;  %v4754_v27 = vmul.f32 %v4712_v5, %v18020_v1 }
0x1029   :  { %v4753_v3 = vmul.f32 %v4710_v26, %v18020_v1 }
0x102b   :  { %v4716_v6 = vpop.permute.xlu0 %4715  ;;  %4785 = vrot.lane.b32.xlu1 %v4751_v41, %s13059_s12 }
0x102c   :  { %v4756_v56 = vmul.f32 %v4716_v6, %v18020_v1  ;;  %v4714_v18 = vpop.permute.xlu1 %4713 }
0x102d   :  { %v4755_v32 = vmul.f32 %v4714_v18, %v18020_v1 }
0x102e   :  { %4795 = vrot.lane.b32.xlu0 %v4756_v56, %s13059_s12 }
0x102f   :  { %v4718_v4 = vpop.permute.xlu0 %4717  ;;  %4791 = vrot.lane.b32.xlu1 %v4754_v27, %s13059_s12 }
0x1030   :  { %v4757_v28 = vmul.f32 %v4718_v4, %v18021_v9  ;;  %v4728_v33 = vpop.permute.xlu1 %4727 }
0x1031   :  { %v4762_v40 = vmul.f32 %v4728_v33, %v18021_v9 }
0x1033   :  { %v4720_v63 = vpop.permute.xlu0 %4719  ;;  %4789 = vrot.lane.b32.xlu1 %v4753_v3, %s13059_s12 }
0x1034   :  { %v4758_v7 = vmul.f32 %v4720_v63, %v18021_v9  ;;  %v15608_v1 = vpop.permute.xlu1 %4729 }
0x1036   :  { %4799 = vrot.lane.b32.xlu0 %v4758_v7, %s13059_s12 }
0x1037   :  { %v4722_v22 = vpop.permute.xlu0 %4721  ;;  %4793 = vrot.lane.b32.xlu1 %v4755_v32, %s13059_s12 }
0x1038   :  { %v4759_v59 = vmul.f32 %v4722_v22, %v18021_v9 }
0x103a   :  { %5115 = vrot.lane.b32.xlu0 %v5110_v8, %s13058_s11 }
0x103b   :  { %v4724_v10 = vpop.permute.xlu0 %4723  ;;  %4797 = vrot.lane.b32.xlu1 %v4757_v28, %s13059_s12 }
0x103c   :  { %v4760_v15 = vmul.f32 %v4724_v10, %v18021_v9 }
0x103f   :  { %v4726_v36 = vpop.permute.xlu0 %4725  ;;  %4801 = vrot.lane.b32.xlu1 %v4759_v59, %s13059_s12 }
0x1040   :  { %v4761_v2 = vmul.f32 %v4726_v36, %v18021_v9 }
0x1042   :  { %4805 = vrot.lane.b32.xlu0 %v4761_v2, %s13059_s12 }
0x1043   :  { %5113 = vrot.lane.b32.xlu1 %v5109_v23, %s13058_s11  ;;  %v15606_v38 = vpop.permute.xlu0 %4731 }
0x1046   :  { %5657 = vrot.lane.b32.xlu0 %v15588_v34, %s13058_s11 }
0x1047   :  { %4803 = vrot.lane.b32.xlu1 %v4760_v15, %s13059_s12 }
0x104a   :  { %5667 = vrot.lane.b32.xlu0 %v15581_v20, %s13057_s10 }
0x104b   :  { %5659 = vrot.lane.b32.xlu1 %v15598_v21, %s13058_s11 }
0x104e   :  { %4807 = vrot.lane.b32.xlu0 %v4762_v40, %s13059_s12 }
0x1094   :  { %v4784_v48 = vpop.permute.xlu0 %4783 }
0x1095   :  { %v15611_v37 = vadd.f32 %v4784_v48, %v15058_v50  ;;  %v4782_v55 = vpop.permute.xlu1 %4781 }
0x1096   :  { %v15614_v54 = vadd.f32 %v4782_v55, %v15061_v44 }
0x1097   :  { %18027 = vst [vmem:[#allocation12_spill] sm:$0xff] %v15611_v37  ;;  %v5344_v39 = vsel %vm264_vm1, %v15611_v37, 0.0  ;;  %v5406_v31 = vmul.f32 %v15611_v37, %v15611_v37 }
0x1098   :  { %18028 = vst [vmem:[#allocation15_spill] sm:$0xff] %v15614_v54  ;;  %5345 = vadd.xlane.f32.xlu1 %v5344_v39  ;;  %11140 = vmatprep.mubr.msk.f32.mxu0 %vm264_vm1, %v15614_v54  ;;  %v5405_v44 = vmul.f32 %v15614_v54, %v15614_v54  ;;  %v5341_v41 = vsel %vm264_vm1, %v15614_v54, 0.0 }
0x1099   :  { %11141 = vmatmul.mubr.msk.f32.vlgmr.msra.gmra.mrb[122].mxu0 %vm264_vm1, %v15611_v37  ;;  %v4788_v5 = vpop.permute.xlu1 %4787  ;;  %v5424_v50 = vsel %vm264_vm1, %v5406_v31, 0.0 }
0x109a   :  { %5425 = vadd.xlane.f32.xlu0 %v5424_v50  ;;  %v15630_v6 = vadd.f32 %v4788_v5, %v15086_v11  ;;  %v5421_v56 = vsel %vm264_vm1, %v5405_v44, 0.0 }
0x109c   :  { %5342 = vadd.xlane.f32.xlu1 %v5341_v41  ;;  %18029 = vst [vmem:[#allocation13_spill] sm:$0xff] %v15630_v6  ;;  %v5350_v11 = vsel %vm264_vm1, %v15630_v6, 0.0  ;;  %v5408_v18 = vmul.f32 %v15630_v6, %v15630_v6 }
0x109d   :  { %v4786_v26 = vpop.permute.xlu1 %4785 }
0x109e   :  { %v15634_v27 = vadd.f32 %v4786_v26, %v15096_v16  ;;  %5422 = vadd.xlane.f32.xlu0 %v5421_v56  ;;  %v5430_v63 = vsel %vm264_vm1, %v5408_v18, 0.0  ;;  %v710_v26 = vsub.s32 3, %v17995_v49  ;;  %v18041_v18 = vld [vmem:[#allocation16_spill] sm:$0xff] }
0x10a0   :  { %18030 = vst [vmem:[#allocation14_spill] sm:$0xff] %v15634_v27  ;;  %11143 = vmatprep.mubr.msk.f32.mxu0 %vm264_vm1, %v15634_v27  ;;  %v5347_v4 = vsel %vm264_vm1, %v15634_v27, 0.0  ;;  %v5407_v61 = vmul.f32 %v15634_v27, %v15634_v27  ;;  %v4796_v7 = vpop.permute.xlu0 %4795 }
0x10a1   :  { %5348 = vadd.xlane.f32.xlu1 %v5347_v4  ;;  %11144 = vmatmul.mubr.msk.f32.gmra.mrb[124].mxu0 %vm264_vm1, %v15630_v6  ;;  %v4792_v3 = vpop.permute.xlu1 %4791 }
0x10a2   :  { %5351 = vadd.xlane.f32.xlu0 %v5350_v11  ;;  %v15653_v22 = vadd.f32 %v4792_v3, %v15093_v14  ;;  %v5427_v28 = vsel %vm264_vm1, %v5407_v61, 0.0  ;;  %v15666_v14 = vadd.f32 %v4796_v7, %v15112_v17  ;;  %v5676_v7 = vld [vmem:[%s17875_s4 + $0x58] sm:$0xff] }
0x10a4   :  { %18032 = vst [vmem:[#allocation11_spill] sm:$0xff] %v15653_v22  ;;  %18034 = vst [vmem:[#allocation2_spill] sm:$0xff] %v15666_v14  ;;  %v5356_v59 = vsel %vm264_vm1, %v15653_v22, 0.0 }
0x10a5   :  { %v4790_v16 = vpop.permute.xlu1 %4789 }
0x10a6   :  { %v15650_v32 = vadd.f32 %v4790_v16, %v15108_v57  ;;  %5431 = vadd.xlane.f32.xlu0 %v5430_v63 }
0x10a8   :  { %18031 = vst [vmem:[#allocation10_spill] sm:$0xff] %v15650_v32  ;;  %11146 = vmatprep.mubr.msk.f32.mxu0 %vm264_vm1, %v15650_v32  ;;  %v5353_v58 = vsel %vm264_vm1, %v15650_v32, 0.0  ;;  %v4800_v10 = vpop.permute.xlu0 %4799 }
0x10a9   :  { %5354 = vadd.xlane.f32.xlu1 %v5353_v58  ;;  %11147 = vmatmul.mubr.msk.f32.gmra.mrb[126].mxu0 %vm264_vm1, %v15653_v22  ;;  %v4794_v8 = vpop.permute.xlu1 %4793  ;;  %v15683_v2 = vadd.f32 %v4800_v10, %v15128_v29  ;;  %v5678_v58 = vld [vmem:[%s17875_s4 + $0x68] sm:$0xff] }
0x10aa   :  { %v15663_v57 = vadd.f32 %v4794_v8, %v15124_v51  ;;  %5428 = vadd.xlane.f32.xlu0 %v5427_v28  ;;  %v5410_v51 = vmul.f32 %v15653_v22, %v15653_v22  ;;  %v11964_v8 = vpack.c.bf16 %v5678_v58, %v5676_v7  ;;  %v5677_v28 = vld [vmem:[%s17875_s4 + $0x60] sm:$0xff] }
0x10ab   :  { %18036 = vst [vmem:[#allocation4_spill] sm:$0xff] %v15683_v2 }
0x10ac   :  { %18033 = vst [vmem:[#allocation31_spill] sm:$0xff] %v15663_v57  ;;  %11149 = vmatprep.mubr.msk.f32.mxu0 %vm264_vm1, %v15663_v57  ;;  %v5411_v13 = vmul.f32 %v15663_v57, %v15663_v57  ;;  %v5116_v23 = vpop.permute.xlu0 %5115  ;;  %v5436_v33 = vsel %vm264_vm1, %v5410_v51, 0.0  ;;  %v5359_v44 = vsel %vm264_vm1, %v15663_v57, 0.0  ;;  %11965 = vmatprep.subr.bf16.mxu1 %v11964_v8 }
0x10ad   :  { %11150 = vmatmul.mubr.msk.f32.gmra.mrb[128].mxu0 %vm264_vm1, %v15666_v14  ;;  %v4798_v45 = vpop.permute.xlu1 %4797 }
0x10ae   :  { %v15679_v36 = vadd.f32 %v4798_v45, %v15140_v43  ;;  %5357 = vadd.xlane.f32.xlu0 %v5356_v59  ;;  %v5439_v17 = vsel %vm264_vm1, %v5411_v13, 0.0  ;;  %v5409_v43 = vmul.f32 %v15650_v32, %v15650_v32  ;;  %v5680_v13 = vld [vmem:[%s17875_s4 + $0x78] sm:$0xff]  ;;  %v5682_v45 = vld [vmem:[%s17875_s4 + $0x88] sm:$0xff]  ;;  %v5679_v59 = vld [vmem:[%s17875_s4 + $0x70] sm:$0xff] }
0x10af   :  { %5440 = vadd.xlane.f32.xlu1 %v5439_v17  ;;  %v11968_v51 = vpack.c.bf16 %v5682_v45, %v5680_v13  ;;  %v5681_v17 = vld [vmem:[%s17875_s4 + $0x80] sm:$0xff] }
0x10b0   :  { %18035 = vst [vmem:[#allocation3_spill] sm:$0xff] %v15679_v36  ;;  %11152 = vmatprep.mubr.msk.f32.mxu0 %vm264_vm1, %v15679_v36  ;;  %v5433_v55 = vsel %vm264_vm1, %v5409_v43, 0.0  ;;  %v5413_v43 = vmul.f32 %v15679_v36, %v15679_v36 }
0x10b1   :  { %11153 = vmatmul.mubr.msk.f32.gmra.mrb[130].mxu0 %vm264_vm1, %v15683_v2  ;;  %v4802_v15 = vpop.permute.xlu1 %4801 }
0x10b2   :  { %v15693_v40 = vadd.f32 %v4802_v15, %v15156_v60  ;;  %5437 = vadd.xlane.f32.xlu0 %v5436_v33  ;;  %v15706_v60 = vadd.f32 %v5116_v23, %v14985_v12  ;;  %v11970_v23 = vpack.c.bf16 %v5681_v17, %v5679_v59  ;;  %v5412_v15 = vmul.f32 %v15666_v14, %v15666_v14 }
0x10b4   :  { %18037 = vst [vmem:[#allocation6_spill] sm:$0xff] %v15693_v40  ;;  %v4806_v29 = vpop.permute.xlu0 %4805  ;;  %11155 = vmatprep.mubr.msk.f32.mxu0 %vm264_vm1, %v15693_v40  ;;  %v5626_v12 = vsel %vm264_vm1, %v15706_v60, 0.0  ;;  %v5442_v33 = vsel %vm264_vm1, %v5412_v15, 0.0 }
0x10b5   :  { %v5114_v48 = vpop.permute.xlu1 %5113 }
0x10b6   :  { %v15699_v39 = vadd.f32 %v5114_v48, %v14993_v42  ;;  %5434 = vadd.xlane.f32.xlu0 %v5433_v55  ;;  %v15714_v42 = vadd.f32 %v4806_v29, %v15172_v52  ;;  %v711_v52 = vrot.slane %v15570_v24, %v710_v26  ;;  %v5445_v29 = vsel %vm264_vm1, %v5413_v43, 0.0 }
0x10b7   :  { %v5368_v48 = vsel %vm264_vm1, %v15683_v2, 0.0  ;;  %v5414_v55 = vmul.f32 %v15683_v2, %v15683_v2  ;;  %v5415_v26 = vmul.f32 %v15693_v40, %v15693_v40 }
0x10b8   :  { %v15701_v31 = vpop.permute.xlu0 %5657  ;;  %v5623_v5 = vsel %vm264_vm1, %v15699_v39, 0.0  ;;  %18039 = vst [vmem:[#allocation7_spill] sm:$0xff] %v15714_v42  ;;  %v5631_v11 = vmul.f32 %v15699_v39, %v15699_v39  ;;  %v15737_v16 = vadd.f32 %v18041_v18, %v711_v52 }
0x10b9   :  { %5624 = vadd.xlane.f32.xlu1 %v5623_v5  ;;  %v4804_v50 = vpop.permute.xlu1 %4803  ;;  %v5362_v5 = vsel %vm264_vm1, %v15666_v14, 0.0 }
0x10ba   :  { %v15711_v41 = vadd.f32 %v4804_v50, %v15144_v62  ;;  %5360 = vadd.xlane.f32.xlu0 %v5359_v44  ;;  %v5632_v62 = vmul.f32 %v15706_v60, %v15706_v60  ;;  %v5633_v63 = vsel %vm264_vm1, %v5631_v11, 0.0  ;;  %v15742_v24 = vrot.slane %v15737_v16, %v17998_v35 }
0x10bb   :  { %v5448_v50 = vsel %vm264_vm1, %v5414_v55, 0.0  ;;  %v5371_v44 = vsel %vm264_vm1, %v15693_v40, 0.0  ;;  %v4764_v11 = vmul.f32 %v15606_v38, %v18021_v9 }
0x10bc   :  { %18038 = vst [vmem:[#allocation5_spill] sm:$0xff] %v15711_v41  ;;  %v15717_v56 = vpop.permute.xlu0 %5667  ;;  %11156 = vmatmul.mubr.msk.f32.gmra.mrb[132].mxu0 %vm264_vm1, %v15711_v41  ;;  %v5636_v3 = vsel %vm264_vm1, %v5632_v62, 0.0  ;;  %18042 = vst [vmem:[#allocation9_spill] sm:$0xff] %v15742_v24  ;;  %v5581_v61 = vadd.f32 1.0, %v15742_v24  ;;  %v5374_v62 = vsel %vm264_vm1, %v15711_v41, 0.0  ;;  %v5416_v52 = vmul.f32 %v15711_v41, %v15711_v41 }
0x10bd   :  { %11158 = vmatprep.mubr.msk.f32.mxu0 %vm264_vm1, %v15714_v42  ;;  %v15808_v7 = vpop.permute.xlu1 %5659 }
0x10be   :  { %5627 = vadd.xlane.f32.xlu0 %v5626_v12  ;;  %v5451_v12 = vsel %vm264_vm1, %v5415_v26, 0.0 }
0x10c0   :  { %v4808_v4 = vpop.permute.xlu0 %4807 }
0x10c1   :  { %v15729_v49 = vadd.f32 %v4808_v4, %v15160_v53  ;;  %v4763_v53 = vmul.f32 %v15608_v1, %v18021_v9  ;;  %v5675_v1 = vld [vmem:[%s17875_s4 + $0x50] sm:$0xff]  ;;  %v5454_v4 = vsel %vm264_vm1, %v5416_v52, 0.0  ;;  %v5365_v9 = vsel %vm264_vm1, %v15679_v36, 0.0 }
0x10c2   :  { %5637 = vadd.xlane.f32.xlu0 %v5636_v3  ;;  %v11966_v10 = vpack.c.bf16 %v5677_v28, %v5675_v1  ;;  %v5417_v3 = vmul.f32 %v15714_v42, %v15714_v42  ;;  %v5377_v28 = vsel %vm264_vm1, %v15714_v42, 0.0 }
0x10c3   :  { %18040 = vst [vmem:[#allocation8_spill] sm:$0xff] %v15729_v49  ;;  %11159 = vmatmul.mubr.msk.f32.gmra.mrb[134].mxu0 %vm264_vm1, %v15729_v49  ;;  %v5380_v45 = vsel %vm264_vm1, %v15729_v49, 0.0 }
0x10c4   :  { %11967 = vmatpush1.bf16.msra.mxu1 %v11966_v10  ;;  %v5457_v18 = vsel %vm264_vm1, %v5417_v3, 0.0 }
0x10c5   :  { %11969 = vmatprep.subr.bf16.mxu1 %v11968_v51 }
0x10c6   :  { %5634 = vadd.xlane.f32.xlu0 %v5633_v63  ;;  %v5418_v63 = vmul.f32 %v15729_v49, %v15729_v49 }
0x10c8   :  { %11971 = vmatpush1.bf16.msra.mxu1 %v11970_v23 }
0x10c9   :  { %12000 = vmatprep.subr.bf16.mxu1 %v17986_v0 }
0x10ca   :  { %4809 = vrot.lane.b32.xlu1 %v4763_v53, %s13059_s12  ;;  %v5460_v53 = vsel %vm264_vm1, %v5418_v63, 0.0 }
0x10ce   :  { %5585 = vrot.lane.b32.xlu1 %v5581_v61, %s13059_s12 }
0x10dc   :  { %5669 = vrot.lane.b32.xlu0 %v15591_v47, %s13057_s10 }
0x10f2   :  { %5443 = vadd.xlane.f32.xlu1 %v5442_v33 }
0x10f6   :  { %5446 = vadd.xlane.f32.xlu1 %v5445_v29 }
0x10fa   :  { %5369 = vadd.xlane.f32.xlu1 %v5368_v48 }
0x10fb   :  { %5363 = vadd.xlane.f32.xlu0 %v5362_v5 }
0x10fe   :  { %5449 = vadd.xlane.f32.xlu1 %v5448_v50 }
0x1102   :  { %5372 = vadd.xlane.f32.xlu1 %v5371_v44 }
0x1106   :  { %5452 = vadd.xlane.f32.xlu1 %v5451_v12 }
0x110a   :  { %5375 = vadd.xlane.f32.xlu1 %v5374_v62 }
0x110e   :  { %5455 = vadd.xlane.f32.xlu1 %v5454_v4 }
0x1111   :  { %4811 = vrot.lane.b32.xlu0 %v4764_v11, %s13059_s12 }
0x1112   :  { %5458 = vadd.xlane.f32.xlu1 %v5457_v18 }
0x1116   :  { %5461 = vadd.xlane.f32.xlu1 %v5460_v53 }
0x1125   :  { %v5346_v8 = vpop.xlane.xlu1 %5345 }
0x1126   :  { %v15830_v11 = vmul.f32 0.03125, %v5346_v8 }
0x1127   :  { %v5426_v61 = vpop.xlane.xlu0 %5425 }
0x1129   :  { %v5343_v10 = vpop.xlane.xlu1 %5342 }
0x112a   :  { %v15827_v12 = vmul.f32 0.03125, %v5343_v10 }
0x112b   :  { %v5423_v58 = vpop.xlane.xlu0 %5422 }
0x112c   :  { %v5485_v18 = vmul.f32 %v15827_v12, %v15827_v12  ;;  %v5469_v63 = vmul.f32 0.03125, %v5423_v58  ;;  %v15840_v58 = vrot.slane %v15737_v16, %v17997_v30 }
0x112e   :  { %v5349_v59 = vpop.xlane.xlu1 %5348  ;;  %18044 = vst [vmem:[#allocation23_spill] sm:$0xff] %v15840_v58 }
0x112f   :  { %v5352_v1 = vpop.xlane.xlu0 %5351 }
0x1130   :  { %5366 = vadd.xlane.f32.xlu0 %v5365_v9 }
0x1133   :  { %v5432_v38 = vpop.xlane.xlu0 %5431 }
0x1134   :  { %5378 = vadd.xlane.f32.xlu0 %v5377_v28 }
0x1136   :  { %v5355_v17 = vpop.xlane.xlu1 %5354 }
0x1137   :  { %v5429_v13 = vpop.xlane.xlu0 %5428 }
0x1138   :  { %5381 = vadd.xlane.f32.xlu0 %v5380_v45  ;;  %v5471_v47 = vmul.f32 0.03125, %v5429_v13 }
0x113b   :  { %v5358_v51 = vpop.xlane.xlu0 %5357 }
0x113c   :  { %v15816_v15 = vpop.xlane.xlu1 %5440 }
0x113f   :  { %v5438_v23 = vpop.xlane.xlu0 %5437 }
0x1143   :  { %v5435_v33 = vpop.xlane.xlu0 %5434 }
0x1146   :  { %v5625_v43 = vpop.xlane.xlu1 %5624 }
0x1147   :  { %v5361_v29 = vpop.xlane.xlu0 %5360  ;;  %v5629_v4 = vmul.f32 0.03125, %v5625_v43 }
0x1149   :  { %v5641_v28 = vmul.f32 %v5629_v4, %v5629_v4 }
0x114a   :  { %v4810_v48 = vpop.permute.xlu1 %4809 }
0x114b   :  { %v15819_v55 = vadd.f32 %v4810_v48, %v15188_v25  ;;  %v5628_v5 = vpop.xlane.xlu0 %5627  ;;  %v5486_v48 = vmul.f32 %v15830_v11, %v15830_v11 }
0x114c   :  { %v5630_v50 = vmul.f32 0.03125, %v5628_v5  ;;  %v5470_v5 = vmul.f32 0.03125, %v5426_v61 }
0x114d   :  { %18043 = vst [vmem:[#allocation24_spill] sm:$0xff] %v15819_v55  ;;  %11161 = vmatprep.mubr.msk.f32.mxu0 %vm264_vm1, %v15819_v55  ;;  %v5383_v44 = vsel %vm264_vm1, %v15819_v55, 0.0  ;;  %v5419_v26 = vmul.f32 %v15819_v55, %v15819_v55 }
0x114e   :  { %5384 = vadd.xlane.f32.xlu0 %v5383_v44  ;;  %v5642_v25 = vmul.f32 %v5630_v50, %v5630_v50  ;;  %v5501_v44 = vsub.f32 %v5469_v63, %v5485_v18  ;;  %v5472_v18 = vmul.f32 0.03125, %v5432_v38  ;;  %v5645_v38 = vsub.f32 %v15699_v39, %v5629_v4  ;;  %v15870_v4 = vpop.permute.xlu1 %5585 }
0x114f   :  { %v5638_v62 = vpop.xlane.xlu0 %5637  ;;  %v5463_v52 = vsel %vm264_vm1, %v5419_v26, 0.0  ;;  %v15836_v26 = vmul.f32 0.03125, %v5349_v59  ;;  %v15846_v59 = vmul.f32 0.03125, %v5355_v17 }
0x1150   :  { %v5640_v3 = vmul.f32 0.03125, %v5638_v62  ;;  %5464 = vadd.xlane.f32.xlu1 %v5463_v52  ;;  %v5502_v62 = vsub.f32 %v5470_v5, %v5486_v48  ;;  %v5533_v52 = vadd.f32 1e-06, %v5501_v44  ;;  %v5474_v48 = vmul.f32 0.03125, %v5438_v23 }
0x1151   :  { %v15858_v44 = vmul.f32 0.03125, %v5361_v29 }
0x1152   :  { %v5644_v53 = vsub.f32 %v5640_v3, %v5642_v25  ;;  %v5487_v25 = vmul.f32 %v15836_v26, %v15836_v26  ;;  %v15844_v3 = vmul.f32 0.03125, %v5352_v1  ;;  %v5534_v61 = vadd.f32 1e-06, %v5502_v62 }
0x1153   :  { %v5635_v9 = vpop.xlane.xlu0 %5634  ;;  %v5489_v1 = vmul.f32 %v15846_v59, %v15846_v59  ;;  %v5491_v39 = vmul.f32 %v15858_v44, %v15858_v44 }
0x1154   :  { %v5648_v45 = vadd.f32 1e-06, %v5644_v53  ;;  %v5639_v10 = vmul.f32 0.03125, %v5635_v9  ;;  %v5503_v63 = vsub.f32 %v5471_v47, %v5487_v25  ;;  %v5582_v53 = vadd.f32 1.0, %v15840_v58 }
0x1155   :  { %v5488_v13 = vmul.f32 %v15844_v3, %v15844_v3  ;;  %v5473_v9 = vmul.f32 0.03125, %v5435_v33  ;;  %v5646_v47 = vsub.f32 %v15706_v60, %v5630_v50  ;;  %v5517_v60 = vsub.f32 %v15614_v54, %v15827_v12 }
0x1156   :  { %v5643_v43 = vsub.f32 %v5639_v10, %v5641_v28  ;;  %12808 = vrsqrt.f32 %v5648_v45  ;;  %v5535_v45 = vadd.f32 1e-06, %v5503_v63  ;;  %v15854_v10 = vmul.f32 0.03125, %v5358_v51 }
0x1157   :  { %v5504_v28 = vsub.f32 %v5472_v18, %v5488_v13  ;;  %v5505_v5 = vsub.f32 %v5473_v9, %v5489_v1  ;;  %v5475_v50 = vmul.f32 0.03125, %v15816_v15  ;;  %v5670_v13 = vpop.permute.xlu0 %5669 }
0x1158   :  { %v5647_v8 = vadd.f32 1e-06, %v5643_v43  ;;  %v5490_v62 = vmul.f32 %v15854_v10, %v15854_v10 }
0x115a   :  { %12810 = vrsqrt.f32 %v5647_v8  ;;  %v5536_v8 = vadd.f32 1e-06, %v5504_v28  ;;  %v5506_v25 = vsub.f32 %v5474_v48, %v5490_v62  ;;  %v5521_v62 = vsub.f32 %v15650_v32, %v15846_v59 }
0x115b   :  { %12812 = vrsqrt.f32 %v5533_v52 }
0x115c   :  { %12814 = vrsqrt.f32 %v5534_v61  ;;  %v5537_v61 = vadd.f32 1e-06, %v5505_v5  ;;  %v5538_v63 = vadd.f32 1e-06, %v5506_v25  ;;  %v5520_v5 = vsub.f32 %v15630_v6, %v15844_v3 }
0x115d   :  { %12816 = vrsqrt.f32 %v5535_v45  ;;  %v5519_v45 = vsub.f32 %v15634_v27, %v15836_v26 }
0x115e   :  { %12818 = vrsqrt.f32 %v5536_v8 }
0x115f   :  { %12820 = vrsqrt.f32 %v5537_v61 }
0x1160   :  { %v12809_v16 = vpop.eup %12808  ;;  %12822 = vrsqrt.f32 %v5538_v63 }
0x1161   :  { %5587 = vrot.lane.b32.xlu1 %v5582_v53, %s13059_s12  ;;  %v5652_v43 = vmul.f32 %v12809_v16, %v5646_v47  ;;  %v5507_v53 = vsub.f32 %v5475_v50, %v5491_v39  ;;  %v5522_v39 = vsub.f32 %v15653_v22, %v15854_v10 }
0x1163   :  { %v5664_v23 = vmul.f32 %v15808_v7, %v5652_v43  ;;  %v5539_v1 = vadd.f32 1e-06, %v5507_v53 }
0x1164   :  { %v12811_v17 = vpop.eup %12810 }
0x1165   :  { %v5651_v33 = vmul.f32 %v12811_v17, %v5645_v38  ;;  %v12813_v51 = vpop.eup %12812  ;;  %v5674_v7 = vadd.f32 %v5670_v13, %v5664_v23  ;;  %12824 = vrsqrt.f32 %v5539_v1 }
0x1166   :  { %v12815_v18 = vpop.eup %12814 }
0x1167   :  { %v5663_v52 = vmul.f32 %v15701_v31, %v5651_v33  ;;  %v5565_v31 = vmul.f32 %v12813_v51, %v5517_v60  ;;  %v12817_v28 = vpop.eup %12816 }
0x1168   :  { %v5567_v47 = vmul.f32 %v12817_v28, %v5519_v45  ;;  %v12819_v17 = vpop.eup %12818 }
0x1169   :  { %v5673_v29 = vadd.f32 %v15717_v56, %v5663_v52  ;;  %v5518_v56 = vsub.f32 %v15611_v37, %v15830_v11  ;;  %v5591_v15 = vmul.f32 %v15870_v4, %v5565_v31  ;;  %v12821_v8 = vpop.eup %12820  ;;  %v5568_v52 = vmul.f32 %v12819_v17, %v5520_v5 }
0x116a   :  { %v5593_v43 = vmul.f32 %v15870_v4, %v5567_v47  ;;  %v5569_v3 = vmul.f32 %v12821_v8, %v5521_v62  ;;  %v12823_v61 = vpop.eup %12822  ;;  %v5523_v31 = vsub.f32 %v15663_v57, %v15858_v44 }
0x116b   :  { %9780 = vmatmul.mubr.msk.f32.vlgmr.msra.gmra.mrb[142].mxu1 %vm264_vm1, %v5673_v29  ;;  %v5566_v16 = vmul.f32 %v12815_v18, %v5518_v56  ;;  %v5607_v38 = vadd.f32 %v5591_v15, %v15742_v24  ;;  %v5594_v25 = vmul.f32 %v15870_v4, %v5568_v52  ;;  %v5570_v50 = vmul.f32 %v12823_v61, %v5522_v39 }
0x116c   :  { %v15873_v9 = vpop.f32.mrb[122].mxu0  ;;  %5819 = vmatprep.mubr.f32.mxu1 %v17987_v46  ;;  %v5609_v51 = vadd.f32 %v5593_v43, %v15742_v24  ;;  %v5595_v29 = vmul.f32 %v15870_v4, %v5569_v3 }
0x116d   :  { %18045 = vst [vmem:[#allocation26_spill] sm:$0xff] %v15873_v9  ;;  %v15878_v12 = vpop.f32.mrb[123].mxu0  ;;  %v5592_v11 = vmul.f32 %v15870_v4, %v5566_v16  ;;  %v5610_v23 = vadd.f32 %v5594_v25, %v15742_v24  ;;  %v5596_v56 = vmul.f32 %v15870_v4, %v5570_v50 }
0x116e   :  { %18046 = vst [vmem:[#allocation25_spill] sm:$0xff] %v15878_v12  ;;  %v5611_v13 = vadd.f32 %v5595_v29, %v15742_v24 }
0x116f   :  { %9781 = vmatmul.mubr.msk.f32.gmra.mrb[144].mxu1 %vm264_vm1, %v5674_v7  ;;  %v5608_v26 = vadd.f32 %v5592_v11, %v15742_v24  ;;  %v12825_v18 = vpop.eup %12824  ;;  %v5612_v15 = vadd.f32 %v5596_v56, %v15742_v24 }
0x1170   :  { %5824 = vmatprep.mubr.f32.mxu1 %v17987_v46  ;;  %v5571_v63 = vmul.f32 %v12825_v18, %v5523_v31 }
0x1172   :  { %v5597_v16 = vmul.f32 %v15870_v4, %v5571_v63 }
0x1173   :  { %9782 = vmatmul.mubr.msk.f32.gmra.mrb[146].mxu1 %vm264_vm1, %v5607_v38 }
0x1174   :  { %v15888_v48 = vpop.f32.mrb[124].mxu0  ;;  %5830 = vmatprep.mubr.f32.mxu1 %v17987_v46  ;;  %v5613_v38 = vadd.f32 %v5597_v16, %v15742_v24 }
0x1175   :  { %18047 = vst [vmem:[#allocation28_spill] sm:$0xff] %v15888_v48  ;;  %v15893_v33 = vpop.f32.mrb[125].mxu0 }
0x1176   :  { %18048 = vst [vmem:[#allocation27_spill] sm:$0xff] %v15893_v33 }
0x1177   :  { %9783 = vmatmul.mubr.msk.f32.gmra.mrb[148].mxu1 %vm264_vm1, %v5608_v26 }
0x1178   :  { %5836 = vmatprep.mubr.f32.mxu1 %v17987_v46 }
0x117b   :  { %9784 = vmatmul.mubr.msk.f32.gmra.mrb[150].mxu1 %vm264_vm1, %v5609_v51 }
0x117c   :  { %v15906_v60 = vpop.f32.mrb[126].mxu0  ;;  %5842 = vmatprep.mubr.f32.mxu1 %v17987_v46 }
0x117d   :  { %18049 = vst [vmem:[#allocation30_spill] sm:$0xff] %v15906_v60  ;;  %v15909_v59 = vpop.f32.mrb[127].mxu0 }
0x117e   :  { %18050 = vst [vmem:[#allocation29_spill] sm:$0xff] %v15909_v59 }
0x117f   :  { %9785 = vmatmul.mubr.msk.f32.gmra.mrb[152].mxu1 %vm264_vm1, %v5610_v23  ;;  %v5444_v28 = vpop.xlane.xlu1 %5443 }
0x1180   :  { %v15916_v10 = vpop.f32.mrb[128].mxu0  ;;  %5848 = vmatprep.mubr.f32.mxu1 %v17987_v46  ;;  %v5476_v11 = vmul.f32 0.03125, %v5444_v28 }
0x1181   :  { %18051 = vst [vmem:[#allocation18_spill] sm:$0xff] %v15916_v10  ;;  %v15919_v53 = vpop.f32.mrb[129].mxu0 }
0x1182   :  { %18052 = vst [vmem:[#allocation22_spill] sm:$0xff] %v15919_v53 }
0x1183   :  { %9786 = vmatmul.mubr.msk.f32.gmra.mrb[154].mxu1 %vm264_vm1, %v5611_v13  ;;  %v5447_v18 = vpop.xlane.xlu1 %5446 }
0x1184   :  { %v15924_v7 = vpop.f32.mrb[130].mxu0  ;;  %5854 = vmatprep.mubr.f32.mxu1 %v17987_v46 }
0x1185   :  { %18053 = vst [vmem:[#allocation17_spill] sm:$0xff] %v15924_v7  ;;  %v15927_v44 = vpop.f32.mrb[131].mxu0 }
0x1186   :  { %18054 = vst [vmem:[#allocation20_spill] sm:$0xff] %v15927_v44 }
0x1187   :  { %9787 = vmatmul.mubr.msk.f32.gmra.mrb[156].mxu1 %vm264_vm1, %v5612_v15  ;;  %v5370_v31 = vpop.xlane.xlu1 %5369 }
0x1188   :  { %v5364_v1 = vpop.xlane.xlu0 %5363  ;;  %5860 = vmatprep.mubr.f32.mxu1 %v17987_v46  ;;  %v5398_v28 = vmul.f32 0.03125, %v5370_v31 }
0x1189   :  { %v5396_v45 = vmul.f32 0.03125, %v5364_v1 }
0x118b   :  { %v5492_v47 = vmul.f32 %v5396_v45, %v5396_v45  ;;  %9788 = vmatmul.mubr.msk.f32.gmra.mrb[158].mxu1 %vm264_vm1, %v5613_v38  ;;  %v5524_v61 = vsub.f32 %v15666_v14, %v5396_v45  ;;  %v5450_v63 = vpop.xlane.xlu1 %5449 }
0x118c   :  { %v4812_v17 = vpop.permute.xlu0 %4811  ;;  %5866 = vmatprep.mubr.f32.mxu1 %v17987_v46  ;;  %v5478_v38 = vmul.f32 0.03125, %v5450_v63 }
0x118d   :  { %v5508_v5 = vsub.f32 %v5476_v11, %v5492_v47  ;;  %v15937_v26 = vadd.f32 %v4812_v17, %v15176_v19  ;;  %v5477_v11 = vmul.f32 0.03125, %v5447_v18  ;;  %v5494_v47 = vmul.f32 %v5398_v28, %v5398_v28 }
0x118f   :  { %18055 = vst [vmem:[#allocation21_spill] sm:$0xff] %v15937_v26  ;;  %v5540_v43 = vadd.f32 1e-06, %v5508_v5  ;;  %v15939_v8 = vpop.f32.mrb[132].mxu0  ;;  %11162 = vmatmul.mubr.msk.f32.gmra.mrb[136].mxu0 %vm264_vm1, %v15937_v26  ;;  %v5386_v62 = vsel %vm264_vm1, %v15937_v26, 0.0  ;;  %v5420_v52 = vmul.f32 %v15937_v26, %v15937_v26  ;;  %v5373_v13 = vpop.xlane.xlu1 %5372  ;;  %v5510_v5 = vsub.f32 %v5478_v38, %v5494_v47 }
0x1190   :  { %18056 = vst [vmem:[#allocation16_spill] sm:$0xff] %v15939_v8  ;;  %v15947_v51 = vpop.f32.mrb[133].mxu0  ;;  %5387 = vadd.xlane.f32.xlu0 %v5386_v62  ;;  %11182 = vmatprep.mubr.msk.f32.mxu0 %vm13056_vm4, %v17987_v46 }
0x1191   :  { %18057 = vst [vmem:[#allocation36_spill] sm:$0xff] %v15947_v51  ;;  %12826 = vrsqrt.f32 %v5540_v43  ;;  %v5466_v19 = vsel %vm264_vm1, %v5420_v52, 0.0 }
0x1193   :  { %v5453_v56 = vpop.xlane.xlu1 %5452 }
0x1194   :  { %5467 = vadd.xlane.f32.xlu0 %v5466_v19  ;;  %v5479_v52 = vmul.f32 0.03125, %v5453_v56 }
0x1196   :  { %v15952_v25 = vpop.f32.mrb[134].mxu0 }
0x1197   :  { %18058 = vst [vmem:[#allocation37_spill] sm:$0xff] %v15952_v25  ;;  %v15954_v3 = vpop.f32.mrb[135].mxu0  ;;  %v5376_v1 = vpop.xlane.xlu1 %5375 }
0x1198   :  { %18059 = vst [vmem:[#allocation38_spill] sm:$0xff] %v15954_v3 }
0x119b   :  { %v12827_v39 = vpop.eup %12826  ;;  %v5456_v43 = vpop.xlane.xlu1 %5455 }
0x119c   :  { %v5572_v23 = vmul.f32 %v12827_v39, %v5524_v61  ;;  %v5400_v61 = vmul.f32 0.03125, %v5376_v1 }
0x119e   :  { %v5598_v29 = vmul.f32 %v15870_v4, %v5572_v23  ;;  %v5399_v4 = vmul.f32 0.03125, %v5373_v13  ;;  %v5542_v23 = vadd.f32 1e-06, %v5510_v5  ;;  %v5496_v8 = vmul.f32 %v5400_v61, %v5400_v61 }
0x11a0   :  { %v5614_v50 = vadd.f32 %v5598_v29, %v15742_v24  ;;  %v5495_v19 = vmul.f32 %v5399_v4, %v5399_v4 }
0x11a2   :  { %9789 = vmatmul.mubr.msk.f32.gmra.mrb[160].mxu1 %vm264_vm1, %v5614_v50  ;;  %v5511_v29 = vsub.f32 %v5479_v52, %v5495_v19  ;;  %v5480_v50 = vmul.f32 0.03125, %v5456_v43 }
0x11a3   :  { %5872 = vmatprep.mubr.f32.mxu1 %v17987_v46 }
0x11a4   :  { %v5543_v18 = vadd.f32 1e-06, %v5511_v29  ;;  %v5512_v63 = vsub.f32 %v5480_v50, %v5496_v8  ;;  %v5526_v50 = vsub.f32 %v15683_v2, %v5398_v28  ;;  %v5528_v28 = vsub.f32 %v15711_v41, %v5400_v61 }
0x11a6   :  { %v5544_v56 = vadd.f32 1e-06, %v5512_v63 }
0x11bd   :  { %v5367_v15 = vpop.xlane.xlu0 %5366 }
0x11be   :  { %v5397_v16 = vmul.f32 0.03125, %v5367_v15  ;;  %v5459_v15 = vpop.xlane.xlu1 %5458 }
0x11bf   :  { %v5481_v38 = vmul.f32 0.03125, %v5459_v15 }
0x11c0   :  { %v5493_v45 = vmul.f32 %v5397_v16, %v5397_v16 }
0x11c1   :  { %v5379_v62 = vpop.xlane.xlu0 %5378 }
0x11c2   :  { %v5509_v17 = vsub.f32 %v5477_v11, %v5493_v45  ;;  %v5401_v51 = vmul.f32 0.03125, %v5379_v62  ;;  %v5462_v11 = vpop.xlane.xlu1 %5461 }
0x11c4   :  { %v5541_v39 = vadd.f32 1e-06, %v5509_v17  ;;  %v5497_v13 = vmul.f32 %v5401_v51, %v5401_v51  ;;  %v5482_v17 = vmul.f32 0.03125, %v5462_v11 }
0x11c5   :  { %v5382_v31 = vpop.xlane.xlu0 %5381 }
0x11c6   :  { %12828 = vrsqrt.f32 %v5541_v39  ;;  %v5402_v45 = vmul.f32 0.03125, %v5382_v31  ;;  %v5513_v47 = vsub.f32 %v5481_v38, %v5497_v13 }
0x11c7   :  { %12830 = vrsqrt.f32 %v5542_v23  ;;  %v5525_v23 = vsub.f32 %v15679_v36, %v5397_v16 }
0x11c8   :  { %12832 = vrsqrt.f32 %v5543_v18  ;;  %v5498_v1 = vmul.f32 %v5402_v45, %v5402_v45  ;;  %v5545_v62 = vadd.f32 1e-06, %v5513_v47  ;;  %v5530_v61 = vsub.f32 %v15729_v49, %v5402_v45 }
0x11c9   :  { %12834 = vrsqrt.f32 %v5544_v56  ;;  %v5527_v56 = vsub.f32 %v15693_v40, %v5399_v4 }
0x11ca   :  { %v5514_v19 = vsub.f32 %v5482_v17, %v5498_v1  ;;  %12836 = vrsqrt.f32 %v5545_v62 }
0x11cc   :  { %v5546_v18 = vadd.f32 1e-06, %v5514_v19  ;;  %v5529_v19 = vsub.f32 %v15714_v42, %v5401_v51 }
0x11ce   :  { %12838 = vrsqrt.f32 %v5546_v18 }
0x11d0   :  { %v12829_v43 = vpop.eup %12828 }
0x11d1   :  { %v12831_v39 = vpop.eup %12830  ;;  %v5573_v15 = vmul.f32 %v12829_v43, %v5525_v23 }
0x11d2   :  { %v5574_v38 = vmul.f32 %v12831_v39, %v5526_v50  ;;  %v12833_v11 = vpop.eup %12832 }
0x11d3   :  { %v12835_v16 = vpop.eup %12834 }
0x11d4   :  { %v5576_v62 = vmul.f32 %v12835_v16, %v5528_v28  ;;  %v12837_v4 = vpop.eup %12836 }
0x11db   :  { %v5385_v5 = vpop.xlane.xlu0 %5384 }
0x11dc   :  { %v5403_v52 = vmul.f32 0.03125, %v5385_v5 }
0x11dd   :  { %v5465_v44 = vpop.xlane.xlu1 %5464 }
0x11de   :  { %v5499_v8 = vmul.f32 %v5403_v52, %v5403_v52  ;;  %v5483_v29 = vmul.f32 0.03125, %v5465_v44  ;;  %v5575_v44 = vmul.f32 %v12833_v11, %v5527_v56 }
0x11e0   :  { %v5515_v31 = vsub.f32 %v5483_v29, %v5499_v8  ;;  %v5577_v8 = vmul.f32 %v12837_v4, %v5529_v19  ;;  %v12839_v29 = vpop.eup %12838 }
0x11e1   :  { %v5588_v63 = vpop.permute.xlu1 %5587  ;;  %v5578_v18 = vmul.f32 %v12839_v29, %v5530_v61 }
0x11e2   :  { %v5599_v13 = vmul.f32 %v5588_v63, %v5573_v15  ;;  %v5547_v5 = vadd.f32 1e-06, %v5515_v31  ;;  %v5600_v1 = vmul.f32 %v5588_v63, %v5574_v38  ;;  %v5601_v43 = vmul.f32 %v5588_v63, %v5575_v44 }
0x11e3   :  { %v5602_v23 = vmul.f32 %v5588_v63, %v5576_v62  ;;  %v5603_v15 = vmul.f32 %v5588_v63, %v5577_v8  ;;  %v5604_v38 = vmul.f32 %v5588_v63, %v5578_v18 }
0x11e4   :  { %v5615_v47 = vadd.f32 %v5599_v13, %v15840_v58  ;;  %12840 = vrsqrt.f32 %v5547_v5  ;;  %v5616_v17 = vadd.f32 %v5600_v1, %v15840_v58  ;;  %v5617_v39 = vadd.f32 %v5601_v43, %v15840_v58 }
0x11e5   :  { %v5618_v50 = vadd.f32 %v5602_v23, %v15840_v58  ;;  %v5531_v13 = vsub.f32 %v15819_v55, %v5403_v52  ;;  %v5619_v51 = vadd.f32 %v5603_v15, %v15840_v58  ;;  %v5620_v45 = vadd.f32 %v5604_v38, %v15840_v58  ;;  %v9779_v15 = vld [vmem:[%s17875_s4 + $0x90] ss:$8 sm:$0x3] }
0x11e6   :  { %9790 = vmatmul.mubr.msk.f32.gmra.mrb[162].mxu1 %vm264_vm1, %v5615_v47 }
0x11e7   :  { %5878 = vmatprep.mubr.f32.mxu1 %v17987_v46 }
0x11ea   :  { %9791 = vmatmul.mubr.msk.f32.gmra.mrb[164].mxu1 %vm264_vm1, %v5616_v17 }
0x11eb   :  { %5884 = vmatprep.mubr.f32.mxu1 %v17987_v46 }
0x11ee   :  { %9792 = vmatmul.mubr.msk.f32.gmra.mrb[166].mxu1 %vm264_vm1, %v5617_v39  ;;  %v12841_v31 = vpop.eup %12840 }
0x11ef   :  { %5890 = vmatprep.mubr.f32.mxu1 %v17987_v46  ;;  %v5579_v11 = vmul.f32 %v12841_v31, %v5531_v13 }
0x11f1   :  { %v5605_v5 = vmul.f32 %v5588_v63, %v5579_v11 }
0x11f2   :  { %9793 = vmatmul.mubr.msk.f32.gmra.mrb[168].mxu1 %vm264_vm1, %v5618_v50 }
0x11f3   :  { %5896 = vmatprep.mubr.f32.mxu1 %v17987_v46  ;;  %v5621_v52 = vadd.f32 %v5605_v5, %v15840_v58 }
0x11f6   :  { %9794 = vmatmul.mubr.msk.f32.gmra.mrb[170].mxu1 %vm264_vm1, %v5619_v51 }
0x11f7   :  { %5902 = vmatprep.mubr.f32.mxu1 %v17987_v46 }
0x11fa   :  { %9795 = vmatmul.mubr.msk.f32.gmra.mrb[172].mxu1 %vm264_vm1, %v5620_v45 }
0x11fb   :  { %5908 = vmatprep.mubr.f32.mxu1 %v17987_v46 }
0x11fe   :  { %9796 = vmatmul.mubr.msk.f32.gmra.mrb[174].mxu1 %vm264_vm1, %v5621_v52 }
0x11ff   :  { %5914 = vmatprep.mubr.f32.mxu1 %v17987_v46 }
0x121d   :  { %v5388_v56 = vpop.xlane.xlu0 %5387 }
0x121e   :  { %v5404_v47 = vmul.f32 0.03125, %v5388_v56 }
0x1220   :  { %v5500_v44 = vmul.f32 %v5404_v47, %v5404_v47  ;;  %v5532_v43 = vsub.f32 %v15937_v26, %v5404_v47 }
0x1221   :  { %v5468_v1 = vpop.xlane.xlu0 %5467 }
0x1222   :  { %v5484_v16 = vmul.f32 0.03125, %v5468_v1 }
0x1224   :  { %v5516_v28 = vsub.f32 %v5484_v16, %v5500_v44 }
0x1226   :  { %v5548_v17 = vadd.f32 1e-06, %v5516_v28 }
0x1228   :  { %12842 = vrsqrt.f32 %v5548_v17 }
0x1232   :  { %v12843_v62 = vpop.eup %12842 }
0x1233   :  { %v5580_v4 = vmul.f32 %v12843_v62, %v5532_v43 }
0x1235   :  { %v5606_v19 = vmul.f32 %v5588_v63, %v5580_v4  ;;  %v16002_v63 = vrot.slane %v9779_v15, %v17997_v30 }
0x1237   :  { %v5622_v39 = vadd.f32 %v5606_v19, %v15840_v58 }
0x1239   :  { %9797 = vmatmul.mubr.msk.f32.gmra.mrb[176].mxu1 %vm264_vm1, %v5622_v39 }
0x123a   :  { %11272 = vmatprep.mubr.msk.f32.mxu1 %vm13056_vm4, %v17987_v46 }
0x123e   :  { %v5816_v23 = vpop.f32.mrb[142].mxu1 }
0x123f   :  { %v5818_v8 = vpop.f32.mrb[143].mxu1 }
0x1242   :  { %v15994_v29 = vpop.f32.mrb[144].mxu1 }
0x1243   :  { %v5823_v61 = vpop.f32.mrb[145].mxu1 }
0x1246   :  { %v15996_v50 = vpop.f32.mrb[146].mxu1 }
0x1247   :  { %v5828_v31 = vpop.f32.mrb[147].mxu1 }
0x1248   :  { %v5829_v51 = vadd.f32 %v5828_v31, %v16002_v63 }
0x124a   :  { %v16004_v18 = vpop.f32.mrb[148].mxu1 }
0x124b   :  { %v5834_v13 = vpop.f32.mrb[149].mxu1 }
0x124c   :  { %v5835_v38 = vadd.f32 %v5834_v13, %v16002_v63 }
0x124e   :  { %v12349_v11 = vpack.i.bf16 %v5835_v38, %v5829_v51  ;;  %v16008_v45 = vpop.f32.mrb[150].mxu1 }
0x124f   :  { %v5840_v5 = vpop.f32.mrb[151].mxu1 }
0x1250   :  { %12350 = vrot.lane.b32.xlu0 %v12349_v11, %s13058_s11  ;;  %v5841_v47 = vadd.f32 %v5840_v5, %v16002_v63 }
0x1252   :  { %v16011_v52 = vpop.f32.mrb[152].mxu1 }
0x1253   :  { %v5846_v56 = vpop.f32.mrb[153].mxu1 }
0x1254   :  { %v5847_v30 = vadd.f32 %v5846_v56, %v16002_v63 }
0x1256   :  { %v12354_v1 = vpack.i.bf16 %v5847_v30, %v5841_v47  ;;  %v16015_v44 = vpop.f32.mrb[154].mxu1 }
0x1257   :  { %v5852_v16 = vpop.f32.mrb[155].mxu1 }
0x1258   :  { %12355 = vrot.lane.b32.xlu1 %v12354_v1, %s13058_s11  ;;  %v5853_v43 = vadd.f32 %v5852_v16, %v16002_v63  ;;  %v16036_v1 = vrot.slane %v9779_v15, %v17998_v35 }
0x125a   :  { %v16018_v28 = vpop.f32.mrb[156].mxu1  ;;  %v5827_v12 = vadd.f32 %v15996_v50, %v16036_v1  ;;  %v5851_v50 = vadd.f32 %v16015_v44, %v16036_v1 }
0x125b   :  { %v5858_v17 = vpop.f32.mrb[157].mxu1 }
0x125c   :  { %v5859_v62 = vadd.f32 %v5858_v17, %v16002_v63 }
0x125e   :  { %v12359_v4 = vpack.i.bf16 %v5859_v62, %v5853_v43  ;;  %v16022_v19 = vpop.f32.mrb[158].mxu1 }
0x125f   :  { %v5864_v39 = vpop.f32.mrb[159].mxu1 }
0x1260   :  { %12360 = vrot.lane.b32.xlu1 %v12359_v4, %s13058_s11  ;;  %v5865_v11 = vadd.f32 %v5864_v39, %v16002_v63  ;;  %v16043_v4 = vadd.f32 %v5816_v23, %v16036_v1 }
0x1262   :  { %v16025_v8 = vpop.f32.mrb[136].mxu0 }
0x1263   :  { %18060 = vst [vmem:[#allocation39_spill] sm:$0xff] %v16025_v8  ;;  %v16027_v61 = vpop.f32.mrb[137].mxu0 }
0x1264   :  { %18061 = vst [vmem:[#allocation40_spill] sm:$0xff] %v16027_v61 }
0x1275   :  { %v5868_v31 = vpop.f32.mrb[160].mxu1 }
0x1276   :  { %v5870_v13 = vpop.f32.mrb[161].mxu1 }
0x1277   :  { %v5871_v16 = vadd.f32 %v5870_v13, %v16002_v63 }
0x12b9   :  { %v16029_v51 = vpop.f32.mrb[162].mxu1 }
0x12ba   :  { %v5876_v38 = vpop.f32.mrb[163].mxu1 }
0x12bb   :  { %v5877_v5 = vadd.f32 %v5876_v38, %v16002_v63 }
0x12bd   :  { %v12364_v56 = vpack.i.bf16 %v5877_v5, %v5865_v11  ;;  %v16033_v47 = vpop.f32.mrb[164].mxu1 }
0x12be   :  { %v5882_v30 = vpop.f32.mrb[165].mxu1 }
0x12bf   :  { %12365 = vrot.lane.b32.xlu1 %v12364_v56, %s13058_s11  ;;  %v5883_v39 = vadd.f32 %v5882_v30, %v16002_v63 }
0x12c1   :  { %v16040_v17 = vpop.f32.mrb[166].mxu1 }
0x12c2   :  { %v12351_v43 = vpop.permute.xlu0 %12350  ;;  %v5888_v62 = vpop.f32.mrb[167].mxu1 }
0x12c3   :  { %v12352_v38 = vunpack.i.l.bf16 %v12351_v43  ;;  %v5889_v11 = vadd.f32 %v5888_v62, %v16002_v63  ;;  %5967 = vrot.lane.b32.xlu1 %v5871_v16, %s13058_s11  ;;  %v12353_v30 = vunpack.i.h.bf16 %v12351_v43 }
0x12c5   :  { %v12384_v35 = vpack.i.bf16 %v5889_v11, %v5883_v39  ;;  %v16048_v15 = vpop.f32.mrb[168].mxu1  ;;  %v16051_v5 = vpack.i.bf16 %v12352_v38, %v16043_v4 }
0x12c6   :  { %v5894_v13 = vpop.f32.mrb[169].mxu1 }
0x12c7   :  { %12370 = vrot.lane.b32.xlu0 %v16051_v5, %s13059_s12  ;;  %v5895_v33 = vadd.f32 %v5894_v13, %v16002_v63 }
0x12c9   :  { %v16055_v56 = vpop.f32.mrb[170].mxu1 }
0x12ca   :  { %v5900_v23 = vpop.f32.mrb[171].mxu1  ;;  %v12356_v7 = vpop.permute.xlu1 %12355 }
0x12cb   :  { %v5901_v62 = vadd.f32 %v5900_v23, %v16002_v63  ;;  %v12357_v16 = vunpack.i.l.bf16 %v12356_v7  ;;  %v12358_v13 = vunpack.i.h.bf16 %v12356_v7  ;;  %v5839_v7 = vadd.f32 %v16008_v45, %v16036_v1 }
0x12cc   :  { %v5869_v45 = vadd.f32 %v5868_v31, %v16036_v1 }
0x12cd   :  { %v12394_v39 = vpack.i.bf16 %v5901_v62, %v5895_v33  ;;  %v16059_v11 = vpop.f32.mrb[172].mxu1  ;;  %v16061_v48 = vpack.i.bf16 %v12357_v16, %v12353_v30  ;;  %v5833_v30 = vadd.f32 %v16004_v18, %v16036_v1  ;;  %v5863_v18 = vadd.f32 %v16022_v19, %v16036_v1 }
0x12ce   :  { %v5906_v38 = vpop.f32.mrb[173].mxu1 }
0x12cf   :  { %12375 = vrot.lane.b32.xlu1 %v16061_v48, %s13059_s12  ;;  %v5907_v23 = vadd.f32 %v5906_v38, %v16002_v63 }
0x12d1   :  { %v16067_v9 = vpop.f32.mrb[174].mxu1 }
0x12d2   :  { %v5912_v43 = vpop.f32.mrb[175].mxu1  ;;  %v12361_v61 = vpop.permute.xlu1 %12360 }
0x12d3   :  { %v5913_v33 = vadd.f32 %v5912_v43, %v16002_v63  ;;  %v12362_v62 = vunpack.i.l.bf16 %v12361_v61  ;;  %5929 = vrot.lane.b32.xlu1 %v5827_v12, %s13058_s11  ;;  %v5845_v12 = vadd.f32 %v16011_v52, %v16036_v1  ;;  %v12363_v38 = vunpack.i.h.bf16 %v12361_v61 }
0x12d5   :  { %v12404_v16 = vpack.i.bf16 %v5913_v33, %v5907_v23  ;;  %v16074_v8 = vpack.i.bf16 %v12362_v62, %v12358_v13 }
0x12d7   :  { %12380 = vrot.lane.b32.xlu0 %v16074_v8, %s13059_s12  ;;  %5931 = vrot.lane.b32.xlu1 %v5833_v30, %s13058_s11 }
0x12db   :  { %12385 = vrot.lane.b32.xlu0 %v12384_v35, %s13058_s11  ;;  %5933 = vrot.lane.b32.xlu1 %v5839_v7, %s13058_s11 }
0x12df   :  { %5935 = vrot.lane.b32.xlu1 %v5845_v12, %s13058_s11 }
0x12e3   :  { %5937 = vrot.lane.b32.xlu1 %v5851_v50, %s13058_s11 }
0x12e7   :  { %12405 = vrot.lane.b32.xlu1 %v12404_v16, %s13058_s11 }
0x12eb   :  { %5941 = vrot.lane.b32.xlu1 %v5863_v18, %s13058_s11 }
0x12ef   :  { %5943 = vrot.lane.b32.xlu1 %v5869_v45, %s13058_s11 }
0x12f3   :  { %12415 = vrot.lane.b32.xlu1 %v16074_v8, %s13060_s0 }
0x130c   :  { %v16097_v52 = vpop.f32.mrb[176].mxu1 }
0x130d   :  { %v5918_v35 = vpop.f32.mrb[177].mxu1 }
0x1331   :  { %v12366_v44 = vpop.permute.xlu1 %12365 }
0x1332   :  { %v12367_v43 = vunpack.i.l.bf16 %v12366_v44 }
0x1334   :  { %v16099_v13 = vpack.i.bf16 %v12367_v43, %v12363_v38 }
0x1335   :  { %v16101_v23 = vpop.permute.xlu1 %5967 }
0x1336   :  { %12390 = vrot.lane.b32.xlu0 %v16099_v13, %s13059_s12  ;;  %6440 = vrot.lane.b32.xlu1 %v16101_v23, %s13060_s0 }
0x1339   :  { %v12371_v19 = vpop.permute.xlu0 %12370 }
0x133a   :  { %v12373_v31 = vunpack.i.h.bf16 %v12371_v19  ;;  %v12372_v33 = vunpack.i.l.bf16 %v12371_v19  ;;  %12395 = vrot.lane.b32.xlu0 %v12394_v39, %s13058_s11  ;;  %6406 = vrot.lane.b32.xlu1 %v16043_v4, %s13061_s15  ;;  %v5857_v39 = vadd.f32 %v16018_v28, %v16036_v1  ;;  %v5919_v28 = vadd.f32 %v5918_v35, %v16002_v63 }
0x133b   :  { %v16144_v63 = vadd.f32 %v15994_v29, %v16036_v1  ;;  %v5887_v29 = vadd.f32 %v16040_v17, %v16036_v1 }
0x133c   :  { %v11973_v61 = vpack.c.bf16 %v12373_v31, %v12372_v33 }
0x133e   :  { %11975 = vmatpush3.bf16.xpose.msk.msra.mxu0 %vm13994_vm7, %v11973_v61  ;;  %5986 = vrot.lane.b32.xlu0 %v16101_v23, %s13059_s12  ;;  %v12368_v61 = vunpack.i.h.bf16 %v12366_v44 }
0x133f   :  { %11976 = vmatprep.subr.bf16.mxu0 %v17986_v0 }
0x1340   :  { %v16151_v35 = vpack.i.bf16 %v12368_v61, %v16144_v63 }
0x1341   :  { %v12376_v30 = vpop.permute.xlu1 %12375 }
0x1342   :  { %v12378_v16 = vunpack.i.h.bf16 %v12376_v30  ;;  %v12377_v7 = vunpack.i.l.bf16 %v12376_v30  ;;  %12400 = vrot.lane.b32.xlu0 %v16051_v5, %s13060_s0 }
0x1344   :  { %v11977_v12 = vpack.c.bf16 %v12378_v16, %v12377_v7  ;;  %v5875_v7 = vadd.f32 %v16029_v51, %v16036_v1 }
0x1345   :  { %v16119_v50 = vpop.permute.xlu1 %5929 }
0x1346   :  { %5939 = vrot.lane.b32.xlu0 %v5857_v39, %s13058_s11  ;;  %11979 = vmatpush3.bf16.xpose.msk.msra.mxu0 %vm13994_vm7, %v11977_v12  ;;  %v5893_v39 = vadd.f32 %v16048_v15, %v16036_v1  ;;  %v5881_v15 = vadd.f32 %v16033_v47, %v16036_v1 }
0x1347   :  { %11980 = vmatprep.subr.bf16.mxu0 %v17986_v0 }
0x1349   :  { %v12381_v18 = vpop.permute.xlu0 %12380  ;;  %v16125_v45 = vpop.permute.xlu1 %5931 }
0x134a   :  { %v12383_v38 = vunpack.i.h.bf16 %v12381_v18  ;;  %v12382_v43 = vunpack.i.l.bf16 %v12381_v18  ;;  %12410 = vrot.lane.b32.xlu0 %v16061_v48, %s13060_s0 }
0x134c   :  { %v11981_v19 = vpack.c.bf16 %v12383_v38, %v12382_v43 }
0x134d   :  { %v16130_v31 = vpop.permute.xlu0 %12385  ;;  %v16132_v33 = vpop.permute.xlu1 %5933 }
0x134e   :  { %6951 = vrot.lane.b32.xlu0 %v5919_v28, %s13058_s11  ;;  %6412 = vrot.lane.b32.xlu1 %v16132_v33, %s13061_s15 }
0x134f   :  { %11983 = vmatpush3.bf16.xpose.msk.msra.mxu0 %vm13994_vm7, %v11981_v19 }
0x1350   :  { %11984 = vmatprep.subr.bf16.mxu0 %v17986_v0 }
0x1351   :  { %v16140_v30 = vpop.permute.xlu1 %5935 }
0x1352   :  { %12420 = vrot.lane.b32.xlu0 %v16099_v13, %s13060_s0  ;;  %12430 = vrot.lane.b32.xlu1 %v16130_v31, %s13059_s12 }
0x1355   :  { %v16153_v44 = vpop.permute.xlu1 %5937 }
0x1356   :  { %12425 = vrot.lane.b32.xlu0 %v16151_v35, %s13059_s12  ;;  %6414 = vrot.lane.b32.xlu1 %v16140_v30, %s13061_s15 }
0x1359   :  { %v16159_v16 = vpop.permute.xlu1 %12405 }
0x135a   :  { %6408 = vrot.lane.b32.xlu0 %v16119_v50, %s13061_s15  ;;  %6416 = vrot.lane.b32.xlu1 %v16153_v44, %s13061_s15 }
0x135d   :  { %v16178_v38 = vpop.permute.xlu1 %5941 }
0x135e   :  { %6410 = vrot.lane.b32.xlu0 %v16125_v45, %s13061_s15  ;;  %6917 = vrot.lane.b32.xlu1 %v5887_v29, %s13058_s11 }
0x1361   :  { %v16185_v51 = vpop.permute.xlu1 %5943 }
0x1362   :  { %6913 = vrot.lane.b32.xlu0 %v5875_v7, %s13058_s11  ;;  %12440 = vrot.lane.b32.xlu1 %v16159_v16, %s13059_s12 }
0x1366   :  { %6919 = vrot.lane.b32.xlu1 %v5893_v39, %s13058_s11  ;;  %v12416_v39 = vpop.permute.xlu1 %12415 }
0x13a8   :  { %v12391_v12 = vpop.permute.xlu0 %12390  ;;  %v16199_v47 = vpop.permute.xlu1 %6440 }
0x13a9   :  { %v12393_v17 = vunpack.i.h.bf16 %v12391_v12  ;;  %v12392_v18 = vunpack.i.l.bf16 %v12391_v12 }
0x13ab   :  { %v11985_v43 = vpack.c.bf16 %v12393_v17, %v12392_v18 }
0x13ac   :  { %v16180_v28 = vpop.permute.xlu0 %12395 }
0x13ad   :  { %11987 = vmatpush3.bf16.xpose.msk.msra.mxu0 %vm13994_vm7, %v11985_v43  ;;  %12435 = vrot.lane.b32.xlu0 %v16180_v28, %s13059_s12 }
0x13ae   :  { %11180 = vmatprep.subr.mxu0 %v17987_v46 }
0x13b0   :  { %v5987_v19 = vpop.permute.xlu0 %5986 }
0x13b1   :  { %6915 = vrot.lane.b32.xlu0 %v5881_v15, %s13058_s11  ;;  %v6407_v15 = vpop.permute.xlu1 %6406 }
0x13b4   :  { %v12401_v61 = vpop.permute.xlu0 %12400 }
0x13b5   :  { %v12403_v29 = vunpack.i.h.bf16 %v12401_v61  ;;  %v12402_v7 = vunpack.i.l.bf16 %v12401_v61  ;;  %11181 = vmatpush3.xpose.msk.msra.mxu0 %vm1610_vm6, %v5987_v19 }
0x13b6   :  { %11988 = vmatprep.subr.bf16.mxu0 %v17986_v0 }
0x13b7   :  { %v12001_v12 = vpack.c.bf16 %v12403_v29, %v12402_v7  ;;  %v12418_v29 = vunpack.i.h.bf16 %v12416_v39  ;;  %v12417_v7 = vunpack.i.l.bf16 %v12416_v39 }
0x13b8   :  { %v5940_v17 = vpop.permute.xlu0 %5939  ;;  %11183 = vmatmul.mubr.msk.f32.vlgmr.msra.gmra.mrb[138].mxu0 %vm1610_vm6, %v16043_v4 }
0x13b9   :  { %12003 = vmatpush3.bf16.xpose.msk.msra.mxu1 %vm13994_vm7, %v12001_v12  ;;  %6418 = vrot.lane.b32.xlu0 %v5940_v17, %s13061_s15  ;;  %v12009_v39 = vpack.c.bf16 %v12418_v29, %v12417_v7 }
0x13ba   :  { %11185 = vmatprep.mubr.msk.f32.mxu0 %vm13056_vm4, %v17987_v46  ;;  %12004 = vmatprep.subr.bf16.mxu1 %v17986_v0 }
0x13bc   :  { %v12411_v18 = vpop.permute.xlu0 %12410  ;;  %11186 = vmatmul.mubr.msk.f32.gmra.mrb[140].mxu0 %vm1610_vm6, %v16119_v50  ;;  %v5899_v50 = vadd.f32 %v16055_v56, %v16036_v1  ;;  %v5905_v56 = vadd.f32 %v16059_v11, %v16036_v1 }
0x13bd   :  { %v12413_v43 = vunpack.i.h.bf16 %v12411_v18  ;;  %v12412_v19 = vunpack.i.l.bf16 %v12411_v18  ;;  %6420 = vrot.lane.b32.xlu0 %v16178_v38, %s13061_s15  ;;  %11188 = vmatprep.mubr.msk.f32.mxu0 %vm13056_vm4, %v17987_v46  ;;  %v5911_v18 = vadd.f32 %v16067_v9, %v16036_v1  ;;  %v5917_v9 = vadd.f32 %v16097_v52, %v16036_v1 }
0x13bf   :  { %v12005_v4 = vpack.c.bf16 %v12413_v43, %v12412_v19 }
0x13c0   :  { %v16210_v61 = vpop.permute.xlu0 %6951  ;;  %11189 = vmatmul.mubr.msk.f32.gmra.mrb[142].mxu0 %vm1610_vm6, %v16125_v45  ;;  %v16225_v45 = vpop.permute.xlu1 %6412 }
0x13c1   :  { %12007 = vmatpush3.bf16.xpose.msk.msra.mxu1 %vm13994_vm7, %v12005_v4  ;;  %6422 = vrot.lane.b32.xlu0 %v16185_v51, %s13061_s15 }
0x13c2   :  { %6970 = vrot.lane.b32.xlu1 %v16210_v61, %s13059_s12  ;;  %11191 = vmatprep.mubr.msk.f32.mxu0 %vm13056_vm4, %v17987_v46 }
0x13c3   :  { %12008 = vmatprep.subr.bf16.mxu1 %v17986_v0 }
0x13c4   :  { %v12421_v12 = vpop.permute.xlu0 %12420  ;;  %11192 = vmatmul.mubr.msk.f32.gmra.mrb[144].mxu0 %vm1610_vm6, %v16132_v33  ;;  %v12431_v33 = vpop.permute.xlu1 %12430 }
0x13c5   :  { %6921 = vrot.lane.b32.xlu0 %v5899_v50, %s13058_s11  ;;  %11194 = vmatprep.mubr.msk.f32.mxu0 %vm13056_vm4, %v17987_v46  ;;  %v12423_v11 = vunpack.i.h.bf16 %v12421_v12  ;;  %v12422_v19 = vunpack.i.l.bf16 %v12421_v12 }
0x13c6   :  { %12445 = vrot.lane.b32.xlu1 %v16151_v35, %s13060_s0 }
0x13c8   :  { %v12426_v43 = vpop.permute.xlu0 %12425  ;;  %11195 = vmatmul.mubr.msk.f32.gmra.mrb[146].mxu0 %vm1610_vm6, %v16140_v30  ;;  %v12013_v30 = vpack.c.bf16 %v12423_v11, %v12422_v19  ;;  %v6415_v50 = vpop.permute.xlu1 %6414 }
0x13c9   :  { %6923 = vrot.lane.b32.xlu0 %v5905_v56, %s13058_s11  ;;  %12011 = vmatpush3.bf16.xpose.msk.msra.mxu1 %vm13994_vm7, %v12009_v39 }
0x13ca   :  { %6925 = vrot.lane.b32.xlu1 %v5911_v18, %s13058_s11  ;;  %11197 = vmatprep.mubr.msk.f32.mxu0 %vm13056_vm4, %v17987_v46 }
0x13cb   :  { %12012 = vmatprep.subr.bf16.mxu1 %v17986_v0 }
0x13cc   :  { %v6409_v4 = vpop.permute.xlu0 %6408  ;;  %11198 = vmatmul.mubr.msk.f32.gmra.mrb[148].mxu0 %vm1610_vm6, %v16153_v44  ;;  %v6417_v52 = vpop.permute.xlu1 %6416  ;;  %v12428_v44 = vunpack.i.h.bf16 %v12426_v43 }
0x13cd   :  { %12450 = vrot.lane.b32.xlu0 %v16130_v31, %s13060_s0  ;;  %11200 = vmatprep.mubr.msk.f32.mxu0 %vm13056_vm4, %v17987_v46 }
0x13ce   :  { %6927 = vrot.lane.b32.xlu1 %v5917_v9, %s13058_s11 }
0x13d0   :  { %11201 = vmatmul.mubr.msk.f32.gmra.mrb[150].mxu0 %vm1610_vm6, %v5940_v17  ;;  %v6411_v1 = vpop.permute.xlu0 %6410  ;;  %v12427_v17 = vunpack.i.l.bf16 %v12426_v43  ;;  %v16285_v7 = vpop.permute.xlu1 %6917 }
0x13d1   :  { %12455 = vrot.lane.b32.xlu0 %v16180_v28, %s13060_s0  ;;  %12015 = vmatpush3.bf16.xpose.msk.msra.mxu1 %vm13994_vm7, %v12013_v30 }
0x13d2   :  { %12460 = vrot.lane.b32.xlu1 %v16159_v16, %s13060_s0  ;;  %11203 = vmatprep.mubr.msk.f32.mxu0 %vm13056_vm4, %v17987_v46 }
0x13d3   :  { %11270 = vmatprep.subr.mxu1 %v17987_v46 }
0x13d4   :  { %11204 = vmatmul.mubr.msk.f32.gmra.mrb[152].mxu0 %vm1610_vm6, %v16178_v38  ;;  %v16274_v29 = vpop.permute.xlu0 %6913  ;;  %v12029_v38 = vpack.c.bf16 %v12428_v44, %v12427_v17  ;;  %v12441_v18 = vpop.permute.xlu1 %12440 }
0x13d5   :  { %7424 = vrot.lane.b32.xlu0 %v16210_v61, %s13060_s0  ;;  %11206 = vmatprep.mubr.msk.f32.mxu0 %vm13056_vm4, %v17987_v46  ;;  %v12442_v11 = vunpack.i.l.bf16 %v12441_v18 }
0x13d6   :  { %7390 = vrot.lane.b32.xlu1 %v16144_v63, %s13061_s15 }
0x13d8   :  { %11207 = vmatmul.mubr.msk.f32.gmra.mrb[154].mxu0 %vm1610_vm6, %v16185_v51  ;;  %v12433_v51 = vunpack.i.h.bf16 %v12431_v33  ;;  %v6920_v19 = vpop.permute.xlu1 %6919 }
0x13d9   :  { %7392 = vrot.lane.b32.xlu0 %v16274_v29, %s13061_s15  ;;  %11271 = vmatpush3.xpose.msk.msra.mxu1 %vm1610_vm6, %v16199_v47  ;;  %v12432_v47 = vunpack.i.l.bf16 %v12431_v33 }
0x13da   :  { %12028 = vmatprep.subr.bf16.mxu1 %v17986_v0  ;;  %11227 = vmatprep.mubr.msk.f32.mxu0 %vm13056_vm4, %v17987_v46 }
0x13db   :  { %v12033_v12 = vpack.c.bf16 %v12433_v51, %v12432_v47 }
0x13dc   :  { %11273 = vmatmul.mubr.msk.f32.vlgmr.msra.gmra.mrb[178].mxu1 %vm1610_vm6, %v6407_v15 }
0x13dd   :  { %7396 = vrot.lane.b32.xlu0 %v16285_v7, %s13061_s15  ;;  %12031 = vmatpush3.bf16.xpose.msk.msra.mxu1 %vm13994_vm7, %v12029_v38 }
0x13de   :  { %11275 = vmatprep.mubr.msk.f32.mxu1 %vm13056_vm4, %v17987_v46  ;;  %12032 = vmatprep.subr.bf16.mxu1 %v17986_v0 }
0x13e0   :  { %11276 = vmatmul.mubr.msk.f32.gmra.mrb[180].mxu1 %vm1610_vm6, %v6409_v4 }
0x13e1   :  { %11278 = vmatprep.mubr.msk.f32.mxu1 %vm13056_vm4, %v17987_v46 }
0x13e4   :  { %11279 = vmatmul.mubr.msk.f32.gmra.mrb[182].mxu1 %vm1610_vm6, %v6411_v1 }
0x13e5   :  { %12035 = vmatpush3.bf16.xpose.msk.msra.mxu1 %vm13994_vm7, %v12033_v12  ;;  %11281 = vmatprep.mubr.msk.f32.mxu1 %vm13056_vm4, %v17987_v46 }
0x13e6   :  { %12036 = vmatprep.subr.bf16.mxu1 %v17986_v0 }
0x13e8   :  { %11282 = vmatmul.mubr.msk.f32.gmra.mrb[184].mxu1 %vm1610_vm6, %v16225_v45  ;;  %v12443_v45 = vunpack.i.h.bf16 %v12441_v18 }
0x13e9   :  { %11284 = vmatprep.mubr.msk.f32.mxu1 %vm13056_vm4, %v17987_v46 }
0x13ea   :  { %v12041_v4 = vpack.c.bf16 %v12443_v45, %v12442_v11 }
0x13ec   :  { %11285 = vmatmul.mubr.msk.f32.gmra.mrb[186].mxu1 %vm1610_vm6, %v6415_v50 }
0x13ed   :  { %11287 = vmatprep.mubr.msk.f32.mxu1 %vm13056_vm4, %v17987_v46 }
0x13f0   :  { %11288 = vmatmul.mubr.msk.f32.gmra.mrb[188].mxu1 %vm1610_vm6, %v6417_v52 }
0x13f1   :  { %11290 = vmatprep.mubr.msk.f32.mxu1 %vm13056_vm4, %v17987_v46 }
0x141f   :  { %v12436_v15 = vpop.permute.xlu0 %12435 }
0x1420   :  { %v12438_v56 = vunpack.i.h.bf16 %v12436_v15  ;;  %v12437_v39 = vunpack.i.l.bf16 %v12436_v15 }
0x1422   :  { %v12037_v43 = vpack.c.bf16 %v12438_v56, %v12437_v39 }
0x1423   :  { %v6916_v33 = vpop.permute.xlu0 %6915 }
0x1424   :  { %12039 = vmatpush3.bf16.xpose.msk.msra.mxu1 %vm13994_vm7, %v12037_v43  ;;  %7394 = vrot.lane.b32.xlu1 %v6916_v33, %s13061_s15 }
0x1425   :  { %12040 = vmatprep.subr.bf16.mxu1 %v17986_v0 }
0x1428   :  { %7398 = vrot.lane.b32.xlu1 %v6920_v19, %s13061_s15 }
0x142b   :  { %v6419_v9 = vpop.permute.xlu0 %6418 }
0x142c   :  { %11291 = vmatmul.mubr.msk.f32.gmra.mrb[190].mxu1 %vm1610_vm6, %v6419_v9 }
0x142d   :  { %11293 = vmatprep.mubr.msk.f32.mxu1 %vm13056_vm4, %v17987_v46  ;;  %12043 = vmatpush3.bf16.xpose.msk.msra.mxu1 %vm13994_vm7, %v12041_v4 }
0x142e   :  { %11360 = vmatprep.subr.mxu1 %v17987_v46 }
0x142f   :  { %v6421_v30 = vpop.permute.xlu0 %6420 }
0x1430   :  { %11294 = vmatmul.mubr.msk.f32.gmra.mrb[192].mxu1 %vm1610_vm6, %v6421_v30 }
0x1431   :  { %11296 = vmatprep.mubr.msk.f32.mxu1 %vm13056_vm4, %v17987_v46 }
0x1433   :  { %v6423_v50 = vpop.permute.xlu0 %6422 }
0x1434   :  { %v6971_v1 = vpop.permute.xlu1 %6970  ;;  %11297 = vmatmul.mubr.msk.f32.gmra.mrb[194].mxu1 %vm1610_vm6, %v6423_v50 }
0x1435   :  { %11362 = vmatprep.mubr.msk.f32.mxu1 %vm13056_vm4, %v17987_v46  ;;  %11361 = vmatpush3.xpose.msk.msra.mxu1 %vm1610_vm6, %v6971_v1 }
0x1436   :  { %12056 = vmatprep.subr.bf16.mxu1 %v17986_v0 }
0x1437   :  { %v6922_v52 = vpop.permute.xlu0 %6921 }
0x1438   :  { %v12446_v44 = vpop.permute.xlu1 %12445  ;;  %7400 = vrot.lane.b32.xlu0 %v6922_v52, %s13061_s15  ;;  %11363 = vmatmul.mubr.msk.f32.vlgmr.msra.gmra.mrb[196].mxu1 %vm1610_vm6, %v16144_v63 }
0x1439   :  { %v12448_v17 = vunpack.i.h.bf16 %v12446_v44  ;;  %v12447_v38 = vunpack.i.l.bf16 %v12446_v44  ;;  %11365 = vmatprep.mubr.msk.f32.mxu1 %vm13056_vm4, %v17987_v46 }
0x143b   :  { %v12057_v51 = vpack.c.bf16 %v12448_v17, %v12447_v38  ;;  %v6924_v47 = vpop.permute.xlu0 %6923 }
0x143c   :  { %v6926_v12 = vpop.permute.xlu1 %6925  ;;  %7402 = vrot.lane.b32.xlu1 %v6924_v47, %s13061_s15  ;;  %11366 = vmatmul.mubr.msk.f32.gmra.mrb[198].mxu1 %vm1610_vm6, %v16274_v29 }
0x143d   :  { %7404 = vrot.lane.b32.xlu0 %v6926_v12, %s13061_s15  ;;  %12059 = vmatpush3.bf16.xpose.msk.msra.mxu1 %vm13994_vm7, %v12057_v51 }
0x143e   :  { %12060 = vmatprep.subr.bf16.mxu1 %v17986_v0  ;;  %11368 = vmatprep.mubr.msk.f32.mxu1 %vm13056_vm4, %v17987_v46 }
0x143f   :  { %v12451_v15 = vpop.permute.xlu0 %12450 }
0x1440   :  { %v12453_v56 = vunpack.i.h.bf16 %v12451_v15  ;;  %v12452_v39 = vunpack.i.l.bf16 %v12451_v15  ;;  %v6928_v18 = vpop.permute.xlu1 %6927  ;;  %11369 = vmatmul.mubr.msk.f32.gmra.mrb[200].mxu1 %vm1610_vm6, %v6916_v33 }
0x1441   :  { %12470 = vrot.lane.b32.xlu0 %v16061_v48, %s13057_s10  ;;  %7406 = vrot.lane.b32.xlu1 %v6928_v18, %s13061_s15 }
0x1442   :  { %v12061_v63 = vpack.c.bf16 %v12453_v56, %v12452_v39  ;;  %11371 = vmatprep.mubr.msk.f32.mxu1 %vm13056_vm4, %v17987_v46 }
0x1443   :  { %v12456_v43 = vpop.permute.xlu0 %12455 }
0x1444   :  { %v12458_v29 = vunpack.i.h.bf16 %v12456_v43  ;;  %v12457_v45 = vunpack.i.l.bf16 %v12456_v43  ;;  %11372 = vmatmul.mubr.msk.f32.gmra.mrb[202].mxu1 %vm1610_vm6, %v16285_v7  ;;  %v12461_v11 = vpop.permute.xlu1 %12460 }
0x1445   :  { %6258 = vrot.lane.b32.xlu0 %v16101_v23, %s13057_s10  ;;  %12465 = vrot.lane.b32.xlu1 %v16051_v5, %s13057_s10  ;;  %v12462_v7 = vunpack.i.l.bf16 %v12461_v11 }
0x1446   :  { %12063 = vmatpush3.bf16.xpose.msk.msra.mxu1 %vm13994_vm7, %v12061_v63  ;;  %11374 = vmatprep.mubr.msk.f32.mxu1 %vm13056_vm4, %v17987_v46  ;;  %v12065_v33 = vpack.c.bf16 %v12458_v29, %v12457_v45 }
0x1447   :  { %12064 = vmatprep.subr.bf16.mxu1 %v17986_v0 }
0x1448   :  { %11375 = vmatmul.mubr.msk.f32.gmra.mrb[204].mxu1 %vm1610_vm6, %v6920_v19 }
0x1449   :  { %12485 = vrot.lane.b32.xlu0 %v16051_v5, %s13062_s1  ;;  %12475 = vrot.lane.b32.xlu1 %v16074_v8, %s13057_s10  ;;  %v12463_v5 = vunpack.i.h.bf16 %v12461_v11 }
0x144a   :  { %11377 = vmatprep.mubr.msk.f32.mxu1 %vm13056_vm4, %v17987_v46 }
0x144c   :  { %11378 = vmatmul.mubr.msk.f32.gmra.mrb[206].mxu1 %vm1610_vm6, %v6922_v52 }
0x144d   :  { %12495 = vrot.lane.b32.xlu0 %v16074_v8, %s13062_s1  ;;  %12480 = vrot.lane.b32.xlu1 %v16099_v13, %s13057_s10  ;;  %v12069_v8 = vpack.c.bf16 %v12463_v5, %v12462_v7 }
0x144e   :  { %12067 = vmatpush3.bf16.xpose.msk.msra.mxu1 %vm13994_vm7, %v12065_v33  ;;  %11380 = vmatprep.mubr.msk.f32.mxu1 %vm13056_vm4, %v17987_v46 }
0x144f   :  { %12068 = vmatprep.subr.bf16.mxu1 %v17986_v0 }
0x1450   :  { %11381 = vmatmul.mubr.msk.f32.gmra.mrb[208].mxu1 %vm1610_vm6, %v6924_v47 }
0x1451   :  { %12505 = vrot.lane.b32.xlu0 %v16151_v35, %s13057_s10  ;;  %12490 = vrot.lane.b32.xlu1 %v16061_v48, %s13062_s1  ;;  %v7425_v48 = vpop.permute.xlu0 %7424 }
0x1452   :  { %11383 = vmatprep.mubr.msk.f32.mxu1 %vm13056_vm4, %v17987_v46 }
0x1454   :  { %11384 = vmatmul.mubr.msk.f32.gmra.mrb[210].mxu1 %vm1610_vm6, %v6926_v12 }
0x1455   :  { %12520 = vrot.lane.b32.xlu0 %v16159_v16, %s13057_s10  ;;  %12500 = vrot.lane.b32.xlu1 %v16099_v13, %s13062_s1  ;;  %v7391_v13 = vpop.permute.xlu1 %7390 }
0x1456   :  { %12071 = vmatpush3.bf16.xpose.msk.msra.mxu1 %vm13994_vm7, %v12069_v8  ;;  %11386 = vmatprep.mubr.msk.f32.mxu1 %vm13056_vm4, %v17987_v46 }
0x1457   :  { %11450 = vmatprep.subr.mxu1 %v17987_v46 }
0x1458   :  { %11387 = vmatmul.mubr.msk.f32.gmra.mrb[212].mxu1 %vm1610_vm6, %v6928_v18 }
0x1459   :  { %6712 = vrot.lane.b32.xlu1 %v16101_v23, %s13062_s1  ;;  %11452 = vmatprep.mubr.msk.f32.mxu1 %vm13056_vm4, %v17987_v46  ;;  %v7393_v23 = vpop.permute.xlu0 %7392 }
0x145d   :  { %12510 = vrot.lane.b32.xlu1 %v16130_v31, %s13057_s10  ;;  %v7397_v12 = vpop.permute.xlu0 %7396 }
0x145e   :  { %11451 = vmatpush3.xpose.msk.msra.mxu1 %vm1610_vm6, %v7425_v48 }
0x1461   :  { %11453 = vmatmul.mubr.msk.f32.vlgmr.msra.gmra.mrb[214].mxu1 %vm1610_vm6, %v7391_v13  ;;  %12515 = vrot.lane.b32.xlu1 %v16180_v28, %s13057_s10 }
0x1462   :  { %11455 = vmatprep.mubr.msk.f32.mxu1 %vm13056_vm4, %v17987_v46 }
0x1465   :  { %11456 = vmatmul.mubr.msk.f32.gmra.mrb[216].mxu1 %vm1610_vm6, %v7393_v23  ;;  %7242 = vrot.lane.b32.xlu1 %v16210_v61, %s13057_s10 }
0x1466   :  { %11458 = vmatprep.mubr.msk.f32.mxu1 %vm13056_vm4, %v17987_v46 }
0x148b   :  { %v6090_v62 = vpop.f32.mrb[138].mxu0 }
0x148c   :  { %v16416_v19 = vmul.f32 0.25, %v6090_v62  ;;  %v11184_v9 = vpop.f32.mrb[139].mxu0 }
0x148e   :  { %v6143_v4 = vsel %vm1766_vm8, %v16416_v19, -inf }
0x148f   :  { %6144 = vmax.xlane.f32.xlu0 %v6143_v4  ;;  %v6095_v30 = vpop.f32.mrb[140].mxu0 }
0x1490   :  { %v11187_v50 = vpop.f32.mrb[141].mxu0  ;;  %v16447_v23 = vmul.f32 0.25, %v6095_v30 }
0x1493   :  { %v6100_v1 = vpop.f32.mrb[142].mxu0 }
0x1494   :  { %v11190_v52 = vpop.f32.mrb[143].mxu0 }
0x1496   :  { %v7395_v38 = vpop.permute.xlu1 %7394 }
0x1497   :  { %v6105_v44 = vpop.f32.mrb[144].mxu0  ;;  %11459 = vmatmul.mubr.msk.f32.gmra.mrb[218].mxu1 %vm1610_vm6, %v7395_v38 }
0x1498   :  { %v11193_v17 = vpop.f32.mrb[145].mxu0  ;;  %11461 = vmatprep.mubr.msk.f32.mxu1 %vm13056_vm4, %v17987_v46 }
0x1499   :  { %v6146_v17 = vsel %vm1766_vm8, %v16447_v23, -inf }
0x149a   :  { %v7399_v39 = vpop.permute.xlu1 %7398 }
0x149b   :  { %v16420_v51 = vpop.f32.mrb[146].mxu0  ;;  %11462 = vmatmul.mubr.msk.f32.gmra.mrb[220].mxu1 %vm1610_vm6, %v7397_v12  ;;  %v16461_v12 = vmul.f32 0.25, %v6100_v1 }
0x149c   :  { %v11196_v47 = vpop.f32.mrb[147].mxu0  ;;  %11464 = vmatprep.mubr.msk.f32.mxu1 %vm13056_vm4, %v17987_v46 }
0x149d   :  { %v6149_v1 = vsel %vm1766_vm8, %v16461_v12, -inf }
0x149f   :  { %v16425_v15 = vpop.f32.mrb[148].mxu0  ;;  %11465 = vmatmul.mubr.msk.f32.gmra.mrb[222].mxu1 %vm1610_vm6, %v7399_v39 }
0x14a0   :  { %v11199_v56 = vpop.f32.mrb[149].mxu0  ;;  %11467 = vmatprep.mubr.msk.f32.mxu1 %vm13056_vm4, %v17987_v46 }
0x14a3   :  { %v16430_v18 = vpop.f32.mrb[150].mxu0 }
0x14a4   :  { %v11202_v63 = vpop.f32.mrb[151].mxu0 }
0x14a7   :  { %v16435_v43 = vpop.f32.mrb[152].mxu0 }
0x14a8   :  { %v11205_v29 = vpop.f32.mrb[153].mxu0 }
0x14aa   :  { %v7401_v45 = vpop.permute.xlu0 %7400 }
0x14ab   :  { %v16437_v33 = vpop.f32.mrb[154].mxu0  ;;  %11468 = vmatmul.mubr.msk.f32.gmra.mrb[224].mxu1 %vm1610_vm6, %v7401_v45 }
0x14ac   :  { %v11208_v11 = vpop.f32.mrb[155].mxu0  ;;  %11470 = vmatprep.mubr.msk.f32.mxu1 %vm13056_vm4, %v17987_v46 }
0x14ae   :  { %v7403_v5 = vpop.permute.xlu1 %7402 }
0x14af   :  { %v6544_v7 = vpop.f32.mrb[178].mxu1  ;;  %11471 = vmatmul.mubr.msk.f32.gmra.mrb[226].mxu1 %vm1610_vm6, %v7403_v5  ;;  %v7405_v13 = vpop.permute.xlu0 %7404 }
0x14b0   :  { %v16443_v8 = vmul.f32 0.25, %v6544_v7  ;;  %v11274_v48 = vpop.f32.mrb[179].mxu1  ;;  %11473 = vmatprep.mubr.msk.f32.mxu1 %vm13056_vm4, %v17987_v46 }
0x14b2   :  { %v6597_v62 = vsel %vm1766_vm8, %v16443_v8, -inf }
0x14b3   :  { %v7407_v9 = vpop.permute.xlu1 %7406  ;;  %6598 = vmax.xlane.f32.xlu1 %v6597_v62  ;;  %11474 = vmatmul.mubr.msk.f32.gmra.mrb[228].mxu1 %vm1610_vm6, %v7405_v13  ;;  %v6549_v4 = vpop.f32.mrb[180].mxu1  ;;  %v16467_v62 = vmul.f32 0.25, %v6105_v44 }
0x14b4   :  { %11476 = vmatprep.mubr.msk.f32.mxu1 %vm13056_vm4, %v17987_v46  ;;  %v16454_v50 = vmul.f32 0.25, %v6549_v4  ;;  %v11277_v52 = vpop.f32.mrb[181].mxu1  ;;  %v12471_v38 = vpop.permute.xlu0 %12470 }
0x14b5   :  { %v12473_v11 = vunpack.i.h.bf16 %v12471_v38  ;;  %v12472_v5 = vunpack.i.l.bf16 %v12471_v38  ;;  %v6152_v44 = vsel %vm1766_vm8, %v16467_v62, -inf }
0x14b6   :  { %v6600_v47 = vsel %vm1766_vm8, %v16454_v50, -inf }
0x14b7   :  { %v12466_v30 = vpop.permute.xlu1 %12465  ;;  %11477 = vmatmul.mubr.msk.f32.gmra.mrb[230].mxu1 %vm1610_vm6, %v7407_v9  ;;  %6147 = vmax.xlane.f32.xlu1 %v6146_v17  ;;  %v6554_v63 = vpop.f32.mrb[182].mxu1  ;;  %v11992_v52 = vpack.c.bf16 %v12473_v11, %v12472_v5  ;;  %v16480_v11 = vmul.f32 0.25, %v16425_v15 }
0x14b8   :  { %v12468_v56 = vunpack.i.h.bf16 %v12466_v30  ;;  %v12467_v39 = vunpack.i.l.bf16 %v12466_v30  ;;  %6601 = vmax.xlane.f32.xlu0 %v6600_v47  ;;  %v16463_v29 = vmul.f32 0.25, %v6554_v63  ;;  %v11280_v45 = vpop.f32.mrb[183].mxu1 }
0x14b9   :  { %v6158_v15 = vsel %vm1766_vm8, %v16480_v11, -inf }
0x14ba   :  { %v11989_v7 = vpack.c.bf16 %v12468_v56, %v12467_v39  ;;  %v6603_v13 = vsel %vm1766_vm8, %v16463_v29, -inf }
0x14bb   :  { %v12476_v48 = vpop.permute.xlu1 %12475  ;;  %v6559_v9 = vpop.f32.mrb[184].mxu1  ;;  %6604 = vmax.xlane.f32.xlu1 %v6603_v13 }
0x14bc   :  { %11990 = vmatpush3.bf16.msra.mxu0 %v11989_v7  ;;  %6150 = vmax.xlane.f32.xlu0 %v6149_v1  ;;  %v11283_v4 = vpop.f32.mrb[185].mxu1  ;;  %v12478_v17 = vunpack.i.h.bf16 %v12476_v48  ;;  %v12477_v38 = vunpack.i.l.bf16 %v12476_v48  ;;  %v16472_v47 = vmul.f32 0.25, %v6559_v9  ;;  %v16485_v48 = vmul.f32 0.25, %v16420_v51 }
0x14bd   :  { %11991 = vmatprep.subr.bf16.mxu0 %v17986_v0 }
0x14be   :  { %v11995_v45 = vpack.c.bf16 %v12478_v17, %v12477_v38  ;;  %v6606_v1 = vsel %vm1766_vm8, %v16472_v47, -inf  ;;  %v6155_v51 = vsel %vm1766_vm8, %v16485_v48, -inf  ;;  %v6259_v38 = vpop.permute.xlu0 %6258 }
0x14bf   :  { %v12481_v30 = vpop.permute.xlu1 %12480  ;;  %v6564_v56 = vpop.f32.mrb[186].mxu1 }
0x14c0   :  { %11993 = vmatpush3.bf16.msra.mxu0 %v11992_v52  ;;  %v16476_v39 = vmul.f32 0.25, %v6564_v56  ;;  %6153 = vmax.xlane.f32.xlu0 %v6152_v44  ;;  %v11286_v63 = vpop.f32.mrb[187].mxu1  ;;  %v12483_v7 = vunpack.i.h.bf16 %v12481_v30  ;;  %v12482_v13 = vunpack.i.l.bf16 %v12481_v30  ;;  %v16498_v30 = vmul.f32 0.25, %v16430_v18 }
0x14c1   :  { %11994 = vmatprep.subr.bf16.mxu0 %v17986_v0 }
0x14c2   :  { %v6609_v5 = vsel %vm1766_vm8, %v16476_v39, -inf  ;;  %v11998_v52 = vpack.c.bf16 %v12483_v7, %v12482_v13  ;;  %v6161_v44 = vsel %vm1766_vm8, %v16498_v30, -inf  ;;  %v16508_v13 = vmul.f32 0.25, %v16435_v43 }
0x14c3   :  { %v6569_v9 = vpop.f32.mrb[188].mxu1  ;;  %6610 = vmax.xlane.f32.xlu1 %v6609_v5 }
0x14c4   :  { %11996 = vmatpush3.bf16.msra.mxu0 %v11995_v45  ;;  %6607 = vmax.xlane.f32.xlu0 %v6606_v1  ;;  %v11289_v4 = vpop.f32.mrb[189].mxu1  ;;  %v16492_v17 = vmul.f32 0.25, %v6569_v9 }
0x14c5   :  { %11997 = vmatprep.subr.bf16.mxu0 %v17986_v0  ;;  %v16515_v4 = vmul.f32 0.25, %v16437_v33 }
0x14c6   :  { %v6612_v56 = vsel %vm1766_vm8, %v16492_v17, -inf }
0x14c7   :  { %6159 = vmax.xlane.f32.xlu1 %v6158_v15  ;;  %v6164_v15 = vsel %vm1766_vm8, %v16508_v13, -inf }
0x14c8   :  { %11999 = vmatpush3.bf16.msra.mxu0 %v11998_v52  ;;  %6156 = vmax.xlane.f32.xlu0 %v6155_v51 }
0x14c9   :  { %11225 = vmatprep.subr.mxu0 %v17987_v46 }
0x14cc   :  { %11226 = vmatpush3.msra.mxu0 %v6259_v38  ;;  %6613 = vmax.xlane.f32.xlu0 %v6612_v56 }
0x14cd   :  { %12016 = vmatprep.subr.bf16.mxu0 %v17986_v0 }
0x14d0   :  { %6162 = vmax.xlane.f32.xlu0 %v6161_v44  ;;  %v6167_v44 = vsel %vm1766_vm8, %v16515_v4, -inf }
0x14ff   :  { %v6574_v63 = vpop.f32.mrb[190].mxu1 }
0x1500   :  { %v16505_v45 = vmul.f32 0.25, %v6574_v63  ;;  %v11292_v7 = vpop.f32.mrb[191].mxu1 }
0x1502   :  { %v6615_v18 = vsel %vm1766_vm8, %v16505_v45, -inf }
0x1503   :  { %v6579_v5 = vpop.f32.mrb[192].mxu1  ;;  %6616 = vmax.xlane.f32.xlu1 %v6615_v18 }
0x1504   :  { %v16512_v9 = vmul.f32 0.25, %v6579_v5  ;;  %v11295_v1 = vpop.f32.mrb[193].mxu1 }
0x1506   :  { %v6618_v52 = vsel %vm1766_vm8, %v16512_v9, -inf }
0x1507   :  { %v6584_v51 = vpop.f32.mrb[194].mxu1  ;;  %6619 = vmax.xlane.f32.xlu0 %v6618_v52  ;;  %6165 = vmax.xlane.f32.xlu1 %v6164_v15 }
0x1508   :  { %v16521_v43 = vmul.f32 0.25, %v6584_v51  ;;  %v11298_v38 = vpop.f32.mrb[195].mxu1 }
0x150a   :  { %v6621_v56 = vsel %vm1766_vm8, %v16521_v43, -inf }
0x150b   :  { %6622 = vmax.xlane.f32.xlu1 %v6621_v56  ;;  %6168 = vmax.xlane.f32.xlu0 %v6167_v44  ;;  %v7074_v33 = vpop.f32.mrb[196].mxu1 }
0x150c   :  { %v16527_v63 = vmul.f32 0.25, %v7074_v33  ;;  %v11364_v7 = vpop.f32.mrb[197].mxu1 }
0x150e   :  { %v7127_v18 = vsel %vm1766_vm8, %v16527_v63, -inf }
0x150f   :  { %v7079_v5 = vpop.f32.mrb[198].mxu1  ;;  %7128 = vmax.xlane.f32.xlu0 %v7127_v18 }
0x1510   :  { %v16531_v1 = vmul.f32 0.25, %v7079_v5  ;;  %v11367_v52 = vpop.f32.mrb[199].mxu1 }
0x1512   :  { %v7130_v15 = vsel %vm1766_vm8, %v16531_v1, -inf }
0x1513   :  { %v7084_v51 = vpop.f32.mrb[200].mxu1  ;;  %7131 = vmax.xlane.f32.xlu1 %v7130_v15 }
0x1514   :  { %v16535_v38 = vmul.f32 0.25, %v7084_v51  ;;  %v11370_v56 = vpop.f32.mrb[201].mxu1 }
0x1516   :  { %v7133_v44 = vsel %vm1766_vm8, %v16535_v38, -inf }
0x1517   :  { %v7089_v33 = vpop.f32.mrb[202].mxu1  ;;  %7134 = vmax.xlane.f32.xlu0 %v7133_v44 }
0x1518   :  { %v16539_v7 = vmul.f32 0.25, %v7089_v33  ;;  %v11373_v3 = vpop.f32.mrb[203].mxu1 }
0x151a   :  { %v7136_v18 = vsel %vm1766_vm8, %v16539_v7, -inf }
0x151b   :  { %v7094_v5 = vpop.f32.mrb[204].mxu1  ;;  %7137 = vmax.xlane.f32.xlu1 %v7136_v18 }
0x151c   :  { %v16543_v52 = vmul.f32 0.25, %v7094_v5  ;;  %v11376_v25 = vpop.f32.mrb[205].mxu1 }
0x151e   :  { %v7139_v15 = vsel %vm1766_vm8, %v16543_v52, -inf }
0x151f   :  { %v7099_v51 = vpop.f32.mrb[206].mxu1  ;;  %7140 = vmax.xlane.f32.xlu1 %v7139_v15 }
0x1520   :  { %v16547_v56 = vmul.f32 0.25, %v7099_v51  ;;  %v11379_v53 = vpop.f32.mrb[207].mxu1 }
0x1522   :  { %v7142_v44 = vsel %vm1766_vm8, %v16547_v56, -inf }
0x1523   :  { %v7104_v3 = vpop.f32.mrb[208].mxu1  ;;  %7143 = vmax.xlane.f32.xlu1 %v7142_v44 }
0x1524   :  { %v16551_v33 = vmul.f32 0.25, %v7104_v3  ;;  %v11382_v10 = vpop.f32.mrb[209].mxu1 }
0x1526   :  { %v7145_v18 = vsel %vm1766_vm8, %v16551_v33, -inf }
0x1527   :  { %v7109_v25 = vpop.f32.mrb[210].mxu1  ;;  %7146 = vmax.xlane.f32.xlu0 %v7145_v18 }
0x1528   :  { %v16555_v5 = vmul.f32 0.25, %v7109_v25  ;;  %v11385_v59 = vpop.f32.mrb[211].mxu1 }
0x152a   :  { %v7148_v15 = vsel %vm1766_vm8, %v16555_v5, -inf }
0x152b   :  { %v7114_v53 = vpop.f32.mrb[212].mxu1  ;;  %7149 = vmax.xlane.f32.xlu1 %v7148_v15 }
0x152c   :  { %v16559_v51 = vmul.f32 0.25, %v7114_v53  ;;  %v11388_v60 = vpop.f32.mrb[213].mxu1  ;;  %v16573_v53 = vpop.permute.xlu0 %12485 }
0x152d   :  { %v16571_v60 = vpop.permute.xlu1 %12490 }
0x152e   :  { %v7151_v44 = vsel %vm1766_vm8, %v16559_v51, -inf }
0x152f   :  { %7152 = vmax.xlane.f32.xlu0 %v7151_v44 }
0x1531   :  { %v16575_v44 = vpop.permute.xlu1 %12500 }
0x1534   :  { %v7528_v10 = vpop.f32.mrb[214].mxu1 }
0x1535   :  { %v16563_v3 = vmul.f32 0.25, %v7528_v10  ;;  %v11454_v20 = vpop.f32.mrb[215].mxu1  ;;  %v16577_v10 = vpop.permute.xlu0 %12495 }
0x1536   :  { %v16579_v20 = vpop.permute.xlu1 %6712 }
0x1537   :  { %v7581_v18 = vsel %vm1766_vm8, %v16563_v3, -inf }
0x1538   :  { %v7533_v59 = vpop.f32.mrb[216].mxu1  ;;  %7582 = vmax.xlane.f32.xlu0 %v7581_v18 }
0x1539   :  { %v16567_v25 = vmul.f32 0.25, %v7533_v59  ;;  %v11457_v21 = vpop.f32.mrb[217].mxu1  ;;  %v16581_v34 = vpop.permute.xlu0 %12505 }
0x153a   :  { %v16583_v18 = vpop.permute.xlu1 %12510 }
0x153b   :  { %v7584_v15 = vsel %vm1766_vm8, %v16567_v25, -inf }
0x153c   :  { %7585 = vmax.xlane.f32.xlu0 %v7584_v15 }
0x153d   :  { %v16585_v59 = vpop.permute.xlu0 %12520 }
0x153e   :  { %18063 = vst [vmem:[#allocation32_spill] sm:$0xff] %v16585_v59  ;;  %v16587_v55 = vpop.permute.xlu1 %12515 }
0x153f   :  { %18064 = vst [vmem:[#allocation41_spill] sm:$0xff] %v16587_v55 }
0x1541   :  { %v6145_v21 = vpop.xlane.xlu0 %6144 }
0x1542   :  { %v16589_v26 = vpop.permute.xlu1 %7242 }
0x1543   :  { %18065 = vst [vmem:[#allocation42_spill] sm:$0xff] %v16589_v26 }
0x1545   :  { %v6602_v15 = vpop.xlane.xlu0 %6601 }
0x1546   :  { %v6599_v2 = vpop.xlane.xlu1 %6598 }
0x1549   :  { %v6151_v41 = vpop.xlane.xlu0 %6150 }
0x154a   :  { %v6148_v37 = vpop.xlane.xlu1 %6147  ;;  %v6172_v55 = vsub.f32 %v16461_v12, %v6151_v41 }
0x154d   :  { %v6154_v54 = vpop.xlane.xlu0 %6153 }
0x1551   :  { %v6608_v24 = vpop.xlane.xlu0 %6607 }
0x156a   :  { %v7538_v42 = vpop.f32.mrb[218].mxu1 }
0x156b   :  { %v16591_v40 = vmul.f32 0.25, %v7538_v42  ;;  %v11460_v49 = vpop.f32.mrb[219].mxu1 }
0x156c   :  { %v6170_v49 = vsub.f32 %v16416_v19, %v6145_v21 }
0x156d   :  { %v7587_v36 = vsel %vm1766_vm8, %v16591_v40, -inf }
0x156e   :  { %v7543_v57 = vpop.f32.mrb[220].mxu1  ;;  %7588 = vmax.xlane.f32.xlu1 %v7587_v36  ;;  %v6179_v36 = vmul.f32 1.442695, %v6170_v49 }
0x156f   :  { %v16595_v32 = vmul.f32 0.25, %v7543_v57  ;;  %v11463_v14 = vpop.f32.mrb[221].mxu1  ;;  %v6624_v57 = vsub.f32 %v16443_v8, %v6599_v2 }
0x1570   :  { %v6171_v14 = vsub.f32 %v16447_v23, %v6148_v37  ;;  %12844 = vpow2.f32 %v6179_v36 }
0x1571   :  { %v7590_v27 = vsel %vm1766_vm8, %v16595_v32, -inf  ;;  %v6633_v59 = vmul.f32 1.442695, %v6624_v57  ;;  %v6157_v57 = vpop.xlane.xlu0 %6156 }
0x1572   :  { %v7548_v22 = vpop.f32.mrb[222].mxu1  ;;  %7591 = vmax.xlane.f32.xlu1 %v7590_v27  ;;  %v6625_v27 = vsub.f32 %v16454_v50, %v6602_v15  ;;  %v6181_v21 = vmul.f32 1.442695, %v6171_v14  ;;  %v6173_v15 = vsub.f32 %v16467_v62, %v6154_v54 }
0x1573   :  { %v16599_v6 = vmul.f32 0.25, %v7548_v22  ;;  %v11466_v42 = vpop.f32.mrb[223].mxu1  ;;  %v6605_v22 = vpop.xlane.xlu1 %6604  ;;  %12846 = vpow2.f32 %v6633_v59  ;;  %v6627_v59 = vsub.f32 %v16472_v47, %v6608_v24 }
0x1574   :  { %v6635_v37 = vmul.f32 1.442695, %v6625_v27  ;;  %v6626_v8 = vsub.f32 %v16463_v29, %v6605_v22  ;;  %12848 = vpow2.f32 %v6181_v21  ;;  %v6185_v27 = vmul.f32 1.442695, %v6173_v15 }
0x1575   :  { %v7593_v58 = vsel %vm1766_vm8, %v16599_v6, -inf  ;;  %v6174_v22 = vsub.f32 %v16485_v48, %v6157_v57  ;;  %v6639_v24 = vmul.f32 1.442695, %v6627_v59 }
0x1576   :  { %7594 = vmax.xlane.f32.xlu1 %v7593_v58  ;;  %12850 = vpow2.f32 %v6635_v37  ;;  %v6637_v36 = vmul.f32 1.442695, %v6626_v8 }
0x1577   :  { %v6611_v23 = vpop.xlane.xlu1 %6610  ;;  %v6187_v37 = vmul.f32 1.442695, %v6174_v22 }
0x157a   :  { %v16624_v62 = vpop.eup %12844 }
0x157d   :  { %v16630_v8 = vpop.eup %12846 }
0x157e   :  { %v7553_v26 = vpop.f32.mrb[224].mxu1  ;;  %v16636_v15 = vpop.eup %12848  ;;  %v6651_v59 = vsel %vm1766_vm8, %v16630_v8, 0.0 }
0x157f   :  { %v16607_v42 = vmul.f32 0.25, %v7553_v26  ;;  %v11469_v19 = vpop.f32.mrb[225].mxu1  ;;  %v6183_v26 = vmul.f32 1.442695, %v6172_v55  ;;  %v6160_v55 = vpop.xlane.xlu1 %6159 }
0x1580   :  { %v6614_v19 = vpop.xlane.xlu0 %6613  ;;  %v6175_v48 = vsub.f32 %v16480_v11, %v6160_v55 }
0x1581   :  { %v7596_v58 = vsel %vm1766_vm8, %v16607_v42, -inf  ;;  %12852 = vpow2.f32 %v6183_v26  ;;  %v6197_v26 = vsel %vm1766_vm8, %v16624_v62, 0.0 }
0x1582   :  { %v7558_v2 = vpop.f32.mrb[226].mxu1  ;;  %7597 = vmax.xlane.f32.xlu0 %v7596_v58  ;;  %12854 = vpow2.f32 %v6637_v36  ;;  %v6628_v58 = vsub.f32 %v16476_v39, %v6611_v23  ;;  %v6629_v23 = vsub.f32 %v16492_v17, %v6614_v19  ;;  %v6189_v57 = vmul.f32 1.442695, %v6175_v48 }
0x1583   :  { %v16613_v49 = vmul.f32 0.25, %v7558_v2  ;;  %v11472_v50 = vpop.f32.mrb[227].mxu1  ;;  %12856 = vpow2.f32 %v6185_v27 }
0x1584   :  { %v6641_v39 = vmul.f32 1.442695, %v6628_v58  ;;  %12858 = vpow2.f32 %v6639_v24  ;;  %v6643_v17 = vmul.f32 1.442695, %v6629_v23 }
0x1585   :  { %v7599_v41 = vsel %vm1766_vm8, %v16613_v49, -inf  ;;  %12860 = vpow2.f32 %v6187_v37 }
0x1586   :  { %v7563_v12 = vpop.f32.mrb[228].mxu1  ;;  %7600 = vmax.xlane.f32.xlu1 %v7599_v41  ;;  %v6163_v41 = vpop.xlane.xlu0 %6162  ;;  %12862 = vpow2.f32 %v6641_v39 }
0x1587   :  { %v16619_v14 = vmul.f32 0.25, %v7563_v12  ;;  %v11475_v29 = vpop.f32.mrb[229].mxu1  ;;  %v16639_v12 = vpop.eup %12850  ;;  %v6176_v22 = vsub.f32 %v16498_v30, %v6163_v41  ;;  %12864 = vpow2.f32 %v6189_v57 }
0x1588   :  { %v6200_v29 = vsel %vm1766_vm8, %v16636_v15, 0.0  ;;  %12866 = vpow2.f32 %v6643_v17 }
0x1589   :  { %v7602_v54 = vsel %vm1766_vm8, %v16619_v14, -inf }
0x158a   :  { %v7568_v21 = vpop.f32.mrb[230].mxu1  ;;  %7603 = vmax.xlane.f32.xlu0 %v7602_v54 }
0x158b   :  { %v16627_v47 = vmul.f32 0.25, %v7568_v21  ;;  %v11478_v2 = vpop.f32.mrb[231].mxu1  ;;  %v16646_v27 = vpop.eup %12852  ;;  %v6654_v21 = vsel %vm1766_vm8, %v16639_v12, 0.0 }
0x158c   :  { %v16649_v19 = vpop.eup %12854  ;;  %v6203_v58 = vsel %vm1766_vm8, %v16646_v27, 0.0  ;;  %v6191_v2 = vmul.f32 1.442695, %v6176_v22 }
0x158d   :  { %v7605_v50 = vsel %vm1766_vm8, %v16627_v47, -inf  ;;  %v16656_v24 = vpop.eup %12856  ;;  %v6657_v48 = vsel %vm1766_vm8, %v16649_v19, 0.0 }
0x158e   :  { %7606 = vmax.xlane.f32.xlu1 %v7605_v50  ;;  %6198 = vadd.xlane.f32.xlu0 %v6197_v26  ;;  %v16658_v37 = vpop.eup %12858 }
0x158f   :  { %v16664_v50 = vpop.eup %12860  ;;  %v6660_v39 = vsel %vm1766_vm8, %v16658_v37, 0.0 }
0x1590   :  { %v6617_v11 = vpop.xlane.xlu1 %6616  ;;  %v16666_v26 = vpop.eup %12862  ;;  %v6209_v23 = vsel %vm1766_vm8, %v16664_v50, 0.0 }
0x1591   :  { %v6630_v36 = vsub.f32 %v16505_v45, %v6617_v11  ;;  %v16672_v57 = vpop.eup %12864  ;;  %v6663_v11 = vsel %vm1766_vm8, %v16666_v26, 0.0 }
0x1592   :  { %6652 = vadd.xlane.f32.xlu1 %v6651_v59  ;;  %6201 = vadd.xlane.f32.xlu0 %v6200_v29  ;;  %v16674_v41 = vpop.eup %12866 }
0x1593   :  { %v6645_v55 = vmul.f32 1.442695, %v6630_v36  ;;  %v6212_v36 = vsel %vm1766_vm8, %v16672_v57, 0.0  ;;  %v6666_v17 = vsel %vm1766_vm8, %v16674_v41, 0.0 }
0x1594   :  { %v6166_v54 = vpop.xlane.xlu1 %6165 }
0x1595   :  { %v6177_v45 = vsub.f32 %v16508_v13, %v6166_v54  ;;  %12868 = vpow2.f32 %v6645_v55  ;;  %v6206_v13 = vsel %vm1766_vm8, %v16656_v24, 0.0 }
0x1596   :  { %6655 = vadd.xlane.f32.xlu1 %v6654_v21  ;;  %6204 = vadd.xlane.f32.xlu0 %v6203_v58  ;;  %12870 = vpow2.f32 %v6191_v2  ;;  %v6620_v21 = vpop.xlane.xlu0 %6619 }
0x1597   :  { %v6193_v30 = vmul.f32 1.442695, %v6177_v45 }
0x1598   :  { %v6623_v58 = vpop.xlane.xlu1 %6622 }
0x1599   :  { %12872 = vpow2.f32 %v6193_v30 }
0x159a   :  { %6658 = vadd.xlane.f32.xlu1 %v6657_v48  ;;  %6207 = vadd.xlane.f32.xlu0 %v6206_v13  ;;  %v6169_v2 = vpop.xlane.xlu0 %6168  ;;  %v6631_v48 = vsub.f32 %v16512_v9, %v6620_v21  ;;  %v6632_v13 = vsub.f32 %v16521_v43, %v6623_v58 }
0x159e   :  { %6661 = vadd.xlane.f32.xlu1 %v6660_v39  ;;  %6210 = vadd.xlane.f32.xlu0 %v6209_v23  ;;  %v7129_v39 = vpop.xlane.xlu0 %7128 }
0x159f   :  { %v16680_v59 = vpop.eup %12868 }
0x15a0   :  { %18066 = vst [vmem:[#allocation43_spill] sm:$0xff] %v16680_v59  ;;  %v16682_v29 = vpop.eup %12870  ;;  %v6669_v22 = vsel %vm1766_vm8, %v16680_v59, 0.0  ;;  %v7132_v30 = vpop.xlane.xlu1 %7131 }
0x15a1   :  { %v6215_v54 = vsel %vm1766_vm8, %v16682_v29, 0.0  ;;  %v7155_v59 = vsub.f32 %v16531_v1, %v7132_v30 }
0x15a2   :  { %6664 = vadd.xlane.f32.xlu1 %v6663_v11  ;;  %6213 = vadd.xlane.f32.xlu0 %v6212_v36  ;;  %v6647_v11 = vmul.f32 1.442695, %v6631_v48  ;;  %v6178_v36 = vsub.f32 %v16515_v4, %v6169_v2 }
0x15a3   :  { %v16688_v55 = vpop.eup %12872  ;;  %v7165_v43 = vmul.f32 1.442695, %v7155_v59 }
0x15a4   :  { %v6218_v45 = vsel %vm1766_vm8, %v16688_v55, 0.0  ;;  %12874 = vpow2.f32 %v6647_v11 }
0x15a6   :  { %6667 = vadd.xlane.f32.xlu1 %v6666_v17  ;;  %6670 = vadd.xlane.f32.xlu0 %v6669_v22  ;;  %v6649_v17 = vmul.f32 1.442695, %v6632_v13  ;;  %v7135_v22 = vpop.xlane.xlu0 %7134 }
0x15a7   :  { %v7156_v21 = vsub.f32 %v16535_v38, %v7135_v22 }
0x15a8   :  { %v16700_v23 = vpop.xlane.xlu1 %7137  ;;  %12876 = vpow2.f32 %v6649_v17 }
0x15aa   :  { %6216 = vadd.xlane.f32.xlu1 %v6215_v54  ;;  %6219 = vadd.xlane.f32.xlu0 %v6218_v45  ;;  %v6195_v54 = vmul.f32 1.442695, %v6178_v36 }
0x15ac   :  { %12878 = vpow2.f32 %v6195_v54 }
0x15ae   :  { %v16711_v48 = vpop.eup %12874 }
0x15af   :  { %v6672_v38 = vsel %vm1766_vm8, %v16711_v48, 0.0 }
0x15b4   :  { %v16705_v9 = vpop.xlane.xlu0 %7146 }
0x15bb   :  { %12530 = vrot.lane.b32.xlu1 %v16130_v31, %s13062_s1  ;;  %v7154_v31 = vsub.f32 %v16527_v63, %v7129_v39  ;;  %v7167_v63 = vmul.f32 1.442695, %v7156_v21  ;;  %v16713_v39 = vpop.eup %12876 }
0x15bc   :  { %v16708_v4 = vpop.xlane.xlu0 %7152  ;;  %v16716_v59 = vpop.eup %12878  ;;  %v6675_v36 = vsel %vm1766_vm8, %v16713_v39, 0.0 }
0x15bd   :  { %v7163_v45 = vmul.f32 1.442695, %v7154_v31 }
0x15bf   :  { %12880 = vpow2.f32 %v7163_v45 }
0x15c0   :  { %12525 = vrot.lane.b32.xlu0 %v16151_v35, %s13062_s1  ;;  %v7141_v35 = vpop.xlane.xlu1 %7140  ;;  %12882 = vpow2.f32 %v7165_v43 }
0x15c1   :  { %v7158_v2 = vsub.f32 %v16543_v52, %v7141_v35  ;;  %12884 = vpow2.f32 %v7167_v63 }
0x15c3   :  { %v7171_v30 = vmul.f32 1.442695, %v7158_v2 }
0x15c4   :  { %v7144_v58 = vpop.xlane.xlu1 %7143 }
0x15c5   :  { %v7583_v1 = vpop.xlane.xlu0 %7582  ;;  %12886 = vpow2.f32 %v7171_v30 }
0x15c6   :  { %v7608_v31 = vsub.f32 %v16563_v3, %v7583_v1 }
0x15c8   :  { %v7150_v13 = vpop.xlane.xlu1 %7149  ;;  %v7617_v45 = vmul.f32 1.442695, %v7608_v31 }
0x15c9   :  { %v7161_v11 = vsub.f32 %v16555_v5, %v7150_v13  ;;  %v16722_v17 = vpop.eup %12880  ;;  %v7586_v22 = vpop.xlane.xlu0 %7585  ;;  %v6221_v5 = vsel %vm1766_vm8, %v16716_v59, 0.0 }
0x15ca   :  { %v7181_v54 = vsel %vm1766_vm8, %v16722_v17, 0.0  ;;  %v16729_v35 = vpop.eup %12882  ;;  %v7609_v43 = vsub.f32 %v16567_v25, %v7586_v22 }
0x15cb   :  { %v7177_v52 = vmul.f32 1.442695, %v7161_v11  ;;  %v7184_v21 = vsel %vm1766_vm8, %v16729_v35, 0.0  ;;  %v16734_v63 = vpop.eup %12884 }
0x15cc   :  { %v7619_v3 = vmul.f32 1.442695, %v7609_v43  ;;  %v7187_v2 = vsel %vm1766_vm8, %v16734_v63, 0.0  ;;  %v7159_v43 = vsub.f32 %v16547_v56, %v7144_v58 }
0x15cd   :  { %12888 = vpow2.f32 %v7177_v52 }
0x15ce   :  { %12890 = vpow2.f32 %v7617_v45 }
0x15cf   :  { %v16738_v13 = vpop.eup %12886  ;;  %12892 = vpow2.f32 %v7619_v3 }
0x15d0   :  { %v7193_v1 = vsel %vm1766_vm8, %v16738_v13, 0.0 }
0x15d7   :  { %v16742_v30 = vpop.eup %12888 }
0x15d8   :  { %v7202_v25 = vsel %vm1766_vm8, %v16742_v30, 0.0  ;;  %v16746_v11 = vpop.eup %12890 }
0x15df   :  { %6673 = vadd.xlane.f32.xlu1 %v6672_v38  ;;  %6676 = vadd.xlane.f32.xlu0 %v6675_v36  ;;  %v7635_v38 = vsel %vm1766_vm8, %v16746_v11, 0.0  ;;  %v16752_v36 = vpop.eup %12892 }
0x15e0   :  { %v7638_v52 = vsel %vm1766_vm8, %v16752_v36, 0.0 }
0x15e3   :  { %6222 = vadd.xlane.f32.xlu1 %v6221_v5  ;;  %7182 = vadd.xlane.f32.xlu0 %v7181_v54  ;;  %v7157_v5 = vsub.f32 %v16539_v7, %v16700_v23  ;;  %v7162_v23 = vsub.f32 %v16559_v51, %v16708_v4 }
0x15e7   :  { %7185 = vadd.xlane.f32.xlu0 %v7184_v21 }
0x15eb   :  { %7188 = vadd.xlane.f32.xlu0 %v7187_v2  ;;  %v7173_v2 = vmul.f32 1.442695, %v7159_v43 }
0x15ef   :  { %7194 = vadd.xlane.f32.xlu0 %v7193_v1  ;;  %v7160_v1 = vsub.f32 %v16551_v33, %v16705_v9 }
0x15f1   :  { %v7175_v7 = vmul.f32 1.442695, %v7160_v1 }
0x15f3   :  { %7203 = vadd.xlane.f32.xlu0 %v7202_v25 }
0x15f4   :  { %12535 = vrot.lane.b32.xlu1 %v16180_v28, %s13062_s1  ;;  %v7169_v28 = vmul.f32 1.442695, %v7157_v5 }
0x15f7   :  { %7636 = vadd.xlane.f32.xlu0 %v7635_v38 }
0x15fb   :  { %7639 = vadd.xlane.f32.xlu0 %v7638_v52  ;;  %v7589_v31 = vpop.xlane.xlu1 %7588 }
0x15fc   :  { %v7610_v22 = vsub.f32 %v16591_v40, %v7589_v31 }
0x15fe   :  { %v7621_v54 = vmul.f32 1.442695, %v7610_v22 }
0x15ff   :  { %v7592_v45 = vpop.xlane.xlu1 %7591 }
0x1600   :  { %12894 = vpow2.f32 %v7621_v54  ;;  %v7611_v58 = vsub.f32 %v16595_v32, %v7592_v45 }
0x1601   :  { %12896 = vpow2.f32 %v7169_v28 }
0x1602   :  { %v7623_v9 = vmul.f32 1.442695, %v7611_v58  ;;  %v12488_v58 = vunpack.i.h.bf16 %v16573_v53 }
0x1603   :  { %v7595_v21 = vpop.xlane.xlu1 %7594 }
0x1604   :  { %v7612_v3 = vsub.f32 %v16599_v6, %v7595_v21  ;;  %v7179_v6 = vmul.f32 1.442695, %v7162_v23 }
0x1606   :  { %v7625_v25 = vmul.f32 1.442695, %v7612_v3 }
0x1608   :  { %12898 = vpow2.f32 %v7625_v25 }
0x1609   :  { %12900 = vpow2.f32 %v7173_v2 }
0x160a   :  { %v16763_v40 = vpop.eup %12894  ;;  %12902 = vpow2.f32 %v7175_v7 }
0x160b   :  { %v7641_v56 = vsel %vm1766_vm8, %v16763_v40, 0.0  ;;  %v16770_v52 = vpop.eup %12896  ;;  %12904 = vpow2.f32 %v7179_v6 }
0x160c   :  { %7642 = vadd.xlane.f32.xlu0 %v7641_v56  ;;  %v7190_v51 = vsel %vm1766_vm8, %v16770_v52, 0.0  ;;  %12906 = vpow2.f32 %v7623_v9 }
0x160f   :  { %v7598_v38 = vpop.xlane.xlu0 %7597 }
0x1610   :  { %v7613_v31 = vsub.f32 %v16607_v42, %v7598_v38  ;;  %v12487_v38 = vunpack.i.l.bf16 %v16573_v53 }
0x1612   :  { %v16772_v33 = vpop.eup %12898  ;;  %v7627_v45 = vmul.f32 1.442695, %v7613_v31 }
0x1613   :  { %v7601_v22 = vpop.xlane.xlu1 %7600  ;;  %v7647_v4 = vsel %vm1766_vm8, %v16772_v33, 0.0  ;;  %v16781_v54 = vpop.eup %12900 }
0x1614   :  { %7648 = vadd.xlane.f32.xlu0 %v7647_v4  ;;  %v7614_v32 = vsub.f32 %v16613_v49, %v7601_v22  ;;  %v7196_v43 = vsel %vm1766_vm8, %v16781_v54, 0.0  ;;  %v16788_v21 = vpop.eup %12902 }
0x1615   :  { %v7199_v49 = vsel %vm1766_vm8, %v16788_v21, 0.0  ;;  %v16794_v25 = vpop.eup %12904 }
0x1616   :  { %v7629_v3 = vmul.f32 1.442695, %v7614_v32  ;;  %v7205_v56 = vsel %vm1766_vm8, %v16794_v25, 0.0  ;;  %v16800_v6 = vpop.eup %12906 }
0x1617   :  { %v16775_v5 = vpop.xlane.xlu0 %7603 }
0x1618   :  { %7191 = vadd.xlane.f32.xlu1 %v7190_v51  ;;  %v7644_v51 = vsel %vm1766_vm8, %v16800_v6, 0.0 }
0x161b   :  { %v16784_v28 = vpop.xlane.xlu1 %7606  ;;  %v6199_v42 = vpop.xlane.xlu0 %6198 }
0x161c   :  { %7197 = vadd.xlane.f32.xlu1 %v7196_v43  ;;  %12908 = vrcp.f32 %v6199_v42  ;;  %v12493_v42 = vunpack.i.h.bf16 %v16571_v60  ;;  %v12492_v43 = vunpack.i.l.bf16 %v16571_v60 }
0x161d   :  { %12910 = vpow2.f32 %v7627_v45  ;;  %v12017_v45 = vpack.c.bf16 %v12488_v58, %v12487_v38 }
0x161e   :  { %12912 = vpow2.f32 %v7629_v3  ;;  %v12020_v58 = vpack.c.bf16 %v12493_v42, %v12492_v43 }
0x161f   :  { %v16790_v2 = vpop.xlane.xlu1 %6652  ;;  %v6202_v1 = vpop.xlane.xlu0 %6201 }
0x1620   :  { %7200 = vadd.xlane.f32.xlu1 %v7199_v49  ;;  %12914 = vrcp.f32 %v6202_v1 }
0x1623   :  { %v16796_v7 = vpop.xlane.xlu1 %6655  ;;  %v6205_v23 = vpop.xlane.xlu0 %6204 }
0x1624   :  { %7206 = vadd.xlane.f32.xlu1 %v7205_v56  ;;  %12916 = vrcp.f32 %v6205_v23  ;;  %v12498_v23 = vunpack.i.h.bf16 %v16577_v10  ;;  %v12497_v56 = vunpack.i.l.bf16 %v16577_v10  ;;  %v12503_v10 = vunpack.i.h.bf16 %v16575_v44 }
0x1626   :  { %v12909_v9 = vpop.eup %12908 }
0x1627   :  { %v16804_v31 = vpop.xlane.xlu1 %6658  ;;  %v6208_v22 = vpop.xlane.xlu0 %6207  ;;  %v6233_v32 = vmul.f32 %v12909_v9, %v16624_v62 }
0x1628   :  { %v16808_v4 = vpop.eup %12910  ;;  %7645 = vadd.xlane.f32.xlu1 %v7644_v51  ;;  %12918 = vrcp.f32 %v6208_v22 }
0x1629   :  { %11228 = vmatmul.mubr.msk.f32.vlgmr.msra.gmra.mrb[156].mxu0 %vm1766_vm8, %v6233_v32  ;;  %v16814_v53 = vpop.eup %12912  ;;  %v7650_v49 = vsel %vm1766_vm8, %v16808_v4, 0.0  ;;  %v12502_v32 = vunpack.i.l.bf16 %v16575_v44  ;;  %v7615_v44 = vsub.f32 %v16619_v14, %v16775_v5 }
0x162a   :  { %12018 = vmatpush3.bf16.msra.mxu0 %v12017_v45  ;;  %11230 = vmatprep.mubr.msk.f32.mxu0 %vm13056_vm4, %v17987_v46  ;;  %v12915_v62 = vpop.eup %12914  ;;  %v7653_v51 = vsel %vm1766_vm8, %v16814_v53, 0.0 }
0x162b   :  { %v16816_v3 = vpop.xlane.xlu1 %6661  ;;  %v6211_v1 = vpop.xlane.xlu0 %6210  ;;  %12019 = vmatprep.subr.bf16.mxu0 %v17986_v0  ;;  %v6234_v60 = vmul.f32 %v12915_v62, %v16636_v15  ;;  %12540 = vrot.lane.b32.xlu0 %v16159_v16, %s13062_s1  ;;  %v12023_v16 = vpack.c.bf16 %v12498_v23, %v12497_v56  ;;  %v7631_v56 = vmul.f32 1.442695, %v7615_v44 }
0x162c   :  { %7651 = vadd.xlane.f32.xlu1 %v7650_v49  ;;  %12920 = vrcp.f32 %v6211_v1  ;;  %v12026_v1 = vpack.c.bf16 %v12503_v10, %v12502_v32 }
0x162d   :  { %11231 = vmatmul.mubr.msk.f32.gmra.mrb[158].mxu0 %vm1766_vm8, %v6234_v60 }
0x162e   :  { %v12917_v38 = vpop.eup %12916  ;;  %12021 = vmatpush3.bf16.msra.mxu0 %v12020_v58  ;;  %11233 = vmatprep.mubr.msk.f32.mxu0 %vm13056_vm4, %v17987_v46 }
0x162f   :  { %v16829_v9 = vpop.xlane.xlu1 %6664  ;;  %v6214_v22 = vpop.xlane.xlu0 %6213  ;;  %v6235_v15 = vmul.f32 %v12917_v38, %v16646_v27  ;;  %12022 = vmatprep.subr.bf16.mxu0 %v17986_v0 }
0x1630   :  { %7654 = vadd.xlane.f32.xlu1 %v7653_v51  ;;  %12922 = vrcp.f32 %v6214_v22 }
0x1631   :  { %11234 = vmatmul.mubr.msk.f32.gmra.mrb[160].mxu0 %vm1766_vm8, %v6235_v15 }
0x1632   :  { %v12919_v45 = vpop.eup %12918  ;;  %12024 = vmatpush3.bf16.msra.mxu0 %v12023_v16  ;;  %11236 = vmatprep.mubr.msk.f32.mxu0 %vm13056_vm4, %v17987_v46 }
0x1633   :  { %v16840_v42 = vpop.xlane.xlu1 %6667  ;;  %v16842_v43 = vpop.xlane.xlu0 %6670  ;;  %v6236_v27 = vmul.f32 %v12919_v45, %v16656_v24  ;;  %12025 = vmatprep.subr.bf16.mxu0 %v17986_v0 }
0x1635   :  { %11237 = vmatmul.mubr.msk.f32.gmra.mrb[162].mxu0 %vm1766_vm8, %v6236_v27 }
0x1636   :  { %v12921_v49 = vpop.eup %12920  ;;  %12027 = vmatpush3.bf16.msra.mxu0 %v12026_v1  ;;  %11239 = vmatprep.mubr.msk.f32.mxu0 %vm13056_vm4, %v17987_v46  ;;  %v12508_v1 = vunpack.i.h.bf16 %v16581_v34 }
0x1637   :  { %v6217_v62 = vpop.xlane.xlu1 %6216  ;;  %v6220_v60 = vpop.xlane.xlu0 %6219  ;;  %v6237_v23 = vmul.f32 %v12921_v49, %v16664_v50  ;;  %11315 = vmatprep.subr.mxu0 %v17987_v46  ;;  %v12507_v49 = vunpack.i.l.bf16 %v16581_v34 }
0x1638   :  { %12924 = vrcp.f32 %v6217_v62 }
0x1639   :  { %12926 = vrcp.f32 %v6220_v60  ;;  %11240 = vmatmul.mubr.msk.f32.gmra.mrb[164].mxu0 %vm1766_vm8, %v6237_v23  ;;  %v12045_v62 = vpack.c.bf16 %v12508_v1, %v12507_v49  ;;  %v18067_v60 = vld [vmem:[#allocation41_spill] sm:$0xff] }
0x163a   :  { %v12923_v24 = vpop.eup %12922  ;;  %11316 = vmatpush3.msra.mxu0 %v16579_v20  ;;  %11242 = vmatprep.mubr.msk.f32.mxu0 %vm13056_vm4, %v17987_v46  ;;  %12928 = vpow2.f32 %v7631_v56  ;;  %v12518_v23 = vunpack.i.h.bf16 %v18067_v60 }
0x163b   :  { %v6238_v14 = vmul.f32 %v12923_v24, %v16672_v57  ;;  %12044 = vmatprep.subr.bf16.mxu0 %v17986_v0  ;;  %v16884_v51 = vpop.permute.xlu1 %12530  ;;  %v16886_v16 = vpop.permute.xlu0 %12525  ;;  %v12517_v24 = vunpack.i.l.bf16 %v18067_v60 }
0x163c   :  { %v12528_v1 = vunpack.i.h.bf16 %v16886_v16  ;;  %v12527_v49 = vunpack.i.l.bf16 %v16886_v16 }
0x163d   :  { %11243 = vmatmul.mubr.msk.f32.gmra.mrb[166].mxu0 %vm1766_vm8, %v6238_v14 }
0x163e   :  { %11245 = vmatprep.mubr.msk.f32.mxu0 %vm13056_vm4, %v17987_v46 }
0x1641   :  { %7696 = vrot.lane.b32.xlu1 %v16210_v61, %s13062_s1 }
0x1642   :  { %v12925_v50 = vpop.eup %12924 }
0x1643   :  { %v6239_v5 = vmul.f32 %v12925_v50, %v16682_v29  ;;  %v12927_v20 = vpop.eup %12926  ;;  %v7616_v29 = vsub.f32 %v16627_v47, %v16784_v28 }
0x1644   :  { %v6240_v57 = vmul.f32 %v12927_v20, %v16688_v55  ;;  %v16871_v58 = vpop.eup %12928 }
0x1645   :  { %11246 = vmatmul.mubr.msk.f32.gmra.mrb[168].mxu0 %vm1766_vm8, %v6239_v5  ;;  %v7656_v61 = vsel %vm1766_vm8, %v16871_v58, 0.0  ;;  %v7633_v38 = vmul.f32 1.442695, %v7616_v29  ;;  %v12051_v5 = vpack.c.bf16 %v12518_v23, %v12517_v24 }
0x1646   :  { %11248 = vmatprep.mubr.msk.f32.mxu0 %vm13056_vm4, %v17987_v46 }
0x1647   :  { %12930 = vpow2.f32 %v7633_v38 }
0x1649   :  { %11249 = vmatmul.mubr.msk.f32.gmra.mrb[170].mxu0 %vm1766_vm8, %v6240_v57 }
0x164a   :  { %11251 = vmatprep.mubr.msk.f32.mxu0 %vm13056_vm4, %v17987_v46  ;;  %7657 = vadd.xlane.f32.xlu0 %v7656_v61 }
0x1651   :  { %v16880_v22 = vpop.eup %12930 }
0x1652   :  { %v7659_v55 = vsel %vm1766_vm8, %v16880_v22, 0.0 }
0x1665   :  { %7660 = vadd.xlane.f32.xlu1 %v7659_v55 }
0x166c   :  { %v6674_v15 = vpop.xlane.xlu1 %6673  ;;  %v6677_v32 = vpop.xlane.xlu0 %6676 }
0x1670   :  { %v6223_v10 = vpop.xlane.xlu1 %6222  ;;  %v7183_v47 = vpop.xlane.xlu0 %7182 }
0x1671   :  { %12932 = vrcp.f32 %v6223_v10 }
0x1672   :  { %12934 = vrcp.f32 %v16790_v2 }
0x1673   :  { %12936 = vrcp.f32 %v16796_v7 }
0x1674   :  { %12938 = vrcp.f32 %v16804_v31  ;;  %v7186_v44 = vpop.xlane.xlu0 %7185  ;;  %v12513_v31 = vunpack.i.h.bf16 %v16583_v18 }
0x1675   :  { %12940 = vrcp.f32 %v16816_v3 }
0x1676   :  { %12942 = vrcp.f32 %v16829_v9  ;;  %v18068_v9 = vld [vmem:[#allocation32_spill] sm:$0xff] }
0x1677   :  { %12944 = vrcp.f32 %v16840_v42  ;;  %v12523_v14 = vunpack.i.h.bf16 %v18068_v9  ;;  %v12522_v50 = vunpack.i.l.bf16 %v18068_v9 }
0x1678   :  { %v7189_v56 = vpop.xlane.xlu0 %7188  ;;  %12946 = vrcp.f32 %v16842_v43 }
0x1679   :  { %v12054_v57 = vpack.c.bf16 %v12523_v14, %v12522_v50  ;;  %12948 = vrcp.f32 %v6674_v15  ;;  %v18070_v15 = vld [vmem:[#allocation43_spill] sm:$0xff] }
0x167a   :  { %12950 = vrcp.f32 %v6677_v32 }
0x167b   :  { %v12933_v28 = vpop.eup %12932  ;;  %12952 = vrcp.f32 %v7183_v47 }
0x167c   :  { %v6241_v45 = vmul.f32 %v12933_v28, %v16716_v59  ;;  %v12935_v27 = vpop.eup %12934  ;;  %v12512_v59 = vunpack.i.l.bf16 %v16583_v18  ;;  %v7195_v20 = vpop.xlane.xlu0 %7194  ;;  %12954 = vrcp.f32 %v7186_v44 }
0x167d   :  { %v6687_v2 = vmul.f32 %v12935_v27, %v16630_v8  ;;  %v12937_v7 = vpop.eup %12936  ;;  %12956 = vrcp.f32 %v7189_v56  ;;  %v12536_v44 = vpop.permute.xlu1 %12535 }
0x167e   :  { %11252 = vmatmul.mubr.msk.f32.gmra.mrb[172].mxu0 %vm1766_vm8, %v6241_v45  ;;  %v6688_v34 = vmul.f32 %v12937_v7, %v16639_v12  ;;  %v12939_v3 = vpop.eup %12938  ;;  %v12048_v8 = vpack.c.bf16 %v12513_v31, %v12512_v59  ;;  %v12073_v31 = vpack.c.bf16 %v12528_v1, %v12527_v49  ;;  %v12537_v60 = vunpack.i.l.bf16 %v12536_v44 }
0x167f   :  { %11317 = vmatprep.mubr.msk.f32.mxu0 %vm13056_vm4, %v17987_v46  ;;  %v6689_v18 = vmul.f32 %v12939_v3, %v16649_v19  ;;  %v12941_v12 = vpop.eup %12940 }
0x1680   :  { %v6690_v42 = vmul.f32 %v12941_v12, %v16658_v37  ;;  %v12943_v19 = vpop.eup %12942  ;;  %v16928_v29 = vpop.xlane.xlu0 %7203  ;;  %v18069_v37 = vld [vmem:[#allocation42_spill] sm:$0xff] }
0x1681   :  { %v6691_v43 = vmul.f32 %v12943_v19, %v16666_v26  ;;  %v12945_v61 = vpop.eup %12944 }
0x1682   :  { %11318 = vmatmul.mubr.msk.f32.vlgmr.msra.gmra.mrb[174].mxu0 %vm1766_vm8, %v6687_v2  ;;  %v6692_v38 = vmul.f32 %v12945_v61, %v16674_v41  ;;  %v12947_v55 = vpop.eup %12946 }
0x1683   :  { %12046 = vmatpush3.bf16.msra.mxu0 %v12045_v62  ;;  %11320 = vmatprep.mubr.msk.f32.mxu0 %vm13056_vm4, %v17987_v46  ;;  %v6693_v10 = vmul.f32 %v12947_v55, %v18070_v15  ;;  %v12949_v32 = vpop.eup %12948  ;;  %v12533_v62 = vunpack.i.h.bf16 %v16884_v51 }
0x1684   :  { %12047 = vmatprep.subr.bf16.mxu0 %v17986_v0  ;;  %v16937_v26 = vpop.xlane.xlu0 %7636  ;;  %v6694_v41 = vmul.f32 %v12949_v32, %v16711_v48  ;;  %v12951_v28 = vpop.eup %12950 }
0x1685   :  { %v6695_v47 = vmul.f32 %v12951_v28, %v16713_v39  ;;  %v12953_v27 = vpop.eup %12952  ;;  %v12532_v39 = vunpack.i.l.bf16 %v16884_v51 }
0x1686   :  { %11321 = vmatmul.mubr.msk.f32.gmra.mrb[176].mxu0 %vm1766_vm8, %v6688_v34  ;;  %v7217_v48 = vmul.f32 %v12953_v27, %v16722_v17  ;;  %v12955_v7 = vpop.eup %12954 }
0x1687   :  { %12049 = vmatpush3.bf16.msra.mxu0 %v12048_v8  ;;  %11323 = vmatprep.mubr.msk.f32.mxu0 %vm13056_vm4, %v17987_v46  ;;  %v7218_v17 = vmul.f32 %v12955_v7, %v16729_v35  ;;  %v12957_v16 = vpop.eup %12956  ;;  %v12076_v3 = vpack.c.bf16 %v12533_v62, %v12532_v39  ;;  %v12538_v8 = vunpack.i.h.bf16 %v12536_v44 }
0x1688   :  { %12050 = vmatprep.subr.bf16.mxu0 %v17986_v0  ;;  %v16946_v45 = vpop.xlane.xlu0 %7639  ;;  %v7219_v24 = vmul.f32 %v12957_v16, %v16734_v63 }
0x1689   :  { %v12079_v56 = vpack.c.bf16 %v12538_v8, %v12537_v60 }
0x168a   :  { %11324 = vmatmul.mubr.msk.f32.gmra.mrb[178].mxu0 %vm1766_vm8, %v6689_v18 }
0x168b   :  { %12052 = vmatpush3.bf16.msra.mxu0 %v12051_v5  ;;  %11326 = vmatprep.mubr.msk.f32.mxu0 %vm13056_vm4, %v17987_v46 }
0x168c   :  { %12053 = vmatprep.subr.bf16.mxu0 %v17986_v0 }
0x168e   :  { %11327 = vmatmul.mubr.msk.f32.gmra.mrb[180].mxu0 %vm1766_vm8, %v6690_v42 }
0x168f   :  { %12055 = vmatpush3.bf16.msra.mxu0 %v12054_v57  ;;  %11329 = vmatprep.mubr.msk.f32.mxu0 %vm13056_vm4, %v17987_v46 }
0x1690   :  { %11405 = vmatprep.subr.mxu0 %v17987_v46 }
0x1692   :  { %11330 = vmatmul.mubr.msk.f32.gmra.mrb[182].mxu0 %vm1766_vm8, %v6691_v43 }
0x1693   :  { %11406 = vmatpush3.msra.mxu0 %v18069_v37  ;;  %11332 = vmatprep.mubr.msk.f32.mxu0 %vm13056_vm4, %v17987_v46 }
0x1694   :  { %12072 = vmatprep.subr.bf16.mxu0 %v17986_v0 }
0x1696   :  { %11333 = vmatmul.mubr.msk.f32.gmra.mrb[184].mxu0 %vm1766_vm8, %v6692_v38 }
0x1697   :  { %11335 = vmatprep.mubr.msk.f32.mxu0 %vm13056_vm4, %v17987_v46 }
0x1699   :  { %v16954_v2 = vpop.xlane.xlu0 %7642 }
0x169a   :  { %11336 = vmatmul.mubr.msk.f32.gmra.mrb[186].mxu0 %vm1766_vm8, %v6693_v10 }
0x169b   :  { %11338 = vmatprep.mubr.msk.f32.mxu0 %vm13056_vm4, %v17987_v46 }
0x169e   :  { %11339 = vmatmul.mubr.msk.f32.gmra.mrb[188].mxu0 %vm1766_vm8, %v6694_v41 }
0x169f   :  { %11341 = vmatprep.mubr.msk.f32.mxu0 %vm13056_vm4, %v17987_v46 }
0x16a1   :  { %v16962_v34 = vpop.xlane.xlu0 %7648 }
0x16a2   :  { %11342 = vmatmul.mubr.msk.f32.gmra.mrb[190].mxu0 %vm1766_vm8, %v6695_v47 }
0x16a3   :  { %11407 = vmatprep.mubr.msk.f32.mxu0 %vm13056_vm4, %v17987_v46 }
0x16a5   :  { %v7192_v59 = vpop.xlane.xlu1 %7191  ;;  %v12541_v23 = vpop.permute.xlu0 %12540 }
0x16a6   :  { %12958 = vrcp.f32 %v7192_v59  ;;  %11408 = vmatmul.mubr.msk.f32.vlgmr.msra.gmra.mrb[192].mxu0 %vm1766_vm8, %v7217_v48  ;;  %v12543_v35 = vunpack.i.h.bf16 %v12541_v23  ;;  %v12542_v18 = vunpack.i.l.bf16 %v12541_v23 }
0x16a7   :  { %12074 = vmatpush3.bf16.msra.mxu0 %v12073_v31  ;;  %11410 = vmatprep.mubr.msk.f32.mxu0 %vm13056_vm4, %v17987_v46  ;;  %12960 = vrcp.f32 %v7195_v20 }
0x16a8   :  { %12075 = vmatprep.subr.bf16.mxu0 %v17986_v0  ;;  %v12082_v14 = vpack.c.bf16 %v12543_v35, %v12542_v18 }
0x16a9   :  { %v7198_v51 = vpop.xlane.xlu1 %7197 }
0x16aa   :  { %11411 = vmatmul.mubr.msk.f32.gmra.mrb[194].mxu0 %vm1766_vm8, %v7218_v17  ;;  %12962 = vrcp.f32 %v7198_v51 }
0x16ab   :  { %12077 = vmatpush3.bf16.msra.mxu0 %v12076_v3  ;;  %11413 = vmatprep.mubr.msk.f32.mxu0 %vm13056_vm4, %v17987_v46 }
0x16ac   :  { %12078 = vmatprep.subr.bf16.mxu0 %v17986_v0 }
0x16ad   :  { %v7201_v12 = vpop.xlane.xlu1 %7200 }
0x16ae   :  { %11414 = vmatmul.mubr.msk.f32.gmra.mrb[196].mxu0 %vm1766_vm8, %v7219_v24  ;;  %12964 = vrcp.f32 %v7201_v12 }
0x16af   :  { %12080 = vmatpush3.bf16.msra.mxu0 %v12079_v56  ;;  %11416 = vmatprep.mubr.msk.f32.mxu0 %vm13056_vm4, %v17987_v46  ;;  %12966 = vrcp.f32 %v16928_v29 }
0x16b0   :  { %v12959_v9 = vpop.eup %12958  ;;  %12081 = vmatprep.subr.bf16.mxu0 %v17986_v0 }
0x16b1   :  { %v7207_v50 = vpop.xlane.xlu1 %7206  ;;  %v7220_v5 = vmul.f32 %v12959_v9, %v16770_v52  ;;  %v12961_v63 = vpop.eup %12960 }
0x16b2   :  { %v7221_v42 = vmul.f32 %v12961_v63, %v16738_v13  ;;  %12968 = vrcp.f32 %v7207_v50  ;;  %v7890_v50 = vld [vmem:[%s17870_s3 + $0x2f8] sm:$0xff] }
0x16b3   :  { %12083 = vmatpush3.bf16.msra.mxu0 %v12082_v14  ;;  %12970 = vrcp.f32 %v16937_v26  ;;  %v7889_v14 = vld [vmem:[%s17870_s3 + $0x2f0] sm:$0xff] }
0x16b4   :  { %11417 = vmatmul.mubr.msk.f32.gmra.mrb[198].mxu0 %vm1766_vm8, %v7220_v5  ;;  %11495 = vmatprep.subr.mxu0 %v17987_v46  ;;  %v12963_v0 = vpop.eup %12962  ;;  %12972 = vrcp.f32 %v16946_v45  ;;  %v7891_v5 = vld [vmem:[%s17870_s3 + $0x300] sm:$0xff] }
0x16b5   :  { %v7646_v20 = vpop.xlane.xlu1 %7645  ;;  %11419 = vmatprep.mubr.msk.f32.mxu0 %vm13056_vm4, %v17987_v46  ;;  %v7222_v52 = vmul.f32 %v12963_v0, %v16781_v54  ;;  %12974 = vrcp.f32 %v16954_v2 }
0x16b6   :  { %12976 = vrcp.f32 %v7646_v20  ;;  %v12084_v20 = vpack.c.bf16 %v7890_v50, %v7889_v14 }
0x16b7   :  { %12978 = vrcp.f32 %v16962_v34 }
0x16b8   :  { %11420 = vmatmul.mubr.msk.f32.gmra.mrb[200].mxu0 %vm1766_vm8, %v7221_v42  ;;  %v12965_v57 = vpop.eup %12964  ;;  %v7892_v42 = vld [vmem:[%s17870_s3 + $0x308] sm:$0xff]  ;;  %12085 = vmatprep.subr.bf16.mxu1 %v12084_v20 }
0x16b9   :  { %v7652_v19 = vpop.xlane.xlu1 %7651  ;;  %11422 = vmatprep.mubr.msk.f32.mxu0 %vm13056_vm4, %v17987_v46  ;;  %v7223_v13 = vmul.f32 %v12965_v57, %v16788_v21  ;;  %v12967_v61 = vpop.eup %12966  ;;  %v12088_v0 = vpack.c.bf16 %v7892_v42, %v7891_v5  ;;  %12087 = vmatpush3.bf16.msra.mxu1 %v12084_v20 }
0x16ba   :  { %v7224_v54 = vmul.f32 %v12967_v61, %v16742_v30  ;;  %12980 = vrcp.f32 %v7652_v19 }
0x16bb   :  { %12089 = vmatprep.subr.bf16.mxu1 %v12088_v0 }
0x16bc   :  { %11423 = vmatmul.mubr.msk.f32.gmra.mrb[202].mxu0 %vm1766_vm8, %v7222_v52  ;;  %v12969_v37 = vpop.eup %12968 }
0x16bd   :  { %v7655_v43 = vpop.xlane.xlu1 %7654  ;;  %11425 = vmatprep.mubr.msk.f32.mxu0 %vm13056_vm4, %v17987_v46  ;;  %v7225_v21 = vmul.f32 %v12969_v37, %v16794_v25  ;;  %v12971_v38 = vpop.eup %12970  ;;  %12091 = vmatpush3.bf16.msra.mxu1 %v12088_v0 }
0x16be   :  { %v7671_v55 = vmul.f32 %v12971_v38, %v16746_v11  ;;  %v12973_v30 = vpop.eup %12972  ;;  %12982 = vrcp.f32 %v7655_v43 }
0x16bf   :  { %v7672_v26 = vmul.f32 %v12973_v30, %v16752_v36  ;;  %v12975_v25 = vpop.eup %12974 }
0x16c0   :  { %11426 = vmatmul.mubr.msk.f32.gmra.mrb[204].mxu0 %vm1766_vm8, %v7223_v13  ;;  %v7673_v15 = vmul.f32 %v12975_v25, %v16763_v40  ;;  %v12977_v11 = vpop.eup %12976 }
0x16c1   :  { %v7697_v29 = vpop.permute.xlu1 %7696  ;;  %11428 = vmatprep.mubr.msk.f32.mxu0 %vm13056_vm4, %v17987_v46  ;;  %v7674_v10 = vmul.f32 %v12977_v11, %v16800_v6  ;;  %v12979_v32 = vpop.eup %12978 }
0x16c2   :  { %11496 = vmatpush3.msra.mxu0 %v7697_v29  ;;  %v7675_v41 = vmul.f32 %v12979_v32, %v16772_v33 }
0x16c4   :  { %11429 = vmatmul.mubr.msk.f32.gmra.mrb[206].mxu0 %vm1766_vm8, %v7224_v54  ;;  %v12981_v28 = vpop.eup %12980 }
0x16c5   :  { %11431 = vmatprep.mubr.msk.f32.mxu0 %vm13056_vm4, %v17987_v46  ;;  %v7676_v40 = vmul.f32 %v12981_v28, %v16808_v4 }
0x16c8   :  { %11432 = vmatmul.mubr.msk.f32.gmra.mrb[208].mxu0 %vm1766_vm8, %v7225_v21  ;;  %v12983_v45 = vpop.eup %12982 }
0x16c9   :  { %11497 = vmatprep.mubr.msk.f32.mxu0 %vm13056_vm4, %v17987_v46  ;;  %v7677_v6 = vmul.f32 %v12983_v45, %v16814_v53 }
0x16cc   :  { %11498 = vmatmul.mubr.msk.f32.vlgmr.msra.gmra.mrb[210].mxu0 %vm1766_vm8, %v7671_v55 }
0x16cd   :  { %11500 = vmatprep.mubr.msk.f32.mxu0 %vm13056_vm4, %v17987_v46 }
0x16d0   :  { %11501 = vmatmul.mubr.msk.f32.gmra.mrb[212].mxu0 %vm1766_vm8, %v7672_v26 }
0x16d1   :  { %11503 = vmatprep.mubr.msk.f32.mxu0 %vm13056_vm4, %v17987_v46 }
0x16d4   :  { %11504 = vmatmul.mubr.msk.f32.gmra.mrb[214].mxu0 %vm1766_vm8, %v7673_v15 }
0x16d5   :  { %11506 = vmatprep.mubr.msk.f32.mxu0 %vm13056_vm4, %v17987_v46 }
0x16d7   :  { %v7658_v36 = vpop.xlane.xlu0 %7657 }
0x16d8   :  { %11507 = vmatmul.mubr.msk.f32.gmra.mrb[216].mxu0 %vm1766_vm8, %v7674_v10  ;;  %12984 = vrcp.f32 %v7658_v36 }
0x16d9   :  { %11509 = vmatprep.mubr.msk.f32.mxu0 %vm13056_vm4, %v17987_v46 }
0x16dc   :  { %11510 = vmatmul.mubr.msk.f32.gmra.mrb[218].mxu0 %vm1766_vm8, %v7675_v41 }
0x16dd   :  { %11512 = vmatprep.mubr.msk.f32.mxu0 %vm13056_vm4, %v17987_v46 }
0x16e0   :  { %11513 = vmatmul.mubr.msk.f32.gmra.mrb[220].mxu0 %vm1766_vm8, %v7676_v40 }
0x16e1   :  { %11515 = vmatprep.mubr.msk.f32.mxu0 %vm13056_vm4, %v17987_v46 }
0x16e2   :  { %v12985_v33 = vpop.eup %12984 }
0x16e3   :  { %v7678_v47 = vmul.f32 %v12985_v33, %v16871_v58 }
0x16e4   :  { %11516 = vmatmul.mubr.msk.f32.gmra.mrb[222].mxu0 %vm1766_vm8, %v7677_v6 }
0x16e5   :  { %11518 = vmatprep.mubr.msk.f32.mxu0 %vm13056_vm4, %v17987_v46 }
0x16e8   :  { %11519 = vmatmul.mubr.msk.f32.gmra.mrb[224].mxu0 %vm1766_vm8, %v7678_v47 }
0x16e9   :  { %11521 = vmatprep.mubr.msk.f32.mxu0 %vm13056_vm4, %v17987_v46 }
0x16f2   :  { %v7661_v4 = vpop.xlane.xlu1 %7660 }
0x16f3   :  { %12986 = vrcp.f32 %v7661_v4 }
0x16fc   :  { %v17040_v1 = vpop.f32.mrb[156].mxu0 }
0x16fd   :  { %v12987_v27 = vpop.eup %12986  ;;  %v11229_v49 = vpop.f32.mrb[157].mxu0 }
0x16fe   :  { %v7679_v53 = vmul.f32 %v12987_v27, %v16880_v22 }
0x1700   :  { %11522 = vmatmul.mubr.msk.f32.gmra.mrb[226].mxu0 %vm1766_vm8, %v7679_v53  ;;  %v17044_v44 = vpop.f32.mrb[158].mxu0 }
0x1701   :  { %v11232_v2 = vpop.f32.mrb[159].mxu0 }
0x1704   :  { %v17046_v48 = vpop.f32.mrb[160].mxu0 }
0x1705   :  { %v11235_v58 = vpop.f32.mrb[161].mxu0 }
0x1708   :  { %v17048_v7 = vpop.f32.mrb[162].mxu0 }
0x1709   :  { %v11238_v62 = vpop.f32.mrb[163].mxu0 }
0x170c   :  { %v17050_v46 = vpop.f32.mrb[164].mxu0 }
0x170d   :  { %v11241_v39 = vpop.f32.mrb[165].mxu0 }
0x1710   :  { %v17052_v31 = vpop.f32.mrb[166].mxu0 }
0x1711   :  { %v11244_v59 = vpop.f32.mrb[167].mxu0 }
0x1718   :  { %v17054_v34 = vpop.f32.mrb[168].mxu0 }
0x1719   :  { %v11247_v22 = vpop.f32.mrb[169].mxu0 }
0x171c   :  { %v17056_v17 = vpop.f32.mrb[170].mxu0 }
0x171d   :  { %v11250_v16 = vpop.f32.mrb[171].mxu0 }
0x1751   :  { %v17058_v3 = vpop.f32.mrb[172].mxu0 }
0x1752   :  { %v11253_v8 = vpop.f32.mrb[173].mxu0 }
0x1755   :  { %v6816_v60 = vpop.f32.mrb[174].mxu0 }
0x1756   :  { %6869 = vrot.lane.b32.xlu0 %v6816_v60, %s13063_s16  ;;  %v11319_v51 = vpop.f32.mrb[175].mxu0 }
0x1759   :  { %v6821_v23 = vpop.f32.mrb[176].mxu0 }
0x175a   :  { %6871 = vrot.lane.b32.xlu0 %v6821_v23, %s13063_s16  ;;  %v11322_v24 = vpop.f32.mrb[177].mxu0 }
0x175d   :  { %v6826_v56 = vpop.f32.mrb[178].mxu0 }
0x175e   :  { %6873 = vrot.lane.b32.xlu0 %v6826_v56, %s13063_s16  ;;  %v11325_v35 = vpop.f32.mrb[179].mxu0 }
0x1761   :  { %v6831_v18 = vpop.f32.mrb[180].mxu0 }
0x1762   :  { %6875 = vrot.lane.b32.xlu0 %v6831_v18, %s13063_s16  ;;  %v11328_v12 = vpop.f32.mrb[181].mxu0 }
0x1765   :  { %v6836_v9 = vpop.f32.mrb[182].mxu0 }
0x1766   :  { %v11331_v63 = vpop.f32.mrb[183].mxu0 }
0x1769   :  { %v6841_v19 = vpop.f32.mrb[184].mxu0 }
0x176a   :  { %6879 = vrot.lane.b32.xlu0 %v6841_v19, %s13063_s16  ;;  %v11334_v52 = vpop.f32.mrb[185].mxu0 }
0x176d   :  { %v6846_v57 = vpop.f32.mrb[186].mxu0 }
0x176e   :  { %v11337_v43 = vpop.f32.mrb[187].mxu0 }
0x1771   :  { %v6851_v13 = vpop.f32.mrb[188].mxu0 }
0x1772   :  { %6883 = vrot.lane.b32.xlu0 %v6851_v13, %s13063_s16  ;;  %v11340_v61 = vpop.f32.mrb[189].mxu0 }
0x1775   :  { %v6856_v29 = vpop.f32.mrb[190].mxu0 }
0x1776   :  { %v11343_v54 = vpop.f32.mrb[191].mxu0 }
0x1779   :  { %v7346_v37 = vpop.f32.mrb[192].mxu0 }
0x177a   :  { %v11409_v21 = vpop.f32.mrb[193].mxu0 }
0x177d   :  { %v17078_v38 = vpop.f32.mrb[194].mxu0 }
0x177e   :  { %v11412_v55 = vpop.f32.mrb[195].mxu0 }
0x1781   :  { %v17080_v30 = vpop.f32.mrb[196].mxu0 }
0x1782   :  { %v11415_v26 = vpop.f32.mrb[197].mxu0 }
0x1787   :  { %v17082_v25 = vpop.f32.mrb[198].mxu0 }
0x1788   :  { %v11418_v15 = vpop.f32.mrb[199].mxu0 }
0x178b   :  { %v17084_v11 = vpop.f32.mrb[200].mxu0 }
0x178c   :  { %v11421_v10 = vpop.f32.mrb[201].mxu0 }
0x178f   :  { %v17086_v32 = vpop.f32.mrb[202].mxu0 }
0x1790   :  { %v11424_v36 = vpop.f32.mrb[203].mxu0 }
0x1793   :  { %v17088_v41 = vpop.f32.mrb[204].mxu0 }
0x1794   :  { %v11427_v28 = vpop.f32.mrb[205].mxu0 }
0x1797   :  { %v17090_v40 = vpop.f32.mrb[206].mxu0 }
0x1798   :  { %v11430_v45 = vpop.f32.mrb[207].mxu0 }
0x179b   :  { %v17092_v6 = vpop.f32.mrb[208].mxu0 }
0x179c   :  { %v11433_v33 = vpop.f32.mrb[209].mxu0 }
0x179f   :  { %v7800_v47 = vpop.f32.mrb[210].mxu0 }
0x17a0   :  { %7853 = vrot.lane.b32.xlu1 %v7800_v47, %s13063_s16  ;;  %v11499_v4 = vpop.f32.mrb[211].mxu0 }
0x17a3   :  { %v7805_v27 = vpop.f32.mrb[212].mxu0 }
0x17a4   :  { %6877 = vrot.lane.b32.xlu1 %v6836_v9, %s13063_s16  ;;  %7855 = vrot.lane.b32.xlu0 %v7805_v27, %s13063_s16  ;;  %v11502_v49 = vpop.f32.mrb[213].mxu0 }
0x17a7   :  { %v7810_v53 = vpop.f32.mrb[214].mxu0 }
0x17a8   :  { %6881 = vrot.lane.b32.xlu1 %v6846_v57, %s13063_s16  ;;  %v11505_v2 = vpop.f32.mrb[215].mxu0 }
0x17ab   :  { %v7815_v58 = vpop.f32.mrb[216].mxu0 }
0x17ac   :  { %6885 = vrot.lane.b32.xlu1 %v6856_v29, %s13063_s16  ;;  %7859 = vrot.lane.b32.xlu0 %v7815_v58, %s13063_s16  ;;  %v11508_v62 = vpop.f32.mrb[217].mxu0 }
0x17af   :  { %v7820_v39 = vpop.f32.mrb[218].mxu0 }
0x17b0   :  { %7857 = vrot.lane.b32.xlu1 %v7810_v53, %s13063_s16  ;;  %v11511_v59 = vpop.f32.mrb[219].mxu0 }
0x17b3   :  { %v7825_v22 = vpop.f32.mrb[220].mxu0 }
0x17b4   :  { %7861 = vrot.lane.b32.xlu1 %v7820_v39, %s13063_s16  ;;  %7863 = vrot.lane.b32.xlu0 %v7825_v22, %s13063_s16  ;;  %v11514_v16 = vpop.f32.mrb[221].mxu0 }
0x17b7   :  { %v7830_v8 = vpop.f32.mrb[222].mxu0 }
0x17b8   :  { %7865 = vrot.lane.b32.xlu1 %v7830_v8, %s13063_s16  ;;  %v11517_v60 = vpop.f32.mrb[223].mxu0 }
0x17bb   :  { %v7835_v51 = vpop.f32.mrb[224].mxu0 }
0x17bc   :  { %7867 = vrot.lane.b32.xlu0 %v7835_v51, %s13063_s16  ;;  %v11520_v23 = vpop.f32.mrb[225].mxu0 }
0x17c8   :  { %v6870_v24 = vpop.permute.xlu0 %6869 }
0x17c9   :  { %v6896_v56 = vsel %vm1610_vm6, %v17040_v1, %v6870_v24 }
0x17ca   :  { %11532 = vmatprep.mubr.msk.f32.mxu1 %vm264_vm1, %v6896_v56 }
0x17cc   :  { %v6872_v12 = vpop.permute.xlu0 %6871 }
0x17cd   :  { %v6897_v5 = vsel %vm1610_vm6, %v17044_v44, %v6872_v12 }
0x17d0   :  { %v6874_v9 = vpop.permute.xlu0 %6873 }
0x17d1   :  { %v6898_v20 = vsel %vm1610_vm6, %v17046_v48, %v6874_v9 }
0x17d3   :  { %v7840_v35 = vpop.f32.mrb[226].mxu0 }
0x17d4   :  { %7869 = vrot.lane.b32.xlu1 %v7840_v35, %s13063_s16  ;;  %v11523_v18 = vpop.f32.mrb[227].mxu0  ;;  %v6876_v63 = vpop.permute.xlu0 %6875 }
0x17d5   :  { %v6899_v42 = vsel %vm1610_vm6, %v17048_v7, %v6876_v63 }
0x17dc   :  { %v6880_v0 = vpop.permute.xlu0 %6879 }
0x17dd   :  { %v6901_v52 = vsel %vm1610_vm6, %v17052_v31, %v6880_v0 }
0x17e4   :  { %v6884_v57 = vpop.permute.xlu0 %6883 }
0x17e5   :  { %v6903_v43 = vsel %vm1610_vm6, %v17056_v17, %v6884_v57 }
0x1812   :  { %v7854_v14 = vpop.permute.xlu1 %7853 }
0x1813   :  { %v7880_v50 = vsel %vm1610_vm6, %v7346_v37, %v7854_v14 }
0x1814   :  { %11533 = vmatmul.mubr.msk.f32.vlgmr.msra.gmra.mrb[232].mxu1 %vm264_vm1, %v7880_v50 }
0x1815   :  { %11535 = vmatprep.mubr.msk.f32.mxu1 %vm264_vm1, %v6897_v5 }
0x1816   :  { %v6878_v1 = vpop.permute.xlu1 %6877  ;;  %v7856_v13 = vpop.permute.xlu0 %7855 }
0x1817   :  { %v6900_v44 = vsel %vm1610_vm6, %v17050_v46, %v6878_v1  ;;  %v7881_v61 = vsel %vm1610_vm6, %v17078_v38, %v7856_v13  ;;  %v18071_v1 = vld [vmem:[#allocation9_spill] sm:$0xff] }
0x1818   :  { %11536 = vmatmul.mubr.msk.f32.gmra.mrb[234].mxu1 %vm264_vm1, %v6898_v20 }
0x1819   :  { %11538 = vmatprep.mubr.msk.f32.mxu1 %vm264_vm1, %v6899_v42 }
0x181a   :  { %v6882_v19 = vpop.permute.xlu1 %6881 }
0x181b   :  { %v6902_v7 = vsel %vm1610_vm6, %v17054_v34, %v6882_v19 }
0x181c   :  { %11539 = vmatmul.mubr.msk.f32.gmra.mrb[236].mxu1 %vm264_vm1, %v6900_v44 }
0x181d   :  { %11541 = vmatprep.mubr.msk.f32.mxu1 %vm264_vm1, %v6901_v52 }
0x181e   :  { %v6886_v48 = vpop.permute.xlu1 %6885  ;;  %v7860_v29 = vpop.permute.xlu0 %7859 }
0x181f   :  { %v6904_v31 = vsel %vm1610_vm6, %v17058_v3, %v6886_v48  ;;  %v7883_v54 = vsel %vm1610_vm6, %v17082_v25, %v7860_v29 }
0x1820   :  { %11542 = vmatmul.mubr.msk.f32.gmra.mrb[238].mxu1 %vm264_vm1, %v6902_v7 }
0x1821   :  { %11544 = vmatprep.mubr.msk.f32.mxu1 %vm264_vm1, %v6903_v43 }
0x1822   :  { %v7858_v46 = vpop.permute.xlu1 %7857 }
0x1823   :  { %v7882_v17 = vsel %vm1610_vm6, %v17080_v30, %v7858_v46 }
0x1824   :  { %11545 = vmatmul.mubr.msk.f32.gmra.mrb[240].mxu1 %vm264_vm1, %v6904_v31 }
0x1825   :  { %11547 = vmatprep.mubr.msk.f32.mxu1 %vm264_vm1, %v7881_v61 }
0x1826   :  { %v7862_v34 = vpop.permute.xlu1 %7861  ;;  %v7864_v37 = vpop.permute.xlu0 %7863 }
0x1827   :  { %v7884_v3 = vsel %vm1610_vm6, %v17084_v11, %v7862_v34  ;;  %v7885_v21 = vsel %vm1610_vm6, %v17086_v32, %v7864_v37  ;;  %v9906_v32 = vld [vmem:[%s17870_s3 + $0x310] ss:$0 sm:$0xff] }
0x1828   :  { %11548 = vmatmul.mubr.msk.f32.gmra.mrb[242].mxu1 %vm264_vm1, %v7882_v17  ;;  %v18072_v17 = vld [vmem:[#allocation23_spill] sm:$0xff] }
0x1829   :  { %11550 = vmatprep.mubr.msk.f32.mxu1 %vm264_vm1, %v7883_v54 }
0x182a   :  { %v7866_v38 = vpop.permute.xlu1 %7865 }
0x182b   :  { %v7886_v30 = vsel %vm1610_vm6, %v17088_v41, %v7866_v38 }
0x182c   :  { %11551 = vmatmul.mubr.msk.f32.gmra.mrb[244].mxu1 %vm264_vm1, %v7884_v3 }
0x182d   :  { %11553 = vmatprep.mubr.msk.f32.mxu1 %vm264_vm1, %v7885_v21 }
0x182e   :  { %v7868_v55 = vpop.permute.xlu0 %7867 }
0x182f   :  { %v7887_v26 = vsel %vm1610_vm6, %v17090_v40, %v7868_v55 }
0x1830   :  { %11554 = vmatmul.mubr.msk.f32.gmra.mrb[246].mxu1 %vm264_vm1, %v7886_v30 }
0x1831   :  { %11556 = vmatprep.mubr.msk.f32.mxu1 %vm264_vm1, %v7887_v26 }
0x1846   :  { %v7870_v25 = vpop.permute.xlu1 %7869 }
0x1847   :  { %v7888_v15 = vsel %vm1610_vm6, %v17092_v6, %v7870_v25 }
0x1848   :  { %11557 = vmatmul.mubr.msk.f32.gmra.mrb[248].mxu1 %vm264_vm1, %v7888_v15 }
0x18e7   :  { %v11534_v11 = vpop.f32.mrb[232].mxu1 }
0x18e8   :  { %v8018_v10 = vpop.f32.mrb[233].mxu1 }
0x18eb   :  { %v11537_v36 = vpop.f32.mrb[234].mxu1 }
0x18ec   :  { %v8032_v41 = vadd.f32 %v11537_v36, %v9906_v32  ;;  %v8026_v28 = vpop.f32.mrb[235].mxu1 }
0x18ed   :  { %v8027_v40 = vadd.f32 %v9906_v32, %v8026_v28 }
0x18ee   :  { %8123 = vrot.lane.b32.xlu1 %v8032_v41, %s13058_s11 }
0x18ef   :  { %v11540_v45 = vpop.f32.mrb[236].mxu1  ;;  %8121 = vrot.lane.b32.xlu0 %v8027_v40, %s13058_s11  ;;  %v18073_v40 = vld [vmem:[#allocation12_spill] sm:$0xff] }
0x18f0   :  { %v8042_v33 = vadd.f32 %v11540_v45, %v9906_v32  ;;  %v8036_v47 = vpop.f32.mrb[237].mxu1 }
0x18f1   :  { %v8037_v6 = vadd.f32 %v9906_v32, %v8036_v47  ;;  %v18074_v47 = vld [vmem:[#allocation15_spill] sm:$0xff] }
0x18f2   :  { %8127 = vrot.lane.b32.xlu1 %v8042_v33, %s13058_s11 }
0x18f3   :  { %v11543_v4 = vpop.f32.mrb[238].mxu1  ;;  %8125 = vrot.lane.b32.xlu0 %v8037_v6, %s13058_s11 }
0x18f4   :  { %v8052_v27 = vadd.f32 %v11543_v4, %v9906_v32  ;;  %v8046_v49 = vpop.f32.mrb[239].mxu1 }
0x18f5   :  { %v8047_v53 = vadd.f32 %v9906_v32, %v8046_v49 }
0x18f6   :  { %8131 = vrot.lane.b32.xlu1 %v8052_v27, %s13058_s11 }
0x18f7   :  { %v11546_v2 = vpop.f32.mrb[240].mxu1  ;;  %8129 = vrot.lane.b32.xlu0 %v8047_v53, %s13058_s11 }
0x18f8   :  { %v8062_v58 = vadd.f32 %v11546_v2, %v9906_v32  ;;  %v8056_v62 = vpop.f32.mrb[241].mxu1  ;;  %v18075_v2 = vld [vmem:[#allocation13_spill] sm:$0xff] }
0x18f9   :  { %v8057_v39 = vadd.f32 %v9906_v32, %v8056_v62 }
0x18fa   :  { %8135 = vrot.lane.b32.xlu1 %v8062_v58, %s13058_s11 }
0x18fb   :  { %v11549_v59 = vpop.f32.mrb[242].mxu1  ;;  %8133 = vrot.lane.b32.xlu0 %v8057_v39, %s13058_s11 }
0x18fc   :  { %v8072_v22 = vadd.f32 %v11549_v59, %v9906_v32  ;;  %v8066_v16 = vpop.f32.mrb[243].mxu1 }
0x18fd   :  { %v8067_v8 = vadd.f32 %v9906_v32, %v8066_v16 }
0x18fe   :  { %8139 = vrot.lane.b32.xlu1 %v8072_v22, %s13058_s11 }
0x18ff   :  { %v11552_v60 = vpop.f32.mrb[244].mxu1  ;;  %8137 = vrot.lane.b32.xlu0 %v8067_v8, %s13058_s11 }
0x1900   :  { %v8082_v51 = vadd.f32 %v11552_v60, %v9906_v32  ;;  %v8076_v23 = vpop.f32.mrb[245].mxu1  ;;  %v18076_v60 = vld [vmem:[#allocation11_spill] sm:$0xff] }
0x1901   :  { %v8077_v24 = vadd.f32 %v9906_v32, %v8076_v23 }
0x1902   :  { %8143 = vrot.lane.b32.xlu1 %v8082_v51, %s13058_s11 }
0x1903   :  { %v11555_v56 = vpop.f32.mrb[246].mxu1  ;;  %8141 = vrot.lane.b32.xlu0 %v8077_v24, %s13058_s11  ;;  %v18077_v24 = vld [vmem:[#allocation14_spill] sm:$0xff] }
0x1904   :  { %v8092_v35 = vadd.f32 %v11555_v56, %v9906_v32  ;;  %v8086_v18 = vpop.f32.mrb[247].mxu1 }
0x1905   :  { %v8087_v12 = vadd.f32 %v9906_v32, %v8086_v18 }
0x1906   :  { %8147 = vrot.lane.b32.xlu1 %v8092_v35, %s13058_s11 }
0x1907   :  { %8145 = vrot.lane.b32.xlu0 %v8087_v12, %s13058_s11 }
0x191b   :  { %v11558_v9 = vpop.f32.mrb[248].mxu1 }
0x191c   :  { %v8102_v14 = vadd.f32 %v11558_v9, %v9906_v32  ;;  %v8096_v50 = vpop.f32.mrb[249].mxu1 }
0x191d   :  { %v8097_v5 = vadd.f32 %v9906_v32, %v8096_v50 }
0x191e   :  { %8151 = vrot.lane.b32.xlu1 %v8102_v14, %s13058_s11 }
0x191f   :  { %8149 = vrot.lane.b32.xlu0 %v8097_v5, %s13058_s11 }
0x1960   :  { %v8124_v63 = vpop.permute.xlu1 %8123 }
0x1961   :  { %v8170_v20 = vmul.f32 %v8124_v63, %v18071_v1  ;;  %v8122_v42 = vpop.permute.xlu0 %8121  ;;  %v18078_v63 = vld [vmem:[#allocation2_spill] sm:$0xff] }
0x1962   :  { %v8169_v0 = vmul.f32 %v8122_v42, %v18071_v1 }
0x1963   :  { %8203 = vrot.lane.b32.xlu1 %v8170_v20, %s13057_s10 }
0x1964   :  { %8201 = vrot.lane.b32.xlu0 %v8169_v0, %s13057_s10  ;;  %v8128_v19 = vpop.permute.xlu1 %8127  ;;  %v18079_v0 = vld [vmem:[#allocation10_spill] sm:$0xff] }
0x1965   :  { %v8172_v44 = vmul.f32 %v8128_v19, %v18071_v1  ;;  %v8126_v52 = vpop.permute.xlu0 %8125 }
0x1966   :  { %v8171_v57 = vmul.f32 %v8126_v52, %v18071_v1 }
0x1967   :  { %8207 = vrot.lane.b32.xlu1 %v8172_v44, %s13057_s10 }
0x1968   :  { %8205 = vrot.lane.b32.xlu0 %v8171_v57, %s13057_s10  ;;  %v8132_v48 = vpop.permute.xlu1 %8131 }
0x1969   :  { %v8174_v7 = vmul.f32 %v8132_v48, %v18071_v1  ;;  %v8130_v43 = vpop.permute.xlu0 %8129 }
0x196a   :  { %v8173_v13 = vmul.f32 %v8130_v43, %v18071_v1 }
0x196b   :  { %8211 = vrot.lane.b32.xlu1 %v8174_v7, %s13057_s10 }
0x196c   :  { %8209 = vrot.lane.b32.xlu0 %v8173_v13, %s13057_s10  ;;  %v8136_v46 = vpop.permute.xlu1 %8135 }
0x196d   :  { %v8176_v31 = vmul.f32 %v8136_v46, %v18071_v1  ;;  %v8134_v61 = vpop.permute.xlu0 %8133  ;;  %v18080_v46 = vld [vmem:[#allocation4_spill] sm:$0xff] }
0x196e   :  { %v8175_v29 = vmul.f32 %v8134_v61, %v18071_v1 }
0x196f   :  { %8215 = vrot.lane.b32.xlu1 %v8176_v31, %s13057_s10 }
0x1970   :  { %8213 = vrot.lane.b32.xlu0 %v8175_v29, %s13057_s10  ;;  %v8140_v34 = vpop.permute.xlu1 %8139  ;;  %v18081_v29 = vld [vmem:[#allocation31_spill] sm:$0xff] }
0x1971   :  { %v8178_v54 = vmul.f32 %v8140_v34, %v18072_v17  ;;  %v8138_v37 = vpop.permute.xlu0 %8137 }
0x1972   :  { %v8177_v3 = vmul.f32 %v8138_v37, %v18072_v17 }
0x1973   :  { %8219 = vrot.lane.b32.xlu1 %v8178_v54, %s13057_s10 }
0x1974   :  { %8217 = vrot.lane.b32.xlu0 %v8177_v3, %s13057_s10  ;;  %v8144_v21 = vpop.permute.xlu1 %8143 }
0x1975   :  { %v8180_v38 = vmul.f32 %v8144_v21, %v18072_v17  ;;  %v8142_v55 = vpop.permute.xlu0 %8141 }
0x1976   :  { %v8179_v30 = vmul.f32 %v8142_v55, %v18072_v17 }
0x1977   :  { %8223 = vrot.lane.b32.xlu1 %v8180_v38, %s13057_s10 }
0x1978   :  { %8221 = vrot.lane.b32.xlu0 %v8179_v30, %s13057_s10  ;;  %v8148_v26 = vpop.permute.xlu1 %8147 }
0x1979   :  { %v8182_v25 = vmul.f32 %v8148_v26, %v18072_v17  ;;  %v8146_v15 = vpop.permute.xlu0 %8145  ;;  %v18082_v26 = vld [vmem:[#allocation5_spill] sm:$0xff] }
0x197a   :  { %v8181_v11 = vmul.f32 %v8146_v15, %v18072_v17 }
0x197b   :  { %8227 = vrot.lane.b32.xlu1 %v8182_v25, %s13057_s10 }
0x197c   :  { %8225 = vrot.lane.b32.xlu0 %v8181_v11, %s13057_s10  ;;  %v18083_v11 = vld [vmem:[#allocation3_spill] sm:$0xff] }
0x1990   :  { %v8152_v10 = vpop.permute.xlu1 %8151 }
0x1991   :  { %v8184_v32 = vmul.f32 %v8152_v10, %v18072_v17  ;;  %v8150_v36 = vpop.permute.xlu0 %8149 }
0x1992   :  { %v8183_v41 = vmul.f32 %v8150_v36, %v18072_v17 }
0x1993   :  { %8231 = vrot.lane.b32.xlu1 %v8184_v32, %s13057_s10 }
0x1994   :  { %8229 = vrot.lane.b32.xlu0 %v8183_v41, %s13057_s10 }
0x19d5   :  { %v8204_v28 = vpop.permute.xlu1 %8203 }
0x19d6   :  { %v17211_v45 = vadd.f32 %v8204_v28, %v18073_v40  ;;  %v8202_v33 = vpop.permute.xlu0 %8201 }
0x19d7   :  { %v17214_v6 = vadd.f32 %v8202_v33, %v18074_v47 }
0x19d8   :  { %v8268_v4 = vsel %vm264_vm1, %v17211_v45, 0.0  ;;  %v8330_v53 = vmul.f32 %v17211_v45, %v17211_v45 }
0x19d9   :  { %8269 = vadd.xlane.f32.xlu1 %v8268_v4  ;;  %v8208_v27 = vpop.permute.xlu1 %8207  ;;  %v8265_v49 = vsel %vm264_vm1, %v17214_v6, 0.0  ;;  %v8329_v16 = vmul.f32 %v17214_v6, %v17214_v6  ;;  %v18084_v4 = vld [vmem:[#allocation8_spill] sm:$0xff] }
0x19da   :  { %v17223_v58 = vadd.f32 %v8208_v27, %v18075_v2  ;;  %8266 = vadd.xlane.f32.xlu0 %v8265_v49  ;;  %v8348_v22 = vsel %vm264_vm1, %v8330_v53, 0.0  ;;  %v8206_v8 = vpop.permute.xlu0 %8205  ;;  %v18085_v53 = vld [vmem:[#allocation6_spill] sm:$0xff] }
0x19db   :  { %v17237_v56 = vadd.f32 %v8206_v8, %v18077_v24  ;;  %v8345_v35 = vsel %vm264_vm1, %v8329_v16, 0.0 }
0x19dc   :  { %v8274_v62 = vsel %vm264_vm1, %v17223_v58, 0.0  ;;  %v8332_v39 = vmul.f32 %v17223_v58, %v17223_v58 }
0x19dd   :  { %8275 = vadd.xlane.f32.xlu1 %v8274_v62  ;;  %v8212_v59 = vpop.permute.xlu1 %8211  ;;  %v8271_v14 = vsel %vm264_vm1, %v17237_v56, 0.0  ;;  %v8331_v50 = vmul.f32 %v17237_v56, %v17237_v56 }
0x19de   :  { %8349 = vadd.xlane.f32.xlu0 %v8348_v22  ;;  %v17233_v51 = vadd.f32 %v8212_v59, %v18076_v60  ;;  %v8354_v23 = vsel %vm264_vm1, %v8332_v39, 0.0  ;;  %v8210_v5 = vpop.permute.xlu0 %8209 }
0x19df   :  { %v17253_v19 = vadd.f32 %v8210_v5, %v18079_v0  ;;  %v8351_v44 = vsel %vm264_vm1, %v8331_v50, 0.0 }
0x19e0   :  { %v8280_v18 = vsel %vm264_vm1, %v17233_v51, 0.0  ;;  %v8334_v12 = vmul.f32 %v17233_v51, %v17233_v51 }
0x19e1   :  { %8355 = vadd.xlane.f32.xlu1 %v8354_v23  ;;  %v8216_v9 = vpop.permute.xlu1 %8215  ;;  %v8277_v7 = vsel %vm264_vm1, %v17253_v19, 0.0  ;;  %v8333_v43 = vmul.f32 %v17253_v19, %v17253_v19  ;;  %v18086_v23 = vld [vmem:[#allocation21_spill] sm:$0xff] }
0x19e2   :  { %8346 = vadd.xlane.f32.xlu0 %v8345_v35  ;;  %v17249_v20 = vadd.f32 %v8216_v9, %v18078_v63  ;;  %v8360_v42 = vsel %vm264_vm1, %v8334_v12, 0.0  ;;  %v8214_v13 = vpop.permute.xlu0 %8213 }
0x19e3   :  { %v17269_v34 = vadd.f32 %v8214_v13, %v18081_v29  ;;  %v8357_v54 = vsel %vm264_vm1, %v8333_v43, 0.0  ;;  %v8543_v43 = vld [vmem:[%s17870_s3 + $0x318] sm:$0xff]  ;;  %v8544_v13 = vld [vmem:[%s17870_s3 + $0x320] sm:$0xff]  ;;  %v8545_v29 = vld [vmem:[%s17870_s3 + $0x328] sm:$0xff] }
0x19e4   :  { %v8286_v52 = vsel %vm264_vm1, %v17249_v20, 0.0  ;;  %v8336_v57 = vmul.f32 %v17249_v20, %v17249_v20 }
0x19e5   :  { %8281 = vadd.xlane.f32.xlu1 %v8280_v18  ;;  %v8220_v48 = vpop.permute.xlu1 %8219  ;;  %v8283_v38 = vsel %vm264_vm1, %v17269_v34, 0.0  ;;  %v8335_v55 = vmul.f32 %v17269_v34, %v17269_v34  ;;  %v18087_v18 = vld [vmem:[#allocation7_spill] sm:$0xff] }
0x19e6   :  { %8272 = vadd.xlane.f32.xlu0 %v8271_v14  ;;  %v17265_v31 = vadd.f32 %v8220_v48, %v18080_v46  ;;  %v8366_v61 = vsel %vm264_vm1, %v8336_v57, 0.0  ;;  %v8218_v30 = vpop.permute.xlu0 %8217  ;;  %v12092_v46 = vpack.c.bf16 %v8544_v13, %v8543_v43 }
0x19e7   :  { %v17285_v10 = vadd.f32 %v8218_v30, %v18083_v11  ;;  %v8363_v32 = vsel %vm264_vm1, %v8335_v55, 0.0 }
0x19e8   :  { %v8292_v37 = vsel %vm264_vm1, %v17265_v31, 0.0  ;;  %v8338_v3 = vmul.f32 %v17265_v31, %v17265_v31  ;;  %12093 = vmatprep.subr.bf16.mxu0 %v12092_v46 }
0x19e9   :  { %8361 = vadd.xlane.f32.xlu1 %v8360_v42  ;;  %v8224_v21 = vpop.permute.xlu1 %8223  ;;  %v8289_v40 = vsel %vm264_vm1, %v17285_v10, 0.0  ;;  %v8337_v33 = vmul.f32 %v17285_v10, %v17285_v10  ;;  %12095 = vmatpush3.bf16.msra.mxu0 %v12092_v46 }
0x19ea   :  { %8352 = vadd.xlane.f32.xlu0 %v8351_v44  ;;  %v17281_v25 = vadd.f32 %v8224_v21, %v18082_v26  ;;  %v8372_v15 = vsel %vm264_vm1, %v8338_v3, 0.0  ;;  %v8222_v47 = vpop.permute.xlu0 %8221  ;;  %v18088_v44 = vld [vmem:[#allocation24_spill] sm:$0xff] }
0x19eb   :  { %v17301_v2 = vadd.f32 %v8222_v47, %v18085_v53  ;;  %v8369_v62 = vsel %vm264_vm1, %v8337_v33, 0.0 }
0x19ec   :  { %v8298_v36 = vsel %vm264_vm1, %v17281_v25, 0.0  ;;  %v8340_v41 = vmul.f32 %v17281_v25, %v17281_v25 }
0x19ed   :  { %8287 = vadd.xlane.f32.xlu1 %v8286_v52  ;;  %v8228_v28 = vpop.permute.xlu1 %8227  ;;  %v8295_v22 = vsel %vm264_vm1, %v17301_v2, 0.0  ;;  %v8339_v8 = vmul.f32 %v17301_v2, %v17301_v2 }
0x19ee   :  { %8278 = vadd.xlane.f32.xlu0 %v8277_v7  ;;  %v17297_v27 = vadd.f32 %v8228_v28, %v18084_v4  ;;  %v8378_v49 = vsel %vm264_vm1, %v8340_v41, 0.0  ;;  %v8226_v60 = vpop.permute.xlu0 %8225 }
0x19ef   :  { %v17317_v12 = vadd.f32 %v8226_v60, %v18087_v18  ;;  %v8375_v9 = vsel %vm264_vm1, %v8339_v8, 0.0 }
0x19f0   :  { %v8304_v39 = vsel %vm264_vm1, %v17297_v27, 0.0  ;;  %v8342_v59 = vmul.f32 %v17297_v27, %v17297_v27 }
0x19f1   :  { %8367 = vadd.xlane.f32.xlu1 %v8366_v61  ;;  %v8301_v5 = vsel %vm264_vm1, %v17317_v12, 0.0  ;;  %v8341_v63 = vmul.f32 %v17317_v12, %v17317_v12 }
0x19f2   :  { %8358 = vadd.xlane.f32.xlu0 %v8357_v54  ;;  %v8384_v35 = vsel %vm264_vm1, %v8342_v59, 0.0  ;;  %v8546_v54 = vld [vmem:[%s17870_s3 + $0x330] sm:$0xff] }
0x19f3   :  { %v8381_v57 = vsel %vm264_vm1, %v8341_v63, 0.0 }
0x19f5   :  { %8293 = vadd.xlane.f32.xlu1 %v8292_v37  ;;  %v12096_v37 = vpack.c.bf16 %v8546_v54, %v8545_v29 }
0x19f6   :  { %8284 = vadd.xlane.f32.xlu0 %v8283_v38 }
0x19f7   :  { %12097 = vmatprep.subr.bf16.mxu0 %v12096_v37 }
0x19f8   :  { %12099 = vmatpush3.bf16.msra.mxu0 %v12096_v37 }
0x19f9   :  { %8373 = vadd.xlane.f32.xlu1 %v8372_v15 }
0x19fa   :  { %8364 = vadd.xlane.f32.xlu0 %v8363_v32 }
0x19fd   :  { %8299 = vadd.xlane.f32.xlu1 %v8298_v36 }
0x19fe   :  { %8290 = vadd.xlane.f32.xlu0 %v8289_v40 }
0x1a01   :  { %8379 = vadd.xlane.f32.xlu1 %v8378_v49 }
0x1a02   :  { %8370 = vadd.xlane.f32.xlu0 %v8369_v62 }
0x1a05   :  { %8305 = vadd.xlane.f32.xlu1 %v8304_v39  ;;  %v8232_v16 = vpop.permute.xlu1 %8231 }
0x1a06   :  { %8296 = vadd.xlane.f32.xlu0 %v8295_v22  ;;  %v17313_v24 = vadd.f32 %v8232_v16, %v18086_v23  ;;  %v8230_v42 = vpop.permute.xlu0 %8229 }
0x1a07   :  { %v17330_v52 = vadd.f32 %v8230_v42, %v18088_v44 }
0x1a08   :  { %v8310_v14 = vsel %vm264_vm1, %v17313_v24, 0.0  ;;  %v8344_v50 = vmul.f32 %v17313_v24, %v17313_v24 }
0x1a09   :  { %8385 = vadd.xlane.f32.xlu1 %v8384_v35  ;;  %v8307_v48 = vsel %vm264_vm1, %v17330_v52, 0.0  ;;  %v8343_v7 = vmul.f32 %v17330_v52, %v17330_v52 }
0x1a0a   :  { %8376 = vadd.xlane.f32.xlu0 %v8375_v9  ;;  %v8390_v0 = vsel %vm264_vm1, %v8344_v50, 0.0 }
0x1a0b   :  { %v8387_v61 = vsel %vm264_vm1, %v8343_v7, 0.0 }
0x1a0d   :  { %8311 = vadd.xlane.f32.xlu1 %v8310_v14 }
0x1a0e   :  { %8302 = vadd.xlane.f32.xlu0 %v8301_v5 }
0x1a11   :  { %8391 = vadd.xlane.f32.xlu1 %v8390_v0 }
0x1a12   :  { %8382 = vadd.xlane.f32.xlu0 %v8381_v57 }
0x1a16   :  { %8308 = vadd.xlane.f32.xlu0 %v8307_v48 }
0x1a1a   :  { %8388 = vadd.xlane.f32.xlu0 %v8387_v61 }
0x1a22   :  { %8523 = vrot.lane.b32.xlu1 %v18072_v17, %s13058_s11 }
0x1a30   :  { %8521 = vrot.lane.b32.xlu0 %v18071_v1, %s13058_s11 }
0x1a66   :  { %v8270_v3 = vpop.xlane.xlu1 %8269 }
0x1a67   :  { %v8267_v21 = vpop.xlane.xlu0 %8266  ;;  %v17354_v53 = vmul.f32 0.03125, %v8270_v3 }
0x1a68   :  { %v17356_v1 = vmul.f32 0.03125, %v8267_v21 }
0x1a69   :  { %v8410_v8 = vmul.f32 %v17354_v53, %v17354_v53 }
0x1a6a   :  { %v8276_v38 = vpop.xlane.xlu1 %8275  ;;  %v8409_v60 = vmul.f32 %v17356_v1, %v17356_v1 }
0x1a6b   :  { %v8350_v55 = vpop.xlane.xlu0 %8349  ;;  %v17364_v18 = vmul.f32 0.03125, %v8276_v38 }
0x1a6c   :  { %v8394_v39 = vmul.f32 0.03125, %v8350_v55 }
0x1a6d   :  { %v8412_v57 = vmul.f32 %v17364_v18, %v17364_v18 }
0x1a6e   :  { %v8356_v30 = vpop.xlane.xlu1 %8355  ;;  %v8426_v9 = vsub.f32 %v8394_v39, %v8410_v8 }
0x1a6f   :  { %v8347_v17 = vpop.xlane.xlu0 %8346  ;;  %v8396_v42 = vmul.f32 0.03125, %v8356_v30 }
0x1a70   :  { %v8393_v22 = vmul.f32 0.03125, %v8347_v17  ;;  %v8458_v48 = vadd.f32 1e-06, %v8426_v9 }
0x1a71   :  { %v8428_v29 = vsub.f32 %v8396_v42, %v8412_v57 }
0x1a72   :  { %v8282_v26 = vpop.xlane.xlu1 %8281  ;;  %v8425_v50 = vsub.f32 %v8393_v22, %v8409_v60  ;;  %12988 = vrsqrt.f32 %v8458_v48 }
0x1a73   :  { %v8273_v15 = vpop.xlane.xlu0 %8272  ;;  %v17372_v46 = vmul.f32 0.03125, %v8282_v26 }
0x1a74   :  { %v17358_v16 = vmul.f32 0.03125, %v8273_v15  ;;  %v8457_v13 = vadd.f32 1e-06, %v8425_v50  ;;  %v8460_v15 = vadd.f32 1e-06, %v8428_v29 }
0x1a75   :  { %v8414_v17 = vmul.f32 %v17372_v46, %v17372_v46 }
0x1a76   :  { %v8362_v11 = vpop.xlane.xlu1 %8361  ;;  %v8411_v5 = vmul.f32 %v17358_v16, %v17358_v16  ;;  %12990 = vrsqrt.f32 %v8457_v13 }
0x1a77   :  { %v8353_v32 = vpop.xlane.xlu0 %8352  ;;  %v8398_v37 = vmul.f32 0.03125, %v8362_v11 }
0x1a78   :  { %v8395_v23 = vmul.f32 0.03125, %v8353_v32 }
0x1a79   :  { %v8430_v11 = vsub.f32 %v8398_v37, %v8414_v17 }
0x1a7a   :  { %v8288_v36 = vpop.xlane.xlu1 %8287  ;;  %v8427_v0 = vsub.f32 %v8395_v23, %v8411_v5 }
0x1a7b   :  { %v8279_v41 = vpop.xlane.xlu0 %8278  ;;  %v17382_v26 = vmul.f32 0.03125, %v8288_v36  ;;  %v8462_v50 = vadd.f32 1e-06, %v8430_v11  ;;  %v8443_v11 = vsub.f32 %v17237_v56, %v17358_v16 }
0x1a7c   :  { %v17368_v63 = vmul.f32 0.03125, %v8279_v41  ;;  %v8459_v3 = vadd.f32 1e-06, %v8427_v0  ;;  %v12989_v13 = vpop.eup %12988 }
0x1a7d   :  { %v8416_v36 = vmul.f32 %v17382_v26, %v17382_v26 }
0x1a7e   :  { %v8368_v28 = vpop.xlane.xlu1 %8367  ;;  %v8413_v61 = vmul.f32 %v17368_v63, %v17368_v63  ;;  %12992 = vrsqrt.f32 %v8459_v3 }
0x1a7f   :  { %v8359_v40 = vpop.xlane.xlu0 %8358  ;;  %12994 = vrsqrt.f32 %v8460_v15 }
0x1a80   :  { %v8397_v44 = vmul.f32 0.03125, %v8359_v40  ;;  %v12991_v37 = vpop.eup %12990 }
0x1a82   :  { %v8294_v33 = vpop.xlane.xlu1 %8293  ;;  %v8429_v21 = vsub.f32 %v8397_v44, %v8413_v61 }
0x1a83   :  { %v8285_v47 = vpop.xlane.xlu0 %8284  ;;  %v17392_v60 = vmul.f32 0.03125, %v8294_v33  ;;  %v8442_v33 = vsub.f32 %v17211_v45, %v17354_v53 }
0x1a84   :  { %v17376_v54 = vmul.f32 0.03125, %v8285_v47  ;;  %v8400_v47 = vmul.f32 0.03125, %v8368_v28  ;;  %v8461_v39 = vadd.f32 1e-06, %v8429_v21 }
0x1a86   :  { %v8374_v4 = vpop.xlane.xlu1 %8373  ;;  %v8415_v32 = vmul.f32 %v17376_v54, %v17376_v54  ;;  %v8432_v28 = vsub.f32 %v8400_v47, %v8416_v36  ;;  %12996 = vrsqrt.f32 %v8461_v39 }
0x1a87   :  { %v8365_v49 = vpop.xlane.xlu0 %8364  ;;  %v8402_v5 = vmul.f32 0.03125, %v8374_v4  ;;  %12998 = vrsqrt.f32 %v8462_v50  ;;  %v8444_v50 = vsub.f32 %v17223_v58, %v17364_v18 }
0x1a88   :  { %v8399_v38 = vmul.f32 0.03125, %v8365_v49  ;;  %v8464_v3 = vadd.f32 1e-06, %v8432_v28 }
0x1a8a   :  { %v8300_v62 = vpop.xlane.xlu1 %8299  ;;  %v8431_v49 = vsub.f32 %v8399_v38, %v8415_v32  ;;  %v12993_v32 = vpop.eup %12992 }
0x1a8b   :  { %v8291_v59 = vpop.xlane.xlu0 %8290  ;;  %v17394_v23 = vmul.f32 0.03125, %v8300_v62  ;;  %v8418_v62 = vmul.f32 %v17392_v60, %v17392_v60  ;;  %v8491_v28 = vmul.f32 %v12993_v32, %v8443_v11  ;;  %v8446_v32 = vsub.f32 %v17233_v51, %v17372_v46 }
0x1a8c   :  { %v17378_v55 = vmul.f32 0.03125, %v8291_v59  ;;  %v8463_v42 = vadd.f32 1e-06, %v8431_v49  ;;  %v8447_v11 = vsub.f32 %v17269_v34, %v17376_v54 }
0x1a8d   :  { %v8420_v61 = vmul.f32 %v17394_v23, %v17394_v23  ;;  %v8434_v21 = vsub.f32 %v8402_v5, %v8418_v62 }
0x1a8e   :  { %v8380_v35 = vpop.xlane.xlu1 %8379  ;;  %v8417_v59 = vmul.f32 %v17378_v55, %v17378_v55  ;;  %13000 = vrsqrt.f32 %v8463_v42 }
0x1a8f   :  { %v8371_v14 = vpop.xlane.xlu0 %8370  ;;  %v8404_v0 = vmul.f32 0.03125, %v8380_v35 }
0x1a90   :  { %v8401_v41 = vmul.f32 0.03125, %v8371_v14 }
0x1a91   :  { %v8436_v53 = vsub.f32 %v8404_v0, %v8420_v61 }
0x1a92   :  { %v8306_v7 = vpop.xlane.xlu1 %8305  ;;  %v8433_v9 = vsub.f32 %v8401_v41, %v8417_v59  ;;  %v8490_v41 = vmul.f32 %v12989_v13, %v8442_v33  ;;  %v18089_v33 = vld [vmem:[#allocation33_spill] sm:$0xff] }
0x1a93   :  { %v8297_v43 = vpop.xlane.xlu0 %8296  ;;  %v17406_v38 = vmul.f32 0.03125, %v8306_v7  ;;  %v8468_v16 = vadd.f32 1e-06, %v8436_v53 }
0x1a94   :  { %v17388_v22 = vmul.f32 0.03125, %v8297_v43  ;;  %v8465_v4 = vadd.f32 1e-06, %v8433_v9  ;;  %v8506_v62 = vmul.f32 %v8490_v41, %v18089_v33 }
0x1a95   :  { %v8422_v36 = vmul.f32 %v17406_v38, %v17406_v38 }
0x1a96   :  { %v8386_v40 = vpop.xlane.xlu1 %8385  ;;  %v8419_v44 = vmul.f32 %v17388_v22, %v17388_v22  ;;  %13002 = vrsqrt.f32 %v8465_v4 }
0x1a97   :  { %v8377_v30 = vpop.xlane.xlu0 %8376  ;;  %v8406_v47 = vmul.f32 0.03125, %v8386_v40  ;;  %13004 = vrsqrt.f32 %v8464_v3 }
0x1a98   :  { %v8403_v14 = vmul.f32 0.03125, %v8377_v30  ;;  %v8441_v30 = vsub.f32 %v17214_v6, %v17356_v1  ;;  %v8466_v1 = vadd.f32 1e-06, %v8434_v21 }
0x1a99   :  { %v8438_v42 = vsub.f32 %v8406_v47, %v8422_v36 }
0x1a9a   :  { %v8312_v57 = vpop.xlane.xlu1 %8311  ;;  %v8435_v29 = vsub.f32 %v8403_v14, %v8419_v44  ;;  %v12995_v14 = vpop.eup %12994 }
0x1a9b   :  { %v8303_v8 = vpop.xlane.xlu0 %8302  ;;  %v17418_v9 = vmul.f32 0.03125, %v8312_v57  ;;  %v12997_v5 = vpop.eup %12996  ;;  %v8445_v57 = vsub.f32 %v17253_v19, %v17368_v63 }
0x1a9c   :  { %v17398_v48 = vmul.f32 0.03125, %v8303_v8  ;;  %v8467_v7 = vadd.f32 1e-06, %v8435_v29  ;;  %v8489_v8 = vmul.f32 %v12991_v37, %v8441_v30  ;;  %v8492_v37 = vmul.f32 %v12995_v14, %v8444_v50  ;;  %v12999_v21 = vpop.eup %12998 }
0x1a9d   :  { %v8424_v18 = vmul.f32 %v17418_v9, %v17418_v9  ;;  %v8493_v3 = vmul.f32 %v12997_v5, %v8445_v57  ;;  %v8470_v30 = vadd.f32 1e-06, %v8438_v42  ;;  %v8448_v14 = vsub.f32 %v17249_v20, %v17382_v26 }
0x1a9e   :  { %v8421_v17 = vmul.f32 %v17398_v48, %v17398_v48  ;;  %v8392_v49 = vpop.xlane.xlu1 %8391  ;;  %13006 = vrsqrt.f32 %v8467_v7  ;;  %v8505_v4 = vmul.f32 %v8489_v8, %v18089_v33  ;;  %v8494_v8 = vmul.f32 %v12999_v21, %v8446_v32 }
0x1a9f   :  { %v8383_v43 = vpop.xlane.xlu0 %8382  ;;  %v8408_v0 = vmul.f32 0.03125, %v8392_v49  ;;  %13008 = vrsqrt.f32 %v8466_v1  ;;  %v8449_v49 = vsub.f32 %v17285_v10, %v17378_v55  ;;  %v8509_v36 = vmul.f32 %v8493_v3, %v18089_v33 }
0x1aa0   :  { %v8405_v35 = vmul.f32 0.03125, %v8383_v43  ;;  %13010 = vrsqrt.f32 %v8468_v16  ;;  %v8453_v3 = vsub.f32 %v17317_v12, %v17398_v48 }
0x1aa1   :  { %v8440_v53 = vsub.f32 %v8408_v0, %v8424_v18  ;;  %v8451_v0 = vsub.f32 %v17301_v2, %v17388_v22 }
0x1aa2   :  { %v8437_v59 = vsub.f32 %v8405_v35, %v8421_v17  ;;  %v8507_v35 = vmul.f32 %v8491_v28, %v18089_v33  ;;  %v8510_v28 = vmul.f32 %v8494_v8, %v18089_v33 }
0x1aa3   :  { %v8309_v15 = vpop.xlane.xlu0 %8308  ;;  %v8472_v46 = vadd.f32 1e-06, %v8440_v53 }
0x1aa4   :  { %v17414_v39 = vmul.f32 0.03125, %v8309_v15  ;;  %v8469_v13 = vadd.f32 1e-06, %v8437_v59  ;;  %v13001_v15 = vpop.eup %13000  ;;  %v8508_v59 = vmul.f32 %v8492_v37, %v18089_v33 }
0x1aa5   :  { %v13003_v7 = vpop.eup %13002  ;;  %v8495_v54 = vmul.f32 %v13001_v15, %v8447_v11 }
0x1aa6   :  { %v8423_v44 = vmul.f32 %v17414_v39, %v17414_v39  ;;  %13012 = vrsqrt.f32 %v8469_v13  ;;  %v13005_v1 = vpop.eup %13004  ;;  %v8497_v55 = vmul.f32 %v13003_v7, %v8449_v49  ;;  %v18090_v13 = vld [vmem:[#allocation19_spill] sm:$0xff]  ;;  %v8455_v48 = vsub.f32 %v17330_v52, %v17414_v39 }
0x1aa7   :  { %v8389_v40 = vpop.xlane.xlu0 %8388  ;;  %13014 = vrsqrt.f32 %v8470_v30  ;;  %v8496_v5 = vmul.f32 %v13005_v1, %v8448_v14 }
0x1aa8   :  { %v8407_v43 = vmul.f32 0.03125, %v8389_v40  ;;  %v13007_v40 = vpop.eup %13006  ;;  %v8513_v18 = vmul.f32 %v8497_v55, %v18090_v13  ;;  %v8549_v55 = vld [vmem:[%s17870_s3 + $0x348] sm:$0xff] }
0x1aa9   :  { %v13009_v42 = vpop.eup %13008  ;;  %v8512_v22 = vmul.f32 %v8496_v5, %v18089_v33  ;;  %v8551_v5 = vld [vmem:[%s17870_s3 + $0x358] sm:$0xff] }
0x1aaa   :  { %v8439_v61 = vsub.f32 %v8407_v43, %v8423_v44  ;;  %v8511_v44 = vmul.f32 %v8495_v54, %v18089_v33  ;;  %v13011_v26 = vpop.eup %13010  ;;  %v8450_v43 = vsub.f32 %v17265_v31, %v17392_v60  ;;  %v8524_v60 = vpop.permute.xlu1 %8523 }
0x1aab   :  { %v8522_v29 = vpop.permute.xlu0 %8521 }
0x1aac   :  { %v8527_v17 = vadd.f32 %v8522_v29, %v8505_v4  ;;  %v8528_v63 = vadd.f32 %v8522_v29, %v8506_v62  ;;  %v8471_v41 = vadd.f32 1e-06, %v8439_v61  ;;  %v8529_v47 = vadd.f32 %v8522_v29, %v8507_v35 }
0x1aad   :  { %v8530_v50 = vadd.f32 %v8522_v29, %v8508_v59  ;;  %v8531_v16 = vadd.f32 %v8522_v29, %v8509_v36  ;;  %v8532_v62 = vadd.f32 %v8522_v29, %v8510_v28  ;;  %v8533_v57 = vadd.f32 %v8522_v29, %v8511_v44  ;;  %v8550_v28 = vld [vmem:[%s17870_s3 + $0x350] sm:$0xff]  ;;  %v8553_v44 = vld [vmem:[%s17870_s3 + $0x368] sm:$0xff] }
0x1aae   :  { %11567 = vmatprep.mubr.msk.f32.mxu0 %vm264_vm1, %v8527_v17  ;;  %13016 = vrsqrt.f32 %v8471_v41  ;;  %v8499_v61 = vmul.f32 %v13007_v40, %v8451_v0  ;;  %v8452_v35 = vsub.f32 %v17281_v25, %v17394_v23  ;;  %v8498_v37 = vmul.f32 %v13009_v42, %v8450_v43  ;;  %v8552_v0 = vld [vmem:[%s17870_s3 + $0x360] sm:$0xff]  ;;  %v8554_v43 = vld [vmem:[%s17870_s3 + $0x370] sm:$0xff] }
0x1aaf   :  { %11568 = vmatmul.mubr.msk.f32.vlgmr.msra.gmra.mrb[228].mxu0 %vm264_vm1, %v8528_v63  ;;  %13018 = vrsqrt.f32 %v8472_v46  ;;  %v8534_v21 = vadd.f32 %v8522_v29, %v8512_v22  ;;  %v8535_v17 = vadd.f32 %v8524_v60, %v8513_v18  ;;  %v8454_v23 = vsub.f32 %v17297_v27, %v17406_v38  ;;  %v8557_v18 = vld [vmem:[%s17870_s3 + $0x388] sm:$0xff] }
0x1ab0   :  { %11570 = vmatprep.mubr.msk.f32.mxu0 %vm264_vm1, %v8529_v47  ;;  %v13013_v4 = vpop.eup %13012  ;;  %v8500_v30 = vmul.f32 %v13011_v26, %v8452_v35  ;;  %v8515_v63 = vmul.f32 %v8499_v61, %v18090_v13  ;;  %v8514_v33 = vmul.f32 %v8498_v37, %v18090_v13  ;;  %v8456_v38 = vsub.f32 %v17313_v24, %v17418_v9  ;;  %v8559_v35 = vld [vmem:[%s17870_s3 + $0x398] sm:$0xff]  ;;  %v8560_v37 = vld [vmem:[%s17870_s3 + $0x3a0] sm:$0xff] }
0x1ab1   :  { %v13015_v53 = vpop.eup %13014  ;;  %v8501_v15 = vmul.f32 %v13013_v4, %v8453_v3  ;;  %v12104_v42 = vpack.c.bf16 %v8551_v5, %v8550_v28  ;;  %v12108_v26 = vpack.c.bf16 %v8553_v44, %v8552_v0  ;;  %v8558_v4 = vld [vmem:[%s17870_s3 + $0x390] sm:$0xff]  ;;  %v8561_v3 = vld [vmem:[%s17870_s3 + $0x3a8] sm:$0xff] }
0x1ab2   :  { %v8536_v29 = vadd.f32 %v8524_v60, %v8514_v33  ;;  %v8516_v41 = vmul.f32 %v8500_v30, %v18090_v13  ;;  %v8502_v11 = vmul.f32 %v13015_v53, %v8454_v23  ;;  %v8537_v7 = vadd.f32 %v8524_v60, %v8515_v63  ;;  %v8563_v30 = vld [vmem:[%s17870_s3 + $0x3b8] sm:$0xff] }
0x1ab3   :  { %11571 = vmatmul.mubr.msk.f32.gmra.mrb[230].mxu0 %vm264_vm1, %v8530_v50  ;;  %v8517_v49 = vmul.f32 %v8501_v15, %v18090_v13  ;;  %v12120_v22 = vpack.c.bf16 %v8559_v35, %v8558_v4 }
0x1ab4   :  { %11573 = vmatprep.mubr.msk.f32.mxu0 %vm264_vm1, %v8531_v16  ;;  %v8538_v8 = vadd.f32 %v8524_v60, %v8516_v41  ;;  %v8518_v39 = vmul.f32 %v8502_v11, %v18090_v13  ;;  %v8548_v16 = vld [vmem:[%s17870_s3 + $0x340] sm:$0xff] }
0x1ab5   :  { %v8539_v46 = vadd.f32 %v8524_v60, %v8517_v49  ;;  %v12100_v40 = vpack.c.bf16 %v8549_v55, %v8548_v16 }
0x1ab6   :  { %v8540_v54 = vadd.f32 %v8524_v60, %v8518_v39 }
0x1ab7   :  { %11574 = vmatmul.mubr.msk.f32.gmra.mrb[232].mxu0 %vm264_vm1, %v8532_v62  ;;  %12101 = vmatprep.subr.bf16.mxu1 %v12100_v40  ;;  %v8555_v62 = vld [vmem:[%s17870_s3 + $0x378] sm:$0xff] }
0x1ab8   :  { %11576 = vmatprep.mubr.msk.f32.mxu0 %vm264_vm1, %v8533_v57  ;;  %v13017_v32 = vpop.eup %13016  ;;  %12103 = vmatpush3.bf16.msra.mxu1 %v12100_v40  ;;  %v12112_v57 = vpack.c.bf16 %v8555_v62, %v8554_v43 }
0x1ab9   :  { %v13019_v47 = vpop.eup %13018  ;;  %v8503_v59 = vmul.f32 %v13017_v32, %v8455_v48  ;;  %12105 = vmatprep.subr.bf16.mxu1 %v12104_v42 }
0x1aba   :  { %v8504_v1 = vmul.f32 %v13019_v47, %v8456_v38 }
0x1abb   :  { %11577 = vmatmul.mubr.msk.f32.gmra.mrb[234].mxu0 %vm264_vm1, %v8534_v21  ;;  %v8519_v36 = vmul.f32 %v8503_v59, %v18090_v13  ;;  %v8562_v21 = vld [vmem:[%s17870_s3 + $0x3b0] sm:$0xff] }
0x1abc   :  { %11579 = vmatprep.mubr.msk.f32.mxu0 %vm264_vm1, %v8535_v17  ;;  %v8520_v14 = vmul.f32 %v8504_v1, %v18090_v13  ;;  %12107 = vmatpush3.bf16.msra.mxu1 %v12104_v42  ;;  %v8556_v13 = vld [vmem:[%s17870_s3 + $0x380] sm:$0xff]  ;;  %v12128_v53 = vpack.c.bf16 %v8563_v30, %v8562_v21  ;;  %v17533_v17 = vld [vmem:[%s17870_s3 + $0x338] ss:$0 sm:$0xff] }
0x1abd   :  { %v8541_v50 = vadd.f32 %v8524_v60, %v8519_v36  ;;  %12109 = vmatprep.subr.bf16.mxu1 %v12108_v26  ;;  %v12116_v61 = vpack.c.bf16 %v8557_v18, %v8556_v13 }
0x1abe   :  { %v8542_v9 = vadd.f32 %v8524_v60, %v8520_v14  ;;  %v12124_v60 = vpack.c.bf16 %v8561_v3, %v8560_v37 }
0x1abf   :  { %11580 = vmatmul.mubr.msk.f32.gmra.mrb[236].mxu0 %vm264_vm1, %v8536_v29 }
0x1ac0   :  { %11582 = vmatprep.mubr.msk.f32.mxu0 %vm264_vm1, %v8537_v7  ;;  %12111 = vmatpush3.bf16.msra.mxu1 %v12108_v26 }
0x1ac1   :  { %12113 = vmatprep.subr.bf16.mxu1 %v12112_v57 }
0x1ac3   :  { %11583 = vmatmul.mubr.msk.f32.gmra.mrb[238].mxu0 %vm264_vm1, %v8538_v8 }
0x1ac4   :  { %11585 = vmatprep.mubr.msk.f32.mxu0 %vm264_vm1, %v8539_v46  ;;  %12115 = vmatpush3.bf16.msra.mxu1 %v12112_v57 }
0x1ac5   :  { %12117 = vmatprep.subr.bf16.mxu1 %v12116_v61 }
0x1ac7   :  { %11586 = vmatmul.mubr.msk.f32.gmra.mrb[240].mxu0 %vm264_vm1, %v8540_v54 }
0x1ac8   :  { %11588 = vmatprep.mubr.msk.f32.mxu0 %vm264_vm1, %v8541_v50  ;;  %12119 = vmatpush3.bf16.msra.mxu1 %v12116_v61 }
0x1ac9   :  { %12121 = vmatprep.subr.bf16.mxu1 %v12120_v22 }
0x1acb   :  { %11589 = vmatmul.mubr.msk.f32.gmra.mrb[242].mxu0 %vm264_vm1, %v8542_v9 }
0x1acc   :  { %12123 = vmatpush3.bf16.msra.mxu1 %v12120_v22 }
0x1acd   :  { %12125 = vmatprep.subr.bf16.mxu1 %v12124_v60 }
0x1ad0   :  { %12127 = vmatpush3.bf16.msra.mxu1 %v12124_v60 }
0x1ad1   :  { %12129 = vmatprep.subr.bf16.mxu1 %v12128_v53 }
0x1ad4   :  { %12131 = vmatpush3.bf16.msra.mxu1 %v12128_v53 }
0x1b82   :  { %v11569_v63 = vpop.f32.mrb[228].mxu0 }
0x1b83   :  { %v17536_v15 = vadd.f32 %v11569_v63, %v17533_v17  ;;  %v8683_v32 = vpop.f32.mrb[229].mxu0 }
0x1b84   :  { %v17539_v23 = vadd.f32 %v17533_v17, %v8683_v32 }
0x1b85   :  { %v8763_v33 = vmul.f32 %v17536_v15, %v17536_v15 }
0x1b86   :  { %v8762_v48 = vmul.f32 %v17539_v23, %v17539_v23  ;;  %v11572_v29 = vpop.f32.mrb[230].mxu0 }
0x1b87   :  { %v8779_v41 = vmul.f32 %v8763_v33, %v17536_v15  ;;  %v17547_v11 = vadd.f32 %v11572_v29, %v17533_v17  ;;  %v8693_v47 = vpop.f32.mrb[231].mxu0 }
0x1b88   :  { %v8778_v7 = vmul.f32 %v8762_v48, %v17539_v23  ;;  %v17551_v49 = vadd.f32 %v17533_v17, %v8693_v47 }
0x1b89   :  { %v8795_v59 = vmul.f32 0.044715, %v8779_v41  ;;  %v8765_v38 = vmul.f32 %v17547_v11, %v17547_v11 }
0x1b8a   :  { %v8794_v8 = vmul.f32 0.044715, %v8778_v7  ;;  %v8764_v39 = vmul.f32 %v17551_v49, %v17551_v49  ;;  %v11575_v1 = vpop.f32.mrb[232].mxu0 }
0x1b8b   :  { %v8811_v46 = vadd.f32 %v8795_v59, %v17536_v15  ;;  %v8781_v36 = vmul.f32 %v8765_v38, %v17547_v11  ;;  %v17560_v54 = vadd.f32 %v11575_v1, %v17533_v17  ;;  %v8703_v14 = vpop.f32.mrb[233].mxu0 }
0x1b8c   :  { %v8810_v50 = vadd.f32 %v8794_v8, %v17539_v23  ;;  %v8780_v9 = vmul.f32 %v8764_v39, %v17551_v49  ;;  %v17565_v16 = vadd.f32 %v17533_v17, %v8703_v14 }
0x1b8d   :  { %v8827_v55 = vmul.f32 0.7978846, %v8811_v46  ;;  %v8797_v40 = vmul.f32 0.044715, %v8781_v36  ;;  %v8767_v28 = vmul.f32 %v17560_v54, %v17560_v54 }
0x1b8e   :  { %v8826_v5 = vmul.f32 0.7978846, %v8810_v50  ;;  %v8796_v42 = vmul.f32 0.044715, %v8780_v9  ;;  %v8766_v0 = vmul.f32 %v17565_v16, %v17565_v16  ;;  %v11578_v44 = vpop.f32.mrb[234].mxu0 }
0x1b8f   :  { %13020 = vtanh.f32 %v8827_v55  ;;  %v8813_v26 = vadd.f32 %v8797_v40, %v17547_v11  ;;  %v8783_v43 = vmul.f32 %v8767_v28, %v17560_v54  ;;  %v17574_v62 = vadd.f32 %v11578_v44, %v17533_v17  ;;  %v8713_v57 = vpop.f32.mrb[235].mxu0 }
0x1b90   :  { %v8812_v13 = vadd.f32 %v8796_v42, %v17551_v49  ;;  %v8782_v18 = vmul.f32 %v8766_v0, %v17565_v16  ;;  %v17579_v61 = vadd.f32 %v17533_v17, %v8713_v57  ;;  %13022 = vtanh.f32 %v8826_v5 }
0x1b91   :  { %v8829_v4 = vmul.f32 0.7978846, %v8813_v26  ;;  %v8799_v35 = vmul.f32 0.044715, %v8783_v43  ;;  %v8769_v22 = vmul.f32 %v17574_v62, %v17574_v62 }
0x1b92   :  { %v8828_v37 = vmul.f32 0.7978846, %v8812_v13  ;;  %v8798_v3 = vmul.f32 0.044715, %v8782_v18  ;;  %v8768_v60 = vmul.f32 %v17579_v61, %v17579_v61  ;;  %v11581_v21 = vpop.f32.mrb[236].mxu0 }
0x1b93   :  { %v8815_v30 = vadd.f32 %v8799_v35, %v17560_v54  ;;  %v8785_v53 = vmul.f32 %v8769_v22, %v17574_v62  ;;  %v17588_v63 = vadd.f32 %v11581_v21, %v17533_v17  ;;  %v8723_v32 = vpop.f32.mrb[237].mxu0 }
0x1b94   :  { %v8814_v33 = vadd.f32 %v8798_v3, %v17565_v16  ;;  %v8784_v48 = vmul.f32 %v8768_v60, %v17579_v61  ;;  %v17593_v29 = vadd.f32 %v17533_v17, %v8723_v32  ;;  %13024 = vtanh.f32 %v8828_v37 }
0x1b95   :  { %v8831_v41 = vmul.f32 0.7978846, %v8815_v30  ;;  %v8801_v47 = vmul.f32 0.044715, %v8785_v53  ;;  %v8771_v7 = vmul.f32 %v17588_v63, %v17588_v63  ;;  %13026 = vtanh.f32 %v8829_v4 }
0x1b96   :  { %v8830_v59 = vmul.f32 0.7978846, %v8814_v33  ;;  %v8800_v38 = vmul.f32 0.044715, %v8784_v48  ;;  %v8770_v8 = vmul.f32 %v17593_v29, %v17593_v29  ;;  %v11584_v39 = vpop.f32.mrb[238].mxu0 }
0x1b97   :  { %v8817_v1 = vadd.f32 %v8801_v47, %v17574_v62  ;;  %v8787_v46 = vmul.f32 %v8771_v7, %v17588_v63  ;;  %v17602_v36 = vadd.f32 %v11584_v39, %v17533_v17  ;;  %v8733_v14 = vpop.f32.mrb[239].mxu0  ;;  %13028 = vtanh.f32 %v8831_v41 }
0x1b98   :  { %v8786_v50 = vmul.f32 %v8770_v8, %v17593_v29  ;;  %v17606_v9 = vadd.f32 %v17533_v17, %v8733_v14  ;;  %13030 = vtanh.f32 %v8830_v59  ;;  %v8816_v42 = vadd.f32 %v8800_v38, %v17579_v61 }
0x1b99   :  { %v13021_v55 = vpop.eup %13020  ;;  %v8803_v40 = vmul.f32 0.044715, %v8787_v46  ;;  %v8773_v28 = vmul.f32 %v17602_v36, %v17602_v36  ;;  %v8833_v43 = vmul.f32 0.7978846, %v8817_v1 }
0x1b9a   :  { %v13023_v5 = vpop.eup %13022  ;;  %v8772_v0 = vmul.f32 %v17606_v9, %v17606_v9  ;;  %v11587_v44 = vpop.f32.mrb[240].mxu0  ;;  %v8859_v26 = vadd.f32 1.0, %v13021_v55  ;;  %v8802_v4 = vmul.f32 0.044715, %v8786_v50  ;;  %v8832_v53 = vmul.f32 0.7978846, %v8816_v42 }
0x1b9b   :  { %v8789_v57 = vmul.f32 %v8773_v28, %v17602_v36  ;;  %v17615_v13 = vadd.f32 %v11587_v44, %v17533_v17  ;;  %v8743_v18 = vpop.f32.mrb[241].mxu0  ;;  %v8819_v37 = vadd.f32 %v8803_v40, %v17588_v63  ;;  %v8858_v21 = vadd.f32 1.0, %v13023_v5 }
0x1b9c   :  { %v8788_v35 = vmul.f32 %v8772_v0, %v17606_v9  ;;  %v17619_v22 = vadd.f32 %v17533_v17, %v8743_v18  ;;  %v8875_v41 = vmul.f32 0.5, %v8859_v26  ;;  %13032 = vtanh.f32 %v8833_v43 }
0x1b9d   :  { %v8805_v3 = vmul.f32 0.044715, %v8789_v57  ;;  %v8775_v60 = vmul.f32 %v17615_v13, %v17615_v13  ;;  %v8818_v8 = vadd.f32 %v8802_v4, %v17593_v29  ;;  %v8874_v46 = vmul.f32 0.5, %v8858_v21 }
0x1b9e   :  { %v13025_v30 = vpop.eup %13024  ;;  %v8804_v32 = vmul.f32 0.044715, %v8788_v35  ;;  %v8774_v33 = vmul.f32 %v17619_v22, %v17619_v22  ;;  %v11590_v48 = vpop.f32.mrb[242].mxu0  ;;  %v8835_v50 = vmul.f32 0.7978846, %v8819_v37 }
0x1b9f   :  { %v8791_v47 = vmul.f32 %v8775_v60, %v17615_v13  ;;  %v17628_v7 = vadd.f32 %v11590_v48, %v17533_v17  ;;  %v8753_v59 = vpop.f32.mrb[243].mxu0  ;;  %v13027_v38 = vpop.eup %13026  ;;  %v8821_v55 = vadd.f32 %v8805_v3, %v17602_v36  ;;  %v8860_v28 = vadd.f32 1.0, %v13025_v30 }
0x1ba0   :  { %v8790_v39 = vmul.f32 %v8774_v33, %v17619_v22  ;;  %v17633_v1 = vadd.f32 %v17533_v17, %v8753_v59  ;;  %v8820_v42 = vadd.f32 %v8804_v32, %v17606_v9  ;;  %v8890_v26 = vmul.f32 %v8874_v46, %v17539_v23 }
0x1ba1   :  { %v13029_v14 = vpop.eup %13028  ;;  %v8777_v40 = vmul.f32 %v17628_v7, %v17628_v7  ;;  %v8891_v17 = vmul.f32 %v8875_v41, %v17536_v15  ;;  %v8807_v43 = vmul.f32 0.044715, %v8791_v47  ;;  %v8876_v18 = vmul.f32 0.5, %v8860_v28 }
0x1ba2   :  { %v13031_v5 = vpop.eup %13030  ;;  %v8806_v0 = vmul.f32 0.044715, %v8790_v39  ;;  %v8776_v44 = vmul.f32 %v17633_v1, %v17633_v1  ;;  %11623 = vmatprep.mubr.f32.mxu1 %v8890_v26  ;;  %v8861_v37 = vadd.f32 1.0, %v13027_v38  ;;  %v8834_v60 = vmul.f32 0.7978846, %v8818_v8 }
0x1ba3   :  { %v8793_v57 = vmul.f32 %v8777_v40, %v17628_v7  ;;  %v8862_v3 = vadd.f32 1.0, %v13031_v5  ;;  %v8837_v21 = vmul.f32 0.7978846, %v8821_v55  ;;  %11624 = vmatmul.mubr.f32.vlgmr.msra.gmra.mrb[250].mxu1 %v8891_v17  ;;  %v8892_v30 = vmul.f32 %v8876_v18, %v17551_v49 }
0x1ba4   :  { %v8822_v4 = vadd.f32 %v8806_v0, %v17619_v22  ;;  %v8792_v35 = vmul.f32 %v8776_v44, %v17633_v1  ;;  %v8863_v32 = vadd.f32 1.0, %v13029_v14  ;;  %13034 = vtanh.f32 %v8835_v50 }
0x1ba5   :  { %v8836_v23 = vmul.f32 0.7978846, %v8820_v42  ;;  %v8877_v33 = vmul.f32 0.5, %v8861_v37  ;;  %v8823_v48 = vadd.f32 %v8807_v43, %v17615_v13  ;;  %v8809_v47 = vmul.f32 0.044715, %v8793_v57  ;;  %11626 = vmatprep.mubr.f32.mxu1 %v8892_v30 }
0x1ba6   :  { %v8808_v15 = vmul.f32 0.044715, %v8792_v35  ;;  %v8838_v41 = vmul.f32 0.7978846, %v8822_v4  ;;  %v8878_v59 = vmul.f32 0.5, %v8862_v3  ;;  %v8879_v8 = vmul.f32 0.5, %v8863_v32  ;;  %v13033_v46 = vpop.eup %13032 }
0x1ba7   :  { %v8893_v38 = vmul.f32 %v8877_v33, %v17547_v11  ;;  %13036 = vtanh.f32 %v8832_v53  ;;  %v8839_v50 = vmul.f32 0.7978846, %v8823_v48  ;;  %v8825_v55 = vadd.f32 %v8809_v47, %v17628_v7 }
0x1ba8   :  { %v8824_v39 = vadd.f32 %v8808_v15, %v17633_v1  ;;  %v8894_v49 = vmul.f32 %v8878_v59, %v17565_v16  ;;  %13038 = vtanh.f32 %v8834_v60  ;;  %v8895_v40 = vmul.f32 %v8879_v8, %v17560_v54 }
0x1ba9   :  { %11627 = vmatmul.mubr.f32.gmra.mrb[252].mxu1 %v8893_v38  ;;  %13040 = vtanh.f32 %v8836_v23  ;;  %v8841_v11 = vmul.f32 0.7978846, %v8825_v55  ;;  %v8865_v28 = vadd.f32 1.0, %v13033_v46 }
0x1baa   :  { %v8840_v14 = vmul.f32 0.7978846, %v8824_v39  ;;  %13042 = vtanh.f32 %v8837_v21  ;;  %11629 = vmatprep.mubr.f32.mxu1 %v8894_v49 }
0x1bab   :  { %13044 = vtanh.f32 %v8838_v41  ;;  %v8881_v44 = vmul.f32 0.5, %v8865_v28 }
0x1bac   :  { %13046 = vtanh.f32 %v8840_v14 }
0x1bad   :  { %11630 = vmatmul.mubr.f32.gmra.mrb[254].mxu1 %v8895_v40  ;;  %13048 = vtanh.f32 %v8839_v50  ;;  %v8897_v21 = vmul.f32 %v8881_v44, %v17574_v62 }
0x1bae   :  { %v13035_v53 = vpop.eup %13034  ;;  %13050 = vtanh.f32 %v8841_v11 }
0x1baf   :  { %v8867_v26 = vadd.f32 1.0, %v13035_v53 }
0x1bb1   :  { %v13037_v5 = vpop.eup %13036  ;;  %v8883_v30 = vmul.f32 0.5, %v8867_v26 }
0x1bb2   :  { %v13039_v16 = vpop.eup %13038  ;;  %v8864_v42 = vadd.f32 1.0, %v13037_v5 }
0x1bb3   :  { %v13041_v0 = vpop.eup %13040  ;;  %v8866_v17 = vadd.f32 1.0, %v13039_v16  ;;  %v8899_v47 = vmul.f32 %v8883_v30, %v17588_v63 }
0x1bb4   :  { %v13043_v43 = vpop.eup %13042  ;;  %v8880_v57 = vmul.f32 0.5, %v8864_v42  ;;  %v8868_v18 = vadd.f32 1.0, %v13041_v0 }
0x1bb5   :  { %v13045_v4 = vpop.eup %13044  ;;  %v8882_v54 = vmul.f32 0.5, %v8866_v17  ;;  %v8869_v32 = vadd.f32 1.0, %v13043_v43 }
0x1bb6   :  { %v8896_v35 = vmul.f32 %v8880_v57, %v17579_v61  ;;  %v8884_v37 = vmul.f32 0.5, %v8868_v18  ;;  %v8870_v3 = vadd.f32 1.0, %v13045_v4  ;;  %v13047_v60 = vpop.eup %13046 }
0x1bb7   :  { %v8898_v23 = vmul.f32 %v8882_v54, %v17593_v29  ;;  %v13049_v15 = vpop.eup %13048  ;;  %v8872_v41 = vadd.f32 1.0, %v13047_v60  ;;  %v8885_v61 = vmul.f32 0.5, %v8869_v32 }
0x1bb8   :  { %11632 = vmatprep.mubr.f32.mxu1 %v8896_v35  ;;  %v8900_v33 = vmul.f32 %v8884_v37, %v17606_v9  ;;  %v8886_v48 = vmul.f32 0.5, %v8870_v3  ;;  %v8871_v59 = vadd.f32 1.0, %v13049_v15  ;;  %v13051_v39 = vpop.eup %13050 }
0x1bb9   :  { %11633 = vmatmul.mubr.f32.gmra.mrb[0].mxu1 %v8897_v21  ;;  %v8888_v38 = vmul.f32 0.5, %v8872_v41  ;;  %v8901_v29 = vmul.f32 %v8885_v61, %v17602_v36  ;;  %v8873_v46 = vadd.f32 1.0, %v13051_v39  ;;  %v9216_v41 = vld [vmem:[%s17870_s3 + $0x480] sm:$0xff] }
0x1bba   :  { %11635 = vmatprep.mubr.f32.mxu1 %v8898_v23  ;;  %v8902_v62 = vmul.f32 %v8886_v48, %v17619_v22  ;;  %v8887_v8 = vmul.f32 0.5, %v8871_v59  ;;  %v9942_v22 = vld [vmem:[%s17870_s3 + $0x3c0] ss:$0 sm:$0xff]  ;;  %v9215_v48 = vld [vmem:[%s17870_s3 + $0x478] sm:$0xff]  ;;  %v9218_v59 = vld [vmem:[%s17870_s3 + $0x490] sm:$0xff] }
0x1bbb   :  { %v8904_v9 = vmul.f32 %v8888_v38, %v17633_v1  ;;  %v8889_v14 = vmul.f32 0.5, %v8873_v46  ;;  %v12132_v61 = vpack.c.bf16 %v9216_v41, %v9215_v48  ;;  %v18091_v38 = vld [vmem:[#allocation34_spill] sm:$0xff]  ;;  %v18097_v41 = vld [vmem:[#allocation37_spill] sm:$0xff] }
0x1bbc   :  { %v8903_v49 = vmul.f32 %v8887_v8, %v17615_v13 }
0x1bbd   :  { %11636 = vmatmul.mubr.f32.gmra.mrb[2].mxu1 %v8899_v47  ;;  %v8905_v63 = vmul.f32 %v8889_v14, %v17628_v7  ;;  %v9217_v47 = vld [vmem:[%s17870_s3 + $0x488] sm:$0xff]  ;;  %12133 = vmatprep.subr.bf16.mxu0 %v12132_v61 }
0x1bbe   :  { %11638 = vmatprep.mubr.f32.mxu1 %v8900_v33  ;;  %v12136_v39 = vpack.c.bf16 %v9218_v59, %v9217_v47  ;;  %12135 = vmatpush3.bf16.msra.mxu0 %v12132_v61  ;;  %v18098_v61 = vld [vmem:[#allocation38_spill] sm:$0xff] }
0x1bc0   :  { %12137 = vmatprep.subr.bf16.mxu0 %v12136_v39 }
0x1bc1   :  { %11639 = vmatmul.mubr.f32.gmra.mrb[4].mxu1 %v8901_v29 }
0x1bc2   :  { %11641 = vmatprep.mubr.f32.mxu1 %v8902_v62  ;;  %12139 = vmatpush3.bf16.msra.mxu0 %v12136_v39  ;;  %v18099_v39 = vld [vmem:[#allocation39_spill] sm:$0xff] }
0x1bc5   :  { %11642 = vmatmul.mubr.f32.gmra.mrb[6].mxu1 %v8903_v49 }
0x1bc6   :  { %11644 = vmatprep.mubr.f32.mxu1 %v8904_v9 }
0x1bc9   :  { %11645 = vmatmul.mubr.f32.gmra.mrb[8].mxu1 %v8905_v63 }
0x1c76   :  { %v11625_v50 = vpop.f32.mrb[250].mxu1 }
0x1c77   :  { %v8976_v36 = vpop.f32.mrb[251].mxu1  ;;  %v8982_v11 = vadd.f32 %v11625_v50, %v9942_v22 }
0x1c78   :  { %v8977_v55 = vadd.f32 %v9942_v22, %v8976_v36 }
0x1c7a   :  { %9071 = vrot.lane.b32.xlu1 %v8977_v55, %s13058_s11 }
0x1c7c   :  { %v11628_v40 = vpop.f32.mrb[252].mxu1 }
0x1c7d   :  { %v8986_v1 = vpop.f32.mrb[253].mxu1  ;;  %v8992_v7 = vadd.f32 %v11628_v40, %v9942_v22 }
0x1c7e   :  { %v8987_v53 = vadd.f32 %v9942_v22, %v8986_v1  ;;  %9073 = vrot.lane.b32.xlu1 %v8982_v11, %s13058_s11 }
0x1c80   :  { %v11631_v13 = vpop.f32.mrb[254].mxu1  ;;  %9075 = vrot.lane.b32.xlu0 %v8987_v53, %s13058_s11 }
0x1c81   :  { %v8996_v28 = vpop.f32.mrb[255].mxu1  ;;  %v9002_v16 = vadd.f32 %v11631_v13, %v9942_v22 }
0x1c82   :  { %v8997_v5 = vadd.f32 %v9942_v22, %v8996_v28  ;;  %9077 = vrot.lane.b32.xlu1 %v8992_v7, %s13058_s11  ;;  %v18092_v28 = vld [vmem:[#allocation35_spill] sm:$0xff] }
0x1c84   :  { %9079 = vrot.lane.b32.xlu0 %v8997_v5, %s13058_s11 }
0x1c86   :  { %9081 = vrot.lane.b32.xlu1 %v9002_v16, %s13058_s11 }
0x1c8c   :  { %v11634_v42 = vpop.f32.mrb[0].mxu1 }
0x1c8d   :  { %v9012_v0 = vadd.f32 %v11634_v42, %v9942_v22  ;;  %v9006_v44 = vpop.f32.mrb[1].mxu1 }
0x1c8e   :  { %v9007_v26 = vadd.f32 %v9942_v22, %v9006_v44 }
0x1c8f   :  { %9085 = vrot.lane.b32.xlu1 %v9012_v0, %s13058_s11 }
0x1c90   :  { %v11637_v17 = vpop.f32.mrb[2].mxu1  ;;  %9083 = vrot.lane.b32.xlu0 %v9007_v26, %s13058_s11 }
0x1c91   :  { %v9022_v43 = vadd.f32 %v11637_v17, %v9942_v22  ;;  %v9016_v57 = vpop.f32.mrb[3].mxu1 }
0x1c92   :  { %v9017_v18 = vadd.f32 %v9942_v22, %v9016_v57 }
0x1c93   :  { %9089 = vrot.lane.b32.xlu1 %v9022_v43, %s13058_s11 }
0x1c94   :  { %v11640_v4 = vpop.f32.mrb[4].mxu1  ;;  %9087 = vrot.lane.b32.xlu0 %v9017_v18, %s13058_s11 }
0x1c95   :  { %v9032_v54 = vadd.f32 %v11640_v4, %v9942_v22  ;;  %v9026_v35 = vpop.f32.mrb[5].mxu1 }
0x1c96   :  { %v9027_v37 = vadd.f32 %v9942_v22, %v9026_v35 }
0x1c97   :  { %9093 = vrot.lane.b32.xlu1 %v9032_v54, %s13058_s11 }
0x1c98   :  { %v11643_v3 = vpop.f32.mrb[6].mxu1  ;;  %9091 = vrot.lane.b32.xlu0 %v9027_v37, %s13058_s11 }
0x1c99   :  { %v9042_v60 = vadd.f32 %v11643_v3, %v9942_v22  ;;  %v9036_v21 = vpop.f32.mrb[7].mxu1  ;;  %v17728_v3 = vld [vmem:[%s17870_s3 + $0x2e8] ss:$0 sm:$0xff] }
0x1c9a   :  { %v9037_v30 = vadd.f32 %v9942_v22, %v9036_v21  ;;  %v5310_v47 = vadd.f32 %v18097_v41, %v17728_v3  ;;  %v5305_v59 = vadd.f32 %v17728_v3, %v18098_v61 }
0x1c9b   :  { %9097 = vrot.lane.b32.xlu1 %v9042_v60, %s13058_s11  ;;  %v18093_v60 = vld [vmem:[#allocation30_spill] sm:$0xff] }
0x1c9c   :  { %v11646_v32 = vpop.f32.mrb[8].mxu1  ;;  %9095 = vrot.lane.b32.xlu0 %v9037_v30, %s13058_s11  ;;  %v5270_v21 = vadd.f32 %v18093_v60, %v17728_v3  ;;  %v18094_v30 = vld [vmem:[#allocation29_spill] sm:$0xff] }
0x1c9d   :  { %v9052_v23 = vadd.f32 %v11646_v32, %v9942_v22  ;;  %v9046_v15 = vpop.f32.mrb[9].mxu1  ;;  %v5265_v32 = vadd.f32 %v17728_v3, %v18094_v30 }
0x1c9e   :  { %v9047_v33 = vadd.f32 %v9942_v22, %v9046_v15 }
0x1c9f   :  { %9101 = vrot.lane.b32.xlu1 %v9052_v23, %s13058_s11  ;;  %v18095_v23 = vld [vmem:[#allocation18_spill] sm:$0xff] }
0x1ca0   :  { %9099 = vrot.lane.b32.xlu0 %v9047_v33, %s13058_s11  ;;  %v5280_v15 = vadd.f32 %v18095_v23, %v17728_v3  ;;  %v18096_v33 = vld [vmem:[#allocation22_spill] sm:$0xff] }
0x1ca1   :  { %v5275_v48 = vadd.f32 %v17728_v3, %v18096_v33 }
0x1cec   :  { %v9072_v62 = vpop.permute.xlu1 %9071 }
0x1ced   :  { %v9119_v29 = vmul.f32 %v9072_v62, %v18091_v38  ;;  %v5320_v62 = vadd.f32 %v18099_v39, %v17728_v3 }
0x1cef   :  { %9151 = vrot.lane.b32.xlu0 %v9119_v29, %s13059_s12 }
0x1cf0   :  { %v9074_v8 = vpop.permute.xlu1 %9073 }
0x1cf1   :  { %v9120_v9 = vmul.f32 %v9074_v8, %v18091_v38 }
0x1cf2   :  { %v9076_v46 = vpop.permute.xlu0 %9075 }
0x1cf3   :  { %v9121_v49 = vmul.f32 %v9076_v46, %v18091_v38  ;;  %9153 = vrot.lane.b32.xlu1 %v9120_v9, %s13059_s12 }
0x1cf4   :  { %v9078_v14 = vpop.permute.xlu1 %9077 }
0x1cf5   :  { %9155 = vrot.lane.b32.xlu0 %v9121_v49, %s13059_s12  ;;  %v9122_v22 = vmul.f32 %v9078_v14, %v18091_v38 }
0x1cf6   :  { %v9080_v63 = vpop.permute.xlu0 %9079 }
0x1cf7   :  { %v9123_v50 = vmul.f32 %v9080_v63, %v18091_v38  ;;  %9157 = vrot.lane.b32.xlu1 %v9122_v22, %s13059_s12 }
0x1cf8   :  { %v9082_v36 = vpop.permute.xlu1 %9081 }
0x1cf9   :  { %9159 = vrot.lane.b32.xlu0 %v9123_v50, %s13059_s12  ;;  %v9124_v55 = vmul.f32 %v9082_v36, %v18091_v38 }
0x1cfb   :  { %9161 = vrot.lane.b32.xlu1 %v9124_v55, %s13059_s12 }
0x1d01   :  { %v9086_v40 = vpop.permute.xlu1 %9085 }
0x1d02   :  { %v9084_v11 = vpop.permute.xlu0 %9083  ;;  %v9126_v1 = vmul.f32 %v9086_v40, %v18091_v38 }
0x1d03   :  { %v9125_v53 = vmul.f32 %v9084_v11, %v18091_v38  ;;  %v18100_v38 = vld [vmem:[#allocation40_spill] sm:$0xff] }
0x1d04   :  { %9165 = vrot.lane.b32.xlu1 %v9126_v1, %s13059_s12  ;;  %v5315_v29 = vadd.f32 %v17728_v3, %v18100_v38 }
0x1d05   :  { %9163 = vrot.lane.b32.xlu0 %v9125_v53, %s13059_s12  ;;  %v9090_v13 = vpop.permute.xlu1 %9089 }
0x1d06   :  { %v9088_v7 = vpop.permute.xlu0 %9087  ;;  %v9128_v5 = vmul.f32 %v9090_v13, %v18092_v28 }
0x1d07   :  { %v9127_v16 = vmul.f32 %v9088_v7, %v18092_v28 }
0x1d08   :  { %9169 = vrot.lane.b32.xlu1 %v9128_v5, %s13059_s12 }
0x1d09   :  { %9167 = vrot.lane.b32.xlu0 %v9127_v16, %s13059_s12  ;;  %v9094_v42 = vpop.permute.xlu1 %9093 }
0x1d0a   :  { %v9092_v0 = vpop.permute.xlu0 %9091  ;;  %v9130_v44 = vmul.f32 %v9094_v42, %v18092_v28 }
0x1d0b   :  { %v9129_v26 = vmul.f32 %v9092_v0, %v18092_v28 }
0x1d0c   :  { %9173 = vrot.lane.b32.xlu1 %v9130_v44, %s13059_s12 }
0x1d0d   :  { %9171 = vrot.lane.b32.xlu0 %v9129_v26, %s13059_s12  ;;  %v9098_v17 = vpop.permute.xlu1 %9097 }
0x1d0e   :  { %v9096_v43 = vpop.permute.xlu0 %9095  ;;  %v9132_v57 = vmul.f32 %v9098_v17, %v18092_v28 }
0x1d0f   :  { %v9131_v18 = vmul.f32 %v9096_v43, %v18092_v28 }
0x1d10   :  { %9177 = vrot.lane.b32.xlu1 %v9132_v57, %s13059_s12 }
0x1d11   :  { %9175 = vrot.lane.b32.xlu0 %v9131_v18, %s13059_s12  ;;  %v9102_v4 = vpop.permute.xlu1 %9101 }
0x1d12   :  { %v9100_v54 = vpop.permute.xlu0 %9099  ;;  %v9134_v35 = vmul.f32 %v9102_v4, %v18092_v28 }
0x1d13   :  { %v9133_v37 = vmul.f32 %v9100_v54, %v18092_v28 }
0x1d14   :  { %9181 = vrot.lane.b32.xlu1 %v9134_v35, %s13059_s12 }
0x1d15   :  { %9179 = vrot.lane.b32.xlu0 %v9133_v37, %s13059_s12 }
0x1d18   :  { %9439 = vrot.lane.b32.xlu1 %v5270_v21, %s13057_s10 }
0x1d19   :  { %9437 = vrot.lane.b32.xlu0 %v5265_v32, %s13057_s10 }
0x1d1c   :  { %9443 = vrot.lane.b32.xlu1 %v5280_v15, %s13057_s10 }
0x1d1d   :  { %9441 = vrot.lane.b32.xlu0 %v5275_v48, %s13057_s10 }
0x1d20   :  { %9504 = vrot.lane.b32.xlu1 %v5310_v47, %s13057_s10 }
0x1d21   :  { %9502 = vrot.lane.b32.xlu0 %v5305_v59, %s13057_s10 }
0x1d24   :  { %9508 = vrot.lane.b32.xlu1 %v5320_v62, %s13057_s10 }
0x1d25   :  { %9506 = vrot.lane.b32.xlu0 %v5315_v29, %s13057_s10 }
0x1d61   :  { %v9152_v8 = vpop.permute.xlu0 %9151 }
0x1d62   :  { %v9199_v46 = vadd.f32 %v9152_v8, %v17214_v6 }
0x1d64   :  { %11655 = vmatprep.mubr.msk.f32.mxu0 %vm264_vm1, %v9199_v46 }
0x1d65   :  { %v9154_v9 = vpop.permute.xlu1 %9153 }
0x1d66   :  { %v9200_v14 = vadd.f32 %v9154_v9, %v17211_v45 }
0x1d67   :  { %v9156_v49 = vpop.permute.xlu0 %9155 }
0x1d68   :  { %v9201_v63 = vadd.f32 %v9156_v49, %v17237_v56  ;;  %11656 = vmatmul.mubr.msk.f32.vlgmr.msra.gmra.mrb[244].mxu0 %vm264_vm1, %v9200_v14 }
0x1d69   :  { %v9158_v22 = vpop.permute.xlu1 %9157 }
0x1d6a   :  { %11658 = vmatprep.mubr.msk.f32.mxu0 %vm264_vm1, %v9201_v63  ;;  %v9202_v36 = vadd.f32 %v9158_v22, %v17223_v58 }
0x1d6b   :  { %v9160_v50 = vpop.permute.xlu0 %9159 }
0x1d6c   :  { %v9203_v55 = vadd.f32 %v9160_v50, %v17253_v19  ;;  %11659 = vmatmul.mubr.msk.f32.gmra.mrb[246].mxu0 %vm264_vm1, %v9202_v36 }
0x1d6d   :  { %v9162_v6 = vpop.permute.xlu1 %9161 }
0x1d6e   :  { %11661 = vmatprep.mubr.msk.f32.mxu0 %vm264_vm1, %v9203_v55  ;;  %v9204_v40 = vadd.f32 %v9162_v6, %v17233_v51 }
0x1d70   :  { %11662 = vmatmul.mubr.msk.f32.gmra.mrb[248].mxu0 %vm264_vm1, %v9204_v40 }
0x1d76   :  { %v9166_v45 = vpop.permute.xlu1 %9165 }
0x1d77   :  { %v9164_v56 = vpop.permute.xlu0 %9163  ;;  %v9206_v11 = vadd.f32 %v9166_v45, %v17249_v20  ;;  %v18101_v45 = vld [vmem:[#allocation26_spill] sm:$0xff] }
0x1d78   :  { %v9205_v1 = vadd.f32 %v9164_v56, %v17269_v34  ;;  %v5250_v56 = vadd.f32 %v18101_v45, %v17728_v3 }
0x1d7a   :  { %11664 = vmatprep.mubr.msk.f32.mxu0 %vm264_vm1, %v9205_v1  ;;  %v9170_v58 = vpop.permute.xlu1 %9169 }
0x1d7b   :  { %v9168_v53 = vpop.permute.xlu0 %9167  ;;  %11665 = vmatmul.mubr.msk.f32.gmra.mrb[250].mxu0 %vm264_vm1, %v9206_v11  ;;  %v9208_v19 = vadd.f32 %v9170_v58, %v17265_v31  ;;  %v18102_v11 = vld [vmem:[#allocation25_spill] sm:$0xff] }
0x1d7c   :  { %v9207_v13 = vadd.f32 %v9168_v53, %v17285_v10  ;;  %v5245_v1 = vadd.f32 %v17728_v3, %v18102_v11 }
0x1d7e   :  { %11667 = vmatprep.mubr.msk.f32.mxu0 %vm264_vm1, %v9207_v13  ;;  %v9174_v51 = vpop.permute.xlu1 %9173 }
0x1d7f   :  { %v9172_v7 = vpop.permute.xlu0 %9171  ;;  %11668 = vmatmul.mubr.msk.f32.gmra.mrb[252].mxu0 %vm264_vm1, %v9208_v19  ;;  %v9210_v20 = vadd.f32 %v9174_v51, %v17281_v25 }
0x1d80   :  { %v9209_v34 = vadd.f32 %v9172_v7, %v17301_v2 }
0x1d82   :  { %11670 = vmatprep.mubr.msk.f32.mxu0 %vm264_vm1, %v9209_v34  ;;  %v9178_v28 = vpop.permute.xlu1 %9177 }
0x1d83   :  { %v9176_v5 = vpop.permute.xlu0 %9175  ;;  %11671 = vmatmul.mubr.msk.f32.gmra.mrb[254].mxu0 %vm264_vm1, %v9210_v20  ;;  %v9212_v31 = vadd.f32 %v9178_v28, %v17297_v27  ;;  %v9943_v27 = vld [vmem:[%s17870_s3 + $0x498] ss:$0 sm:$0xff] }
0x1d84   :  { %v9211_v10 = vadd.f32 %v9176_v5, %v17317_v12 }
0x1d86   :  { %11673 = vmatprep.mubr.msk.f32.mxu0 %vm264_vm1, %v9211_v10  ;;  %v9182_v16 = vpop.permute.xlu1 %9181 }
0x1d87   :  { %v9180_v42 = vpop.permute.xlu0 %9179  ;;  %11674 = vmatmul.mubr.msk.f32.gmra.mrb[0].mxu0 %vm264_vm1, %v9212_v31  ;;  %v9214_v25 = vadd.f32 %v9182_v16, %v17313_v24  ;;  %v18103_v31 = vld [vmem:[#allocation28_spill] sm:$0xff]  ;;  %v18104_v16 = vld [vmem:[#allocation27_spill] sm:$0xff] }
0x1d88   :  { %v9213_v2 = vadd.f32 %v9180_v42, %v17330_v52  ;;  %v5260_v10 = vadd.f32 %v18103_v31, %v17728_v3  ;;  %v5255_v42 = vadd.f32 %v17728_v3, %v18104_v16 }
0x1d8a   :  { %11676 = vmatprep.mubr.msk.f32.mxu0 %vm264_vm1, %v9213_v2  ;;  %v9440_v9 = vpop.permute.xlu1 %9439 }
0x1d8b   :  { %11677 = vmatmul.mubr.msk.f32.gmra.mrb[2].mxu0 %vm264_vm1, %v9214_v25  ;;  %v9438_v49 = vpop.permute.xlu0 %9437 }
0x1d8e   :  { %v9444_v14 = vpop.permute.xlu1 %9443 }
0x1d8f   :  { %v9442_v63 = vpop.permute.xlu0 %9441 }
0x1d92   :  { %v9505_v22 = vpop.permute.xlu1 %9504 }
0x1d93   :  { %v9503_v50 = vpop.permute.xlu0 %9502 }
0x1d96   :  { %v9509_v36 = vpop.permute.xlu1 %9508 }
0x1d97   :  { %v9507_v55 = vpop.permute.xlu0 %9506 }
0x1e3b   :  { %v11657_v0 = vpop.f32.mrb[244].mxu0 }
0x1e3c   :  { %v9344_v12 = vadd.f32 %v11657_v0, %v9943_v27  ;;  %v9338_v44 = vpop.f32.mrb[245].mxu0 }
0x1e3d   :  { %v9339_v26 = vadd.f32 %v9943_v27, %v9338_v44 }
0x1e3e   :  { %9423 = vrot.lane.b32.xlu1 %v9344_v12, %s13058_s11 }
0x1e3f   :  { %9421 = vrot.lane.b32.xlu0 %v9339_v26, %s13058_s11  ;;  %v11660_v17 = vpop.f32.mrb[246].mxu0 }
0x1e40   :  { %v9354_v24 = vadd.f32 %v11660_v17, %v9943_v27  ;;  %v9348_v43 = vpop.f32.mrb[247].mxu0 }
0x1e41   :  { %v9349_v52 = vadd.f32 %v9943_v27, %v9348_v43 }
0x1e42   :  { %9427 = vrot.lane.b32.xlu1 %v9354_v24, %s13058_s11 }
0x1e43   :  { %9425 = vrot.lane.b32.xlu0 %v9349_v52, %s13058_s11  ;;  %v11663_v57 = vpop.f32.mrb[248].mxu0  ;;  %v18105_v52 = vld [vmem:[#allocation17_spill] sm:$0xff] }
0x1e44   :  { %v9364_v18 = vadd.f32 %v11663_v57, %v9943_v27  ;;  %v9358_v4 = vpop.f32.mrb[249].mxu0  ;;  %v5290_v57 = vadd.f32 %v18105_v52, %v17728_v3 }
0x1e45   :  { %v9359_v54 = vadd.f32 %v9943_v27, %v9358_v4 }
0x1e46   :  { %9455 = vrot.lane.b32.xlu1 %v9364_v18, %s13059_s12  ;;  %v18106_v18 = vld [vmem:[#allocation20_spill] sm:$0xff] }
0x1e47   :  { %9453 = vrot.lane.b32.xlu0 %v9359_v54, %s13059_s12  ;;  %v5285_v4 = vadd.f32 %v17728_v3, %v18106_v18 }
0x1e4e   :  { %v11666_v35 = vpop.f32.mrb[250].mxu0 }
0x1e4f   :  { %v9374_v37 = vadd.f32 %v11666_v35, %v9943_v27  ;;  %v9368_v60 = vpop.f32.mrb[251].mxu0 }
0x1e50   :  { %v9369_v21 = vadd.f32 %v9943_v27, %v9368_v60 }
0x1e51   :  { %9459 = vrot.lane.b32.xlu1 %v9374_v37, %s13059_s12 }
0x1e52   :  { %9457 = vrot.lane.b32.xlu0 %v9369_v21, %s13059_s12  ;;  %v11669_v30 = vpop.f32.mrb[252].mxu0  ;;  %v18107_v21 = vld [vmem:[#allocation16_spill] sm:$0xff] }
0x1e53   :  { %v9384_v32 = vadd.f32 %v11669_v30, %v9943_v27  ;;  %v9378_v23 = vpop.f32.mrb[253].mxu0  ;;  %v5300_v30 = vadd.f32 %v18107_v21, %v17728_v3 }
0x1e54   :  { %v9379_v15 = vadd.f32 %v9943_v27, %v9378_v23 }
0x1e55   :  { %9488 = vrot.lane.b32.xlu1 %v9384_v32, %s13058_s11  ;;  %v18108_v32 = vld [vmem:[#allocation36_spill] sm:$0xff] }
0x1e56   :  { %9486 = vrot.lane.b32.xlu0 %v9379_v15, %s13058_s11  ;;  %v11672_v33 = vpop.f32.mrb[254].mxu0  ;;  %v5295_v23 = vadd.f32 %v17728_v3, %v18108_v32 }
0x1e57   :  { %v9394_v48 = vadd.f32 %v11672_v33, %v9943_v27  ;;  %v9388_v41 = vpop.f32.mrb[255].mxu0 }
0x1e58   :  { %v9389_v47 = vadd.f32 %v9943_v27, %v9388_v41 }
0x1e59   :  { %9492 = vrot.lane.b32.xlu1 %v9394_v48, %s13058_s11 }
0x1e5a   :  { %9490 = vrot.lane.b32.xlu0 %v9389_v47, %s13058_s11  ;;  %v11675_v61 = vpop.f32.mrb[0].mxu0 }
0x1e5b   :  { %v9404_v59 = vadd.f32 %v11675_v61, %v9943_v27  ;;  %v9398_v39 = vpop.f32.mrb[1].mxu0 }
0x1e5c   :  { %v9399_v62 = vadd.f32 %v9943_v27, %v9398_v39 }
0x1e5d   :  { %9520 = vrot.lane.b32.xlu1 %v9404_v59, %s13059_s12 }
0x1e5e   :  { %9518 = vrot.lane.b32.xlu0 %v9399_v62, %s13059_s12  ;;  %v11678_v38 = vpop.f32.mrb[2].mxu0 }
0x1e5f   :  { %v9414_v29 = vadd.f32 %v11678_v38, %v9943_v27  ;;  %v9408_v8 = vpop.f32.mrb[3].mxu0 }
0x1e60   :  { %v9409_v46 = vadd.f32 %v9943_v27, %v9408_v8 }
0x1e61   :  { %9524 = vrot.lane.b32.xlu1 %v9414_v29, %s13059_s12 }
0x1e62   :  { %9522 = vrot.lane.b32.xlu0 %v9409_v46, %s13059_s12 }
0x1eb0   :  { %v9424_v6 = vpop.permute.xlu1 %9423 }
0x1eb1   :  { %v9422_v40 = vpop.permute.xlu0 %9421  ;;  %v9466_v53 = vsel %vm264_vm1, %v5250_v56, %v9424_v6 }
0x1eb2   :  { %v9465_v13 = vsel %vm264_vm1, %v5245_v1, %v9422_v40  ;;  %v9470_v51 = vsel %vm589_vm5, %v9466_v53, %v9440_v9 }
0x1eb3   :  { %v9469_v34 = vsel %vm589_vm5, %v9465_v13, %v9438_v49 }
0x1eb4   :  { %v9428_v58 = vpop.permute.xlu1 %9427 }
0x1eb5   :  { %v9426_v19 = vpop.permute.xlu0 %9425  ;;  %v9468_v25 = vsel %vm264_vm1, %v5260_v10, %v9428_v58 }
0x1eb6   :  { %v9467_v2 = vsel %vm264_vm1, %v5255_v42, %v9426_v19  ;;  %v9472_v27 = vsel %vm589_vm5, %v9468_v25, %v9444_v14 }
0x1eb7   :  { %v9471_v44 = vsel %vm589_vm5, %v9467_v2, %v9442_v63 }
0x1eb8   :  { %v9456_v7 = vpop.permute.xlu1 %9455 }
0x1eb9   :  { %v9475_v20 = vsel %vm9473_vm9, %v9470_v51, %v9456_v7  ;;  %v9454_v28 = vpop.permute.xlu0 %9453 }
0x1eba   :  { %9479 = vst [vmem:[%s17877_s7 + $0x8] sm:$0xff] %v9475_v20  ;;  %v9474_v5 = vsel %vm9473_vm9, %v9469_v34, %v9454_v28 }
0x1ebb   :  { %9478 = vst [vmem:[%s17877_s7] sm:$0xff] %v9474_v5 }
0x1ec3   :  { %v9460_v0 = vpop.permute.xlu1 %9459 }
0x1ec4   :  { %v9477_v12 = vsel %vm9473_vm9, %v9472_v27, %v9460_v0  ;;  %v9458_v26 = vpop.permute.xlu0 %9457 }
0x1ec5   :  { %9481 = vst [vmem:[%s17877_s7 + $0x18] sm:$0xff] %v9477_v12  ;;  %v9476_v17 = vsel %vm9473_vm9, %v9471_v44, %v9458_v26 }
0x1ec6   :  { %9480 = vst [vmem:[%s17877_s7 + $0x10] sm:$0xff] %v9476_v17 }
0x1ec7   :  { %v9489_v24 = vpop.permute.xlu1 %9488 }
0x1ec8   :  { %v9487_v43 = vpop.permute.xlu0 %9486  ;;  %v9531_v35 = vsel %vm264_vm1, %v5290_v57, %v9489_v24 }
0x1ec9   :  { %v9530_v60 = vsel %vm264_vm1, %v5285_v4, %v9487_v43  ;;  %v9535_v15 = vsel %vm589_vm5, %v9531_v35, %v9505_v22 }
0x1eca   :  { %v9534_v47 = vsel %vm589_vm5, %v9530_v60, %v9503_v50 }
0x1ecb   :  { %v9493_v54 = vpop.permute.xlu1 %9492 }
0x1ecc   :  { %v9491_v37 = vpop.permute.xlu0 %9490  ;;  %v9533_v48 = vsel %vm264_vm1, %v5300_v30, %v9493_v54 }
0x1ecd   :  { %v9532_v59 = vsel %vm264_vm1, %v5295_v23, %v9491_v37  ;;  %v9537_v3 = vsel %vm589_vm5, %v9533_v48, %v9509_v36 }
0x1ece   :  { %v9536_v29 = vsel %vm589_vm5, %v9532_v59, %v9507_v55 }
0x1ecf   :  { %v9521_v33 = vpop.permute.xlu1 %9520 }
0x1ed0   :  { %v9539_v41 = vsel %vm9473_vm9, %v9535_v15, %v9521_v33  ;;  %v9519_v61 = vpop.permute.xlu0 %9518 }
0x1ed1   :  { %9961 = vst [vmem:[%s17877_s7 + $0x28] sm:$0xff] %v9539_v41  ;;  %v9538_v39 = vsel %vm9473_vm9, %v9534_v47, %v9519_v61 }
0x1ed2   :  { %9960 = vst [vmem:[%s17877_s7 + $0x20] sm:$0xff] %v9538_v39 }
0x1ed3   :  { %v9525_v62 = vpop.permute.xlu1 %9524 }
0x1ed4   :  { %v9541_v38 = vsel %vm9473_vm9, %v9537_v3, %v9525_v62  ;;  %v9523_v8 = vpop.permute.xlu0 %9522 }
0x1ed5   :  { %9963 = vst [vmem:[%s17877_s7 + $0x38] sm:$0xff] %v9541_v38  ;;  %v9540_v46 = vsel %vm9473_vm9, %v9536_v29, %v9523_v8 }
0x1ed6   :  { %9962 = vst [vmem:[%s17877_s7 + $0x30] sm:$0xff] %v9540_v46 }

</bundles_post_ra>
